<compile_context>
chip_gen: v6e
topology: v6e:2x2x1
jax: 0.10.0
libtpu: 0.0.40
codegen_flags: <defaults>
</compile_context>

<pallas_src>
import math

import jax
import jax.numpy as jnp
from jax import lax
from jax.experimental import pallas as pl
from jax.experimental.pallas import tpu as pltpu


def _lstm_kernel(x_ref, wh_hbm, wx_hbm, b_ref, out_ref,
                 wh_vmem, wx_vmem, xw_scr, h_scr, c_scr, dma_sem):
    """One (batch_tile, time_chunk) grid step.

    x_ref   : (TS, TB, E)  bf16/f32  input chunk (auto-pipelined)
    wh_hbm  : (H, 4H)      bf16      recurrent weights, raw HBM ref (pl.ANY)
    wx_hbm  : (E, 4H)      bf16      input weights, raw HBM ref (pl.ANY)
    b_ref   : (1, 4H)      f32       bias
    out_ref : (TS, TB, H)  f32       output chunk
    wh_vmem / wx_vmem : single-buffered VMEM copies of the weights
    xw_scr  : (TS, TB, 4H) f32       hoisted x @ w_x + b for the whole chunk
    h_scr / c_scr : (TB, H) f32      recurrent state, persists across time chunks
    """
    ti = pl.program_id(1)               # time-chunk index (innermost, sequential)
    TS, TB, E = x_ref.shape
    H = h_scr.shape[-1]

    # ---- per-batch-tile init: start weight DMAs, reset state ---------------
    # w_x is waited immediately (needed by the hoisted matmul below); w_h is
    # waited only just before the recurrence so its transfer is hidden behind
    # the big x @ w_x matmul.
    @pl.when(ti == 0)
    def _start():
        pltpu.make_async_copy(wh_hbm, wh_vmem, dma_sem.at[0]).start()
        pltpu.make_async_copy(wx_hbm, wx_vmem, dma_sem.at[1]).start()
        h_scr[...] = jnp.zeros_like(h_scr)
        c_scr[...] = jnp.zeros_like(c_scr)
        pltpu.make_async_copy(wx_hbm, wx_vmem, dma_sem.at[1]).wait()

    # ---- hoisted, non-recurrent work for the whole chunk --------------------
    # cat(h, x) @ w + b == h @ w_h + (x @ w_x + b).  The second term has no
    # time dependence: compute it for all TS steps at once (M = TS*TB) and
    # fold in the bias broadcast a single time per chunk.
    x = x_ref[...].reshape(TS * TB, E)
    if x.dtype != wx_vmem.dtype:
        x = x.astype(wx_vmem.dtype)
    xw = jnp.dot(x, wx_vmem[...], preferred_element_type=jnp.float32)
    xw_scr[...] = (xw + b_ref[...]).reshape(TS, TB, 4 * H)

    @pl.when(ti == 0)
    def _wait_wh():
        pltpu.make_async_copy(wh_hbm, wh_vmem, dma_sem.at[0]).wait()

    # ---- sequential recurrence over the chunk (f32 gate/state math) ---------
    # Per-gate slabs: 4 matmuls of N = H with the nonlinearity applied right
    # away, so live vreg state per step stays at ~(TB, H) instead of (TB, 4H).
    def step(t, carry):
        h, c = carry
        h_bf = h.astype(wh_vmem.dtype)
        xw_t = xw_scr.at[t]                         # (TB, 4H) ref view

        def gate(k, act):
            z = jnp.dot(h_bf, wh_vmem[:, k * H:(k + 1) * H],
                        preferred_element_type=jnp.float32)
            return act(z + xw_t[:, k * H:(k + 1) * H])

        g = gate(0, jnp.tanh)
        i = gate(1, jax.nn.sigmoid)
        f = gate(2, jax.nn.sigmoid)
        o = gate(3, jax.nn.sigmoid)
        c_new = g * i + c * f
        h_new = jnp.tanh(c_new) * o
        out_ref[t] = h_new.astype(out_ref.dtype)
        return h_new, c_new

    unroll = True if TS <= 8 else 4
    h_fin, c_fin = lax.fori_loop(0, TS, step, (h_scr[...], c_scr[...]),
                                 unroll=unroll)
    h_scr[...] = h_fin
    c_scr[...] = c_fin


def _vmem_capacity_bytes():
    """Generation-aware VMEM capacity (64 MiB v7x, 128 MiB v5e/v6e)."""
    try:
        info = pltpu.get_tpu_info()
        cap = getattr(info, "vmem_capacity_bytes", None)
        if cap:
            return int(cap)
    except Exception:
        pass
    return 128 * 1024 * 1024


def lstm_forward(embeds, w, b, *, time_chunk=None, batch_tile=None):
    """embeds: [T, B, E] (f32 or bf16); w: [H+E, 4H]; b: [4H] -> [T, B, H] f32."""
    T, B, E = embeds.shape
    four_h = w.shape[1]
    H = four_h // 4
    assert w.shape[0] == H + E

    # Large tiles: the recurrent matmul has M = TB (MXU row fill) and the
    # hoisted x @ w_x has M = TS*TB; the ~0.35 us per-grid-step overhead is
    # amortized by TS.  Pick batch_tile so nb = B // TB is 1-2 (2 keeps both
    # v7x TensorCores busy under the leading "parallel" axis).
    TS = time_chunk if time_chunk is not None else min(T, 16)
    TB = batch_tile if batch_tile is not None else min(B, 128)
    assert T % TS == 0, "time length must be divisible by time_chunk"
    assert B % TB == 0, "batch must be divisible by batch_tile"
    nb, nt = B // TB, T // TS

    # MXU-native bf16 weights; accumulation stays f32 inside the kernel.
    w_h = w[:H, :].astype(jnp.bfloat16)          # (H, 4H)
    w_x = w[H:, :].astype(jnp.bfloat16)          # (E, 4H)
    b2d = b.reshape(1, four_h).astype(jnp.float32)

    # VMEM residency estimate (double-buffered x/out chunks, single-buffered
    # bf16 weights, scratch) with headroom; request is capped at 75% of the
    # queried physical VMEM so the same code sizes correctly on v5e/v6e
    # (128 MiB) and v7x (64 MiB).
    resident = (2 * TS * TB * E * embeds.dtype.itemsize   # x chunk, 2 buffers
                + 2 * TS * TB * H * 4                     # out chunk, 2 buffers
                + (H + E) * four_h * 2                    # bf16 weights, 1 buffer
                + 2 * four_h * 4                          # bias, 2 buffers
                + TS * TB * four_h * 4                    # xw scratch (f32)
                + 2 * TB * H * 4)                         # h, c scratch
    vmem_cap = _vmem_capacity_bytes()
    vmem_limit = int(min(int(0.75 * vmem_cap),
                         max(2 * resident + (8 << 20), 32 << 20)))

    grid_spec = pltpu.PrefetchScalarGridSpec(
        num_scalar_prefetch=0,
        grid=(nb, nt),   # batch tiles (parallel) x time chunks (sequential)
        in_specs=[
            pl.BlockSpec((TS, TB, E), lambda bi, ti: (ti, bi, 0)),   # x chunk
            pl.BlockSpec(memory_space=pl.ANY),                       # w_h (HBM)
            pl.BlockSpec(memory_space=pl.ANY),                       # w_x (HBM)
            pl.BlockSpec((1, four_h), lambda bi, ti: (0, 0)),        # bias
        ],
        out_specs=pl.BlockSpec((TS, TB, H), lambda bi, ti: (ti, bi, 0)),
        scratch_shapes=[
            pltpu.VMEM((H, four_h), w_h.dtype),         # resident w_h
            pltpu.VMEM((E, four_h), w_x.dtype),         # resident w_x
            pltpu.VMEM((TS, TB, four_h), jnp.float32),  # hoisted x@w_x + b
            pltpu.VMEM((TB, H), jnp.float32),           # h
            pltpu.VMEM((TB, H), jnp.float32),           # c
            pltpu.SemaphoreType.DMA((2,)),
        ],
    )

    return pl.pallas_call(
        _lstm_kernel,
        out_shape=jax.ShapeDtypeStruct((T, B, H), jnp.float32),
        grid_spec=grid_spec,
        compiler_params=pltpu.CompilerParams(
            dimension_semantics=("parallel", "arbitrary"),
            vmem_limit_bytes=vmem_limit,
        ),
    )(embeds, w_h, w_x, b2d)


def lstm_reference(embeds, w, b):
    """Pure-JAX f32 reference matching the PyTorch module exactly."""
    T, B, E = embeds.shape
    H = w.shape[1] // 4
    h = jnp.zeros((B, H), jnp.float32)
    c = jnp.zeros((B, H), jnp.float32)
    outs = []
    for t in range(T):
        data = jnp.concatenate([h, embeds[t]], axis=-1)
        big = data @ w + b
        g, i, f, o = jnp.split(big, 4, axis=1)
        g = jnp.tanh(g)
        i = jax.nn.sigmoid(i)
        f = jax.nn.sigmoid(f)
        o = jax.nn.sigmoid(o)
        c = g * i + c * f
        h = jnp.tanh(c) * o
        outs.append(h)
    return jnp.stack(outs, axis=0)


def init_params(key, hidden_dim, embed_dim):
    """Deterministic re-implementation of LSTM.init_parameters()."""
    factor = 1.0 / math.sqrt(hidden_dim)
    kw, kb = jax.random.split(key)
    w = jax.random.uniform(kw, (hidden_dim + embed_dim, 4 * hidden_dim),
                           jnp.float32, minval=-factor, maxval=factor)
    b = jax.random.uniform(kb, (4 * hidden_dim,),
                           jnp.float32, minval=-factor, maxval=factor)
    # forget-gate bias (+1), gate order (g, i, f, o) -> slice [2H:3H]
    b = b.at[2 * hidden_dim:3 * hidden_dim].add(1.0)
    return w, b


# TODO(synk): cross-call persistence of self.h/self.c (the module carries state
# between forward() calls once set) is not modeled; each call starts from zeros.

if __name__ == "__main__":
    # Lane-friendly shapes: H = E = 128 keeps gate slices and the output block
    # lane-dense.  B=128 with batch_tile=64 gives nb=2 batch tiles (both v7x
    # TCs busy, MXU fill M=64 on the recurrence); T=16 with time_chunk=8 gives
    # nt=2 chunks (exercises chunking + the per-batch-tile h/c reset) and
    # M = TS*TB = 512 on the hoisted x @ w_x matmul.
    T, B, E, H = 16, 128, 128, 128

    key = jax.random.PRNGKey(0)
    k_param, k_x = jax.random.split(key)
    w, b = init_params(k_param, H, E)
    # bf16 embeds produced upstream (halves the x-chunk DMA bytes); the f32
    # reference consumes the same bf16 values cast up, so the input
    # quantization is not counted as kernel error.
    embeds = jax.random.normal(k_x, (T, B, E), jnp.bfloat16)

    out = lstm_forward(embeds, w, b, time_chunk=8, batch_tile=64)
    out = jax.block_until_ready(out)

    ref = lstm_reference(embeds.astype(jnp.float32), w, b)
    assert out.shape == (T, B, H)
    # bf16 weights and per-step bf16 h inside the kernel compound over T=16
    # steps vs the pure-f32 reference (f32 MXU accumulation throughout), so the
    # max tolerance is loosened; the mean error check keeps it meaningful.
    err = jnp.abs(out - ref)
    max_err = float(jnp.max(err))
    mean_err = float(jnp.mean(err))
    assert max_err < 1e-1 and mean_err < 2e-2, (
        f"mismatch vs reference: max_err={max_err}, mean_err={mean_err}")

    print("KERNEL_OK")
</pallas_src>

<mosaic_0001>
module attributes {stable_mosaic.version = 11 : i64} {
  func.func @_lstm_kernel(%arg0: i32, %arg1: i32, %arg2: memref<8x64x128xbf16, #tpu.memory_space<vmem>>, %arg3: memref<128x512xbf16, #tpu.memory_space<any>>, %arg4: memref<128x512xbf16, #tpu.memory_space<any>>, %arg5: memref<1x512xf32, #tpu.memory_space<vmem>>, %arg6: memref<8x64x128xf32, #tpu.memory_space<vmem>>, %arg7: memref<128x512xbf16, #tpu.memory_space<vmem>>, %arg8: memref<128x512xbf16, #tpu.memory_space<vmem>>, %arg9: memref<8x64x512xf32, #tpu.memory_space<vmem>>, %arg10: memref<64x128xf32, #tpu.memory_space<vmem>>, %arg11: memref<64x128xf32, #tpu.memory_space<vmem>>, %arg12: memref<2x!tpu.dma_semaphore, #tpu.memory_space<semaphore_mem>>) attributes {dimension_semantics = [#tpu.dimension_semantics<parallel>, #tpu.dimension_semantics<arbitrary>], iteration_bounds = array<i64: 2, 2>, scalar_prefetch = 0 : i64, scratch_operands = 6 : i64, tpu.core_type = #tpu.core_type<tc>, window_params = [{transform_indices = @transform_0, window_bounds = array<i64: 8, 64, 128>}, {}, {}, {pipeline_mode = #tpu.pipeline_mode<synchronous>, transform_indices = @transform_3, window_bounds = array<i64: 1, 512>}, {transform_indices = @transform_4, window_bounds = array<i64: 8, 64, 128>}]} {
    %c0_i32 = arith.constant 0 : i32
    %0 = arith.cmpi eq, %arg1, %c0_i32 : i32
    %1 = arith.extui %0 : i1 to i32
    %c0_i32_0 = arith.constant 0 : i32
    %2 = arith.cmpi ne, %1, %c0_i32_0 : i32
    scf.if %2 {
      %c0_i32_282 = arith.constant 0 : i32
      %419 = tpu.memref_slice %arg12[%c0_i32_282] : memref<2x!tpu.dma_semaphore, #tpu.memory_space<semaphore_mem>> -> memref<1x!tpu.dma_semaphore, #tpu.memory_space<semaphore_mem>>
      %420 = tpu.memref_squeeze %419 : memref<1x!tpu.dma_semaphore, #tpu.memory_space<semaphore_mem>> -> memref<!tpu.dma_semaphore, #tpu.memory_space<semaphore_mem>>
      tpu.enqueue_dma source(%arg3 : memref<128x512xbf16, #tpu.memory_space<any>>) target(%arg7 : memref<128x512xbf16, #tpu.memory_space<vmem>>) target_semaphore(%420 : memref<!tpu.dma_semaphore, #tpu.memory_space<semaphore_mem>>)
      %c1_i32_283 = arith.constant 1 : i32
      %421 = tpu.memref_slice %arg12[%c1_i32_283] : memref<2x!tpu.dma_semaphore, #tpu.memory_space<semaphore_mem>> -> memref<1x!tpu.dma_semaphore, #tpu.memory_space<semaphore_mem>>
      %422 = tpu.memref_squeeze %421 : memref<1x!tpu.dma_semaphore, #tpu.memory_space<semaphore_mem>> -> memref<!tpu.dma_semaphore, #tpu.memory_space<semaphore_mem>>
      tpu.enqueue_dma source(%arg4 : memref<128x512xbf16, #tpu.memory_space<any>>) target(%arg8 : memref<128x512xbf16, #tpu.memory_space<vmem>>) target_semaphore(%422 : memref<!tpu.dma_semaphore, #tpu.memory_space<semaphore_mem>>)
      %cst_284 = arith.constant 0.000000e+00 : f32
      %423 = vector.broadcast %cst_284 : f32 to vector<64x128xf32>
      %c0_285 = arith.constant 0 : index
      %c0_286 = arith.constant 0 : index
      %424 = vector.load %arg10[%c0_285, %c0_286] : memref<64x128xf32, #tpu.memory_space<vmem>>, vector<64x128xf32>
      tpu.vector_store %arg10[%c0_285, %c0_286], %423 {strides = array<i32>} : memref<64x128xf32, #tpu.memory_space<vmem>>, vector<64x128xf32>,
      %cst_287 = arith.constant 0.000000e+00 : f32
      %425 = vector.broadcast %cst_287 : f32 to vector<64x128xf32>
      %c0_288 = arith.constant 0 : index
      %c0_289 = arith.constant 0 : index
      %426 = vector.load %arg11[%c0_288, %c0_289] : memref<64x128xf32, #tpu.memory_space<vmem>>, vector<64x128xf32>
      tpu.vector_store %arg11[%c0_288, %c0_289], %425 {strides = array<i32>} : memref<64x128xf32, #tpu.memory_space<vmem>>, vector<64x128xf32>,
      %c1_i32_290 = arith.constant 1 : i32
      %427 = tpu.memref_slice %arg12[%c1_i32_290] : memref<2x!tpu.dma_semaphore, #tpu.memory_space<semaphore_mem>> -> memref<1x!tpu.dma_semaphore, #tpu.memory_space<semaphore_mem>>
      %428 = tpu.memref_squeeze %427 : memref<1x!tpu.dma_semaphore, #tpu.memory_space<semaphore_mem>> -> memref<!tpu.dma_semaphore, #tpu.memory_space<semaphore_mem>>
      tpu.wait_dma2 semaphore(%428 : memref<!tpu.dma_semaphore, #tpu.memory_space<semaphore_mem>>) src(%arg4 : memref<128x512xbf16, #tpu.memory_space<any>>) dst(%arg8 : memref<128x512xbf16, #tpu.memory_space<vmem>>)
    } else {
    }
    %c0 = arith.constant 0 : index
    %c0_1 = arith.constant 0 : index
    %c0_2 = arith.constant 0 : index
    %3 = vector.load %arg2[%c0, %c0_1, %c0_2] : memref<8x64x128xbf16, #tpu.memory_space<vmem>>, vector<8x64x128xbf16>
    %4 = vector.shape_cast %3 : vector<8x64x128xbf16> to vector<512x128xbf16>
    %c0_3 = arith.constant 0 : index
    %c0_4 = arith.constant 0 : index
    %5 = vector.load %arg8[%c0_3, %c0_4] : memref<128x512xbf16, #tpu.memory_space<vmem>>, vector<128x512xbf16>
    %cst = arith.constant dense<0.000000e+00> : vector<512x512xf32>
    %6 = tpu.matmul %4, %5, %cst {dimension_numbers = #tpu.dot_dimension_numbers<[1], [0], [0], [1], [0, 0, 1, 1], [], []>} : vector<512x128xbf16>, vector<128x512xbf16>, vector<512x512xf32> -> vector<512x512xf32>
    %c0_5 = arith.constant 0 : index
    %c0_6 = arith.constant 0 : index
    %7 = vector.load %arg5[%c0_5, %c0_6] : memref<1x512xf32, #tpu.memory_space<vmem>>, vector<1x512xf32>
    %8 = vector.broadcast %7 : vector<1x512xf32> to vector<512x512xf32>
    %9 = arith.addf %6, %8 : vector<512x512xf32>
    %10 = vector.shape_cast %9 : vector<512x512xf32> to vector<8x64x512xf32>
    %c0_7 = arith.constant 0 : index
    %c0_8 = arith.constant 0 : index
    %c0_9 = arith.constant 0 : index
    %11 = vector.load %arg9[%c0_7, %c0_8, %c0_9] : memref<8x64x512xf32, #tpu.memory_space<vmem>>, vector<8x64x512xf32>
    tpu.vector_store %arg9[%c0_7, %c0_8, %c0_9], %10 {strides = array<i32>} : memref<8x64x512xf32, #tpu.memory_space<vmem>>, vector<8x64x512xf32>,
    %c0_i32_10 = arith.constant 0 : i32
    %12 = arith.cmpi eq, %arg1, %c0_i32_10 : i32
    %13 = arith.extui %12 : i1 to i32
    %c0_i32_11 = arith.constant 0 : i32
    %14 = arith.cmpi ne, %13, %c0_i32_11 : i32
    scf.if %14 {
      %c0_i32_282 = arith.constant 0 : i32
      %419 = tpu.memref_slice %arg12[%c0_i32_282] : memref<2x!tpu.dma_semaphore, #tpu.memory_space<semaphore_mem>> -> memref<1x!tpu.dma_semaphore, #tpu.memory_space<semaphore_mem>>
      %420 = tpu.memref_squeeze %419 : memref<1x!tpu.dma_semaphore, #tpu.memory_space<semaphore_mem>> -> memref<!tpu.dma_semaphore, #tpu.memory_space<semaphore_mem>>
      tpu.wait_dma2 semaphore(%420 : memref<!tpu.dma_semaphore, #tpu.memory_space<semaphore_mem>>) src(%arg3 : memref<128x512xbf16, #tpu.memory_space<any>>) dst(%arg7 : memref<128x512xbf16, #tpu.memory_space<vmem>>)
    } else {
    }
    %c0_12 = arith.constant 0 : index
    %c0_13 = arith.constant 0 : index
    %15 = vector.load %arg10[%c0_12, %c0_13] : memref<64x128xf32, #tpu.memory_space<vmem>>, vector<64x128xf32>
    %c0_14 = arith.constant 0 : index
    %c0_15 = arith.constant 0 : index
    %16 = vector.load %arg11[%c0_14, %c0_15] : memref<64x128xf32, #tpu.memory_space<vmem>>, vector<64x128xf32>
    %c0_i32_16 = arith.constant 0 : i32
    %17 = arith.truncf %15 : vector<64x128xf32> to vector<64x128xbf16>
    %c0_17 = arith.constant 0 : index
    %c0_18 = arith.constant 0 : index
    %18 = vector.load %arg7[%c0_17, %c0_18] : memref<128x512xbf16, #tpu.memory_space<vmem>>, vector<128x128xbf16>
    %cst_19 = arith.constant dense<0.000000e+00> : vector<64x128xf32>
    %19 = tpu.matmul %17, %18, %cst_19 {dimension_numbers = #tpu.dot_dimension_numbers<[1], [0], [0], [1], [0, 0, 1, 1], [], []>} : vector<64x128xbf16>, vector<128x128xbf16>, vector<64x128xf32> -> vector<64x128xf32>
    %c0_i32_20 = arith.constant 0 : i32
    %c0_i32_21 = arith.constant 0 : i32
    %20 = tpu.memref_slice %arg9[%c0_i32_16, %c0_i32_20, %c0_i32_21] : memref<8x64x512xf32, #tpu.memory_space<vmem>> -> memref<1x64x512xf32, #tpu.memory_space<vmem>>
    %21 = tpu.memref_squeeze %20 : memref<1x64x512xf32, #tpu.memory_space<vmem>> -> memref<64x512xf32, #tpu.memory_space<vmem>>
    %c0_22 = arith.constant 0 : index
    %c0_23 = arith.constant 0 : index
    %22 = vector.load %21[%c0_22, %c0_23] : memref<64x512xf32, #tpu.memory_space<vmem>>, vector<64x128xf32>
    %23 = arith.addf %19, %22 : vector<64x128xf32>
    %24 = math.tanh %23 : vector<64x128xf32>
    %c0_24 = arith.constant 0 : index
    %c128 = arith.constant 128 : index
    %25 = vector.load %arg7[%c0_24, %c128] : memref<128x512xbf16, #tpu.memory_space<vmem>>, vector<128x128xbf16>
    %cst_25 = arith.constant dense<0.000000e+00> : vector<64x128xf32>
    %26 = tpu.matmul %17, %25, %cst_25 {dimension_numbers = #tpu.dot_dimension_numbers<[1], [0], [0], [1], [0, 0, 1, 1], [], []>} : vector<64x128xbf16>, vector<128x128xbf16>, vector<64x128xf32> -> vector<64x128xf32>
    %c0_i32_26 = arith.constant 0 : i32
    %c0_i32_27 = arith.constant 0 : i32
    %27 = tpu.memref_slice %arg9[%c0_i32_16, %c0_i32_26, %c0_i32_27] : memref<8x64x512xf32, #tpu.memory_space<vmem>> -> memref<1x64x512xf32, #tpu.memory_space<vmem>>
    %28 = tpu.memref_squeeze %27 : memref<1x64x512xf32, #tpu.memory_space<vmem>> -> memref<64x512xf32, #tpu.memory_space<vmem>>
    %c0_28 = arith.constant 0 : index
    %c128_29 = arith.constant 128 : index
    %29 = vector.load %28[%c0_28, %c128_29] : memref<64x512xf32, #tpu.memory_space<vmem>>, vector<64x128xf32>
    %30 = arith.addf %26, %29 : vector<64x128xf32>
    %31 = arith.negf %30 : vector<64x128xf32>
    %32 = math.exp %31 : vector<64x128xf32>
    %cst_30 = arith.constant 1.000000e+00 : f32
    %33 = vector.broadcast %cst_30 : f32 to vector<64x128xf32>
    %34 = arith.addf %33, %32 : vector<64x128xf32>
    %35 = arith.divf %33, %34 : vector<64x128xf32>
    %c0_31 = arith.constant 0 : index
    %c256 = arith.constant 256 : index
    %36 = vector.load %arg7[%c0_31, %c256] : memref<128x512xbf16, #tpu.memory_space<vmem>>, vector<128x128xbf16>
    %cst_32 = arith.constant dense<0.000000e+00> : vector<64x128xf32>
    %37 = tpu.matmul %17, %36, %cst_32 {dimension_numbers = #tpu.dot_dimension_numbers<[1], [0], [0], [1], [0, 0, 1, 1], [], []>} : vector<64x128xbf16>, vector<128x128xbf16>, vector<64x128xf32> -> vector<64x128xf32>
    %c0_i32_33 = arith.constant 0 : i32
    %c0_i32_34 = arith.constant 0 : i32
    %38 = tpu.memref_slice %arg9[%c0_i32_16, %c0_i32_33, %c0_i32_34] : memref<8x64x512xf32, #tpu.memory_space<vmem>> -> memref<1x64x512xf32, #tpu.memory_space<vmem>>
    %39 = tpu.memref_squeeze %38 : memref<1x64x512xf32, #tpu.memory_space<vmem>> -> memref<64x512xf32, #tpu.memory_space<vmem>>
    %c0_35 = arith.constant 0 : index
    %c256_36 = arith.constant 256 : index
    %40 = vector.load %39[%c0_35, %c256_36] : memref<64x512xf32, #tpu.memory_space<vmem>>, vector<64x128xf32>
    %41 = arith.addf %37, %40 : vector<64x128xf32>
    %42 = arith.negf %41 : vector<64x128xf32>
    %43 = math.exp %42 : vector<64x128xf32>
    %cst_37 = arith.constant 1.000000e+00 : f32
    %44 = vector.broadcast %cst_37 : f32 to vector<64x128xf32>
    %45 = arith.addf %44, %43 : vector<64x128xf32>
    %46 = arith.divf %44, %45 : vector<64x128xf32>
    %c0_38 = arith.constant 0 : index
    %c384 = arith.constant 384 : index
    %47 = vector.load %arg7[%c0_38, %c384] : memref<128x512xbf16, #tpu.memory_space<vmem>>, vector<128x128xbf16>
    %cst_39 = arith.constant dense<0.000000e+00> : vector<64x128xf32>
    %48 = tpu.matmul %17, %47, %cst_39 {dimension_numbers = #tpu.dot_dimension_numbers<[1], [0], [0], [1], [0, 0, 1, 1], [], []>} : vector<64x128xbf16>, vector<128x128xbf16>, vector<64x128xf32> -> vector<64x128xf32>
    %c0_i32_40 = arith.constant 0 : i32
    %c0_i32_41 = arith.constant 0 : i32
    %49 = tpu.memref_slice %arg9[%c0_i32_16, %c0_i32_40, %c0_i32_41] : memref<8x64x512xf32, #tpu.memory_space<vmem>> -> memref<1x64x512xf32, #tpu.memory_space<vmem>>
    %50 = tpu.memref_squeeze %49 : memref<1x64x512xf32, #tpu.memory_space<vmem>> -> memref<64x512xf32, #tpu.memory_space<vmem>>
    %c0_42 = arith.constant 0 : index
    %c384_43 = arith.constant 384 : index
    %51 = vector.load %50[%c0_42, %c384_43] : memref<64x512xf32, #tpu.memory_space<vmem>>, vector<64x128xf32>
    %52 = arith.addf %48, %51 : vector<64x128xf32>
    %53 = arith.negf %52 : vector<64x128xf32>
    %54 = math.exp %53 : vector<64x128xf32>
    %cst_44 = arith.constant 1.000000e+00 : f32
    %55 = vector.broadcast %cst_44 : f32 to vector<64x128xf32>
    %56 = arith.addf %55, %54 : vector<64x128xf32>
    %57 = arith.divf %55, %56 : vector<64x128xf32>
    %58 = arith.mulf %24, %35 : vector<64x128xf32>
    %59 = arith.mulf %16, %46 : vector<64x128xf32>
    %60 = arith.addf %58, %59 : vector<64x128xf32>
    %61 = math.tanh %60 : vector<64x128xf32>
    %62 = arith.mulf %61, %57 : vector<64x128xf32>
    %63 = arith.index_cast %c0_i32_16 : i32 to index
    %c0_45 = arith.constant 0 : index
    %c0_46 = arith.constant 0 : index
    %64 = vector.load %arg6[%63, %c0_45, %c0_46] : memref<8x64x128xf32, #tpu.memory_space<vmem>>, vector<1x64x128xf32>
    %65 = vector.shape_cast %64 : vector<1x64x128xf32> to vector<64x128xf32>
    %66 = vector.shape_cast %62 : vector<64x128xf32> to vector<1x64x128xf32>
    tpu.vector_store %arg6[%63, %c0_45, %c0_46], %66 {strides = array<i32>} : memref<8x64x128xf32, #tpu.memory_space<vmem>>, vector<1x64x128xf32>,
    %c1_i32 = arith.constant 1 : i32
    %67 = arith.truncf %62 : vector<64x128xf32> to vector<64x128xbf16>
    %c0_47 = arith.constant 0 : index
    %c0_48 = arith.constant 0 : index
    %68 = vector.load %arg7[%c0_47, %c0_48] : memref<128x512xbf16, #tpu.memory_space<vmem>>, vector<128x128xbf16>
    %cst_49 = arith.constant dense<0.000000e+00> : vector<64x128xf32>
    %69 = tpu.matmul %67, %68, %cst_49 {dimension_numbers = #tpu.dot_dimension_numbers<[1], [0], [0], [1], [0, 0, 1, 1], [], []>} : vector<64x128xbf16>, vector<128x128xbf16>, vector<64x128xf32> -> vector<64x128xf32>
    %c0_i32_50 = arith.constant 0 : i32
    %c0_i32_51 = arith.constant 0 : i32
    %70 = tpu.memref_slice %arg9[%c1_i32, %c0_i32_50, %c0_i32_51] : memref<8x64x512xf32, #tpu.memory_space<vmem>> -> memref<1x64x512xf32, #tpu.memory_space<vmem>>
    %71 = tpu.memref_squeeze %70 : memref<1x64x512xf32, #tpu.memory_space<vmem>> -> memref<64x512xf32, #tpu.memory_space<vmem>>
    %c0_52 = arith.constant 0 : index
    %c0_53 = arith.constant 0 : index
    %72 = vector.load %71[%c0_52, %c0_53] : memref<64x512xf32, #tpu.memory_space<vmem>>, vector<64x128xf32>
    %73 = arith.addf %69, %72 : vector<64x128xf32>
    %74 = math.tanh %73 : vector<64x128xf32>
    %c0_54 = arith.constant 0 : index
    %c128_55 = arith.constant 128 : index
    %75 = vector.load %arg7[%c0_54, %c128_55] : memref<128x512xbf16, #tpu.memory_space<vmem>>, vector<128x128xbf16>
    %cst_56 = arith.constant dense<0.000000e+00> : vector<64x128xf32>
    %76 = tpu.matmul %67, %75, %cst_56 {dimension_numbers = #tpu.dot_dimension_numbers<[1], [0], [0], [1], [0, 0, 1, 1], [], []>} : vector<64x128xbf16>, vector<128x128xbf16>, vector<64x128xf32> -> vector<64x128xf32>
    %c0_i32_57 = arith.constant 0 : i32
    %c0_i32_58 = arith.constant 0 : i32
    %77 = tpu.memref_slice %arg9[%c1_i32, %c0_i32_57, %c0_i32_58] : memref<8x64x512xf32, #tpu.memory_space<vmem>> -> memref<1x64x512xf32, #tpu.memory_space<vmem>>
    %78 = tpu.memref_squeeze %77 : memref<1x64x512xf32, #tpu.memory_space<vmem>> -> memref<64x512xf32, #tpu.memory_space<vmem>>
    %c0_59 = arith.constant 0 : index
    %c128_60 = arith.constant 128 : index
    %79 = vector.load %78[%c0_59, %c128_60] : memref<64x512xf32, #tpu.memory_space<vmem>>, vector<64x128xf32>
    %80 = arith.addf %76, %79 : vector<64x128xf32>
    %81 = arith.negf %80 : vector<64x128xf32>
    %82 = math.exp %81 : vector<64x128xf32>
    %cst_61 = arith.constant 1.000000e+00 : f32
    %83 = vector.broadcast %cst_61 : f32 to vector<64x128xf32>
    %84 = arith.addf %83, %82 : vector<64x128xf32>
    %85 = arith.divf %83, %84 : vector<64x128xf32>
    %c0_62 = arith.constant 0 : index
    %c256_63 = arith.constant 256 : index
    %86 = vector.load %arg7[%c0_62, %c256_63] : memref<128x512xbf16, #tpu.memory_space<vmem>>, vector<128x128xbf16>
    %cst_64 = arith.constant dense<0.000000e+00> : vector<64x128xf32>
    %87 = tpu.matmul %67, %86, %cst_64 {dimension_numbers = #tpu.dot_dimension_numbers<[1], [0], [0], [1], [0, 0, 1, 1], [], []>} : vector<64x128xbf16>, vector<128x128xbf16>, vector<64x128xf32> -> vector<64x128xf32>
    %c0_i32_65 = arith.constant 0 : i32
    %c0_i32_66 = arith.constant 0 : i32
    %88 = tpu.memref_slice %arg9[%c1_i32, %c0_i32_65, %c0_i32_66] : memref<8x64x512xf32, #tpu.memory_space<vmem>> -> memref<1x64x512xf32, #tpu.memory_space<vmem>>
    %89 = tpu.memref_squeeze %88 : memref<1x64x512xf32, #tpu.memory_space<vmem>> -> memref<64x512xf32, #tpu.memory_space<vmem>>
    %c0_67 = arith.constant 0 : index
    %c256_68 = arith.constant 256 : index
    %90 = vector.load %89[%c0_67, %c256_68] : memref<64x512xf32, #tpu.memory_space<vmem>>, vector<64x128xf32>
    %91 = arith.addf %87, %90 : vector<64x128xf32>
    %92 = arith.negf %91 : vector<64x128xf32>
    %93 = math.exp %92 : vector<64x128xf32>
    %cst_69 = arith.constant 1.000000e+00 : f32
    %94 = vector.broadcast %cst_69 : f32 to vector<64x128xf32>
    %95 = arith.addf %94, %93 : vector<64x128xf32>
    %96 = arith.divf %94, %95 : vector<64x128xf32>
    %c0_70 = arith.constant 0 : index
    %c384_71 = arith.constant 384 : index
    %97 = vector.load %arg7[%c0_70, %c384_71] : memref<128x512xbf16, #tpu.memory_space<vmem>>, vector<128x128xbf16>
    %cst_72 = arith.constant dense<0.000000e+00> : vector<64x128xf32>
    %98 = tpu.matmul %67, %97, %cst_72 {dimension_numbers = #tpu.dot_dimension_numbers<[1], [0], [0], [1], [0, 0, 1, 1], [], []>} : vector<64x128xbf16>, vector<128x128xbf16>, vector<64x128xf32> -> vector<64x128xf32>
    %c0_i32_73 = arith.constant 0 : i32
    %c0_i32_74 = arith.constant 0 : i32
    %99 = tpu.memref_slice %arg9[%c1_i32, %c0_i32_73, %c0_i32_74] : memref<8x64x512xf32, #tpu.memory_space<vmem>> -> memref<1x64x512xf32, #tpu.memory_space<vmem>>
    %100 = tpu.memref_squeeze %99 : memref<1x64x512xf32, #tpu.memory_space<vmem>> -> memref<64x512xf32, #tpu.memory_space<vmem>>
    %c0_75 = arith.constant 0 : index
    %c384_76 = arith.constant 384 : index
    %101 = vector.load %100[%c0_75, %c384_76] : memref<64x512xf32, #tpu.memory_space<vmem>>, vector<64x128xf32>
    %102 = arith.addf %98, %101 : vector<64x128xf32>
    %103 = arith.negf %102 : vector<64x128xf32>
    %104 = math.exp %103 : vector<64x128xf32>
    %cst_77 = arith.constant 1.000000e+00 : f32
    %105 = vector.broadcast %cst_77 : f32 to vector<64x128xf32>
    %106 = arith.addf %105, %104 : vector<64x128xf32>
    %107 = arith.divf %105, %106 : vector<64x128xf32>
    %108 = arith.mulf %74, %85 : vector<64x128xf32>
    %109 = arith.mulf %60, %96 : vector<64x128xf32>
    %110 = arith.addf %108, %109 : vector<64x128xf32>
    %111 = math.tanh %110 : vector<64x128xf32>
    %112 = arith.mulf %111, %107 : vector<64x128xf32>
    %113 = arith.index_cast %c1_i32 : i32 to index
    %c0_78 = arith.constant 0 : index
    %c0_79 = arith.constant 0 : index
    %114 = vector.load %arg6[%113, %c0_78, %c0_79] : memref<8x64x128xf32, #tpu.memory_space<vmem>>, vector<1x64x128xf32>
    %115 = vector.shape_cast %114 : vector<1x64x128xf32> to vector<64x128xf32>
    %116 = vector.shape_cast %112 : vector<64x128xf32> to vector<1x64x128xf32>
    tpu.vector_store %arg6[%113, %c0_78, %c0_79], %116 {strides = array<i32>} : memref<8x64x128xf32, #tpu.memory_space<vmem>>, vector<1x64x128xf32>,
    %c2_i32 = arith.constant 2 : i32
    %117 = arith.truncf %112 : vector<64x128xf32> to vector<64x128xbf16>
    %c0_80 = arith.constant 0 : index
    %c0_81 = arith.constant 0 : index
    %118 = vector.load %arg7[%c0_80, %c0_81] : memref<128x512xbf16, #tpu.memory_space<vmem>>, vector<128x128xbf16>
    %cst_82 = arith.constant dense<0.000000e+00> : vector<64x128xf32>
    %119 = tpu.matmul %117, %118, %cst_82 {dimension_numbers = #tpu.dot_dimension_numbers<[1], [0], [0], [1], [0, 0, 1, 1], [], []>} : vector<64x128xbf16>, vector<128x128xbf16>, vector<64x128xf32> -> vector<64x128xf32>
    %c0_i32_83 = arith.constant 0 : i32
    %c0_i32_84 = arith.constant 0 : i32
    %120 = tpu.memref_slice %arg9[%c2_i32, %c0_i32_83, %c0_i32_84] : memref<8x64x512xf32, #tpu.memory_space<vmem>> -> memref<1x64x512xf32, #tpu.memory_space<vmem>>
    %121 = tpu.memref_squeeze %120 : memref<1x64x512xf32, #tpu.memory_space<vmem>> -> memref<64x512xf32, #tpu.memory_space<vmem>>
    %c0_85 = arith.constant 0 : index
    %c0_86 = arith.constant 0 : index
    %122 = vector.load %121[%c0_85, %c0_86] : memref<64x512xf32, #tpu.memory_space<vmem>>, vector<64x128xf32>
    %123 = arith.addf %119, %122 : vector<64x128xf32>
    %124 = math.tanh %123 : vector<64x128xf32>
    %c0_87 = arith.constant 0 : index
    %c128_88 = arith.constant 128 : index
    %125 = vector.load %arg7[%c0_87, %c128_88] : memref<128x512xbf16, #tpu.memory_space<vmem>>, vector<128x128xbf16>
    %cst_89 = arith.constant dense<0.000000e+00> : vector<64x128xf32>
    %126 = tpu.matmul %117, %125, %cst_89 {dimension_numbers = #tpu.dot_dimension_numbers<[1], [0], [0], [1], [0, 0, 1, 1], [], []>} : vector<64x128xbf16>, vector<128x128xbf16>, vector<64x128xf32> -> vector<64x128xf32>
    %c0_i32_90 = arith.constant 0 : i32
    %c0_i32_91 = arith.constant 0 : i32
    %127 = tpu.memref_slice %arg9[%c2_i32, %c0_i32_90, %c0_i32_91] : memref<8x64x512xf32, #tpu.memory_space<vmem>> -> memref<1x64x512xf32, #tpu.memory_space<vmem>>
    %128 = tpu.memref_squeeze %127 : memref<1x64x512xf32, #tpu.memory_space<vmem>> -> memref<64x512xf32, #tpu.memory_space<vmem>>
    %c0_92 = arith.constant 0 : index
    %c128_93 = arith.constant 128 : index
    %129 = vector.load %128[%c0_92, %c128_93] : memref<64x512xf32, #tpu.memory_space<vmem>>, vector<64x128xf32>
    %130 = arith.addf %126, %129 : vector<64x128xf32>
    %131 = arith.negf %130 : vector<64x128xf32>
    %132 = math.exp %131 : vector<64x128xf32>
    %cst_94 = arith.constant 1.000000e+00 : f32
    %133 = vector.broadcast %cst_94 : f32 to vector<64x128xf32>
    %134 = arith.addf %133, %132 : vector<64x128xf32>
    %135 = arith.divf %133, %134 : vector<64x128xf32>
    %c0_95 = arith.constant 0 : index
    %c256_96 = arith.constant 256 : index
    %136 = vector.load %arg7[%c0_95, %c256_96] : memref<128x512xbf16, #tpu.memory_space<vmem>>, vector<128x128xbf16>
    %cst_97 = arith.constant dense<0.000000e+00> : vector<64x128xf32>
    %137 = tpu.matmul %117, %136, %cst_97 {dimension_numbers = #tpu.dot_dimension_numbers<[1], [0], [0], [1], [0, 0, 1, 1], [], []>} : vector<64x128xbf16>, vector<128x128xbf16>, vector<64x128xf32> -> vector<64x128xf32>
    %c0_i32_98 = arith.constant 0 : i32
    %c0_i32_99 = arith.constant 0 : i32
    %138 = tpu.memref_slice %arg9[%c2_i32, %c0_i32_98, %c0_i32_99] : memref<8x64x512xf32, #tpu.memory_space<vmem>> -> memref<1x64x512xf32, #tpu.memory_space<vmem>>
    %139 = tpu.memref_squeeze %138 : memref<1x64x512xf32, #tpu.memory_space<vmem>> -> memref<64x512xf32, #tpu.memory_space<vmem>>
    %c0_100 = arith.constant 0 : index
    %c256_101 = arith.constant 256 : index
    %140 = vector.load %139[%c0_100, %c256_101] : memref<64x512xf32, #tpu.memory_space<vmem>>, vector<64x128xf32>
    %141 = arith.addf %137, %140 : vector<64x128xf32>
    %142 = arith.negf %141 : vector<64x128xf32>
    %143 = math.exp %142 : vector<64x128xf32>
    %cst_102 = arith.constant 1.000000e+00 : f32
    %144 = vector.broadcast %cst_102 : f32 to vector<64x128xf32>
    %145 = arith.addf %144, %143 : vector<64x128xf32>
    %146 = arith.divf %144, %145 : vector<64x128xf32>
    %c0_103 = arith.constant 0 : index
    %c384_104 = arith.constant 384 : index
    %147 = vector.load %arg7[%c0_103, %c384_104] : memref<128x512xbf16, #tpu.memory_space<vmem>>, vector<128x128xbf16>
    %cst_105 = arith.constant dense<0.000000e+00> : vector<64x128xf32>
    %148 = tpu.matmul %117, %147, %cst_105 {dimension_numbers = #tpu.dot_dimension_numbers<[1], [0], [0], [1], [0, 0, 1, 1], [], []>} : vector<64x128xbf16>, vector<128x128xbf16>, vector<64x128xf32> -> vector<64x128xf32>
    %c0_i32_106 = arith.constant 0 : i32
    %c0_i32_107 = arith.constant 0 : i32
    %149 = tpu.memref_slice %arg9[%c2_i32, %c0_i32_106, %c0_i32_107] : memref<8x64x512xf32, #tpu.memory_space<vmem>> -> memref<1x64x512xf32, #tpu.memory_space<vmem>>
    %150 = tpu.memref_squeeze %149 : memref<1x64x512xf32, #tpu.memory_space<vmem>> -> memref<64x512xf32, #tpu.memory_space<vmem>>
    %c0_108 = arith.constant 0 : index
    %c384_109 = arith.constant 384 : index
    %151 = vector.load %150[%c0_108, %c384_109] : memref<64x512xf32, #tpu.memory_space<vmem>>, vector<64x128xf32>
    %152 = arith.addf %148, %151 : vector<64x128xf32>
    %153 = arith.negf %152 : vector<64x128xf32>
    %154 = math.exp %153 : vector<64x128xf32>
    %cst_110 = arith.constant 1.000000e+00 : f32
    %155 = vector.broadcast %cst_110 : f32 to vector<64x128xf32>
    %156 = arith.addf %155, %154 : vector<64x128xf32>
    %157 = arith.divf %155, %156 : vector<64x128xf32>
    %158 = arith.mulf %124, %135 : vector<64x128xf32>
    %159 = arith.mulf %110, %146 : vector<64x128xf32>
    %160 = arith.addf %158, %159 : vector<64x128xf32>
    %161 = math.tanh %160 : vector<64x128xf32>
    %162 = arith.mulf %161, %157 : vector<64x128xf32>
    %163 = arith.index_cast %c2_i32 : i32 to index
    %c0_111 = arith.constant 0 : index
    %c0_112 = arith.constant 0 : index
    %164 = vector.load %arg6[%163, %c0_111, %c0_112] : memref<8x64x128xf32, #tpu.memory_space<vmem>>, vector<1x64x128xf32>
    %165 = vector.shape_cast %164 : vector<1x64x128xf32> to vector<64x128xf32>
    %166 = vector.shape_cast %162 : vector<64x128xf32> to vector<1x64x128xf32>
    tpu.vector_store %arg6[%163, %c0_111, %c0_112], %166 {strides = array<i32>} : memref<8x64x128xf32, #tpu.memory_space<vmem>>, vector<1x64x128xf32>,
    %c3_i32 = arith.constant 3 : i32
    %167 = arith.truncf %162 : vector<64x128xf32> to vector<64x128xbf16>
    %c0_113 = arith.constant 0 : index
    %c0_114 = arith.constant 0 : index
    %168 = vector.load %arg7[%c0_113, %c0_114] : memref<128x512xbf16, #tpu.memory_space<vmem>>, vector<128x128xbf16>
    %cst_115 = arith.constant dense<0.000000e+00> : vector<64x128xf32>
    %169 = tpu.matmul %167, %168, %cst_115 {dimension_numbers = #tpu.dot_dimension_numbers<[1], [0], [0], [1], [0, 0, 1, 1], [], []>} : vector<64x128xbf16>, vector<128x128xbf16>, vector<64x128xf32> -> vector<64x128xf32>
    %c0_i32_116 = arith.constant 0 : i32
    %c0_i32_117 = arith.constant 0 : i32
    %170 = tpu.memref_slice %arg9[%c3_i32, %c0_i32_116, %c0_i32_117] : memref<8x64x512xf32, #tpu.memory_space<vmem>> -> memref<1x64x512xf32, #tpu.memory_space<vmem>>
    %171 = tpu.memref_squeeze %170 : memref<1x64x512xf32, #tpu.memory_space<vmem>> -> memref<64x512xf32, #tpu.memory_space<vmem>>
    %c0_118 = arith.constant 0 : index
    %c0_119 = arith.constant 0 : index
    %172 = vector.load %171[%c0_118, %c0_119] : memref<64x512xf32, #tpu.memory_space<vmem>>, vector<64x128xf32>
    %173 = arith.addf %169, %172 : vector<64x128xf32>
    %174 = math.tanh %173 : vector<64x128xf32>
    %c0_120 = arith.constant 0 : index
    %c128_121 = arith.constant 128 : index
    %175 = vector.load %arg7[%c0_120, %c128_121] : memref<128x512xbf16, #tpu.memory_space<vmem>>, vector<128x128xbf16>
    %cst_122 = arith.constant dense<0.000000e+00> : vector<64x128xf32>
    %176 = tpu.matmul %167, %175, %cst_122 {dimension_numbers = #tpu.dot_dimension_numbers<[1], [0], [0], [1], [0, 0, 1, 1], [], []>} : vector<64x128xbf16>, vector<128x128xbf16>, vector<64x128xf32> -> vector<64x128xf32>
    %c0_i32_123 = arith.constant 0 : i32
    %c0_i32_124 = arith.constant 0 : i32
    %177 = tpu.memref_slice %arg9[%c3_i32, %c0_i32_123, %c0_i32_124] : memref<8x64x512xf32, #tpu.memory_space<vmem>> -> memref<1x64x512xf32, #tpu.memory_space<vmem>>
    %178 = tpu.memref_squeeze %177 : memref<1x64x512xf32, #tpu.memory_space<vmem>> -> memref<64x512xf32, #tpu.memory_space<vmem>>
    %c0_125 = arith.constant 0 : index
    %c128_126 = arith.constant 128 : index
    %179 = vector.load %178[%c0_125, %c128_126] : memref<64x512xf32, #tpu.memory_space<vmem>>, vector<64x128xf32>
    %180 = arith.addf %176, %179 : vector<64x128xf32>
    %181 = arith.negf %180 : vector<64x128xf32>
    %182 = math.exp %181 : vector<64x128xf32>
    %cst_127 = arith.constant 1.000000e+00 : f32
    %183 = vector.broadcast %cst_127 : f32 to vector<64x128xf32>
    %184 = arith.addf %183, %182 : vector<64x128xf32>
    %185 = arith.divf %183, %184 : vector<64x128xf32>
    %c0_128 = arith.constant 0 : index
    %c256_129 = arith.constant 256 : index
    %186 = vector.load %arg7[%c0_128, %c256_129] : memref<128x512xbf16, #tpu.memory_space<vmem>>, vector<128x128xbf16>
    %cst_130 = arith.constant dense<0.000000e+00> : vector<64x128xf32>
    %187 = tpu.matmul %167, %186, %cst_130 {dimension_numbers = #tpu.dot_dimension_numbers<[1], [0], [0], [1], [0, 0, 1, 1], [], []>} : vector<64x128xbf16>, vector<128x128xbf16>, vector<64x128xf32> -> vector<64x128xf32>
    %c0_i32_131 = arith.constant 0 : i32
    %c0_i32_132 = arith.constant 0 : i32
    %188 = tpu.memref_slice %arg9[%c3_i32, %c0_i32_131, %c0_i32_132] : memref<8x64x512xf32, #tpu.memory_space<vmem>> -> memref<1x64x512xf32, #tpu.memory_space<vmem>>
    %189 = tpu.memref_squeeze %188 : memref<1x64x512xf32, #tpu.memory_space<vmem>> -> memref<64x512xf32, #tpu.memory_space<vmem>>
    %c0_133 = arith.constant 0 : index
    %c256_134 = arith.constant 256 : index
    %190 = vector.load %189[%c0_133, %c256_134] : memref<64x512xf32, #tpu.memory_space<vmem>>, vector<64x128xf32>
    %191 = arith.addf %187, %190 : vector<64x128xf32>
    %192 = arith.negf %191 : vector<64x128xf32>
    %193 = math.exp %192 : vector<64x128xf32>
    %cst_135 = arith.constant 1.000000e+00 : f32
    %194 = vector.broadcast %cst_135 : f32 to vector<64x128xf32>
    %195 = arith.addf %194, %193 : vector<64x128xf32>
    %196 = arith.divf %194, %195 : vector<64x128xf32>
    %c0_136 = arith.constant 0 : index
    %c384_137 = arith.constant 384 : index
    %197 = vector.load %arg7[%c0_136, %c384_137] : memref<128x512xbf16, #tpu.memory_space<vmem>>, vector<128x128xbf16>
    %cst_138 = arith.constant dense<0.000000e+00> : vector<64x128xf32>
    %198 = tpu.matmul %167, %197, %cst_138 {dimension_numbers = #tpu.dot_dimension_numbers<[1], [0], [0], [1], [0, 0, 1, 1], [], []>} : vector<64x128xbf16>, vector<128x128xbf16>, vector<64x128xf32> -> vector<64x128xf32>
    %c0_i32_139 = arith.constant 0 : i32
    %c0_i32_140 = arith.constant 0 : i32
    %199 = tpu.memref_slice %arg9[%c3_i32, %c0_i32_139, %c0_i32_140] : memref<8x64x512xf32, #tpu.memory_space<vmem>> -> memref<1x64x512xf32, #tpu.memory_space<vmem>>
    %200 = tpu.memref_squeeze %199 : memref<1x64x512xf32, #tpu.memory_space<vmem>> -> memref<64x512xf32, #tpu.memory_space<vmem>>
    %c0_141 = arith.constant 0 : index
    %c384_142 = arith.constant 384 : index
    %201 = vector.load %200[%c0_141, %c384_142] : memref<64x512xf32, #tpu.memory_space<vmem>>, vector<64x128xf32>
    %202 = arith.addf %198, %201 : vector<64x128xf32>
    %203 = arith.negf %202 : vector<64x128xf32>
    %204 = math.exp %203 : vector<64x128xf32>
    %cst_143 = arith.constant 1.000000e+00 : f32
    %205 = vector.broadcast %cst_143 : f32 to vector<64x128xf32>
    %206 = arith.addf %205, %204 : vector<64x128xf32>
    %207 = arith.divf %205, %206 : vector<64x128xf32>
    %208 = arith.mulf %174, %185 : vector<64x128xf32>
    %209 = arith.mulf %160, %196 : vector<64x128xf32>
    %210 = arith.addf %208, %209 : vector<64x128xf32>
    %211 = math.tanh %210 : vector<64x128xf32>
    %212 = arith.mulf %211, %207 : vector<64x128xf32>
    %213 = arith.index_cast %c3_i32 : i32 to index
    %c0_144 = arith.constant 0 : index
    %c0_145 = arith.constant 0 : index
    %214 = vector.load %arg6[%213, %c0_144, %c0_145] : memref<8x64x128xf32, #tpu.memory_space<vmem>>, vector<1x64x128xf32>
    %215 = vector.shape_cast %214 : vector<1x64x128xf32> to vector<64x128xf32>
    %216 = vector.shape_cast %212 : vector<64x128xf32> to vector<1x64x128xf32>
    tpu.vector_store %arg6[%213, %c0_144, %c0_145], %216 {strides = array<i32>} : memref<8x64x128xf32, #tpu.memory_space<vmem>>, vector<1x64x128xf32>,
    %c4_i32 = arith.constant 4 : i32
    %217 = arith.truncf %212 : vector<64x128xf32> to vector<64x128xbf16>
    %c0_146 = arith.constant 0 : index
    %c0_147 = arith.constant 0 : index
    %218 = vector.load %arg7[%c0_146, %c0_147] : memref<128x512xbf16, #tpu.memory_space<vmem>>, vector<128x128xbf16>
    %cst_148 = arith.constant dense<0.000000e+00> : vector<64x128xf32>
    %219 = tpu.matmul %217, %218, %cst_148 {dimension_numbers = #tpu.dot_dimension_numbers<[1], [0], [0], [1], [0, 0, 1, 1], [], []>} : vector<64x128xbf16>, vector<128x128xbf16>, vector<64x128xf32> -> vector<64x128xf32>
    %c0_i32_149 = arith.constant 0 : i32
    %c0_i32_150 = arith.constant 0 : i32
    %220 = tpu.memref_slice %arg9[%c4_i32, %c0_i32_149, %c0_i32_150] : memref<8x64x512xf32, #tpu.memory_space<vmem>> -> memref<1x64x512xf32, #tpu.memory_space<vmem>>
    %221 = tpu.memref_squeeze %220 : memref<1x64x512xf32, #tpu.memory_space<vmem>> -> memref<64x512xf32, #tpu.memory_space<vmem>>
    %c0_151 = arith.constant 0 : index
    %c0_152 = arith.constant 0 : index
    %222 = vector.load %221[%c0_151, %c0_152] : memref<64x512xf32, #tpu.memory_space<vmem>>, vector<64x128xf32>
    %223 = arith.addf %219, %222 : vector<64x128xf32>
    %224 = math.tanh %223 : vector<64x128xf32>
    %c0_153 = arith.constant 0 : index
    %c128_154 = arith.constant 128 : index
    %225 = vector.load %arg7[%c0_153, %c128_154] : memref<128x512xbf16, #tpu.memory_space<vmem>>, vector<128x128xbf16>
    %cst_155 = arith.constant dense<0.000000e+00> : vector<64x128xf32>
    %226 = tpu.matmul %217, %225, %cst_155 {dimension_numbers = #tpu.dot_dimension_numbers<[1], [0], [0], [1], [0, 0, 1, 1], [], []>} : vector<64x128xbf16>, vector<128x128xbf16>, vector<64x128xf32> -> vector<64x128xf32>
    %c0_i32_156 = arith.constant 0 : i32
    %c0_i32_157 = arith.constant 0 : i32
    %227 = tpu.memref_slice %arg9[%c4_i32, %c0_i32_156, %c0_i32_157] : memref<8x64x512xf32, #tpu.memory_space<vmem>> -> memref<1x64x512xf32, #tpu.memory_space<vmem>>
    %228 = tpu.memref_squeeze %227 : memref<1x64x512xf32, #tpu.memory_space<vmem>> -> memref<64x512xf32, #tpu.memory_space<vmem>>
    %c0_158 = arith.constant 0 : index
    %c128_159 = arith.constant 128 : index
    %229 = vector.load %228[%c0_158, %c128_159] : memref<64x512xf32, #tpu.memory_space<vmem>>, vector<64x128xf32>
    %230 = arith.addf %226, %229 : vector<64x128xf32>
    %231 = arith.negf %230 : vector<64x128xf32>
    %232 = math.exp %231 : vector<64x128xf32>
    %cst_160 = arith.constant 1.000000e+00 : f32
    %233 = vector.broadcast %cst_160 : f32 to vector<64x128xf32>
    %234 = arith.addf %233, %232 : vector<64x128xf32>
    %235 = arith.divf %233, %234 : vector<64x128xf32>
    %c0_161 = arith.constant 0 : index
    %c256_162 = arith.constant 256 : index
    %236 = vector.load %arg7[%c0_161, %c256_162] : memref<128x512xbf16, #tpu.memory_space<vmem>>, vector<128x128xbf16>
    %cst_163 = arith.constant dense<0.000000e+00> : vector<64x128xf32>
    %237 = tpu.matmul %217, %236, %cst_163 {dimension_numbers = #tpu.dot_dimension_numbers<[1], [0], [0], [1], [0, 0, 1, 1], [], []>} : vector<64x128xbf16>, vector<128x128xbf16>, vector<64x128xf32> -> vector<64x128xf32>
    %c0_i32_164 = arith.constant 0 : i32
    %c0_i32_165 = arith.constant 0 : i32
    %238 = tpu.memref_slice %arg9[%c4_i32, %c0_i32_164, %c0_i32_165] : memref<8x64x512xf32, #tpu.memory_space<vmem>> -> memref<1x64x512xf32, #tpu.memory_space<vmem>>
    %239 = tpu.memref_squeeze %238 : memref<1x64x512xf32, #tpu.memory_space<vmem>> -> memref<64x512xf32, #tpu.memory_space<vmem>>
    %c0_166 = arith.constant 0 : index
    %c256_167 = arith.constant 256 : index
    %240 = vector.load %239[%c0_166, %c256_167] : memref<64x512xf32, #tpu.memory_space<vmem>>, vector<64x128xf32>
    %241 = arith.addf %237, %240 : vector<64x128xf32>
    %242 = arith.negf %241 : vector<64x128xf32>
    %243 = math.exp %242 : vector<64x128xf32>
    %cst_168 = arith.constant 1.000000e+00 : f32
    %244 = vector.broadcast %cst_168 : f32 to vector<64x128xf32>
    %245 = arith.addf %244, %243 : vector<64x128xf32>
    %246 = arith.divf %244, %245 : vector<64x128xf32>
    %c0_169 = arith.constant 0 : index
    %c384_170 = arith.constant 384 : index
    %247 = vector.load %arg7[%c0_169, %c384_170] : memref<128x512xbf16, #tpu.memory_space<vmem>>, vector<128x128xbf16>
    %cst_171 = arith.constant dense<0.000000e+00> : vector<64x128xf32>
    %248 = tpu.matmul %217, %247, %cst_171 {dimension_numbers = #tpu.dot_dimension_numbers<[1], [0], [0], [1], [0, 0, 1, 1], [], []>} : vector<64x128xbf16>, vector<128x128xbf16>, vector<64x128xf32> -> vector<64x128xf32>
    %c0_i32_172 = arith.constant 0 : i32
    %c0_i32_173 = arith.constant 0 : i32
    %249 = tpu.memref_slice %arg9[%c4_i32, %c0_i32_172, %c0_i32_173] : memref<8x64x512xf32, #tpu.memory_space<vmem>> -> memref<1x64x512xf32, #tpu.memory_space<vmem>>
    %250 = tpu.memref_squeeze %249 : memref<1x64x512xf32, #tpu.memory_space<vmem>> -> memref<64x512xf32, #tpu.memory_space<vmem>>
    %c0_174 = arith.constant 0 : index
    %c384_175 = arith.constant 384 : index
    %251 = vector.load %250[%c0_174, %c384_175] : memref<64x512xf32, #tpu.memory_space<vmem>>, vector<64x128xf32>
    %252 = arith.addf %248, %251 : vector<64x128xf32>
    %253 = arith.negf %252 : vector<64x128xf32>
    %254 = math.exp %253 : vector<64x128xf32>
    %cst_176 = arith.constant 1.000000e+00 : f32
    %255 = vector.broadcast %cst_176 : f32 to vector<64x128xf32>
    %256 = arith.addf %255, %254 : vector<64x128xf32>
    %257 = arith.divf %255, %256 : vector<64x128xf32>
    %258 = arith.mulf %224, %235 : vector<64x128xf32>
    %259 = arith.mulf %210, %246 : vector<64x128xf32>
    %260 = arith.addf %258, %259 : vector<64x128xf32>
    %261 = math.tanh %260 : vector<64x128xf32>
    %262 = arith.mulf %261, %257 : vector<64x128xf32>
    %263 = arith.index_cast %c4_i32 : i32 to index
    %c0_177 = arith.constant 0 : index
    %c0_178 = arith.constant 0 : index
    %264 = vector.load %arg6[%263, %c0_177, %c0_178] : memref<8x64x128xf32, #tpu.memory_space<vmem>>, vector<1x64x128xf32>
    %265 = vector.shape_cast %264 : vector<1x64x128xf32> to vector<64x128xf32>
    %266 = vector.shape_cast %262 : vector<64x128xf32> to vector<1x64x128xf32>
    tpu.vector_store %arg6[%263, %c0_177, %c0_178], %266 {strides = array<i32>} : memref<8x64x128xf32, #tpu.memory_space<vmem>>, vector<1x64x128xf32>,
    %c5_i32 = arith.constant 5 : i32
    %267 = arith.truncf %262 : vector<64x128xf32> to vector<64x128xbf16>
    %c0_179 = arith.constant 0 : index
    %c0_180 = arith.constant 0 : index
    %268 = vector.load %arg7[%c0_179, %c0_180] : memref<128x512xbf16, #tpu.memory_space<vmem>>, vector<128x128xbf16>
    %cst_181 = arith.constant dense<0.000000e+00> : vector<64x128xf32>
    %269 = tpu.matmul %267, %268, %cst_181 {dimension_numbers = #tpu.dot_dimension_numbers<[1], [0], [0], [1], [0, 0, 1, 1], [], []>} : vector<64x128xbf16>, vector<128x128xbf16>, vector<64x128xf32> -> vector<64x128xf32>
    %c0_i32_182 = arith.constant 0 : i32
    %c0_i32_183 = arith.constant 0 : i32
    %270 = tpu.memref_slice %arg9[%c5_i32, %c0_i32_182, %c0_i32_183] : memref<8x64x512xf32, #tpu.memory_space<vmem>> -> memref<1x64x512xf32, #tpu.memory_space<vmem>>
    %271 = tpu.memref_squeeze %270 : memref<1x64x512xf32, #tpu.memory_space<vmem>> -> memref<64x512xf32, #tpu.memory_space<vmem>>
    %c0_184 = arith.constant 0 : index
    %c0_185 = arith.constant 0 : index
    %272 = vector.load %271[%c0_184, %c0_185] : memref<64x512xf32, #tpu.memory_space<vmem>>, vector<64x128xf32>
    %273 = arith.addf %269, %272 : vector<64x128xf32>
    %274 = math.tanh %273 : vector<64x128xf32>
    %c0_186 = arith.constant 0 : index
    %c128_187 = arith.constant 128 : index
    %275 = vector.load %arg7[%c0_186, %c128_187] : memref<128x512xbf16, #tpu.memory_space<vmem>>, vector<128x128xbf16>
    %cst_188 = arith.constant dense<0.000000e+00> : vector<64x128xf32>
    %276 = tpu.matmul %267, %275, %cst_188 {dimension_numbers = #tpu.dot_dimension_numbers<[1], [0], [0], [1], [0, 0, 1, 1], [], []>} : vector<64x128xbf16>, vector<128x128xbf16>, vector<64x128xf32> -> vector<64x128xf32>
    %c0_i32_189 = arith.constant 0 : i32
    %c0_i32_190 = arith.constant 0 : i32
    %277 = tpu.memref_slice %arg9[%c5_i32, %c0_i32_189, %c0_i32_190] : memref<8x64x512xf32, #tpu.memory_space<vmem>> -> memref<1x64x512xf32, #tpu.memory_space<vmem>>
    %278 = tpu.memref_squeeze %277 : memref<1x64x512xf32, #tpu.memory_space<vmem>> -> memref<64x512xf32, #tpu.memory_space<vmem>>
    %c0_191 = arith.constant 0 : index
    %c128_192 = arith.constant 128 : index
    %279 = vector.load %278[%c0_191, %c128_192] : memref<64x512xf32, #tpu.memory_space<vmem>>, vector<64x128xf32>
    %280 = arith.addf %276, %279 : vector<64x128xf32>
    %281 = arith.negf %280 : vector<64x128xf32>
    %282 = math.exp %281 : vector<64x128xf32>
    %cst_193 = arith.constant 1.000000e+00 : f32
    %283 = vector.broadcast %cst_193 : f32 to vector<64x128xf32>
    %284 = arith.addf %283, %282 : vector<64x128xf32>
    %285 = arith.divf %283, %284 : vector<64x128xf32>
    %c0_194 = arith.constant 0 : index
    %c256_195 = arith.constant 256 : index
    %286 = vector.load %arg7[%c0_194, %c256_195] : memref<128x512xbf16, #tpu.memory_space<vmem>>, vector<128x128xbf16>
    %cst_196 = arith.constant dense<0.000000e+00> : vector<64x128xf32>
    %287 = tpu.matmul %267, %286, %cst_196 {dimension_numbers = #tpu.dot_dimension_numbers<[1], [0], [0], [1], [0, 0, 1, 1], [], []>} : vector<64x128xbf16>, vector<128x128xbf16>, vector<64x128xf32> -> vector<64x128xf32>
    %c0_i32_197 = arith.constant 0 : i32
    %c0_i32_198 = arith.constant 0 : i32
    %288 = tpu.memref_slice %arg9[%c5_i32, %c0_i32_197, %c0_i32_198] : memref<8x64x512xf32, #tpu.memory_space<vmem>> -> memref<1x64x512xf32, #tpu.memory_space<vmem>>
    %289 = tpu.memref_squeeze %288 : memref<1x64x512xf32, #tpu.memory_space<vmem>> -> memref<64x512xf32, #tpu.memory_space<vmem>>
    %c0_199 = arith.constant 0 : index
    %c256_200 = arith.constant 256 : index
    %290 = vector.load %289[%c0_199, %c256_200] : memref<64x512xf32, #tpu.memory_space<vmem>>, vector<64x128xf32>
    %291 = arith.addf %287, %290 : vector<64x128xf32>
    %292 = arith.negf %291 : vector<64x128xf32>
    %293 = math.exp %292 : vector<64x128xf32>
    %cst_201 = arith.constant 1.000000e+00 : f32
    %294 = vector.broadcast %cst_201 : f32 to vector<64x128xf32>
    %295 = arith.addf %294, %293 : vector<64x128xf32>
    %296 = arith.divf %294, %295 : vector<64x128xf32>
    %c0_202 = arith.constant 0 : index
    %c384_203 = arith.constant 384 : index
    %297 = vector.load %arg7[%c0_202, %c384_203] : memref<128x512xbf16, #tpu.memory_space<vmem>>, vector<128x128xbf16>
    %cst_204 = arith.constant dense<0.000000e+00> : vector<64x128xf32>
    %298 = tpu.matmul %267, %297, %cst_204 {dimension_numbers = #tpu.dot_dimension_numbers<[1], [0], [0], [1], [0, 0, 1, 1], [], []>} : vector<64x128xbf16>, vector<128x128xbf16>, vector<64x128xf32> -> vector<64x128xf32>
    %c0_i32_205 = arith.constant 0 : i32
    %c0_i32_206 = arith.constant 0 : i32
    %299 = tpu.memref_slice %arg9[%c5_i32, %c0_i32_205, %c0_i32_206] : memref<8x64x512xf32, #tpu.memory_space<vmem>> -> memref<1x64x512xf32, #tpu.memory_space<vmem>>
    %300 = tpu.memref_squeeze %299 : memref<1x64x512xf32, #tpu.memory_space<vmem>> -> memref<64x512xf32, #tpu.memory_space<vmem>>
    %c0_207 = arith.constant 0 : index
    %c384_208 = arith.constant 384 : index
    %301 = vector.load %300[%c0_207, %c384_208] : memref<64x512xf32, #tpu.memory_space<vmem>>, vector<64x128xf32>
    %302 = arith.addf %298, %301 : vector<64x128xf32>
    %303 = arith.negf %302 : vector<64x128xf32>
    %304 = math.exp %303 : vector<64x128xf32>
    %cst_209 = arith.constant 1.000000e+00 : f32
    %305 = vector.broadcast %cst_209 : f32 to vector<64x128xf32>
    %306 = arith.addf %305, %304 : vector<64x128xf32>
    %307 = arith.divf %305, %306 : vector<64x128xf32>
    %308 = arith.mulf %274, %285 : vector<64x128xf32>
    %309 = arith.mulf %260, %296 : vector<64x128xf32>
    %310 = arith.addf %308, %309 : vector<64x128xf32>
    %311 = math.tanh %310 : vector<64x128xf32>
    %312 = arith.mulf %311, %307 : vector<64x128xf32>
    %313 = arith.index_cast %c5_i32 : i32 to index
    %c0_210 = arith.constant 0 : index
    %c0_211 = arith.constant 0 : index
    %314 = vector.load %arg6[%313, %c0_210, %c0_211] : memref<8x64x128xf32, #tpu.memory_space<vmem>>, vector<1x64x128xf32>
    %315 = vector.shape_cast %314 : vector<1x64x128xf32> to vector<64x128xf32>
    %316 = vector.shape_cast %312 : vector<64x128xf32> to vector<1x64x128xf32>
    tpu.vector_store %arg6[%313, %c0_210, %c0_211], %316 {strides = array<i32>} : memref<8x64x128xf32, #tpu.memory_space<vmem>>, vector<1x64x128xf32>,
    %c6_i32 = arith.constant 6 : i32
    %317 = arith.truncf %312 : vector<64x128xf32> to vector<64x128xbf16>
    %c0_212 = arith.constant 0 : index
    %c0_213 = arith.constant 0 : index
    %318 = vector.load %arg7[%c0_212, %c0_213] : memref<128x512xbf16, #tpu.memory_space<vmem>>, vector<128x128xbf16>
    %cst_214 = arith.constant dense<0.000000e+00> : vector<64x128xf32>
    %319 = tpu.matmul %317, %318, %cst_214 {dimension_numbers = #tpu.dot_dimension_numbers<[1], [0], [0], [1], [0, 0, 1, 1], [], []>} : vector<64x128xbf16>, vector<128x128xbf16>, vector<64x128xf32> -> vector<64x128xf32>
    %c0_i32_215 = arith.constant 0 : i32
    %c0_i32_216 = arith.constant 0 : i32
    %320 = tpu.memref_slice %arg9[%c6_i32, %c0_i32_215, %c0_i32_216] : memref<8x64x512xf32, #tpu.memory_space<vmem>> -> memref<1x64x512xf32, #tpu.memory_space<vmem>>
    %321 = tpu.memref_squeeze %320 : memref<1x64x512xf32, #tpu.memory_space<vmem>> -> memref<64x512xf32, #tpu.memory_space<vmem>>
    %c0_217 = arith.constant 0 : index
    %c0_218 = arith.constant 0 : index
    %322 = vector.load %321[%c0_217, %c0_218] : memref<64x512xf32, #tpu.memory_space<vmem>>, vector<64x128xf32>
    %323 = arith.addf %319, %322 : vector<64x128xf32>
    %324 = math.tanh %323 : vector<64x128xf32>
    %c0_219 = arith.constant 0 : index
    %c128_220 = arith.constant 128 : index
    %325 = vector.load %arg7[%c0_219, %c128_220] : memref<128x512xbf16, #tpu.memory_space<vmem>>, vector<128x128xbf16>
    %cst_221 = arith.constant dense<0.000000e+00> : vector<64x128xf32>
    %326 = tpu.matmul %317, %325, %cst_221 {dimension_numbers = #tpu.dot_dimension_numbers<[1], [0], [0], [1], [0, 0, 1, 1], [], []>} : vector<64x128xbf16>, vector<128x128xbf16>, vector<64x128xf32> -> vector<64x128xf32>
    %c0_i32_222 = arith.constant 0 : i32
    %c0_i32_223 = arith.constant 0 : i32
    %327 = tpu.memref_slice %arg9[%c6_i32, %c0_i32_222, %c0_i32_223] : memref<8x64x512xf32, #tpu.memory_space<vmem>> -> memref<1x64x512xf32, #tpu.memory_space<vmem>>
    %328 = tpu.memref_squeeze %327 : memref<1x64x512xf32, #tpu.memory_space<vmem>> -> memref<64x512xf32, #tpu.memory_space<vmem>>
    %c0_224 = arith.constant 0 : index
    %c128_225 = arith.constant 128 : index
    %329 = vector.load %328[%c0_224, %c128_225] : memref<64x512xf32, #tpu.memory_space<vmem>>, vector<64x128xf32>
    %330 = arith.addf %326, %329 : vector<64x128xf32>
    %331 = arith.negf %330 : vector<64x128xf32>
    %332 = math.exp %331 : vector<64x128xf32>
    %cst_226 = arith.constant 1.000000e+00 : f32
    %333 = vector.broadcast %cst_226 : f32 to vector<64x128xf32>
    %334 = arith.addf %333, %332 : vector<64x128xf32>
    %335 = arith.divf %333, %334 : vector<64x128xf32>
    %c0_227 = arith.constant 0 : index
    %c256_228 = arith.constant 256 : index
    %336 = vector.load %arg7[%c0_227, %c256_228] : memref<128x512xbf16, #tpu.memory_space<vmem>>, vector<128x128xbf16>
    %cst_229 = arith.constant dense<0.000000e+00> : vector<64x128xf32>
    %337 = tpu.matmul %317, %336, %cst_229 {dimension_numbers = #tpu.dot_dimension_numbers<[1], [0], [0], [1], [0, 0, 1, 1], [], []>} : vector<64x128xbf16>, vector<128x128xbf16>, vector<64x128xf32> -> vector<64x128xf32>
    %c0_i32_230 = arith.constant 0 : i32
    %c0_i32_231 = arith.constant 0 : i32
    %338 = tpu.memref_slice %arg9[%c6_i32, %c0_i32_230, %c0_i32_231] : memref<8x64x512xf32, #tpu.memory_space<vmem>> -> memref<1x64x512xf32, #tpu.memory_space<vmem>>
    %339 = tpu.memref_squeeze %338 : memref<1x64x512xf32, #tpu.memory_space<vmem>> -> memref<64x512xf32, #tpu.memory_space<vmem>>
    %c0_232 = arith.constant 0 : index
    %c256_233 = arith.constant 256 : index
    %340 = vector.load %339[%c0_232, %c256_233] : memref<64x512xf32, #tpu.memory_space<vmem>>, vector<64x128xf32>
    %341 = arith.addf %337, %340 : vector<64x128xf32>
    %342 = arith.negf %341 : vector<64x128xf32>
    %343 = math.exp %342 : vector<64x128xf32>
    %cst_234 = arith.constant 1.000000e+00 : f32
    %344 = vector.broadcast %cst_234 : f32 to vector<64x128xf32>
    %345 = arith.addf %344, %343 : vector<64x128xf32>
    %346 = arith.divf %344, %345 : vector<64x128xf32>
    %c0_235 = arith.constant 0 : index
    %c384_236 = arith.constant 384 : index
    %347 = vector.load %arg7[%c0_235, %c384_236] : memref<128x512xbf16, #tpu.memory_space<vmem>>, vector<128x128xbf16>
    %cst_237 = arith.constant dense<0.000000e+00> : vector<64x128xf32>
    %348 = tpu.matmul %317, %347, %cst_237 {dimension_numbers = #tpu.dot_dimension_numbers<[1], [0], [0], [1], [0, 0, 1, 1], [], []>} : vector<64x128xbf16>, vector<128x128xbf16>, vector<64x128xf32> -> vector<64x128xf32>
    %c0_i32_238 = arith.constant 0 : i32
    %c0_i32_239 = arith.constant 0 : i32
    %349 = tpu.memref_slice %arg9[%c6_i32, %c0_i32_238, %c0_i32_239] : memref<8x64x512xf32, #tpu.memory_space<vmem>> -> memref<1x64x512xf32, #tpu.memory_space<vmem>>
    %350 = tpu.memref_squeeze %349 : memref<1x64x512xf32, #tpu.memory_space<vmem>> -> memref<64x512xf32, #tpu.memory_space<vmem>>
    %c0_240 = arith.constant 0 : index
    %c384_241 = arith.constant 384 : index
    %351 = vector.load %350[%c0_240, %c384_241] : memref<64x512xf32, #tpu.memory_space<vmem>>, vector<64x128xf32>
    %352 = arith.addf %348, %351 : vector<64x128xf32>
    %353 = arith.negf %352 : vector<64x128xf32>
    %354 = math.exp %353 : vector<64x128xf32>
    %cst_242 = arith.constant 1.000000e+00 : f32
    %355 = vector.broadcast %cst_242 : f32 to vector<64x128xf32>
    %356 = arith.addf %355, %354 : vector<64x128xf32>
    %357 = arith.divf %355, %356 : vector<64x128xf32>
    %358 = arith.mulf %324, %335 : vector<64x128xf32>
    %359 = arith.mulf %310, %346 : vector<64x128xf32>
    %360 = arith.addf %358, %359 : vector<64x128xf32>
    %361 = math.tanh %360 : vector<64x128xf32>
    %362 = arith.mulf %361, %357 : vector<64x128xf32>
    %363 = arith.index_cast %c6_i32 : i32 to index
    %c0_243 = arith.constant 0 : index
    %c0_244 = arith.constant 0 : index
    %364 = vector.load %arg6[%363, %c0_243, %c0_244] : memref<8x64x128xf32, #tpu.memory_space<vmem>>, vector<1x64x128xf32>
    %365 = vector.shape_cast %364 : vector<1x64x128xf32> to vector<64x128xf32>
    %366 = vector.shape_cast %362 : vector<64x128xf32> to vector<1x64x128xf32>
    tpu.vector_store %arg6[%363, %c0_243, %c0_244], %366 {strides = array<i32>} : memref<8x64x128xf32, #tpu.memory_space<vmem>>, vector<1x64x128xf32>,
    %c7_i32 = arith.constant 7 : i32
    %367 = arith.truncf %362 : vector<64x128xf32> to vector<64x128xbf16>
    %c0_245 = arith.constant 0 : index
    %c0_246 = arith.constant 0 : index
    %368 = vector.load %arg7[%c0_245, %c0_246] : memref<128x512xbf16, #tpu.memory_space<vmem>>, vector<128x128xbf16>
    %cst_247 = arith.constant dense<0.000000e+00> : vector<64x128xf32>
    %369 = tpu.matmul %367, %368, %cst_247 {dimension_numbers = #tpu.dot_dimension_numbers<[1], [0], [0], [1], [0, 0, 1, 1], [], []>} : vector<64x128xbf16>, vector<128x128xbf16>, vector<64x128xf32> -> vector<64x128xf32>
    %c0_i32_248 = arith.constant 0 : i32
    %c0_i32_249 = arith.constant 0 : i32
    %370 = tpu.memref_slice %arg9[%c7_i32, %c0_i32_248, %c0_i32_249] : memref<8x64x512xf32, #tpu.memory_space<vmem>> -> memref<1x64x512xf32, #tpu.memory_space<vmem>>
    %371 = tpu.memref_squeeze %370 : memref<1x64x512xf32, #tpu.memory_space<vmem>> -> memref<64x512xf32, #tpu.memory_space<vmem>>
    %c0_250 = arith.constant 0 : index
    %c0_251 = arith.constant 0 : index
    %372 = vector.load %371[%c0_250, %c0_251] : memref<64x512xf32, #tpu.memory_space<vmem>>, vector<64x128xf32>
    %373 = arith.addf %369, %372 : vector<64x128xf32>
    %374 = math.tanh %373 : vector<64x128xf32>
    %c0_252 = arith.constant 0 : index
    %c128_253 = arith.constant 128 : index
    %375 = vector.load %arg7[%c0_252, %c128_253] : memref<128x512xbf16, #tpu.memory_space<vmem>>, vector<128x128xbf16>
    %cst_254 = arith.constant dense<0.000000e+00> : vector<64x128xf32>
    %376 = tpu.matmul %367, %375, %cst_254 {dimension_numbers = #tpu.dot_dimension_numbers<[1], [0], [0], [1], [0, 0, 1, 1], [], []>} : vector<64x128xbf16>, vector<128x128xbf16>, vector<64x128xf32> -> vector<64x128xf32>
    %c0_i32_255 = arith.constant 0 : i32
    %c0_i32_256 = arith.constant 0 : i32
    %377 = tpu.memref_slice %arg9[%c7_i32, %c0_i32_255, %c0_i32_256] : memref<8x64x512xf32, #tpu.memory_space<vmem>> -> memref<1x64x512xf32, #tpu.memory_space<vmem>>
    %378 = tpu.memref_squeeze %377 : memref<1x64x512xf32, #tpu.memory_space<vmem>> -> memref<64x512xf32, #tpu.memory_space<vmem>>
    %c0_257 = arith.constant 0 : index
    %c128_258 = arith.constant 128 : index
    %379 = vector.load %378[%c0_257, %c128_258] : memref<64x512xf32, #tpu.memory_space<vmem>>, vector<64x128xf32>
    %380 = arith.addf %376, %379 : vector<64x128xf32>
    %381 = arith.negf %380 : vector<64x128xf32>
    %382 = math.exp %381 : vector<64x128xf32>
    %cst_259 = arith.constant 1.000000e+00 : f32
    %383 = vector.broadcast %cst_259 : f32 to vector<64x128xf32>
    %384 = arith.addf %383, %382 : vector<64x128xf32>
    %385 = arith.divf %383, %384 : vector<64x128xf32>
    %c0_260 = arith.constant 0 : index
    %c256_261 = arith.constant 256 : index
    %386 = vector.load %arg7[%c0_260, %c256_261] : memref<128x512xbf16, #tpu.memory_space<vmem>>, vector<128x128xbf16>
    %cst_262 = arith.constant dense<0.000000e+00> : vector<64x128xf32>
    %387 = tpu.matmul %367, %386, %cst_262 {dimension_numbers = #tpu.dot_dimension_numbers<[1], [0], [0], [1], [0, 0, 1, 1], [], []>} : vector<64x128xbf16>, vector<128x128xbf16>, vector<64x128xf32> -> vector<64x128xf32>
    %c0_i32_263 = arith.constant 0 : i32
    %c0_i32_264 = arith.constant 0 : i32
    %388 = tpu.memref_slice %arg9[%c7_i32, %c0_i32_263, %c0_i32_264] : memref<8x64x512xf32, #tpu.memory_space<vmem>> -> memref<1x64x512xf32, #tpu.memory_space<vmem>>
    %389 = tpu.memref_squeeze %388 : memref<1x64x512xf32, #tpu.memory_space<vmem>> -> memref<64x512xf32, #tpu.memory_space<vmem>>
    %c0_265 = arith.constant 0 : index
    %c256_266 = arith.constant 256 : index
    %390 = vector.load %389[%c0_265, %c256_266] : memref<64x512xf32, #tpu.memory_space<vmem>>, vector<64x128xf32>
    %391 = arith.addf %387, %390 : vector<64x128xf32>
    %392 = arith.negf %391 : vector<64x128xf32>
    %393 = math.exp %392 : vector<64x128xf32>
    %cst_267 = arith.constant 1.000000e+00 : f32
    %394 = vector.broadcast %cst_267 : f32 to vector<64x128xf32>
    %395 = arith.addf %394, %393 : vector<64x128xf32>
    %396 = arith.divf %394, %395 : vector<64x128xf32>
    %c0_268 = arith.constant 0 : index
    %c384_269 = arith.constant 384 : index
    %397 = vector.load %arg7[%c0_268, %c384_269] : memref<128x512xbf16, #tpu.memory_space<vmem>>, vector<128x128xbf16>
    %cst_270 = arith.constant dense<0.000000e+00> : vector<64x128xf32>
    %398 = tpu.matmul %367, %397, %cst_270 {dimension_numbers = #tpu.dot_dimension_numbers<[1], [0], [0], [1], [0, 0, 1, 1], [], []>} : vector<64x128xbf16>, vector<128x128xbf16>, vector<64x128xf32> -> vector<64x128xf32>
    %c0_i32_271 = arith.constant 0 : i32
    %c0_i32_272 = arith.constant 0 : i32
    %399 = tpu.memref_slice %arg9[%c7_i32, %c0_i32_271, %c0_i32_272] : memref<8x64x512xf32, #tpu.memory_space<vmem>> -> memref<1x64x512xf32, #tpu.memory_space<vmem>>
    %400 = tpu.memref_squeeze %399 : memref<1x64x512xf32, #tpu.memory_space<vmem>> -> memref<64x512xf32, #tpu.memory_space<vmem>>
    %c0_273 = arith.constant 0 : index
    %c384_274 = arith.constant 384 : index
    %401 = vector.load %400[%c0_273, %c384_274] : memref<64x512xf32, #tpu.memory_space<vmem>>, vector<64x128xf32>
    %402 = arith.addf %398, %401 : vector<64x128xf32>
    %403 = arith.negf %402 : vector<64x128xf32>
    %404 = math.exp %403 : vector<64x128xf32>
    %cst_275 = arith.constant 1.000000e+00 : f32
    %405 = vector.broadcast %cst_275 : f32 to vector<64x128xf32>
    %406 = arith.addf %405, %404 : vector<64x128xf32>
    %407 = arith.divf %405, %406 : vector<64x128xf32>
    %408 = arith.mulf %374, %385 : vector<64x128xf32>
    %409 = arith.mulf %360, %396 : vector<64x128xf32>
    %410 = arith.addf %408, %409 : vector<64x128xf32>
    %411 = math.tanh %410 : vector<64x128xf32>
    %412 = arith.mulf %411, %407 : vector<64x128xf32>
    %413 = arith.index_cast %c7_i32 : i32 to index
    %c0_276 = arith.constant 0 : index
    %c0_277 = arith.constant 0 : index
    %414 = vector.load %arg6[%413, %c0_276, %c0_277] : memref<8x64x128xf32, #tpu.memory_space<vmem>>, vector<1x64x128xf32>
    %415 = vector.shape_cast %414 : vector<1x64x128xf32> to vector<64x128xf32>
    %416 = vector.shape_cast %412 : vector<64x128xf32> to vector<1x64x128xf32>
    tpu.vector_store %arg6[%413, %c0_276, %c0_277], %416 {strides = array<i32>} : memref<8x64x128xf32, #tpu.memory_space<vmem>>, vector<1x64x128xf32>,
    %c8_i32 = arith.constant 8 : i32
    %c0_278 = arith.constant 0 : index
    %c0_279 = arith.constant 0 : index
    %417 = vector.load %arg10[%c0_278, %c0_279] : memref<64x128xf32, #tpu.memory_space<vmem>>, vector<64x128xf32>
    tpu.vector_store %arg10[%c0_278, %c0_279], %412 {strides = array<i32>} : memref<64x128xf32, #tpu.memory_space<vmem>>, vector<64x128xf32>,
    %c0_280 = arith.constant 0 : index
    %c0_281 = arith.constant 0 : index
    %418 = vector.load %arg11[%c0_280, %c0_281] : memref<64x128xf32, #tpu.memory_space<vmem>>, vector<64x128xf32>
    tpu.vector_store %arg11[%c0_280, %c0_281], %410 {strides = array<i32>} : memref<64x128xf32, #tpu.memory_space<vmem>>, vector<64x128xf32>,
    return
  }
  func.func @transform_0(%arg0: i32, %arg1: i32) -> (i32, i32, i32) {
    %c0_i32 = arith.constant 0 : i32
    %c0_i32_0 = arith.constant 0 : i32
    return %arg1, %arg0, %c0_i32 : i32, i32, i32
  }
  func.func @transform_3(%arg0: i32, %arg1: i32) -> (i32, i32) {
    %c0_i32 = arith.constant 0 : i32
    %c0_i32_0 = arith.constant 0 : i32
    %c0_i32_1 = arith.constant 0 : i32
    return %c0_i32, %c0_i32_0 : i32, i32
  }
  func.func @transform_4(%arg0: i32, %arg1: i32) -> (i32, i32, i32) {
    %c0_i32 = arith.constant 0 : i32
    %c0_i32_0 = arith.constant 0 : i32
    return %arg1, %arg0, %c0_i32 : i32, i32, i32
  }
}

</mosaic_0001>

<bundles_post_ra>
// kernel: tpu_custom_call.1
= control target key start
LH: loop header
LB: loop body
LE: loop exit
PB: predicated region body
PF: predicated region fallthrough
CT: control target
= control target key end

     0   :  { %9 = vsyncpa [#allocation9], 0  ;;  %s12562_s0 = inlined_call_operand.hbm [shape: bf16[16,128,128], index: 0, kind: input, shape index: {}]   ;;  %s12563_s1 = inlined_call_operand.hbm [shape: bf16[128,512], index: 1, kind: input, shape index: {}]   ;;  %s12564_s2 = inlined_call_operand.hbm [shape: bf16[128,512], index: 2, kind: input, shape index: {}]   ;;  %s12565_s3 = inlined_call_operand.vmem [shape: f32[1,512], index: 3, kind: input, shape index: {}]   ;;  %s12566_s4 = inlined_call_operand.hbm [shape: f32[16,128,128], index: 4, kind: output, shape index: {}]  }
   0x1   :  { %11 = vsyncpa [#allocation9 + $0x1], 0 }
   0x2   :  { %12 = vsyncpa [#allocation10], 0 }
   0x3   :  { %14 = vsyncpa [#allocation10 + $0x1], 0  ;;  %s11275_s15 = smov 0   ;;  %s11277_s16 = smov 0  }
   0x4   :  { %s11279_s17 = smov 0   ;;  %s11281_s18 = smov 0  }
   0x5   :  { %s11283_s19 = smov 0   ;;  %s11285_s20 = smov 0  }
   0x6   :  { %s11287_s21 = smov 0   ;;  %s11289_s22 = smov 0  }
   0x7 LB: > { %12570 = sst [smem:[#allocation27_spill]] %s11228_s21  ;;  %s7904_s23 = sadd.s32 4294967295, %s11232_s22   ;;  %s11232_s22 = sphi %s11289_s22, %s20_s22   ;;  %s11228_s21 = sphi %s11287_s21, %s12579_s21   ;;  %s11224_s20 = sphi %s11285_s20, %s12584_s20   ;;  %s11220_s19 = sphi %s11283_s19, %s12577_s19   ;;  %s11216_s18 = sphi %s11281_s18, %s12583_s18   ;;  %s11212_s17 = sphi %s11279_s17, %s12582_s17   ;;  %s11208_s16 = sphi %s11277_s16, %s12581_s16   ;;  %s11204_s15 = sphi %s11275_s15, %s12580_s15  }
   0x8   : > { %s7905_s24 = sadd.s32 4294967294, %s11232_s22   ;;  %s29_s25 = sadd.s32 1, %s11224_s20 }
   0x9   : > { %p30_p0 = scmp.ge.s32.totalorder %s29_s25, 2  ;;  %s32_s26 = sadd.s32 1, %s11228_s21 }
   0xa   : > { %p48_p1 = scmp.ne.s32.totalorder %s11212_s17, %s11208_s16  ;;  %p49_p2 = scmp.eq.s32.totalorder %s11232_s22, 0 }
   0xb   : > { %s12586_s25 = smov (%p30_p0, %s29_s25), 0  ;;  %s12588_s26 = smov (!%p30_p0, %s32_s26), %s11228_s21 }
   0xc   : > { %12571 = sst [smem:[#allocation28_spill]] %s12586_s25  ;;  %s36_s27 = ssub.s32 %s11224_s20, %s12586_s25 }
   0xd   : > { %p11327_p3 = por %p49_p2, %p48_p1  ;;  %p34_p4 = scmp.ge.s32.totalorder %s12588_s26, 2 }
   0xe   : > { %p54_p5 = scmp.ne.s32.totalorder %s11208_s16, %s11204_s15  ;;  %p55_p6 = scmp.eq.s32.totalorder %s7904_s23, 0 }
   0xf   : > { %p101_p7 = scmp.eq.s32.totalorder %s7904_s23, 3  ;;  %s12590_s26 = smov (%p34_p4, %s12588_s26), 0 }
  0x10   : > { %12573 = sst [smem:[#allocation29_spill]] %s12590_s26  ;;  %p11335_p8 = por %p55_p6, %p54_p5 }
  0x11   : > { %p11339_p9 = por %p101_p7, %p48_p1  ;;  %s37_s5 = ssub.s32 %s11228_s21, %s12590_s26 }
  0x12   : > { %p107_p10 = scmp.eq.s32.totalorder %s7905_s24, 3  ;;  %s38_s6 = sor.u32 %s37_s5, %s36_s27 }
  0x13   : > { %s41_s7 = sadd.s32 1, %s11212_s17  ;;  %p39_p11 = scmp.eq.s32.totalorder %s38_s6, 0 }
  0x14   : > { %p11346_p12 = por %p107_p10, %p54_p5  ;;  %p7907_p13 = scmp.ge.s32.totalorder %s11232_s22, 4 }
  0x15   : > { %s11351_s9 = scalar_select %p39_p11, %s11212_s17, %s41_s7  }
  0x16   : > { %126 = sbr.rel (%p7907_p13) target bundleno = 43 (0x2b), region = 20 }
  0x1b   : > { %s130_s10 = sand.u32 1, %s11212_s17   ;;  %s7910_s11 = sshll.u32 %s11228_s21, 3 }
  0x1c   : > { %s7908_s12 = sshll.u32 %s130_s10, 8  ;;  %s8497_s13 = sshll.u32 %s11224_s20, 7 }
  0x1d   : > { %s141_s14 = sadd.s32 %s8497_s13, %s7910_s11  ;;  %s134_s23 = scalar_lea.vmem [#allocation8], %s7908_s12 }
  0x1e   : > { %s156_s24 = sshll.u32 %s134_s23, 4  ;;  %s7912_s27 = sshll.u32 %s141_s14, 6  ;;  %s157_s24 = int_to_ptr.vmem [resolvable:$true] %s156_s24 }
  0x1f   : > { %s9651_s5 = scalar_select %p11327_p3, [#allocation0], [#allocation22] }
  0x20   : > { %s11234_s6 = smov 1024   ;;  %s11235_s26 = smov 512  }
  0x21   : > { %9652 = sst [smem:[#allocation13]] (%p11327_p3), %s11234_s6  ;;  %s11236_s25 = smov 8  }
  0x22   : > { %s148_s7 = sld [smem:[%s9651_s5]]   ;;  %s11237_s11 = smov 64  }
  0x23   : > { %9653 = sst [smem:[#allocation13 + $0x1]] (%p11327_p3), %s11235_s26  ;;  %s143_s14 = scalar_lea.hbm %s12562_s0, %s7912_s27 }
  0x24   : > { %9654 = sst [smem:[#allocation13 + $0x2]] (%p11327_p3), %s11236_s25  ;;  %s11238_s23 = smov 4  }
  0x25   : > { %9655 = sst [smem:[#allocation13 + $0x3]] (%p11327_p3), %s11237_s11  ;;  %s131_s21 = scalar_lea.sflag [#allocation9], %s130_s10 }
  0x26   : > { %9656 = sst [smem:[#allocation13 + $0x4]] (%p11327_p3), %s11237_s11  ;;  %s11239_s26 = smov 131072  }
  0x27   : > { %9657 = sst [smem:[#allocation13 + $0x5]] (%p11327_p3), %s11238_s23 }
  0x28   : > { %s7913_s5 = sshll.u32 %s148_s7, 26 }
  0x29   : > { %s7914_s6 = sadd.s32 134217728, %s7913_s5 }
  0x2a   : > { %9658 = dma.general (%p11327_p3), %s143_s14, 4096, %s157_s24, %s131_s21, %s11239_s26, [#allocation13], %s7914_s6, 0  }
  0x2b PF: > { %p7915_p0 = scmp.ge.s32.totalorder %s11232_s22, 1  ;;  %p177_p1 = scmp.lt.s32.totalorder %s11232_s22, 5 }
  0x2d   : > { %p178_p2 = pnand %p7915_p0, %p177_p1 }
  0x2e   : > { %s11379_s25 = sand.u32 (!%p178_p2), 1, %s11208_s16  }
  0x2f   : > { %181 = sbr.rel (%p178_p2) target bundleno = 2928 (0xb70), region = 28  ;;  %s7916_s27 = sshll.u32 (!%p178_p2), %s11379_s25, 8 }
  0x30   : > { %s184_s7 = scalar_lea.sflag (!%p178_p2), [#allocation9], %s11379_s25  ;;  %s11383_s11 = scalar_lea.vmem (!%p178_p2), [#allocation8], %s7916_s27 }
  0x34   : > { %11189 = dma.done.wait (%p11335_p8), %s184_s7, 4096  }
  0x35   : > { %11191 = vsyncadd (%p11335_p8), %s184_s7, 4294963200  ;;  %s7917_s21 = sshll.u32 %s11379_s25, 9  ;;  %p7918_p3 = scmp.ne.s32.totalorder %s11216_s18, 0 }
  0x36   : > { %s11390_s28 = scalar_lea.vmem [#allocation11], %s7917_s21  ;;  %s11240_s10 = smov (!%p7918_p3), [#allocation2]  }
  0x37   : > { %216 = sbr.rel (%p7918_p3) target bundleno = 82 (0x52), region = 36  ;;  %s224_s24 = sshll.u32 (!%p7918_p3), %s11240_s10, 4  ;;  %s225_s24 = int_to_ptr.vmem [resolvable:$true] %s224_s24 }
  0x38   : > { %s11241_s12 = smov (!%p7918_p3), [#allocation3]   ;;  %s11124_s29 = scalar_lea.vmem (!%p7918_p3), %s225_s24, 4096 }
  0x39   : > { %s236_s13 = sshll.u32 (!%p7918_p3), %s11241_s12, 4  ;;  %p11125_p4 = scmp.ne.s32.totalorder (!%p7918_p3), %s225_s24, %s11124_s29  ;;  %s237_s13 = int_to_ptr.vmem [resolvable:$true] %s236_s13 }
  0x3a   : > { %p11129_p5 = scmp.lt.s32.totalorder (!%p7918_p3), %s225_s24, %s225_s24  ;;  %p11130_p6 = scmp.lt.s32.totalorder (!%p7918_p3), %s11124_s29, %s11124_s29 }
  0x3c   : > { %v11242_v0 = vmov 0.0   ;;  %p11131_p7 = por %p11130_p6, %p11129_p5 }
  0x3d   : > { %240 = vst [vmem:[#allocation5 + $0x8] sm:$0xff] %v11242_v0  ;;  %241 = vst [vmem:[#allocation5 + $0x30] sm:$0xff] %v11242_v0 }
  0x3e   : > { %242 = vst [vmem:[#allocation5 + $0x28] sm:$0xff] %v11242_v0  ;;  %243 = vst [vmem:[#allocation5 + $0x18] sm:$0xff] %v11242_v0  ;;  %p11132_p8 = pnand %p11131_p7, %p11125_p4 }
  0x3f   : > { %244 = vst [vmem:[#allocation5 + $0x20] sm:$0xff] %v11242_v0  ;;  %245 = vst [vmem:[#allocation5] sm:$0xff] %v11242_v0 }
  0x40   : > { %246 = vst [vmem:[#allocation5 + $0x38] sm:$0xff] %v11242_v0  ;;  %247 = vst [vmem:[#allocation5 + $0x10] sm:$0xff] %v11242_v0 }
  0x41   : > { %248 = vst [vmem:[#allocation6 + $0x18] sm:$0xff] %v11242_v0  ;;  %249 = vst [vmem:[#allocation6 + $0x30] sm:$0xff] %v11242_v0 }
  0x42   : > { %250 = vst [vmem:[#allocation6 + $0x28] sm:$0xff] %v11242_v0  ;;  %251 = vst [vmem:[#allocation6 + $0x8] sm:$0xff] %v11242_v0 }
  0x43   : > { %252 = vst [vmem:[#allocation6 + $0x38] sm:$0xff] %v11242_v0  ;;  %253 = vst [vmem:[#allocation6 + $0x10] sm:$0xff] %v11242_v0 }
  0x44   : > { %254 = vst [vmem:[#allocation6] sm:$0xff] %v11242_v0  ;;  %255 = vst [vmem:[#allocation6 + $0x20] sm:$0xff] %v11242_v0 }
  0x45   : > { %11135 = shalt.err (!%p11132_p8)  }
  0x46   : > { %227 = dma.hbm_to_vmem [thread:$0]  %s12563_s1, 4096, %s225_s24, [#allocation7] }
  0x47   : > { %s11144_s5 = scalar_lea.vmem %s237_s13, 4096  ;;  %p11149_p11 = scmp.lt.s32.totalorder %s237_s13, %s237_s13 }
  0x48   : > { %p11145_p10 = scmp.ne.s32.totalorder %s237_s13, %s11144_s5  ;;  %p11150_p13 = scmp.lt.s32.totalorder %s11144_s5, %s11144_s5 }
  0x4a   : > { %p11151_p0 = por %p11150_p13, %p11149_p11 }
  0x4c   : > { %p11152_p1 = pnand %p11151_p0, %p11145_p10 }
  0x4e   : > { %11155 = shalt.err (!%p11152_p1)  }
  0x4f   : > { %239 = dma.hbm_to_vmem [thread:$0]  %s12564_s2, 4096, %s237_s13, [#allocation7 + $0x1] }
  0x50   : > { %11192 = dma.done.wait [#allocation7 + $0x1], 4096 }
  0x51   : > { %11193 = vsyncadd [#allocation7 + $0x1], 4294963200 }
  0x52 PF: > { %v9756_v1 = vld [vmem:[#allocation3 + $0xe4] ss:$16 sps:$4 sm:$0xff]   ;;  %v9758_v2 = vld [vmem:[#allocation3 + $0xec] ss:$16 sps:$4 sm:$0xff]   ;;  %v11243_v3 = vmov 0   ;;  %v358_v57 = vlaneseq  ;;  %p9674_p2 = scmp.eq.s32.totalorder %s11216_s18, 0 }
  0x53   : > { %762 = vmatprep.mubr.bf16.mxu0 %v11243_v3  ;;  %1115 = vmatprep.mubr.bf16.mxu1 %v11243_v3  ;;  %v9760_v4 = vld [vmem:[#allocation3 + $0xe0] ss:$16 sps:$4 sm:$0xff]   ;;  %v9761_v5 = vld [vmem:[#allocation3 + $0xe8] ss:$16 sps:$4 sm:$0xff]   ;;  %v9762_v6 = vld [vmem:[#allocation3 + $0xc4] ss:$16 sps:$4 sm:$0xff]  }
  0x54   : > { %730 = vmatprep.subr.bf16.mxu0 %v9756_v1  ;;  %1083 = vmatprep.subr.bf16.mxu1 %v9758_v2  ;;  %v9764_v7 = vld [vmem:[#allocation3 + $0xcc] ss:$16 sps:$4 sm:$0xff]   ;;  %v9766_v8 = vld [vmem:[#allocation3 + $0xc0] ss:$16 sps:$4 sm:$0xff]   ;;  %v9767_v9 = vld [vmem:[#allocation3 + $0xc8] ss:$16 sps:$4 sm:$0xff]  }
  0x55   : > { %731 = vmatpush1.bf16.msra.mxu0 %v9760_v4  ;;  %1084 = vmatpush1.bf16.msra.mxu1 %v9761_v5  ;;  %v9768_v10 = vld [vmem:[#allocation3 + $0xa4] ss:$16 sps:$4 sm:$0xff]   ;;  %v9770_v11 = vld [vmem:[#allocation3 + $0xac] ss:$16 sps:$4 sm:$0xff]   ;;  %v9772_v12 = vld [vmem:[#allocation3 + $0xa0] ss:$16 sps:$4 sm:$0xff]  }
  0x56   : > { %732 = vmatprep.subr.bf16.mxu0 %v9762_v6  ;;  %1085 = vmatprep.subr.bf16.mxu1 %v9764_v7  ;;  %v9773_v13 = vld [vmem:[#allocation3 + $0xa8] ss:$16 sps:$4 sm:$0xff]   ;;  %v9774_v14 = vld [vmem:[#allocation3 + $0x84] ss:$16 sps:$4 sm:$0xff]   ;;  %v9776_v15 = vld [vmem:[#allocation3 + $0x8c] ss:$16 sps:$4 sm:$0xff]  }
  0x57   : > { %v9778_v16 = vld [vmem:[#allocation3 + $0x80] ss:$16 sps:$4 sm:$0xff]   ;;  %v9779_v17 = vld [vmem:[#allocation3 + $0x88] ss:$16 sps:$4 sm:$0xff]   ;;  %v9780_v18 = vld [vmem:[#allocation3 + $0x64] ss:$16 sps:$4 sm:$0xff]  }
  0x58   : > { %v9782_v19 = vld [vmem:[#allocation3 + $0x6c] ss:$16 sps:$4 sm:$0xff]   ;;  %v9784_v20 = vld [vmem:[#allocation3 + $0x60] ss:$16 sps:$4 sm:$0xff]   ;;  %v9785_v21 = vld [vmem:[#allocation3 + $0x68] ss:$16 sps:$4 sm:$0xff]  }
  0x59   : > { %733 = vmatpush1.bf16.msra.mxu0 %v9766_v8  ;;  %1086 = vmatpush1.bf16.msra.mxu1 %v9767_v9  ;;  %v9786_v22 = vld [vmem:[#allocation3 + $0x44] ss:$16 sps:$4 sm:$0xff]   ;;  %v9788_v23 = vld [vmem:[#allocation3 + $0x4c] ss:$16 sps:$4 sm:$0xff]   ;;  %v9790_v24 = vld [vmem:[#allocation3 + $0x40] ss:$16 sps:$4 sm:$0xff]  }
  0x5a   : > { %734 = vmatprep.subr.bf16.mxu0 %v9768_v10  ;;  %1087 = vmatprep.subr.bf16.mxu1 %v9770_v11  ;;  %v9791_v25 = vld [vmem:[#allocation3 + $0x48] ss:$16 sps:$4 sm:$0xff]   ;;  %v9792_v26 = vld [vmem:[#allocation3 + $0x24] ss:$16 sps:$4 sm:$0xff]   ;;  %v9794_v27 = vld [vmem:[#allocation3 + $0x2c] ss:$16 sps:$4 sm:$0xff]  }
  0x5b   : > { %v9796_v28 = vld [vmem:[#allocation3 + $0x20] ss:$16 sps:$4 sm:$0xff]   ;;  %v9797_v29 = vld [vmem:[#allocation3 + $0x28] ss:$16 sps:$4 sm:$0xff]   ;;  %v9798_v30 = vld [vmem:[#allocation3 + $0x4] ss:$16 sps:$4 sm:$0xff]  }
  0x5c   : > { %v9800_v31 = vld [vmem:[#allocation3 + $0xc] ss:$16 sps:$4 sm:$0xff]   ;;  %v9802_v32 = vld [vmem:[#allocation3] ss:$16 sps:$4 sm:$0xff]   ;;  %v9803_v33 = vld [vmem:[#allocation3 + $0x8] ss:$16 sps:$4 sm:$0xff]  }
  0x5d   : > { %735 = vmatpush1.bf16.msra.mxu0 %v9772_v12  ;;  %1088 = vmatpush1.bf16.msra.mxu1 %v9773_v13  ;;  %v9804_v34 = vld [vmem:[%s11383_s11] sm:$0xff]   ;;  %v9805_v35 = vld [vmem:[%s11383_s11 + $0x8] sm:$0xff]   ;;  %v9806_v36 = vld [vmem:[%s11383_s11 + $0x10] sm:$0xff]   ;;  %v359_v59 = vshrl.u32 %v358_v57, 7 }
  0x5e   : > { %736 = vmatprep.subr.bf16.mxu0 %v9774_v14  ;;  %1089 = vmatprep.subr.bf16.mxu1 %v9776_v15  ;;  %v9807_v37 = vld [vmem:[%s11383_s11 + $0x18] sm:$0xff]   ;;  %v9808_v38 = vld [vmem:[%s11383_s11 + $0x20] sm:$0xff]   ;;  %v9809_v39 = vld [vmem:[%s11383_s11 + $0x28] sm:$0xff]  }
  0x5f   : > { %v9810_v40 = vld [vmem:[%s11383_s11 + $0x30] sm:$0xff]   ;;  %v9811_v41 = vld [vmem:[%s11383_s11 + $0x38] sm:$0xff]   ;;  %v9812_v42 = vld [vmem:[%s11383_s11 + $0x40] sm:$0xff]   ;;  %v360_v60 = vsub.s32 0, %v359_v59  ;;  %v368_v61 = vsub.s32 2, %v359_v59  ;;  %v364_v63 = vsub.s32 1, %v359_v59 }
  0x60   : > { %v9813_v43 = vld [vmem:[%s11383_s11 + $0x48] sm:$0xff]   ;;  %v9814_v44 = vld [vmem:[%s11383_s11 + $0x50] sm:$0xff]   ;;  %v9815_v45 = vld [vmem:[%s11383_s11 + $0x58] sm:$0xff]   ;;  %v372_v0 = vsub.s32 3, %v359_v59 }
  0x61   : > { %737 = vmatpush1.bf16.msra.mxu0 %v9778_v16  ;;  %1090 = vmatpush1.bf16.msra.mxu1 %v9779_v17  ;;  %v9816_v46 = vld [vmem:[%s11383_s11 + $0x60] sm:$0xff]   ;;  %v9817_v47 = vld [vmem:[%s11383_s11 + $0x68] sm:$0xff]   ;;  %v9818_v48 = vld [vmem:[%s11383_s11 + $0x70] sm:$0xff]  }
  0x62   : > { %738 = vmatprep.subr.bf16.mxu0 %v9780_v18  ;;  %1091 = vmatprep.subr.bf16.mxu1 %v9782_v19  ;;  %v9819_v49 = vld [vmem:[%s11383_s11 + $0x78] sm:$0xff]   ;;  %v9820_v50 = vld [vmem:[%s11383_s11 + $0x80] sm:$0xff]   ;;  %v9821_v51 = vld [vmem:[%s11383_s11 + $0x88] sm:$0xff]  }
  0x63   : > { %v9822_v52 = vld [vmem:[%s11383_s11 + $0x90] sm:$0xff]   ;;  %v9823_v53 = vld [vmem:[%s11383_s11 + $0x98] sm:$0xff]   ;;  %v9824_v54 = vld [vmem:[%s11383_s11 + $0xa0] sm:$0xff]  }
  0x64   : > { %v9825_v55 = vld [vmem:[%s11383_s11 + $0xa8] sm:$0xff]   ;;  %v9826_v56 = vld [vmem:[%s11383_s11 + $0xb0] sm:$0xff]   ;;  %v9827_v58 = vld [vmem:[%s11383_s11 + $0xb8] sm:$0xff]  }
  0x65   : > { %739 = vmatpush1.bf16.msra.mxu0 %v9784_v20  ;;  %1092 = vmatpush1.bf16.msra.mxu1 %v9785_v21  ;;  %v356_v62 = vld [vmem:[%s12565_s3] sm:$0xf]  ;;  %v9829_v17 = vld [vmem:[%s11383_s11 + $0xc8] sm:$0xff]  }
  0x66   : > { %740 = vmatprep.subr.bf16.mxu0 %v9786_v22  ;;  %1093 = vmatprep.subr.bf16.mxu1 %v9788_v23  ;;  %v9828_v1 = vld [vmem:[%s11383_s11 + $0xc0] sm:$0xff]   ;;  %v11477_v2 = vrot.slane %v356_v62, %v360_v60  ;;  %v11479_v4 = vrot.slane %v356_v62, %v368_v61  ;;  %v11481_v5 = vrot.slane %v356_v62, %v364_v63 }
  0x67   : > { %v11483_v6 = vrot.slane %v356_v62, %v372_v0 }
  0x69   : > { %741 = vmatpush1.bf16.msra.mxu0 %v9790_v24  ;;  %1094 = vmatpush1.bf16.msra.mxu1 %v9791_v25 }
  0x6a   : > { %742 = vmatprep.subr.bf16.mxu0 %v9792_v26  ;;  %1095 = vmatprep.subr.bf16.mxu1 %v9794_v27 }
  0x6d   : > { %743 = vmatpush1.bf16.msra.mxu0 %v9796_v28  ;;  %1096 = vmatpush1.bf16.msra.mxu1 %v9797_v29 }
  0x6e   : > { %744 = vmatprep.subr.bf16.mxu0 %v9798_v30  ;;  %1097 = vmatprep.subr.bf16.mxu1 %v9800_v31 }
  0x71   : > { %745 = vmatpush1.bf16.msra.mxu0 %v9802_v32  ;;  %1098 = vmatpush1.bf16.msra.mxu1 %v9803_v33 }
  0x74   : > { %763 = vmatmul.mubr.bf16.vlgmr.msra.gmra.mxu0 %v9804_v34  ;;  %1116 = vmatmul.mubr.bf16.vlgmr.msra.gmra.mxu1 %v9804_v34  ;;  %v9830_v34 = vld [vmem:[%s11383_s11 + $0xd0] sm:$0xff]  }
  0x75   : > { %772 = vmatprep.mubr.bf16.mxu0 %v11243_v3  ;;  %1125 = vmatprep.mubr.bf16.mxu1 %v11243_v3 }
  0x7c   : > { %773 = vmatmul.mubr.bf16.gmra.mxu0 %v9805_v35  ;;  %1126 = vmatmul.mubr.bf16.gmra.mxu1 %v9805_v35 }
  0x7d   : > { %782 = vmatprep.mubr.bf16.mxu0 %v11243_v3  ;;  %1135 = vmatprep.mubr.bf16.mxu1 %v11243_v3 }
  0x84   : > { %783 = vmatmul.mubr.bf16.gmra.mxu0 %v9806_v36  ;;  %1136 = vmatmul.mubr.bf16.gmra.mxu1 %v9806_v36 }
  0x85   : > { %792 = vmatprep.mubr.bf16.mxu0 %v11243_v3  ;;  %1145 = vmatprep.mubr.bf16.mxu1 %v11243_v3 }
  0x8c   : > { %793 = vmatmul.mubr.bf16.gmra.mxu0 %v9807_v37  ;;  %1146 = vmatmul.mubr.bf16.gmra.mxu1 %v9807_v37 }
  0x8d   : > { %802 = vmatprep.mubr.bf16.mxu0 %v11243_v3  ;;  %1155 = vmatprep.mubr.bf16.mxu1 %v11243_v3 }
  0x94   : > { %803 = vmatmul.mubr.bf16.gmra.mxu0 %v9808_v38  ;;  %1156 = vmatmul.mubr.bf16.gmra.mxu1 %v9808_v38 }
  0x95   : > { %812 = vmatprep.mubr.bf16.mxu0 %v11243_v3  ;;  %1165 = vmatprep.mubr.bf16.mxu1 %v11243_v3 }
  0x9c   : > { %813 = vmatmul.mubr.bf16.gmra.mxu0 %v9809_v39  ;;  %1166 = vmatmul.mubr.bf16.gmra.mxu1 %v9809_v39 }
  0x9d   : > { %822 = vmatprep.mubr.bf16.mxu0 %v11243_v3  ;;  %1175 = vmatprep.mubr.bf16.mxu1 %v11243_v3 }
  0xa4   : > { %823 = vmatmul.mubr.bf16.gmra.mxu0 %v9810_v40  ;;  %1176 = vmatmul.mubr.bf16.gmra.mxu1 %v9810_v40 }
  0xa5   : > { %832 = vmatprep.mubr.bf16.mxu0 %v11243_v3  ;;  %1185 = vmatprep.mubr.bf16.mxu1 %v11243_v3 }
  0xac   : > { %833 = vmatmul.mubr.bf16.gmra.mxu0 %v9811_v41  ;;  %1186 = vmatmul.mubr.bf16.gmra.mxu1 %v9811_v41 }
  0xad   : > { %842 = vmatprep.mubr.bf16.mxu0 %v11243_v3  ;;  %1195 = vmatprep.mubr.bf16.mxu1 %v11243_v3 }
  0xb4   : > { %843 = vmatmul.mubr.bf16.gmra.mxu0 %v9812_v42  ;;  %1196 = vmatmul.mubr.bf16.gmra.mxu1 %v9812_v42 }
  0xb5   : > { %852 = vmatprep.mubr.bf16.mxu0 %v11243_v3  ;;  %1205 = vmatprep.mubr.bf16.mxu1 %v11243_v3 }
  0xbc   : > { %853 = vmatmul.mubr.bf16.gmra.mxu0 %v9813_v43  ;;  %1206 = vmatmul.mubr.bf16.gmra.mxu1 %v9813_v43 }
  0xbd   : > { %862 = vmatprep.mubr.bf16.mxu0 %v11243_v3  ;;  %1215 = vmatprep.mubr.bf16.mxu1 %v11243_v3 }
  0xc4   : > { %863 = vmatmul.mubr.bf16.gmra.mxu0 %v9814_v44  ;;  %1216 = vmatmul.mubr.bf16.gmra.mxu1 %v9814_v44 }
  0xc5   : > { %872 = vmatprep.mubr.bf16.mxu0 %v11243_v3  ;;  %1225 = vmatprep.mubr.bf16.mxu1 %v11243_v3 }
  0xcc   : > { %873 = vmatmul.mubr.bf16.gmra.mxu0 %v9815_v45  ;;  %1226 = vmatmul.mubr.bf16.gmra.mxu1 %v9815_v45 }
  0xcd   : > { %882 = vmatprep.mubr.bf16.mxu0 %v11243_v3  ;;  %1235 = vmatprep.mubr.bf16.mxu1 %v11243_v3 }
  0xd4   : > { %883 = vmatmul.mubr.bf16.gmra.mxu0 %v9816_v46  ;;  %1236 = vmatmul.mubr.bf16.gmra.mxu1 %v9816_v46 }
  0xd5   : > { %892 = vmatprep.mubr.bf16.mxu0 %v11243_v3  ;;  %1245 = vmatprep.mubr.bf16.mxu1 %v11243_v3 }
  0xdc   : > { %893 = vmatmul.mubr.bf16.gmra.mxu0 %v9817_v47  ;;  %1246 = vmatmul.mubr.bf16.gmra.mxu1 %v9817_v47 }
  0xdd   : > { %902 = vmatprep.mubr.bf16.mxu0 %v11243_v3  ;;  %1255 = vmatprep.mubr.bf16.mxu1 %v11243_v3 }
  0xe4   : > { %903 = vmatmul.mubr.bf16.gmra.mxu0 %v9818_v48  ;;  %1256 = vmatmul.mubr.bf16.gmra.mxu1 %v9818_v48 }
  0xe5   : > { %912 = vmatprep.mubr.bf16.mxu0 %v11243_v3  ;;  %1265 = vmatprep.mubr.bf16.mxu1 %v11243_v3 }
  0xec   : > { %913 = vmatmul.mubr.bf16.gmra.mxu0 %v9819_v49  ;;  %1266 = vmatmul.mubr.bf16.gmra.mxu1 %v9819_v49 }
  0xed   : > { %922 = vmatprep.mubr.bf16.mxu0 %v11243_v3  ;;  %1275 = vmatprep.mubr.bf16.mxu1 %v11243_v3 }
  0xf4   : > { %923 = vmatmul.mubr.bf16.gmra.mxu0 %v9820_v50  ;;  %1276 = vmatmul.mubr.bf16.gmra.mxu1 %v9820_v50 }
  0xf5   : > { %932 = vmatprep.mubr.bf16.mxu0 %v11243_v3  ;;  %1285 = vmatprep.mubr.bf16.mxu1 %v11243_v3 }
  0xfc   : > { %933 = vmatmul.mubr.bf16.gmra.mxu0 %v9821_v51  ;;  %1286 = vmatmul.mubr.bf16.gmra.mxu1 %v9821_v51  ;;  %v9831_v51 = vld [vmem:[%s11383_s11 + $0xd8] sm:$0xff]  }
  0xfd   : > { %942 = vmatprep.mubr.bf16.mxu0 %v11243_v3  ;;  %1295 = vmatprep.mubr.bf16.mxu1 %v11243_v3 }
 0x104   : > { %943 = vmatmul.mubr.bf16.gmra.mxu0 %v9822_v52  ;;  %1296 = vmatmul.mubr.bf16.gmra.mxu1 %v9822_v52 }
 0x105   : > { %952 = vmatprep.mubr.bf16.mxu0 %v11243_v3  ;;  %1305 = vmatprep.mubr.bf16.mxu1 %v11243_v3 }
 0x10c   : > { %953 = vmatmul.mubr.bf16.gmra.mxu0 %v9823_v53  ;;  %1306 = vmatmul.mubr.bf16.gmra.mxu1 %v9823_v53 }
 0x10d   : > { %962 = vmatprep.mubr.bf16.mxu0 %v11243_v3  ;;  %1315 = vmatprep.mubr.bf16.mxu1 %v11243_v3 }
 0x114   : > { %963 = vmatmul.mubr.bf16.gmra.mxu0 %v9824_v54  ;;  %1316 = vmatmul.mubr.bf16.gmra.mxu1 %v9824_v54 }
 0x115   : > { %972 = vmatprep.mubr.bf16.mxu0 %v11243_v3  ;;  %1325 = vmatprep.mubr.bf16.mxu1 %v11243_v3 }
 0x11c   : > { %973 = vmatmul.mubr.bf16.gmra.mxu0 %v9825_v55  ;;  %1326 = vmatmul.mubr.bf16.gmra.mxu1 %v9825_v55 }
 0x11d   : > { %982 = vmatprep.mubr.bf16.mxu0 %v11243_v3  ;;  %1335 = vmatprep.mubr.bf16.mxu1 %v11243_v3 }
 0x124   : > { %983 = vmatmul.mubr.bf16.gmra.mxu0 %v9826_v56  ;;  %1336 = vmatmul.mubr.bf16.gmra.mxu1 %v9826_v56 }
 0x125   : > { %992 = vmatprep.mubr.bf16.mxu0 %v11243_v3  ;;  %1345 = vmatprep.mubr.bf16.mxu1 %v11243_v3 }
 0x12c   : > { %993 = vmatmul.mubr.bf16.gmra.mxu0 %v9827_v58  ;;  %1346 = vmatmul.mubr.bf16.gmra.mxu1 %v9827_v58 }
 0x12d   : > { %1002 = vmatprep.mubr.bf16.mxu0 %v11243_v3  ;;  %1355 = vmatprep.mubr.bf16.mxu1 %v11243_v3 }
 0x134   : > { %v764_v7 = vpop.f32.mrf.mxu0  ;;  %1003 = vmatmul.mubr.bf16.gmra.mxu0 %v9828_v1  ;;  %v1117_v8 = vpop.f32.mrf.mxu1  ;;  %1356 = vmatmul.mubr.bf16.gmra.mxu1 %v9828_v1 }
 0x135   : > { %v765_v9 = vadd.f32 %v764_v7, %v11477_v2  ;;  %v1118_v10 = vadd.f32 %v1117_v8, %v11479_v4  ;;  %1012 = vmatprep.mubr.bf16.mxu0 %v11243_v3  ;;  %1365 = vmatprep.mubr.bf16.mxu1 %v11243_v3 }
 0x136   : > { %v766_v11 = vpop.f32.mrf.mxu0  ;;  %v1119_v12 = vpop.f32.mrf.mxu1 }
 0x137   : > { %1436 = vst [vmem:[#allocation4 + $0x2b0] sm:$0xff] %v765_v9  ;;  %1438 = vst [vmem:[#allocation4 + $0x4d8] sm:$0xff] %v1118_v10  ;;  %v767_v13 = vadd.f32 %v766_v11, %v11481_v5  ;;  %v1120_v14 = vadd.f32 %v1119_v12, %v11483_v6  ;;  %v9832_v9 = vld [vmem:[%s11383_s11 + $0xe0] sm:$0xff]  }
 0x138   : > { %v768_v15 = vpop.f32.mrf.mxu0  ;;  %v1121_v16 = vpop.f32.mrf.mxu1 }
 0x139   : > { %1437 = vst [vmem:[#allocation4 + $0x3b0] sm:$0xff] %v767_v13  ;;  %1439 = vst [vmem:[#allocation4 + $0x18] sm:$0xff] %v1120_v14  ;;  %v769_v18 = vadd.f32 %v768_v15, %v11477_v2  ;;  %v1122_v19 = vadd.f32 %v1121_v16, %v11479_v4 }
 0x13a   : > { %v770_v20 = vpop.f32.mrf.mxu0  ;;  %v1123_v21 = vpop.f32.mrf.mxu1 }
 0x13b   : > { %1440 = vst [vmem:[#allocation4 + $0x450] sm:$0xff] %v769_v18  ;;  %1442 = vst [vmem:[#allocation4 + $0x330] sm:$0xff] %v1122_v19  ;;  %v771_v22 = vadd.f32 %v770_v20, %v11481_v5  ;;  %v1124_v23 = vadd.f32 %v1123_v21, %v11483_v6 }
 0x13c   : > { %v774_v24 = vpop.f32.mrf.mxu0  ;;  %1013 = vmatmul.mubr.bf16.gmra.mxu0 %v9829_v17  ;;  %v1127_v25 = vpop.f32.mrf.mxu1  ;;  %1366 = vmatmul.mubr.bf16.gmra.mxu1 %v9829_v17 }
 0x13d   : > { %1441 = vst [vmem:[#allocation4 + $0x768] sm:$0xff] %v771_v22  ;;  %1443 = vst [vmem:[#allocation4 + $0x448] sm:$0xff] %v1124_v23  ;;  %v775_v26 = vadd.f32 %v774_v24, %v11477_v2  ;;  %v1128_v27 = vadd.f32 %v1127_v25, %v11479_v4  ;;  %1022 = vmatprep.mubr.bf16.mxu0 %v11243_v3  ;;  %1375 = vmatprep.mubr.bf16.mxu1 %v11243_v3 }
 0x13e   : > { %v776_v28 = vpop.f32.mrf.mxu0  ;;  %v1129_v29 = vpop.f32.mrf.mxu1 }
 0x13f   : > { %1444 = vst [vmem:[#allocation4 + $0x380] sm:$0xff] %v775_v26  ;;  %1446 = vst [vmem:[#allocation4 + $0x518] sm:$0xff] %v1128_v27  ;;  %v777_v30 = vadd.f32 %v776_v28, %v11481_v5  ;;  %v1130_v31 = vadd.f32 %v1129_v29, %v11483_v6  ;;  %v9833_v26 = vld [vmem:[%s11383_s11 + $0xe8] sm:$0xff]  }
 0x140   : > { %v778_v32 = vpop.f32.mrf.mxu0  ;;  %v1131_v33 = vpop.f32.mrf.mxu1 }
 0x141   : > { %1445 = vst [vmem:[#allocation4 + $0x110] sm:$0xff] %v777_v30  ;;  %1447 = vst [vmem:[#allocation4 + $0x498] sm:$0xff] %v1130_v31  ;;  %v779_v35 = vadd.f32 %v778_v32, %v11477_v2  ;;  %v1132_v36 = vadd.f32 %v1131_v33, %v11479_v4 }
 0x142   : > { %v780_v37 = vpop.f32.mrf.mxu0  ;;  %v1133_v38 = vpop.f32.mrf.mxu1 }
 0x143   : > { %1448 = vst [vmem:[#allocation4 + $0x320] sm:$0xff] %v779_v35  ;;  %1450 = vst [vmem:[#allocation4 + $0x508] sm:$0xff] %v1132_v36  ;;  %v781_v39 = vadd.f32 %v780_v37, %v11481_v5  ;;  %v1134_v40 = vadd.f32 %v1133_v38, %v11483_v6 }
 0x144   : > { %v784_v41 = vpop.f32.mrf.mxu0  ;;  %1023 = vmatmul.mubr.bf16.gmra.mxu0 %v9830_v34  ;;  %v1137_v42 = vpop.f32.mrf.mxu1  ;;  %1376 = vmatmul.mubr.bf16.gmra.mxu1 %v9830_v34 }
 0x145   : > { %1449 = vst [vmem:[#allocation4 + $0x550] sm:$0xff] %v781_v39  ;;  %1451 = vst [vmem:[#allocation4 + $0x720] sm:$0xff] %v1134_v40  ;;  %v785_v43 = vadd.f32 %v784_v41, %v11477_v2  ;;  %v1138_v44 = vadd.f32 %v1137_v42, %v11479_v4  ;;  %1032 = vmatprep.mubr.bf16.mxu0 %v11243_v3  ;;  %1385 = vmatprep.mubr.bf16.mxu1 %v11243_v3 }
 0x146   : > { %v786_v45 = vpop.f32.mrf.mxu0  ;;  %v1139_v46 = vpop.f32.mrf.mxu1 }
 0x147   : > { %1452 = vst [vmem:[#allocation4 + $0x6e0] sm:$0xff] %v785_v43  ;;  %1454 = vst [vmem:[#allocation4 + $0x338] sm:$0xff] %v1138_v44  ;;  %v787_v47 = vadd.f32 %v786_v45, %v11481_v5  ;;  %v1140_v48 = vadd.f32 %v1139_v46, %v11483_v6  ;;  %v9834_v43 = vld [vmem:[%s11383_s11 + $0xf0] sm:$0xff]  }
 0x148   : > { %v788_v49 = vpop.f32.mrf.mxu0  ;;  %v1141_v50 = vpop.f32.mrf.mxu1 }
 0x149   : > { %1453 = vst [vmem:[#allocation4 + $0x788] sm:$0xff] %v787_v47  ;;  %1455 = vst [vmem:[#allocation4 + $0x740] sm:$0xff] %v1140_v48  ;;  %v789_v52 = vadd.f32 %v788_v49, %v11477_v2  ;;  %v1142_v53 = vadd.f32 %v1141_v50, %v11479_v4 }
 0x14a   : > { %v790_v54 = vpop.f32.mrf.mxu0  ;;  %v1143_v55 = vpop.f32.mrf.mxu1 }
 0x14b   : > { %1456 = vst [vmem:[#allocation4 + $0x2e0] sm:$0xff] %v789_v52  ;;  %1458 = vst [vmem:[#allocation4 + $0x5b8] sm:$0xff] %v1142_v53  ;;  %v791_v56 = vadd.f32 %v790_v54, %v11481_v5  ;;  %v1144_v57 = vadd.f32 %v1143_v55, %v11483_v6 }
 0x14c   : > { %v794_v58 = vpop.f32.mrf.mxu0  ;;  %1033 = vmatmul.mubr.bf16.gmra.mxu0 %v9831_v51  ;;  %v1147_v59 = vpop.f32.mrf.mxu1  ;;  %1386 = vmatmul.mubr.bf16.gmra.mxu1 %v9831_v51 }
 0x14d   : > { %1457 = vst [vmem:[#allocation4 + $0x5a8] sm:$0xff] %v791_v56  ;;  %1459 = vst [vmem:[#allocation4 + $0x568] sm:$0xff] %v1144_v57  ;;  %v795_v60 = vadd.f32 %v794_v58, %v11477_v2  ;;  %v1148_v61 = vadd.f32 %v1147_v59, %v11479_v4  ;;  %1042 = vmatprep.mubr.bf16.mxu0 %v11243_v3  ;;  %1395 = vmatprep.mubr.bf16.mxu1 %v11243_v3 }
 0x14e   : > { %v796_v62 = vpop.f32.mrf.mxu0  ;;  %v1149_v63 = vpop.f32.mrf.mxu1 }
 0x14f   : > { %1460 = vst [vmem:[#allocation4 + $0x3e8] sm:$0xff] %v795_v60  ;;  %1462 = vst [vmem:[#allocation4 + $0x690] sm:$0xff] %v1148_v61  ;;  %v797_v0 = vadd.f32 %v796_v62, %v11481_v5  ;;  %v1150_v1 = vadd.f32 %v1149_v63, %v11483_v6  ;;  %v9835_v60 = vld [vmem:[%s11383_s11 + $0xf8] sm:$0xff]  }
 0x150   : > { %v798_v7 = vpop.f32.mrf.mxu0  ;;  %v1151_v8 = vpop.f32.mrf.mxu1 }
 0x151   : > { %1461 = vst [vmem:[#allocation4 + $0x6f8] sm:$0xff] %v797_v0  ;;  %1463 = vst [vmem:[#allocation4 + $0x368] sm:$0xff] %v1150_v1  ;;  %v799_v10 = vadd.f32 %v798_v7, %v11477_v2  ;;  %v1152_v11 = vadd.f32 %v1151_v8, %v11479_v4 }
 0x152   : > { %v800_v12 = vpop.f32.mrf.mxu0  ;;  %v1153_v13 = vpop.f32.mrf.mxu1 }
 0x153   : > { %1464 = vst [vmem:[#allocation4 + $0x138] sm:$0xff] %v799_v10  ;;  %1466 = vst [vmem:[#allocation4 + $0x1c0] sm:$0xff] %v1152_v11  ;;  %v801_v14 = vadd.f32 %v800_v12, %v11481_v5  ;;  %v1154_v15 = vadd.f32 %v1153_v13, %v11483_v6 }
 0x154   : > { %v804_v16 = vpop.f32.mrf.mxu0  ;;  %1043 = vmatmul.mubr.bf16.gmra.mxu0 %v9832_v9  ;;  %v1157_v17 = vpop.f32.mrf.mxu1  ;;  %1396 = vmatmul.mubr.bf16.gmra.mxu1 %v9832_v9 }
 0x155   : > { %1465 = vst [vmem:[#allocation4 + $0xc0] sm:$0xff] %v801_v14  ;;  %1467 = vst [vmem:[#allocation4 + $0x280] sm:$0xff] %v1154_v15  ;;  %v805_v18 = vadd.f32 %v804_v16, %v11477_v2  ;;  %v1158_v19 = vadd.f32 %v1157_v17, %v11479_v4  ;;  %1052 = vmatprep.mubr.bf16.mxu0 %v11243_v3  ;;  %1405 = vmatprep.mubr.bf16.mxu1 %v11243_v3 }
 0x156   : > { %v806_v20 = vpop.f32.mrf.mxu0  ;;  %v1159_v21 = vpop.f32.mrf.mxu1 }
 0x157   : > { %1468 = vst [vmem:[#allocation4 + $0x100] sm:$0xff] %v805_v18  ;;  %1470 = vst [vmem:[#allocation4 + $0x558] sm:$0xff] %v1158_v19  ;;  %v807_v22 = vadd.f32 %v806_v20, %v11481_v5  ;;  %v1160_v23 = vadd.f32 %v1159_v21, %v11483_v6 }
 0x158   : > { %v808_v24 = vpop.f32.mrf.mxu0  ;;  %v1161_v25 = vpop.f32.mrf.mxu1 }
 0x159   : > { %1469 = vst [vmem:[#allocation4 + $0x3c0] sm:$0xff] %v807_v22  ;;  %1471 = vst [vmem:[#allocation4 + $0x3e0] sm:$0xff] %v1160_v23  ;;  %v809_v27 = vadd.f32 %v808_v24, %v11477_v2  ;;  %v1162_v28 = vadd.f32 %v1161_v25, %v11479_v4 }
 0x15a   : > { %v810_v29 = vpop.f32.mrf.mxu0  ;;  %v1163_v30 = vpop.f32.mrf.mxu1 }
 0x15b   : > { %1472 = vst [vmem:[#allocation4 + $0x618] sm:$0xff] %v809_v27  ;;  %1474 = vst [vmem:[#allocation4 + $0x70] sm:$0xff] %v1162_v28  ;;  %v811_v31 = vadd.f32 %v810_v29, %v11481_v5  ;;  %v1164_v32 = vadd.f32 %v1163_v30, %v11483_v6 }
 0x15c   : > { %v814_v33 = vpop.f32.mrf.mxu0  ;;  %1053 = vmatmul.mubr.bf16.gmra.mxu0 %v9833_v26  ;;  %v1167_v34 = vpop.f32.mrf.mxu1  ;;  %1406 = vmatmul.mubr.bf16.gmra.mxu1 %v9833_v26 }
 0x15d   : > { %1473 = vst [vmem:[#allocation4 + $0x4c0] sm:$0xff] %v811_v31  ;;  %1475 = vst [vmem:[#allocation4 + $0x7b8] sm:$0xff] %v1164_v32  ;;  %v815_v35 = vadd.f32 %v814_v33, %v11477_v2  ;;  %v1168_v36 = vadd.f32 %v1167_v34, %v11479_v4  ;;  %1062 = vmatprep.mubr.bf16.mxu0 %v11243_v3  ;;  %1415 = vmatprep.mubr.bf16.mxu1 %v11243_v3 }
 0x15e   : > { %v816_v37 = vpop.f32.mrf.mxu0  ;;  %v1169_v38 = vpop.f32.mrf.mxu1 }
 0x15f   : > { %1476 = vst [vmem:[#allocation4 + $0x400] sm:$0xff] %v815_v35  ;;  %1478 = vst [vmem:[#allocation4 + $0x3f8] sm:$0xff] %v1168_v36  ;;  %v817_v39 = vadd.f32 %v816_v37, %v11481_v5  ;;  %v1170_v40 = vadd.f32 %v1169_v38, %v11483_v6 }
 0x160   : > { %v818_v41 = vpop.f32.mrf.mxu0  ;;  %v1171_v42 = vpop.f32.mrf.mxu1 }
 0x161   : > { %1477 = vst [vmem:[#allocation4 + $0x6a8] sm:$0xff] %v817_v39  ;;  %1479 = vst [vmem:[#allocation4 + $0x2e8] sm:$0xff] %v1170_v40  ;;  %v819_v44 = vadd.f32 %v818_v41, %v11477_v2  ;;  %v1172_v45 = vadd.f32 %v1171_v42, %v11479_v4 }
 0x162   : > { %v820_v46 = vpop.f32.mrf.mxu0  ;;  %v1173_v47 = vpop.f32.mrf.mxu1 }
 0x163   : > { %1480 = vst [vmem:[#allocation4 + $0x6c8] sm:$0xff] %v819_v44  ;;  %1482 = vst [vmem:[#allocation4 + $0x5e8] sm:$0xff] %v1172_v45  ;;  %v821_v48 = vadd.f32 %v820_v46, %v11481_v5  ;;  %v1174_v49 = vadd.f32 %v1173_v47, %v11483_v6 }
 0x164   : > { %v824_v50 = vpop.f32.mrf.mxu0  ;;  %1063 = vmatmul.mubr.bf16.gmra.mxu0 %v9834_v43  ;;  %v1177_v51 = vpop.f32.mrf.mxu1  ;;  %1416 = vmatmul.mubr.bf16.gmra.mxu1 %v9834_v43 }
 0x165   : > { %1481 = vst [vmem:[#allocation4 + $0x5c0] sm:$0xff] %v821_v48  ;;  %1483 = vst [vmem:[#allocation4 + $0x5f8] sm:$0xff] %v1174_v49  ;;  %v825_v52 = vadd.f32 %v824_v50, %v11477_v2  ;;  %v1178_v53 = vadd.f32 %v1177_v51, %v11479_v4  ;;  %1072 = vmatprep.mubr.bf16.mxu0 %v11243_v3  ;;  %1425 = vmatprep.mubr.bf16.mxu1 %v11243_v3 }
 0x166   : > { %v826_v54 = vpop.f32.mrf.mxu0  ;;  %v1179_v55 = vpop.f32.mrf.mxu1 }
 0x167   : > { %1484 = vst [vmem:[#allocation4 + $0x770] sm:$0xff] %v825_v52  ;;  %1486 = vst [vmem:[#allocation4 + $0x640] sm:$0xff] %v1178_v53  ;;  %v827_v56 = vadd.f32 %v826_v54, %v11481_v5  ;;  %v1180_v57 = vadd.f32 %v1179_v55, %v11483_v6 }
 0x168   : > { %v828_v58 = vpop.f32.mrf.mxu0  ;;  %v1181_v59 = vpop.f32.mrf.mxu1 }
 0x169   : > { %1485 = vst [vmem:[#allocation4 + $0x520] sm:$0xff] %v827_v56  ;;  %1487 = vst [vmem:[#allocation4 + $0x250] sm:$0xff] %v1180_v57  ;;  %v829_v61 = vadd.f32 %v828_v58, %v11477_v2  ;;  %v1182_v62 = vadd.f32 %v1181_v59, %v11479_v4 }
 0x16a   : > { %v830_v63 = vpop.f32.mrf.mxu0  ;;  %v1183_v0 = vpop.f32.mrf.mxu1 }
 0x16b   : > { %1488 = vst [vmem:[#allocation4 + $0x348] sm:$0xff] %v829_v61  ;;  %1490 = vst [vmem:[#allocation4 + $0xe0] sm:$0xff] %v1182_v62  ;;  %v831_v3 = vadd.f32 %v830_v63, %v11481_v5  ;;  %v1184_v1 = vadd.f32 %v1183_v0, %v11483_v6 }
 0x16c   : > { %v834_v7 = vpop.f32.mrf.mxu0  ;;  %1073 = vmatmul.mubr.bf16.gmra.mxu0 %v9835_v60  ;;  %v1187_v8 = vpop.f32.mrf.mxu1  ;;  %1426 = vmatmul.mubr.bf16.gmra.mxu1 %v9835_v60 }
 0x16d   : > { %1489 = vst [vmem:[#allocation4 + $0x420] sm:$0xff] %v831_v3  ;;  %1491 = vst [vmem:[#allocation4 + $0x620] sm:$0xff] %v1184_v1  ;;  %v835_v9 = vadd.f32 %v834_v7, %v11477_v2  ;;  %v1188_v10 = vadd.f32 %v1187_v8, %v11479_v4 }
 0x16e   : > { %v836_v11 = vpop.f32.mrf.mxu0  ;;  %v1189_v12 = vpop.f32.mrf.mxu1 }
 0x16f   : > { %1492 = vst [vmem:[#allocation4 + $0x148] sm:$0xff] %v835_v9  ;;  %1494 = vst [vmem:[#allocation4 + $0x4e8] sm:$0xff] %v1188_v10  ;;  %v837_v13 = vadd.f32 %v836_v11, %v11481_v5  ;;  %v1190_v14 = vadd.f32 %v1189_v12, %v11483_v6 }
 0x170   : > { %v838_v15 = vpop.f32.mrf.mxu0  ;;  %v1191_v16 = vpop.f32.mrf.mxu1 }
 0x171   : > { %1493 = vst [vmem:[#allocation4 + $0x3a0] sm:$0xff] %v837_v13  ;;  %1495 = vst [vmem:[#allocation4 + $0x310] sm:$0xff] %v1190_v14  ;;  %v839_v17 = vadd.f32 %v838_v15, %v11477_v2  ;;  %v1192_v18 = vadd.f32 %v1191_v16, %v11479_v4 }
 0x172   : > { %v840_v19 = vpop.f32.mrf.mxu0  ;;  %v1193_v20 = vpop.f32.mrf.mxu1 }
 0x173   : > { %1496 = vst [vmem:[#allocation4 + $0x38] sm:$0xff] %v839_v17  ;;  %1498 = vst [vmem:[#allocation4 + $0x50] sm:$0xff] %v1192_v18  ;;  %v841_v21 = vadd.f32 %v840_v19, %v11481_v5  ;;  %v1194_v22 = vadd.f32 %v1193_v20, %v11483_v6 }
 0x174   : > { %v844_v23 = vpop.f32.mrf.mxu0  ;;  %v1197_v24 = vpop.f32.mrf.mxu1 }
 0x175   : > { %1497 = vst [vmem:[#allocation4 + $0x440] sm:$0xff] %v841_v21  ;;  %1499 = vst [vmem:[#allocation4 + $0x390] sm:$0xff] %v1194_v22  ;;  %v845_v25 = vadd.f32 %v844_v23, %v11477_v2  ;;  %v1198_v26 = vadd.f32 %v1197_v24, %v11479_v4 }
 0x176   : > { %v846_v27 = vpop.f32.mrf.mxu0  ;;  %v1199_v28 = vpop.f32.mrf.mxu1 }
 0x177   : > { %1500 = vst [vmem:[#allocation4 + $0x538] sm:$0xff] %v845_v25  ;;  %1502 = vst [vmem:[#allocation4 + $0x790] sm:$0xff] %v1198_v26  ;;  %v847_v29 = vadd.f32 %v846_v27, %v11481_v5  ;;  %v1200_v30 = vadd.f32 %v1199_v28, %v11483_v6 }
 0x178   : > { %v848_v31 = vpop.f32.mrf.mxu0  ;;  %v1201_v32 = vpop.f32.mrf.mxu1 }
 0x179   : > { %1501 = vst [vmem:[#allocation4 + $0xf0] sm:$0xff] %v847_v29  ;;  %1503 = vst [vmem:[#allocation4 + $0x680] sm:$0xff] %v1200_v30  ;;  %v849_v33 = vadd.f32 %v848_v31, %v11477_v2  ;;  %v1202_v34 = vadd.f32 %v1201_v32, %v11479_v4 }
 0x17a   : > { %v850_v35 = vpop.f32.mrf.mxu0  ;;  %v1203_v36 = vpop.f32.mrf.mxu1 }
 0x17b   : > { %1504 = vst [vmem:[#allocation4 + $0xb8] sm:$0xff] %v849_v33  ;;  %1506 = vst [vmem:[#allocation4 + $0xd0] sm:$0xff] %v1202_v34  ;;  %v851_v37 = vadd.f32 %v850_v35, %v11481_v5  ;;  %v1204_v38 = vadd.f32 %v1203_v36, %v11483_v6 }
 0x17c   : > { %v854_v39 = vpop.f32.mrf.mxu0  ;;  %v1207_v40 = vpop.f32.mrf.mxu1 }
 0x17d   : > { %1505 = vst [vmem:[#allocation4 + $0x120] sm:$0xff] %v851_v37  ;;  %1507 = vst [vmem:[#allocation4 + $0x40] sm:$0xff] %v1204_v38  ;;  %v855_v41 = vadd.f32 %v854_v39, %v11477_v2  ;;  %v1208_v42 = vadd.f32 %v1207_v40, %v11479_v4 }
 0x17e   : > { %v856_v43 = vpop.f32.mrf.mxu0  ;;  %v1209_v44 = vpop.f32.mrf.mxu1 }
 0x17f   : > { %1508 = vst [vmem:[#allocation4 + $0x6f0] sm:$0xff] %v855_v41  ;;  %1510 = vst [vmem:[#allocation4 + $0x758] sm:$0xff] %v1208_v42  ;;  %v857_v45 = vadd.f32 %v856_v43, %v11481_v5  ;;  %v1210_v46 = vadd.f32 %v1209_v44, %v11483_v6 }
 0x180   : > { %v858_v47 = vpop.f32.mrf.mxu0  ;;  %v1211_v48 = vpop.f32.mrf.mxu1 }
 0x181   : > { %1509 = vst [vmem:[#allocation4 + $0x2f8] sm:$0xff] %v857_v45  ;;  %1511 = vst [vmem:[#allocation4 + $0x178] sm:$0xff] %v1210_v46  ;;  %v859_v49 = vadd.f32 %v858_v47, %v11477_v2  ;;  %v1212_v50 = vadd.f32 %v1211_v48, %v11479_v4 }
 0x182   : > { %v860_v51 = vpop.f32.mrf.mxu0  ;;  %v1213_v52 = vpop.f32.mrf.mxu1 }
 0x183   : > { %1512 = vst [vmem:[#allocation4 + $0x738] sm:$0xff] %v859_v49  ;;  %1514 = vst [vmem:[#allocation4 + $0x7d8] sm:$0xff] %v1212_v50  ;;  %v861_v53 = vadd.f32 %v860_v51, %v11481_v5  ;;  %v1214_v54 = vadd.f32 %v1213_v52, %v11483_v6 }
 0x184   : > { %v864_v55 = vpop.f32.mrf.mxu0  ;;  %v1217_v56 = vpop.f32.mrf.mxu1 }
 0x185   : > { %1513 = vst [vmem:[#allocation4 + $0x598] sm:$0xff] %v861_v53  ;;  %1515 = vst [vmem:[#allocation4 + $0x6d8] sm:$0xff] %v1214_v54  ;;  %v865_v57 = vadd.f32 %v864_v55, %v11477_v2  ;;  %v1218_v58 = vadd.f32 %v1217_v56, %v11479_v4 }
 0x186   : > { %v866_v59 = vpop.f32.mrf.mxu0  ;;  %v1219_v60 = vpop.f32.mrf.mxu1 }
 0x187   : > { %1516 = vst [vmem:[#allocation4 + $0x398] sm:$0xff] %v865_v57  ;;  %1518 = vst [vmem:[#allocation4 + $0x698] sm:$0xff] %v1218_v58  ;;  %v867_v61 = vadd.f32 %v866_v59, %v11481_v5  ;;  %v1220_v62 = vadd.f32 %v1219_v60, %v11483_v6 }
 0x188   : > { %v868_v63 = vpop.f32.mrf.mxu0  ;;  %v1221_v0 = vpop.f32.mrf.mxu1 }
 0x189   : > { %1517 = vst [vmem:[#allocation4 + $0x1a8] sm:$0xff] %v867_v61  ;;  %1519 = vst [vmem:[#allocation4 + $0x3b8] sm:$0xff] %v1220_v62  ;;  %v869_v3 = vadd.f32 %v868_v63, %v11477_v2  ;;  %v1222_v1 = vadd.f32 %v1221_v0, %v11479_v4 }
 0x18a   : > { %v870_v7 = vpop.f32.mrf.mxu0  ;;  %v1223_v8 = vpop.f32.mrf.mxu1 }
 0x18b   : > { %1520 = vst [vmem:[#allocation4 + $0x5d8] sm:$0xff] %v869_v3  ;;  %1522 = vst [vmem:[#allocation4 + $0x218] sm:$0xff] %v1222_v1  ;;  %v871_v9 = vadd.f32 %v870_v7, %v11481_v5  ;;  %v1224_v10 = vadd.f32 %v1223_v8, %v11483_v6 }
 0x18c   : > { %v874_v11 = vpop.f32.mrf.mxu0  ;;  %v1227_v12 = vpop.f32.mrf.mxu1 }
 0x18d   : > { %1521 = vst [vmem:[#allocation4 + $0x610] sm:$0xff] %v871_v9  ;;  %1523 = vst [vmem:[#allocation4 + $0x1d8] sm:$0xff] %v1224_v10  ;;  %v875_v13 = vadd.f32 %v874_v11, %v11477_v2  ;;  %v1228_v14 = vadd.f32 %v1227_v12, %v11479_v4 }
 0x18e   : > { %v876_v15 = vpop.f32.mrf.mxu0  ;;  %v1229_v16 = vpop.f32.mrf.mxu1 }
 0x18f   : > { %1524 = vst [vmem:[#allocation4 + $0x628] sm:$0xff] %v875_v13  ;;  %1526 = vst [vmem:[#allocation4 + $0x388] sm:$0xff] %v1228_v14  ;;  %v877_v17 = vadd.f32 %v876_v15, %v11481_v5  ;;  %v1230_v18 = vadd.f32 %v1229_v16, %v11483_v6 }
 0x190   : > { %v878_v19 = vpop.f32.mrf.mxu0  ;;  %v1231_v20 = vpop.f32.mrf.mxu1 }
 0x191   : > { %1525 = vst [vmem:[#allocation4 + $0x1f8] sm:$0xff] %v877_v17  ;;  %1527 = vst [vmem:[#allocation4 + $0x278] sm:$0xff] %v1230_v18  ;;  %v879_v21 = vadd.f32 %v878_v19, %v11477_v2  ;;  %v1232_v22 = vadd.f32 %v1231_v20, %v11479_v4 }
 0x192   : > { %v880_v23 = vpop.f32.mrf.mxu0  ;;  %v1233_v24 = vpop.f32.mrf.mxu1 }
 0x193   : > { %1528 = vst [vmem:[#allocation4 + $0x478] sm:$0xff] %v879_v21  ;;  %1530 = vst [vmem:[#allocation4 + $0x1c8] sm:$0xff] %v1232_v22  ;;  %v881_v25 = vadd.f32 %v880_v23, %v11481_v5  ;;  %v1234_v26 = vadd.f32 %v1233_v24, %v11483_v6 }
 0x194   : > { %v884_v27 = vpop.f32.mrf.mxu0  ;;  %v1237_v28 = vpop.f32.mrf.mxu1 }
 0x195   : > { %1529 = vst [vmem:[#allocation4 + $0x2c0] sm:$0xff] %v881_v25  ;;  %1531 = vst [vmem:[#allocation4 + $0x7c0] sm:$0xff] %v1234_v26  ;;  %v885_v29 = vadd.f32 %v884_v27, %v11477_v2  ;;  %v1238_v30 = vadd.f32 %v1237_v28, %v11479_v4 }
 0x196   : > { %v886_v31 = vpop.f32.mrf.mxu0  ;;  %v1239_v32 = vpop.f32.mrf.mxu1 }
 0x197   : > { %1532 = vst [vmem:[#allocation4 + $0x418] sm:$0xff] %v885_v29  ;;  %1534 = vst [vmem:[#allocation4 + $0x4b0] sm:$0xff] %v1238_v30  ;;  %v887_v33 = vadd.f32 %v886_v31, %v11481_v5  ;;  %v1240_v34 = vadd.f32 %v1239_v32, %v11483_v6 }
 0x198   : > { %v888_v35 = vpop.f32.mrf.mxu0  ;;  %v1241_v36 = vpop.f32.mrf.mxu1 }
 0x199   : > { %1533 = vst [vmem:[#allocation4 + $0x7f0] sm:$0xff] %v887_v33  ;;  %1535 = vst [vmem:[#allocation4 + $0x318] sm:$0xff] %v1240_v34  ;;  %v889_v37 = vadd.f32 %v888_v35, %v11477_v2  ;;  %v1242_v38 = vadd.f32 %v1241_v36, %v11479_v4 }
 0x19a   : > { %v890_v39 = vpop.f32.mrf.mxu0  ;;  %v1243_v40 = vpop.f32.mrf.mxu1 }
 0x19b   : > { %1536 = vst [vmem:[#allocation4 + $0x90] sm:$0xff] %v889_v37  ;;  %1538 = vst [vmem:[#allocation4 + $0x588] sm:$0xff] %v1242_v38  ;;  %v891_v41 = vadd.f32 %v890_v39, %v11481_v5  ;;  %v1244_v42 = vadd.f32 %v1243_v40, %v11483_v6 }
 0x19c   : > { %v894_v43 = vpop.f32.mrf.mxu0  ;;  %v1247_v44 = vpop.f32.mrf.mxu1 }
 0x19d   : > { %1537 = vst [vmem:[#allocation4 + $0x540] sm:$0xff] %v891_v41  ;;  %1539 = vst [vmem:[#allocation4 + $0x648] sm:$0xff] %v1244_v42  ;;  %v895_v45 = vadd.f32 %v894_v43, %v11477_v2  ;;  %v1248_v46 = vadd.f32 %v1247_v44, %v11479_v4 }
 0x19e   : > { %v896_v47 = vpop.f32.mrf.mxu0  ;;  %v1249_v48 = vpop.f32.mrf.mxu1 }
 0x19f   : > { %1540 = vst [vmem:[#allocation4 + $0x58] sm:$0xff] %v895_v45  ;;  %1542 = vst [vmem:[#allocation4 + $0x68] sm:$0xff] %v1248_v46  ;;  %v897_v49 = vadd.f32 %v896_v47, %v11481_v5  ;;  %v1250_v50 = vadd.f32 %v1249_v48, %v11483_v6 }
 0x1a0   : > { %v898_v51 = vpop.f32.mrf.mxu0  ;;  %v1251_v52 = vpop.f32.mrf.mxu1 }
 0x1a1   : > { %1541 = vst [vmem:[#allocation4 + $0x198] sm:$0xff] %v897_v49  ;;  %1543 = vst [vmem:[#allocation4 + $0x600] sm:$0xff] %v1250_v50  ;;  %v899_v53 = vadd.f32 %v898_v51, %v11477_v2  ;;  %v1252_v54 = vadd.f32 %v1251_v52, %v11479_v4 }
 0x1a2   : > { %v900_v55 = vpop.f32.mrf.mxu0  ;;  %v1253_v56 = vpop.f32.mrf.mxu1 }
 0x1a3   : > { %1544 = vst [vmem:[#allocation4 + $0x3a8] sm:$0xff] %v899_v53  ;;  %1546 = vst [vmem:[#allocation4 + $0x630] sm:$0xff] %v1252_v54  ;;  %v901_v57 = vadd.f32 %v900_v55, %v11481_v5  ;;  %v1254_v58 = vadd.f32 %v1253_v56, %v11483_v6 }
 0x1a4   : > { %v904_v59 = vpop.f32.mrf.mxu0  ;;  %v1257_v60 = vpop.f32.mrf.mxu1 }
 0x1a5   : > { %1545 = vst [vmem:[#allocation4 + $0xb0] sm:$0xff] %v901_v57  ;;  %1547 = vst [vmem:[#allocation4 + $0x158] sm:$0xff] %v1254_v58  ;;  %v905_v61 = vadd.f32 %v904_v59, %v11477_v2  ;;  %v1258_v62 = vadd.f32 %v1257_v60, %v11479_v4 }
 0x1a6   : > { %v906_v63 = vpop.f32.mrf.mxu0  ;;  %v1259_v0 = vpop.f32.mrf.mxu1 }
 0x1a7   : > { %1548 = vst [vmem:[#allocation4 + $0x370] sm:$0xff] %v905_v61  ;;  %1550 = vst [vmem:[#allocation4 + $0x7b0] sm:$0xff] %v1258_v62  ;;  %v907_v3 = vadd.f32 %v906_v63, %v11481_v5  ;;  %v1260_v1 = vadd.f32 %v1259_v0, %v11483_v6 }
 0x1a8   : > { %v908_v7 = vpop.f32.mrf.mxu0  ;;  %v1261_v8 = vpop.f32.mrf.mxu1 }
 0x1a9   : > { %1549 = vst [vmem:[#allocation4 + $0x1e0] sm:$0xff] %v907_v3  ;;  %1551 = vst [vmem:[#allocation4 + $0x6c0] sm:$0xff] %v1260_v1  ;;  %v909_v9 = vadd.f32 %v908_v7, %v11477_v2  ;;  %v1262_v10 = vadd.f32 %v1261_v8, %v11479_v4 }
 0x1aa   : > { %v910_v11 = vpop.f32.mrf.mxu0  ;;  %v1263_v12 = vpop.f32.mrf.mxu1 }
 0x1ab   : > { %1552 = vst [vmem:[#allocation4 + $0xd8] sm:$0xff] %v909_v9  ;;  %1554 = vst [vmem:[#allocation4 + $0x140] sm:$0xff] %v1262_v10  ;;  %v911_v13 = vadd.f32 %v910_v11, %v11481_v5  ;;  %v1264_v14 = vadd.f32 %v1263_v12, %v11483_v6 }
 0x1ac   : > { %v914_v15 = vpop.f32.mrf.mxu0  ;;  %v1267_v16 = vpop.f32.mrf.mxu1 }
 0x1ad   : > { %1553 = vst [vmem:[#allocation4 + $0x6b8] sm:$0xff] %v911_v13  ;;  %1555 = vst [vmem:[#allocation4 + $0x5b0] sm:$0xff] %v1264_v14  ;;  %v915_v17 = vadd.f32 %v914_v15, %v11477_v2  ;;  %v1268_v18 = vadd.f32 %v1267_v16, %v11479_v4 }
 0x1ae   : > { %v916_v19 = vpop.f32.mrf.mxu0  ;;  %v1269_v20 = vpop.f32.mrf.mxu1 }
 0x1af   : > { %1556 = vst [vmem:[#allocation4 + $0x30] sm:$0xff] %v915_v17  ;;  %1558 = vst [vmem:[#allocation4 + $0x1a0] sm:$0xff] %v1268_v18  ;;  %v917_v21 = vadd.f32 %v916_v19, %v11481_v5  ;;  %v1270_v22 = vadd.f32 %v1269_v20, %v11483_v6 }
 0x1b0   : > { %v918_v23 = vpop.f32.mrf.mxu0  ;;  %v1271_v24 = vpop.f32.mrf.mxu1 }
 0x1b1   : > { %1557 = vst [vmem:[#allocation4 + $0x128] sm:$0xff] %v917_v21  ;;  %1559 = vst [vmem:[#allocation4 + $0x5f0] sm:$0xff] %v1270_v22  ;;  %v919_v25 = vadd.f32 %v918_v23, %v11477_v2  ;;  %v1272_v26 = vadd.f32 %v1271_v24, %v11479_v4 }
 0x1b2   : > { %v920_v27 = vpop.f32.mrf.mxu0  ;;  %v1273_v28 = vpop.f32.mrf.mxu1 }
 0x1b3   : > { %1560 = vst [vmem:[#allocation4 + $0x670] sm:$0xff] %v919_v25  ;;  %1562 = vst [vmem:[#allocation4 + $0x118] sm:$0xff] %v1272_v26  ;;  %v921_v29 = vadd.f32 %v920_v27, %v11481_v5  ;;  %v1274_v30 = vadd.f32 %v1273_v28, %v11483_v6 }
 0x1b4   : > { %v924_v31 = vpop.f32.mrf.mxu0  ;;  %v1277_v32 = vpop.f32.mrf.mxu1 }
 0x1b5   : > { %1561 = vst [vmem:[#allocation4 + $0x240] sm:$0xff] %v921_v29  ;;  %1563 = vst [vmem:[#allocation4 + $0x268] sm:$0xff] %v1274_v30  ;;  %v925_v33 = vadd.f32 %v924_v31, %v11477_v2  ;;  %v1278_v34 = vadd.f32 %v1277_v32, %v11479_v4 }
 0x1b6   : > { %v926_v35 = vpop.f32.mrf.mxu0  ;;  %v1279_v36 = vpop.f32.mrf.mxu1 }
 0x1b7   : > { %1564 = vst [vmem:[#allocation4 + $0x4a8] sm:$0xff] %v925_v33  ;;  %1566 = vst [vmem:[#allocation4 + $0x438] sm:$0xff] %v1278_v34  ;;  %v927_v37 = vadd.f32 %v926_v35, %v11481_v5  ;;  %v1280_v38 = vadd.f32 %v1279_v36, %v11483_v6 }
 0x1b8   : > { %v928_v39 = vpop.f32.mrf.mxu0  ;;  %v1281_v40 = vpop.f32.mrf.mxu1 }
 0x1b9   : > { %1565 = vst [vmem:[#allocation4 + $0x5c8] sm:$0xff] %v927_v37  ;;  %1567 = vst [vmem:[#allocation4 + $0x350] sm:$0xff] %v1280_v38  ;;  %v929_v41 = vadd.f32 %v928_v39, %v11477_v2  ;;  %v1282_v42 = vadd.f32 %v1281_v40, %v11479_v4 }
 0x1ba   : > { %v930_v43 = vpop.f32.mrf.mxu0  ;;  %v1283_v44 = vpop.f32.mrf.mxu1 }
 0x1bb   : > { %1568 = vst [vmem:[#allocation4 + $0x2c8] sm:$0xff] %v929_v41  ;;  %1570 = vst [vmem:[#allocation4 + $0x488] sm:$0xff] %v1282_v42  ;;  %v931_v45 = vadd.f32 %v930_v43, %v11481_v5  ;;  %v1284_v46 = vadd.f32 %v1283_v44, %v11483_v6 }
 0x1bc   : > { %v934_v47 = vpop.f32.mrf.mxu0  ;;  %v1287_v48 = vpop.f32.mrf.mxu1 }
 0x1bd   : > { %1569 = vst [vmem:[#allocation4 + $0xf8] sm:$0xff] %v931_v45  ;;  %1571 = vst [vmem:[#allocation4 + $0x6a0] sm:$0xff] %v1284_v46  ;;  %v935_v49 = vadd.f32 %v934_v47, %v11477_v2  ;;  %v1288_v50 = vadd.f32 %v1287_v48, %v11479_v4 }
 0x1be   : > { %v936_v51 = vpop.f32.mrf.mxu0  ;;  %v1289_v52 = vpop.f32.mrf.mxu1 }
 0x1bf   : > { %1572 = vst [vmem:[#allocation4 + $0x3c8] sm:$0xff] %v935_v49  ;;  %1574 = vst [vmem:[#allocation4 + $0x6d0] sm:$0xff] %v1288_v50  ;;  %v937_v53 = vadd.f32 %v936_v51, %v11481_v5  ;;  %v1290_v54 = vadd.f32 %v1289_v52, %v11483_v6 }
 0x1c0   : > { %v938_v55 = vpop.f32.mrf.mxu0  ;;  %v1291_v56 = vpop.f32.mrf.mxu1 }
 0x1c1   : > { %1573 = vst [vmem:[#allocation4 + $0x1e8] sm:$0xff] %v937_v53  ;;  %1575 = vst [vmem:[#allocation4 + $0x688] sm:$0xff] %v1290_v54  ;;  %v939_v57 = vadd.f32 %v938_v55, %v11477_v2  ;;  %v1292_v58 = vadd.f32 %v1291_v56, %v11479_v4 }
 0x1c2   : > { %v940_v59 = vpop.f32.mrf.mxu0  ;;  %v1293_v60 = vpop.f32.mrf.mxu1 }
 0x1c3   : > { %1576 = vst [vmem:[#allocation4 + $0x730] sm:$0xff] %v939_v57  ;;  %1578 = vst [vmem:[#allocation4 + $0x458] sm:$0xff] %v1292_v58  ;;  %v941_v61 = vadd.f32 %v940_v59, %v11481_v5  ;;  %v1294_v62 = vadd.f32 %v1293_v60, %v11483_v6 }
 0x1c4   : > { %v944_v63 = vpop.f32.mrf.mxu0  ;;  %v1297_v0 = vpop.f32.mrf.mxu1 }
 0x1c5   : > { %1577 = vst [vmem:[#allocation4 + $0x658] sm:$0xff] %v941_v61  ;;  %1579 = vst [vmem:[#allocation4 + $0x1b8] sm:$0xff] %v1294_v62  ;;  %v945_v3 = vadd.f32 %v944_v63, %v11477_v2  ;;  %v1298_v1 = vadd.f32 %v1297_v0, %v11479_v4 }
 0x1c6   : > { %v946_v7 = vpop.f32.mrf.mxu0  ;;  %v1299_v8 = vpop.f32.mrf.mxu1 }
 0x1c7   : > { %1580 = vst [vmem:[#allocation4 + $0x460] sm:$0xff] %v945_v3  ;;  %1582 = vst [vmem:[#allocation4 + $0x528] sm:$0xff] %v1298_v1  ;;  %v947_v9 = vadd.f32 %v946_v7, %v11481_v5  ;;  %v1300_v10 = vadd.f32 %v1299_v8, %v11483_v6 }
 0x1c8   : > { %v948_v11 = vpop.f32.mrf.mxu0  ;;  %v1301_v12 = vpop.f32.mrf.mxu1 }
 0x1c9   : > { %1581 = vst [vmem:[#allocation4 + $0x4f0] sm:$0xff] %v947_v9  ;;  %1583 = vst [vmem:[#allocation4 + $0x258] sm:$0xff] %v1300_v10  ;;  %v949_v13 = vadd.f32 %v948_v11, %v11477_v2  ;;  %v1302_v14 = vadd.f32 %v1301_v12, %v11479_v4 }
 0x1ca   : > { %v950_v15 = vpop.f32.mrf.mxu0  ;;  %v1303_v16 = vpop.f32.mrf.mxu1 }
 0x1cb   : > { %1584 = vst [vmem:[#allocation4 + $0x4d0] sm:$0xff] %v949_v13  ;;  %1586 = vst [vmem:[#allocation4 + $0x78] sm:$0xff] %v1302_v14  ;;  %v951_v17 = vadd.f32 %v950_v15, %v11481_v5  ;;  %v1304_v18 = vadd.f32 %v1303_v16, %v11483_v6 }
 0x1cc   : > { %v954_v19 = vpop.f32.mrf.mxu0  ;;  %v1307_v20 = vpop.f32.mrf.mxu1 }
 0x1cd   : > { %1585 = vst [vmem:[#allocation4 + $0x4f8] sm:$0xff] %v951_v17  ;;  %1587 = vst [vmem:[#allocation4 + $0x2a0] sm:$0xff] %v1304_v18  ;;  %v955_v21 = vadd.f32 %v954_v19, %v11477_v2  ;;  %v1308_v22 = vadd.f32 %v1307_v20, %v11479_v4 }
 0x1ce   : > { %v956_v23 = vpop.f32.mrf.mxu0  ;;  %v1309_v24 = vpop.f32.mrf.mxu1 }
 0x1cf   : > { %1588 = vst [vmem:[#allocation4 + $0x10] sm:$0xff] %v955_v21  ;;  %1590 = vst [vmem:[#allocation4 + $0x7a8] sm:$0xff] %v1308_v22  ;;  %v957_v25 = vadd.f32 %v956_v23, %v11481_v5  ;;  %v1310_v26 = vadd.f32 %v1309_v24, %v11483_v6 }
 0x1d0   : > { %v958_v27 = vpop.f32.mrf.mxu0  ;;  %v1311_v28 = vpop.f32.mrf.mxu1 }
 0x1d1   : > { %1589 = vst [vmem:[#allocation4 + $0x778] sm:$0xff] %v957_v25  ;;  %1591 = vst [vmem:[#allocation4 + $0x530] sm:$0xff] %v1310_v26  ;;  %v959_v29 = vadd.f32 %v958_v27, %v11477_v2  ;;  %v1312_v30 = vadd.f32 %v1311_v28, %v11479_v4 }
 0x1d2   : > { %v960_v31 = vpop.f32.mrf.mxu0  ;;  %v1313_v32 = vpop.f32.mrf.mxu1 }
 0x1d3   : > { %1592 = vst [vmem:[#allocation4 + $0x590] sm:$0xff] %v959_v29  ;;  %1594 = vst [vmem:[#allocation4 + $0x358] sm:$0xff] %v1312_v30  ;;  %v961_v33 = vadd.f32 %v960_v31, %v11481_v5  ;;  %v1314_v34 = vadd.f32 %v1313_v32, %v11483_v6 }
 0x1d4   : > { %v964_v35 = vpop.f32.mrf.mxu0  ;;  %v1317_v36 = vpop.f32.mrf.mxu1 }
 0x1d5   : > { %1593 = vst [vmem:[#allocation4 + $0x660] sm:$0xff] %v961_v33  ;;  %1595 = vst [vmem:[#allocation4 + $0x700] sm:$0xff] %v1314_v34  ;;  %v965_v37 = vadd.f32 %v964_v35, %v11477_v2  ;;  %v1318_v38 = vadd.f32 %v1317_v36, %v11479_v4 }
 0x1d6   : > { %v966_v39 = vpop.f32.mrf.mxu0  ;;  %v1319_v40 = vpop.f32.mrf.mxu1 }
 0x1d7   : > { %1596 = vst [vmem:[#allocation4 + $0x340] sm:$0xff] %v965_v37  ;;  %1598 = vst [vmem:[#allocation4 + $0x3d0] sm:$0xff] %v1318_v38  ;;  %v967_v41 = vadd.f32 %v966_v39, %v11481_v5  ;;  %v1320_v42 = vadd.f32 %v1319_v40, %v11483_v6 }
 0x1d8   : > { %v968_v43 = vpop.f32.mrf.mxu0  ;;  %v1321_v44 = vpop.f32.mrf.mxu1 }
 0x1d9   : > { %1597 = vst [vmem:[#allocation4 + $0x5a0] sm:$0xff] %v967_v41  ;;  %1599 = vst [vmem:[#allocation4 + $0x230] sm:$0xff] %v1320_v42  ;;  %v969_v45 = vadd.f32 %v968_v43, %v11477_v2  ;;  %v1322_v46 = vadd.f32 %v1321_v44, %v11479_v4 }
 0x1da   : > { %v970_v47 = vpop.f32.mrf.mxu0  ;;  %v1323_v48 = vpop.f32.mrf.mxu1 }
 0x1db   : > { %1600 = vst [vmem:[#allocation4 + $0x560] sm:$0xff] %v969_v45  ;;  %1602 = vst [vmem:[#allocation4 + $0x4e0] sm:$0xff] %v1322_v46  ;;  %v971_v49 = vadd.f32 %v970_v47, %v11481_v5  ;;  %v1324_v50 = vadd.f32 %v1323_v48, %v11483_v6 }
 0x1dc   : > { %v974_v51 = vpop.f32.mrf.mxu0  ;;  %v1327_v52 = vpop.f32.mrf.mxu1 }
 0x1dd   : > { %1601 = vst [vmem:[#allocation4 + $0x7f8] sm:$0xff] %v971_v49  ;;  %1603 = vst [vmem:[#allocation4 + $0x200] sm:$0xff] %v1324_v50  ;;  %v975_v53 = vadd.f32 %v974_v51, %v11477_v2  ;;  %v1328_v54 = vadd.f32 %v1327_v52, %v11479_v4 }
 0x1de   : > { %v976_v55 = vpop.f32.mrf.mxu0  ;;  %v1329_v56 = vpop.f32.mrf.mxu1 }
 0x1df   : > { %1604 = vst [vmem:[#allocation4 + $0x468] sm:$0xff] %v975_v53  ;;  %1606 = vst [vmem:[#allocation4 + $0x1d0] sm:$0xff] %v1328_v54  ;;  %v977_v57 = vadd.f32 %v976_v55, %v11481_v5  ;;  %v1330_v58 = vadd.f32 %v1329_v56, %v11483_v6 }
 0x1e0   : > { %v978_v59 = vpop.f32.mrf.mxu0  ;;  %v1331_v60 = vpop.f32.mrf.mxu1 }
 0x1e1   : > { %1605 = vst [vmem:[#allocation4 + $0x2a8] sm:$0xff] %v977_v57  ;;  %1607 = vst [vmem:[#allocation4 + $0x510] sm:$0xff] %v1330_v58  ;;  %v979_v61 = vadd.f32 %v978_v59, %v11477_v2  ;;  %v1332_v62 = vadd.f32 %v1331_v60, %v11479_v4 }
 0x1e2   : > { %v980_v63 = vpop.f32.mrf.mxu0  ;;  %v1333_v0 = vpop.f32.mrf.mxu1 }
 0x1e3   : > { %1608 = vst [vmem:[#allocation4 + $0x750] sm:$0xff] %v979_v61  ;;  %1610 = vst [vmem:[#allocation4 + $0x28] sm:$0xff] %v1332_v62  ;;  %v981_v3 = vadd.f32 %v980_v63, %v11481_v5  ;;  %v1334_v1 = vadd.f32 %v1333_v0, %v11483_v6 }
 0x1e4   : > { %v984_v7 = vpop.f32.mrf.mxu0  ;;  %v1337_v8 = vpop.f32.mrf.mxu1 }
 0x1e5   : > { %1609 = vst [vmem:[#allocation4 + $0x130] sm:$0xff] %v981_v3  ;;  %1611 = vst [vmem:[#allocation4 + $0x760] sm:$0xff] %v1334_v1  ;;  %v985_v9 = vadd.f32 %v984_v7, %v11477_v2  ;;  %v1338_v10 = vadd.f32 %v1337_v8, %v11479_v4 }
 0x1e6   : > { %v986_v11 = vpop.f32.mrf.mxu0  ;;  %v1339_v12 = vpop.f32.mrf.mxu1 }
 0x1e7   : > { %1612 = vst [vmem:[#allocation4 + $0x5d0] sm:$0xff] %v985_v9  ;;  %1614 = vst [vmem:[#allocation4 + $0x208] sm:$0xff] %v1338_v10  ;;  %v987_v13 = vadd.f32 %v986_v11, %v11481_v5  ;;  %v1340_v14 = vadd.f32 %v1339_v12, %v11483_v6 }
 0x1e8   : > { %v988_v15 = vpop.f32.mrf.mxu0  ;;  %v1341_v16 = vpop.f32.mrf.mxu1 }
 0x1e9   : > { %1613 = vst [vmem:[#allocation4 + $0x228] sm:$0xff] %v987_v13  ;;  %1615 = vst [vmem:[#allocation4 + $0x290] sm:$0xff] %v1340_v14  ;;  %v989_v17 = vadd.f32 %v988_v15, %v11477_v2  ;;  %v1342_v18 = vadd.f32 %v1341_v16, %v11479_v4 }
 0x1ea   : > { %v990_v19 = vpop.f32.mrf.mxu0  ;;  %v1343_v20 = vpop.f32.mrf.mxu1 }
 0x1eb   : > { %1616 = vst [vmem:[#allocation4 + $0x7a0] sm:$0xff] %v989_v17  ;;  %1618 = vst [vmem:[#allocation4 + $0x4c8] sm:$0xff] %v1342_v18  ;;  %v991_v21 = vadd.f32 %v990_v19, %v11481_v5  ;;  %v1344_v22 = vadd.f32 %v1343_v20, %v11483_v6 }
 0x1ec   : > { %v994_v23 = vpop.f32.mrf.mxu0  ;;  %v1347_v24 = vpop.f32.mrf.mxu1 }
 0x1ed   : > { %1617 = vst [vmem:[#allocation4 + $0x80] sm:$0xff] %v991_v21  ;;  %1619 = vst [vmem:[#allocation4 + $0x3f0] sm:$0xff] %v1344_v22  ;;  %v995_v25 = vadd.f32 %v994_v23, %v11477_v2  ;;  %v1348_v26 = vadd.f32 %v1347_v24, %v11479_v4 }
 0x1ee   : > { %v996_v27 = vpop.f32.mrf.mxu0  ;;  %v1349_v28 = vpop.f32.mrf.mxu1 }
 0x1ef   : > { %1620 = vst [vmem:[#allocation4 + $0x798] sm:$0xff] %v995_v25  ;;  %1622 = vst [vmem:[#allocation4 + $0x160] sm:$0xff] %v1348_v26  ;;  %v997_v29 = vadd.f32 %v996_v27, %v11481_v5  ;;  %v1350_v30 = vadd.f32 %v1349_v28, %v11483_v6 }
 0x1f0   : > { %v998_v31 = vpop.f32.mrf.mxu0  ;;  %v1351_v32 = vpop.f32.mrf.mxu1 }
 0x1f1   : > { %1621 = vst [vmem:[#allocation4 + $0x378] sm:$0xff] %v997_v29  ;;  %1623 = vst [vmem:[#allocation4 + $0x260] sm:$0xff] %v1350_v30  ;;  %v999_v33 = vadd.f32 %v998_v31, %v11477_v2  ;;  %v1352_v34 = vadd.f32 %v1351_v32, %v11479_v4 }
 0x1f2   : > { %v1000_v35 = vpop.f32.mrf.mxu0  ;;  %v1353_v36 = vpop.f32.mrf.mxu1 }
 0x1f3   : > { %1624 = vst [vmem:[#allocation4 + $0x728] sm:$0xff] %v999_v33  ;;  %1626 = vst [vmem:[#allocation4 + $0x188] sm:$0xff] %v1352_v34  ;;  %v1001_v37 = vadd.f32 %v1000_v35, %v11481_v5  ;;  %v1354_v38 = vadd.f32 %v1353_v36, %v11483_v6 }
 0x1f4   : > { %v1004_v39 = vpop.f32.mrf.mxu0  ;;  %v1357_v40 = vpop.f32.mrf.mxu1 }
 0x1f5   : > { %1625 = vst [vmem:[#allocation4 + $0x288] sm:$0xff] %v1001_v37  ;;  %1627 = vst [vmem:[#allocation4 + $0x408] sm:$0xff] %v1354_v38  ;;  %v1005_v41 = vadd.f32 %v1004_v39, %v11477_v2  ;;  %v1358_v42 = vadd.f32 %v1357_v40, %v11479_v4 }
 0x1f6   : > { %v1006_v43 = vpop.f32.mrf.mxu0  ;;  %v1359_v44 = vpop.f32.mrf.mxu1 }
 0x1f7   : > { %1628 = vst [vmem:[#allocation4 + $0x678] sm:$0xff] %v1005_v41  ;;  %1630 = vst [vmem:[#allocation4 + $0x470] sm:$0xff] %v1358_v42  ;;  %v1007_v45 = vadd.f32 %v1006_v43, %v11481_v5  ;;  %v1360_v46 = vadd.f32 %v1359_v44, %v11483_v6 }
 0x1f8   : > { %v1008_v47 = vpop.f32.mrf.mxu0  ;;  %v1361_v48 = vpop.f32.mrf.mxu1 }
 0x1f9   : > { %1629 = vst [vmem:[#allocation4 + $0x98] sm:$0xff] %v1007_v45  ;;  %1631 = vst [vmem:[#allocation4 + $0x410] sm:$0xff] %v1360_v46  ;;  %v1009_v49 = vadd.f32 %v1008_v47, %v11477_v2  ;;  %v1362_v50 = vadd.f32 %v1361_v48, %v11479_v4 }
 0x1fa   : > { %v1010_v51 = vpop.f32.mrf.mxu0  ;;  %v1363_v52 = vpop.f32.mrf.mxu1 }
 0x1fb   : > { %1632 = vst [vmem:[#allocation4 + $0x248] sm:$0xff] %v1009_v49  ;;  %1634 = vst [vmem:[#allocation4 + $0x220] sm:$0xff] %v1362_v50  ;;  %v1011_v53 = vadd.f32 %v1010_v51, %v11481_v5  ;;  %v1364_v54 = vadd.f32 %v1363_v52, %v11483_v6 }
 0x1fc   : > { %v1014_v55 = vpop.f32.mrf.mxu0  ;;  %v1367_v56 = vpop.f32.mrf.mxu1 }
 0x1fd   : > { %1633 = vst [vmem:[#allocation4 + $0x548] sm:$0xff] %v1011_v53  ;;  %1635 = vst [vmem:[#allocation4 + $0x780] sm:$0xff] %v1364_v54  ;;  %v1015_v57 = vadd.f32 %v1014_v55, %v11477_v2  ;;  %v1368_v58 = vadd.f32 %v1367_v56, %v11479_v4 }
 0x1fe   : > { %v1016_v59 = vpop.f32.mrf.mxu0  ;;  %v1369_v60 = vpop.f32.mrf.mxu1 }
 0x1ff   : > { %1636 = vst [vmem:[#allocation4 + $0x708] sm:$0xff] %v1015_v57  ;;  %1638 = vst [vmem:[#allocation4 + $0x428] sm:$0xff] %v1368_v58  ;;  %v1017_v61 = vadd.f32 %v1016_v59, %v11481_v5  ;;  %v1370_v62 = vadd.f32 %v1369_v60, %v11483_v6 }
 0x200   : > { %v1018_v63 = vpop.f32.mrf.mxu0  ;;  %v1371_v0 = vpop.f32.mrf.mxu1 }
 0x201   : > { %1637 = vst [vmem:[#allocation4 + $0x8] sm:$0xff] %v1017_v61  ;;  %1639 = vst [vmem:[#allocation4 + $0x170] sm:$0xff] %v1370_v62  ;;  %v1019_v3 = vadd.f32 %v1018_v63, %v11477_v2  ;;  %v1372_v1 = vadd.f32 %v1371_v0, %v11479_v4 }
 0x202   : > { %v1020_v7 = vpop.f32.mrf.mxu0  ;;  %v1373_v8 = vpop.f32.mrf.mxu1 }
 0x203   : > { %1640 = vst [vmem:[#allocation4 + $0x7e0] sm:$0xff] %v1019_v3  ;;  %1642 = vst [vmem:[#allocation4 + $0x308] sm:$0xff] %v1372_v1  ;;  %v1021_v9 = vadd.f32 %v1020_v7, %v11481_v5  ;;  %v1374_v10 = vadd.f32 %v1373_v8, %v11483_v6 }
 0x204   : > { %v1024_v11 = vpop.f32.mrf.mxu0  ;;  %v1377_v12 = vpop.f32.mrf.mxu1 }
 0x205   : > { %1641 = vst [vmem:[#allocation4 + $0x20] sm:$0xff] %v1021_v9  ;;  %1643 = vst [vmem:[#allocation4 + $0x88] sm:$0xff] %v1374_v10  ;;  %v1025_v13 = vadd.f32 %v1024_v11, %v11477_v2  ;;  %v1378_v14 = vadd.f32 %v1377_v12, %v11479_v4 }
 0x206   : > { %v1026_v15 = vpop.f32.mrf.mxu0  ;;  %v1379_v16 = vpop.f32.mrf.mxu1 }
 0x207   : > { %1644 = vst [vmem:[#allocation4 + $0x6e8] sm:$0xff] %v1025_v13  ;;  %1646 = vst [vmem:[#allocation4 + $0x300] sm:$0xff] %v1378_v14  ;;  %v1027_v17 = vadd.f32 %v1026_v15, %v11481_v5  ;;  %v1380_v18 = vadd.f32 %v1379_v16, %v11483_v6 }
 0x208   : > { %v1028_v19 = vpop.f32.mrf.mxu0  ;;  %v1381_v20 = vpop.f32.mrf.mxu1 }
 0x209   : > { %1645 = vst [vmem:[#allocation4 + $0x6b0] sm:$0xff] %v1027_v17  ;;  %1647 = vst [vmem:[#allocation4 + $0x108] sm:$0xff] %v1380_v18  ;;  %v1029_v21 = vadd.f32 %v1028_v19, %v11477_v2  ;;  %v1382_v22 = vadd.f32 %v1381_v20, %v11479_v4 }
 0x20a   : > { %v1030_v23 = vpop.f32.mrf.mxu0  ;;  %v1383_v24 = vpop.f32.mrf.mxu1 }
 0x20b   : > { %1648 = vst [vmem:[#allocation4 + $0x180] sm:$0xff] %v1029_v21  ;;  %1650 = vst [vmem:[#allocation4 + $0x570] sm:$0xff] %v1382_v22  ;;  %v1031_v25 = vadd.f32 %v1030_v23, %v11481_v5  ;;  %v1384_v26 = vadd.f32 %v1383_v24, %v11483_v6 }
 0x20c   : > { %v1034_v27 = vpop.f32.mrf.mxu0  ;;  %v1387_v28 = vpop.f32.mrf.mxu1 }
 0x20d   : > { %1649 = vst [vmem:[#allocation4 + $0x490] sm:$0xff] %v1031_v25  ;;  %1651 = vst [vmem:[#allocation4 + $0x500] sm:$0xff] %v1384_v26  ;;  %v1035_v29 = vadd.f32 %v1034_v27, %v11477_v2  ;;  %v1388_v30 = vadd.f32 %v1387_v28, %v11479_v4 }
 0x20e   : > { %v1036_v31 = vpop.f32.mrf.mxu0  ;;  %v1389_v32 = vpop.f32.mrf.mxu1 }
 0x20f   : > { %1652 = vst [vmem:[#allocation4 + $0xe8] sm:$0xff] %v1035_v29  ;;  %1654 = vst [vmem:[#allocation4 + $0x7e8] sm:$0xff] %v1388_v30  ;;  %v1037_v33 = vadd.f32 %v1036_v31, %v11481_v5  ;;  %v1390_v34 = vadd.f32 %v1389_v32, %v11483_v6 }
 0x210   : > { %v1038_v35 = vpop.f32.mrf.mxu0  ;;  %v1391_v36 = vpop.f32.mrf.mxu1 }
 0x211   : > { %1653 = vst [vmem:[#allocation4 + $0x2f0] sm:$0xff] %v1037_v33  ;;  %1655 = vst [vmem:[#allocation4 + $0x360] sm:$0xff] %v1390_v34  ;;  %v1039_v37 = vadd.f32 %v1038_v35, %v11477_v2  ;;  %v1392_v38 = vadd.f32 %v1391_v36, %v11479_v4 }
 0x212   : > { %v1040_v39 = vpop.f32.mrf.mxu0  ;;  %v1393_v40 = vpop.f32.mrf.mxu1 }
 0x213   : > { %1656 = vst [vmem:[#allocation4 + $0x60] sm:$0xff] %v1039_v37  ;;  %1658 = vst [vmem:[#allocation4 + $0x4a0] sm:$0xff] %v1392_v38  ;;  %v1041_v41 = vadd.f32 %v1040_v39, %v11481_v5  ;;  %v1394_v42 = vadd.f32 %v1393_v40, %v11483_v6 }
 0x214   : > { %v1044_v43 = vpop.f32.mrf.mxu0  ;;  %v1397_v44 = vpop.f32.mrf.mxu1 }
 0x215   : > { %1657 = vst [vmem:[#allocation4 + $0x210] sm:$0xff] %v1041_v41  ;;  %1659 = vst [vmem:[#allocation4 + $0x748] sm:$0xff] %v1394_v42  ;;  %v1045_v45 = vadd.f32 %v1044_v43, %v11477_v2  ;;  %v1398_v46 = vadd.f32 %v1397_v44, %v11479_v4 }
 0x216   : > { %v1046_v47 = vpop.f32.mrf.mxu0  ;;  %v1399_v48 = vpop.f32.mrf.mxu1 }
 0x217   : > { %1660 = vst [vmem:[#allocation4 + $0x168] sm:$0xff] %v1045_v45  ;;  %1662 = vst [vmem:[#allocation4 + $0x270] sm:$0xff] %v1398_v46  ;;  %v1047_v49 = vadd.f32 %v1046_v47, %v11481_v5  ;;  %v1400_v50 = vadd.f32 %v1399_v48, %v11483_v6 }
 0x218   : > { %v1048_v51 = vpop.f32.mrf.mxu0  ;;  %v1401_v52 = vpop.f32.mrf.mxu1 }
 0x219   : > { %1661 = vst [vmem:[#allocation4 + $0x668] sm:$0xff] %v1047_v49  ;;  %1663 = vst [vmem:[#allocation4 + $0x2d8] sm:$0xff] %v1400_v50  ;;  %v1049_v53 = vadd.f32 %v1048_v51, %v11477_v2  ;;  %v1402_v54 = vadd.f32 %v1401_v52, %v11479_v4 }
 0x21a   : > { %v1050_v55 = vpop.f32.mrf.mxu0  ;;  %v1403_v56 = vpop.f32.mrf.mxu1 }
 0x21b   : > { %1664 = vst [vmem:[#allocation4 + $0xc8] sm:$0xff] %v1049_v53  ;;  %1666 = vst [vmem:[#allocation4 + $0x48] sm:$0xff] %v1402_v54  ;;  %v1051_v57 = vadd.f32 %v1050_v55, %v11481_v5  ;;  %v1404_v58 = vadd.f32 %v1403_v56, %v11483_v6 }
 0x21c   : > { %v1054_v59 = vpop.f32.mrf.mxu0  ;;  %v1407_v60 = vpop.f32.mrf.mxu1 }
 0x21d   : > { %1665 = vst [vmem:[#allocation4 + $0xa0] sm:$0xff] %v1051_v57  ;;  %1667 = vst [vmem:[#allocation4 + $0x328] sm:$0xff] %v1404_v58  ;;  %v1055_v61 = vadd.f32 %v1054_v59, %v11477_v2  ;;  %v1408_v62 = vadd.f32 %v1407_v60, %v11479_v4 }
 0x21e   : > { %v1056_v63 = vpop.f32.mrf.mxu0  ;;  %v1409_v0 = vpop.f32.mrf.mxu1 }
 0x21f   : > { %1668 = vst [vmem:[#allocation4 + $0x7c8] sm:$0xff] %v1055_v61  ;;  %1670 = vst [vmem:[#allocation4 + $0x578] sm:$0xff] %v1408_v62  ;;  %v1057_v3 = vadd.f32 %v1056_v63, %v11481_v5  ;;  %v1410_v1 = vadd.f32 %v1409_v0, %v11483_v6 }
 0x220   : > { %v1058_v7 = vpop.f32.mrf.mxu0  ;;  %v1411_v8 = vpop.f32.mrf.mxu1 }
 0x221   : > { %1669 = vst [vmem:[#allocation4 + $0x430] sm:$0xff] %v1057_v3  ;;  %1671 = vst [vmem:[#allocation4 + $0x608] sm:$0xff] %v1410_v1  ;;  %v1059_v9 = vadd.f32 %v1058_v7, %v11477_v2  ;;  %v1412_v10 = vadd.f32 %v1411_v8, %v11479_v4 }
 0x222   : > { %v1060_v11 = vpop.f32.mrf.mxu0  ;;  %v1413_v12 = vpop.f32.mrf.mxu1 }
 0x223   : > { %1672 = vst [vmem:[#allocation4 + $0x638] sm:$0xff] %v1059_v9  ;;  %1674 = vst [vmem:[#allocation4 + $0x298] sm:$0xff] %v1412_v10  ;;  %v1061_v13 = vadd.f32 %v1060_v11, %v11481_v5  ;;  %v1414_v14 = vadd.f32 %v1413_v12, %v11483_v6 }
 0x224   : > { %v1064_v15 = vpop.f32.mrf.mxu0  ;;  %v1417_v16 = vpop.f32.mrf.mxu1 }
 0x225   : > { %1673 = vst [vmem:[#allocation4 + $0x4b8] sm:$0xff] %v1061_v13  ;;  %1675 = vst [vmem:[#allocation4 + $0x1f0] sm:$0xff] %v1414_v14  ;;  %v1065_v17 = vadd.f32 %v1064_v15, %v11477_v2  ;;  %v1418_v18 = vadd.f32 %v1417_v16, %v11479_v4 }
 0x226   : > { %v1066_v19 = vpop.f32.mrf.mxu0  ;;  %v1419_v20 = vpop.f32.mrf.mxu1 }
 0x227   : > { %1676 = vst [vmem:[#allocation4] sm:$0xff] %v1065_v17  ;;  %1678 = vst [vmem:[#allocation4 + $0x650] sm:$0xff] %v1418_v18  ;;  %v1067_v21 = vadd.f32 %v1066_v19, %v11481_v5  ;;  %v1420_v22 = vadd.f32 %v1419_v20, %v11483_v6 }
 0x228   : > { %v1068_v23 = vpop.f32.mrf.mxu0  ;;  %v1421_v24 = vpop.f32.mrf.mxu1 }
 0x229   : > { %1677 = vst [vmem:[#allocation4 + $0x2d0] sm:$0xff] %v1067_v21  ;;  %1679 = vst [vmem:[#allocation4 + $0x480] sm:$0xff] %v1420_v22  ;;  %v1069_v25 = vadd.f32 %v1068_v23, %v11477_v2  ;;  %v1422_v26 = vadd.f32 %v1421_v24, %v11479_v4 }
 0x22a   : > { %v1070_v27 = vpop.f32.mrf.mxu0  ;;  %v1423_v28 = vpop.f32.mrf.mxu1 }
 0x22b   : > { %1680 = vst [vmem:[#allocation4 + $0x3d8] sm:$0xff] %v1069_v25  ;;  %1682 = vst [vmem:[#allocation4 + $0x7d0] sm:$0xff] %v1422_v26  ;;  %v1071_v29 = vadd.f32 %v1070_v27, %v11481_v5  ;;  %v1424_v30 = vadd.f32 %v1423_v28, %v11483_v6 }
 0x22c   : > { %v1074_v31 = vpop.f32.mrf.mxu0  ;;  %v1427_v32 = vpop.f32.mrf.mxu1 }
 0x22d   : > { %1681 = vst [vmem:[#allocation4 + $0x718] sm:$0xff] %v1071_v29  ;;  %1683 = vst [vmem:[#allocation4 + $0x190] sm:$0xff] %v1424_v30  ;;  %v1075_v33 = vadd.f32 %v1074_v31, %v11477_v2  ;;  %v1428_v34 = vadd.f32 %v1427_v32, %v11479_v4 }
 0x22e   : > { %v1076_v35 = vpop.f32.mrf.mxu0  ;;  %v1429_v36 = vpop.f32.mrf.mxu1 }
 0x22f   : > { %1684 = vst [vmem:[#allocation4 + $0x710] sm:$0xff] %v1075_v33  ;;  %1686 = vst [vmem:[#allocation4 + $0x2b8] sm:$0xff] %v1428_v34  ;;  %v1077_v37 = vadd.f32 %v1076_v35, %v11481_v5  ;;  %v1430_v38 = vadd.f32 %v1429_v36, %v11483_v6 }
 0x230   : > { %v1078_v39 = vpop.f32.mrf.mxu0  ;;  %v1431_v40 = vpop.f32.mrf.mxu1 }
 0x231   : > { %1685 = vst [vmem:[#allocation4 + $0xa8] sm:$0xff] %v1077_v37  ;;  %1687 = vst [vmem:[#allocation4 + $0x238] sm:$0xff] %v1430_v38  ;;  %v1079_v41 = vadd.f32 %v1078_v39, %v11477_v2  ;;  %v1432_v42 = vadd.f32 %v1431_v40, %v11479_v4 }
 0x232   : > { %v1080_v43 = vpop.f32.mrf.mxu0  ;;  %v1433_v44 = vpop.f32.mrf.mxu1 }
 0x233   : > { %1688 = vst [vmem:[#allocation4 + $0x1b0] sm:$0xff] %v1079_v41  ;;  %1690 = vst [vmem:[#allocation4 + $0x580] sm:$0xff] %v1432_v42  ;;  %v1081_v45 = vadd.f32 %v1080_v43, %v11481_v5  ;;  %v1434_v46 = vadd.f32 %v1433_v44, %v11483_v6 }
 0x235   : > { %1689 = vst [vmem:[#allocation4 + $0x5e0] sm:$0xff] %v1081_v45  ;;  %1691 = vst [vmem:[#allocation4 + $0x150] sm:$0xff] %v1434_v46 }
 0x236   : > { %11195 = dma.done.wait (%p9674_p2), [#allocation7], 4096 }
 0x237   : > { %11197 = vsyncadd (%p9674_p2), [#allocation7], 4294963200  ;;  %v9836_v47 = vld [vmem:[#allocation2 + $0xe0] ss:$16 sps:$4 sm:$0xff]   ;;  %v9837_v48 = vld [vmem:[#allocation2 + $0xe4] ss:$16 sps:$4 sm:$0xff]  }
 0x238   : > { %8883 = vmatprep.subr.bf16.mxu0 %v9836_v47  ;;  %v9838_v2 = vld [vmem:[#allocation2 + $0xc0] ss:$16 sps:$4 sm:$0xff]   ;;  %8907 = vmatprep.subr.bf16.mxu1 %v9837_v48  ;;  %v9839_v4 = vld [vmem:[#allocation2 + $0xc4] ss:$16 sps:$4 sm:$0xff]   ;;  %v1699_v54 = vld [vmem:[#allocation5 + $0x8] sm:$0xff]  ;;  %s7762_s11 = scalar_lea.sflag [#allocation10], %s11379_s25 }
 0x239   : > { %8884 = vmatpush3.bf16.msra.mxu0 %v9836_v47  ;;  %8908 = vmatpush3.bf16.msra.mxu1 %v9837_v48  ;;  %v9840_v49 = vld [vmem:[#allocation2 + $0xa0] ss:$16 sps:$4 sm:$0xff]   ;;  %v9841_v5 = vld [vmem:[#allocation2 + $0xa4] ss:$16 sps:$4 sm:$0xff]   ;;  %v1701_v62 = vld [vmem:[#allocation5 + $0x28] sm:$0xff] }
 0x23a   : > { %8885 = vmatprep.subr.bf16.mxu0 %v9838_v2  ;;  %8909 = vmatprep.subr.bf16.mxu1 %v9839_v4  ;;  %v9842_v6 = vld [vmem:[#allocation2 + $0x80] ss:$16 sps:$4 sm:$0xff]   ;;  %v9843_v50 = vld [vmem:[#allocation2 + $0x84] ss:$16 sps:$4 sm:$0xff]   ;;  %v1702_v63 = vld [vmem:[#allocation5 + $0x18] sm:$0xff] }
 0x23b   : > { %v9844_v51 = vld [vmem:[#allocation2 + $0x60] ss:$16 sps:$4 sm:$0xff]   ;;  %v9845_v52 = vld [vmem:[#allocation2 + $0x64] ss:$16 sps:$4 sm:$0xff]   ;;  %v9852_v0 = vld [vmem:[#allocation2 + $0xe8] ss:$16 sps:$4 sm:$0xff]   ;;  %v1716_v8 = vpack.c.bf16 %v1702_v63, %v1701_v62 }
 0x23c   : > { %v9846_v53 = vld [vmem:[#allocation2 + $0x40] ss:$16 sps:$4 sm:$0xff]   ;;  %v9847_v56 = vld [vmem:[#allocation2 + $0x44] ss:$16 sps:$4 sm:$0xff]   ;;  %v9856_v7 = vld [vmem:[#allocation2 + $0xec] ss:$16 sps:$4 sm:$0xff]  }
 0x23d   : > { %8886 = vmatpush3.bf16.msra.mxu0 %v9838_v2  ;;  %8910 = vmatpush3.bf16.msra.mxu1 %v9839_v4  ;;  %v1700_v55 = vld [vmem:[#allocation5 + $0x30] sm:$0xff]  ;;  %v1703_v3 = vld [vmem:[#allocation5 + $0x20] sm:$0xff]  ;;  %v9853_v9 = vld [vmem:[#allocation2 + $0xc8] ss:$16 sps:$4 sm:$0xff]  }
 0x23e   : > { %8887 = vmatprep.subr.bf16.mxu0 %v9840_v49  ;;  %8911 = vmatprep.subr.bf16.mxu1 %v9841_v5  ;;  %v1715_v57 = vpack.c.bf16 %v1700_v55, %v1699_v54  ;;  %v9848_v58 = vld [vmem:[#allocation2 + $0x20] ss:$16 sps:$4 sm:$0xff]   ;;  %v9849_v59 = vld [vmem:[#allocation2 + $0x24] ss:$16 sps:$4 sm:$0xff]   ;;  %v1705_v11 = vld [vmem:[#allocation5 + $0x38] sm:$0xff] }
 0x23f   : > { %v9850_v60 = vld [vmem:[#allocation2] ss:$16 sps:$4 sm:$0xff]   ;;  %v9851_v61 = vld [vmem:[#allocation2 + $0x4] ss:$16 sps:$4 sm:$0xff]   ;;  %v9854_v13 = vld [vmem:[#allocation2 + $0xa8] ss:$16 sps:$4 sm:$0xff]  }
 0x240   : > { %8899 = vmatprep.mubr.bf16.mxu0 %v1715_v57  ;;  %8923 = vmatprep.mubr.bf16.mxu1 %v1715_v57  ;;  %v1704_v1 = vld [vmem:[#allocation5] sm:$0xff]  ;;  %v1706_v12 = vld [vmem:[#allocation5 + $0x10] sm:$0xff]  ;;  %v9858_v14 = vld [vmem:[#allocation2 + $0xcc] ss:$16 sps:$4 sm:$0xff]  }
 0x241   : > { %8888 = vmatpush3.bf16.msra.mxu0 %v9840_v49  ;;  %8912 = vmatpush3.bf16.msra.mxu1 %v9841_v5  ;;  %v1717_v10 = vpack.c.bf16 %v1704_v1, %v1703_v3  ;;  %v9860_v15 = vld [vmem:[#allocation2 + $0xac] ss:$16 sps:$4 sm:$0xff]   ;;  %v9855_v16 = vld [vmem:[#allocation2 + $0x88] ss:$16 sps:$4 sm:$0xff]   ;;  %v1718_v17 = vpack.c.bf16 %v1706_v12, %v1705_v11  ;;  %v9868_v27 = vld [vmem:[#allocation2 + $0xe0] ss:$16 sps:$4 sm:$0xff]  }
 0x242   : > { %8889 = vmatprep.subr.bf16.mxu0 %v9842_v6  ;;  %8913 = vmatprep.subr.bf16.mxu1 %v9843_v50  ;;  %v9862_v18 = vld [vmem:[#allocation2 + $0x8c] ss:$16 sps:$4 sm:$0xff]   ;;  %v9857_v19 = vld [vmem:[#allocation2 + $0x68] ss:$16 sps:$4 sm:$0xff]   ;;  %v9869_v28 = vld [vmem:[#allocation2 + $0xe4] ss:$16 sps:$4 sm:$0xff]  }
 0x243   : > { %v9864_v20 = vld [vmem:[#allocation2 + $0x6c] ss:$16 sps:$4 sm:$0xff]   ;;  %v9859_v21 = vld [vmem:[#allocation2 + $0x48] ss:$16 sps:$4 sm:$0xff]   ;;  %v9870_v29 = vld [vmem:[#allocation2 + $0xc0] ss:$16 sps:$4 sm:$0xff]  }
 0x244   : > { %v9865_v22 = vld [vmem:[#allocation2 + $0x4c] ss:$16 sps:$4 sm:$0xff]   ;;  %v9861_v23 = vld [vmem:[#allocation2 + $0x28] ss:$16 sps:$4 sm:$0xff]   ;;  %v9871_v30 = vld [vmem:[#allocation2 + $0xc4] ss:$16 sps:$4 sm:$0xff]  }
 0x245   : > { %8890 = vmatpush3.bf16.msra.mxu0 %v9842_v6  ;;  %8914 = vmatpush3.bf16.msra.mxu1 %v9843_v50  ;;  %v9866_v24 = vld [vmem:[#allocation2 + $0x2c] ss:$16 sps:$4 sm:$0xff]   ;;  %v9863_v25 = vld [vmem:[#allocation2 + $0x8] ss:$16 sps:$4 sm:$0xff]   ;;  %v9872_v31 = vld [vmem:[#allocation2 + $0xa0] ss:$16 sps:$4 sm:$0xff]  }
 0x246   : > { %8891 = vmatprep.subr.bf16.mxu0 %v9844_v51  ;;  %8915 = vmatprep.subr.bf16.mxu1 %v9845_v52  ;;  %v9867_v26 = vld [vmem:[#allocation2 + $0xc] ss:$16 sps:$4 sm:$0xff]   ;;  %v9873_v32 = vld [vmem:[#allocation2 + $0xa4] ss:$16 sps:$4 sm:$0xff]   ;;  %v9874_v33 = vld [vmem:[#allocation2 + $0x80] ss:$16 sps:$4 sm:$0xff]  }
 0x247   : > { %v9875_v34 = vld [vmem:[#allocation2 + $0x84] ss:$16 sps:$4 sm:$0xff]   ;;  %v9876_v35 = vld [vmem:[#allocation2 + $0x60] ss:$16 sps:$4 sm:$0xff]   ;;  %v11767_v43 = vld [vmem:[#allocation2 + $0xe8] ss:$16 sps:$4 sm:$0xff]  }
 0x248   : > { %v9877_v36 = vld [vmem:[#allocation2 + $0x64] ss:$16 sps:$4 sm:$0xff]   ;;  %v9878_v37 = vld [vmem:[#allocation2 + $0x40] ss:$16 sps:$4 sm:$0xff]   ;;  %v11769_v44 = vld [vmem:[#allocation2 + $0xec] ss:$16 sps:$4 sm:$0xff]  }
 0x249   : > { %8892 = vmatpush3.bf16.msra.mxu0 %v9844_v51  ;;  %8916 = vmatpush3.bf16.msra.mxu1 %v9845_v52  ;;  %v9879_v38 = vld [vmem:[#allocation2 + $0x44] ss:$16 sps:$4 sm:$0xff]   ;;  %v9880_v39 = vld [vmem:[#allocation2 + $0x20] ss:$16 sps:$4 sm:$0xff]   ;;  %v1881_v52 = vld [vmem:[#allocation4 + $0x768] sm:$0xff] }
 0x24a   : > { %8893 = vmatprep.subr.bf16.mxu0 %v9846_v53  ;;  %8917 = vmatprep.subr.bf16.mxu1 %v9847_v56  ;;  %v9881_v40 = vld [vmem:[#allocation2 + $0x24] ss:$16 sps:$4 sm:$0xff]   ;;  %v9882_v41 = vld [vmem:[#allocation2] ss:$16 sps:$4 sm:$0xff]  }
 0x24b   : > { %v9883_v42 = vld [vmem:[#allocation2 + $0x4] ss:$16 sps:$4 sm:$0xff]  }
 0x24c   : > { %v1882_v48 = vld [vmem:[#allocation4 + $0x110] sm:$0xff]  ;;  %v1737_v12 = vld [vmem:[#allocation4 + $0x380] sm:$0xff] }
 0x24d   : > { %8894 = vmatpush3.bf16.msra.mxu0 %v9846_v53  ;;  %8918 = vmatpush3.bf16.msra.mxu1 %v9847_v56  ;;  %v1880_v2 = vld [vmem:[#allocation4 + $0x3b0] sm:$0xff]  ;;  %v1886_v56 = vld [vmem:[#allocation4 + $0x6f8] sm:$0xff] }
 0x24e   : > { %8895 = vmatprep.subr.bf16.mxu0 %v9848_v58  ;;  %8919 = vmatprep.subr.bf16.mxu1 %v9849_v59  ;;  %v1883_v5 = vld [vmem:[#allocation4 + $0x550] sm:$0xff] }
 0x251   : > { %8896 = vmatpush3.bf16.msra.mxu0 %v9848_v58  ;;  %8920 = vmatpush3.bf16.msra.mxu1 %v9849_v59 }
 0x252   : > { %8897 = vmatprep.subr.bf16.mxu0 %v9850_v60  ;;  %8921 = vmatprep.subr.bf16.mxu1 %v9851_v61 }
 0x255   : > { %8898 = vmatpush3.bf16.msra.mxu0 %v9850_v60  ;;  %8922 = vmatpush3.bf16.msra.mxu1 %v9851_v61  ;;  %v1884_v61 = vld [vmem:[#allocation4 + $0x788] sm:$0xff] }
 0x256   : > { %8931 = vmatprep.subr.bf16.mxu0 %v9852_v0  ;;  %8955 = vmatprep.subr.bf16.mxu1 %v9856_v7 }
 0x258   : > { %8900 = vmatmul.mubr.bf16.vlgmr.msra.gmra.mxu0 %v1716_v8  ;;  %8924 = vmatmul.mubr.bf16.vlgmr.msra.gmra.mxu1 %v1716_v8 }
 0x259   : > { %8932 = vmatpush3.bf16.msra.mxu0 %v9852_v0  ;;  %8927 = vmatprep.mubr.bf16.mxu1 %v1717_v10  ;;  %v1887_v0 = vld [vmem:[#allocation4 + $0xc0] sm:$0xff] }
 0x25a   : > { %8933 = vmatprep.subr.bf16.mxu0 %v9853_v9  ;;  %8956 = vmatpush3.bf16.msra.mxu1 %v9856_v7 }
 0x25b   : > { %8903 = vmatprep.mubr.bf16.mxu0 %v1717_v10  ;;  %8957 = vmatprep.subr.bf16.mxu1 %v9858_v14 }
 0x25d   : > { %8934 = vmatpush3.bf16.msra.mxu0 %v9853_v9 }
 0x25e   : > { %8935 = vmatprep.subr.bf16.mxu0 %v9854_v13  ;;  %8958 = vmatpush3.bf16.msra.mxu1 %v9858_v14  ;;  %v1735_v14 = vld [vmem:[#allocation4 + $0x2b0] sm:$0xff] }
 0x25f   : > { %8959 = vmatprep.subr.bf16.mxu1 %v9860_v15 }
 0x260   : > { %8904 = vmatmul.mubr.bf16.gmra.mxu0 %v1718_v17  ;;  %8928 = vmatmul.mubr.bf16.gmra.mxu1 %v1718_v17 }
 0x261   : > { %8936 = vmatpush3.bf16.msra.mxu0 %v9854_v13  ;;  %8947 = vmatprep.mubr.bf16.mxu0 %v1715_v57 }
 0x262   : > { %8937 = vmatprep.subr.bf16.mxu0 %v9855_v16  ;;  %8960 = vmatpush3.bf16.msra.mxu1 %v9860_v15  ;;  %v1738_v15 = vld [vmem:[#allocation4 + $0x320] sm:$0xff] }
 0x263   : > { %8971 = vmatprep.mubr.bf16.mxu1 %v1715_v57  ;;  %8961 = vmatprep.subr.bf16.mxu1 %v9862_v18 }
 0x265   : > { %8938 = vmatpush3.bf16.msra.mxu0 %v9855_v16 }
 0x266   : > { %8939 = vmatprep.subr.bf16.mxu0 %v9857_v19  ;;  %8962 = vmatpush3.bf16.msra.mxu1 %v9862_v18 }
 0x267   : > { %8963 = vmatprep.subr.bf16.mxu1 %v9864_v20 }
 0x269   : > { %8940 = vmatpush3.bf16.msra.mxu0 %v9857_v19  ;;  %v1736_v19 = vld [vmem:[#allocation4 + $0x450] sm:$0xff] }
 0x26a   : > { %8941 = vmatprep.subr.bf16.mxu0 %v9859_v21  ;;  %8964 = vmatpush3.bf16.msra.mxu1 %v9864_v20 }
 0x26b   : > { %8965 = vmatprep.subr.bf16.mxu1 %v9865_v22 }
 0x26d   : > { %8942 = vmatpush3.bf16.msra.mxu0 %v9859_v21  ;;  %v1885_v21 = vld [vmem:[#allocation4 + $0x5a8] sm:$0xff] }
 0x26e   : > { %8943 = vmatprep.subr.bf16.mxu0 %v9861_v23  ;;  %8966 = vmatpush3.bf16.msra.mxu1 %v9865_v22 }
 0x26f   : > { %8967 = vmatprep.subr.bf16.mxu1 %v9866_v24 }
 0x271   : > { %8944 = vmatpush3.bf16.msra.mxu0 %v9861_v23  ;;  %v1741_v23 = vld [vmem:[#allocation4 + $0x3e8] sm:$0xff] }
 0x272   : > { %8945 = vmatprep.subr.bf16.mxu0 %v9863_v25  ;;  %8968 = vmatpush3.bf16.msra.mxu1 %v9866_v24 }
 0x273   : > { %8969 = vmatprep.subr.bf16.mxu1 %v9867_v26 }
 0x275   : > { %8946 = vmatpush3.bf16.msra.mxu0 %v9863_v25  ;;  %v1739_v25 = vld [vmem:[#allocation4 + $0x6e0] sm:$0xff] }
 0x276   : > { %8970 = vmatpush3.bf16.msra.mxu1 %v9867_v26  ;;  %8979 = vmatprep.subr.bf16.mxu0 %v9868_v27 }
 0x277   : > { %9003 = vmatprep.subr.bf16.mxu1 %v9869_v28 }
 0x278   : > { %8948 = vmatmul.mubr.bf16.vlgmr.msra.gmra.mxu0 %v1716_v8 }
 0x279   : > { %8951 = vmatprep.mubr.bf16.mxu0 %v1717_v10  ;;  %8972 = vmatmul.mubr.bf16.vlgmr.msra.gmra.mxu1 %v1716_v8 }
 0x27a   : > { %8975 = vmatprep.mubr.bf16.mxu1 %v1717_v10  ;;  %8980 = vmatpush3.bf16.msra.mxu0 %v9868_v27 }
 0x27b   : > { %9004 = vmatpush3.bf16.msra.mxu1 %v9869_v28  ;;  %8981 = vmatprep.subr.bf16.mxu0 %v9870_v29  ;;  %v1742_v28 = vld [vmem:[#allocation4 + $0x138] sm:$0xff] }
 0x27c   : > { %9005 = vmatprep.subr.bf16.mxu1 %v9871_v30 }
 0x27e   : > { %8982 = vmatpush3.bf16.msra.mxu0 %v9870_v29 }
 0x27f   : > { %9006 = vmatpush3.bf16.msra.mxu1 %v9871_v30  ;;  %8983 = vmatprep.subr.bf16.mxu0 %v9872_v31 }
 0x280   : > { %8952 = vmatmul.mubr.bf16.gmra.mxu0 %v1718_v17  ;;  %9007 = vmatprep.subr.bf16.mxu1 %v9873_v32 }
 0x281   : > { %8976 = vmatmul.mubr.bf16.gmra.mxu1 %v1718_v17 }
 0x282   : > { %8984 = vmatpush3.bf16.msra.mxu0 %v9872_v31 }
 0x283   : > { %9008 = vmatpush3.bf16.msra.mxu1 %v9873_v32  ;;  %8985 = vmatprep.subr.bf16.mxu0 %v9874_v33 }
 0x284   : > { %9009 = vmatprep.subr.bf16.mxu1 %v9875_v34 }
 0x286   : > { %8986 = vmatpush3.bf16.msra.mxu0 %v9874_v33 }
 0x287   : > { %9010 = vmatpush3.bf16.msra.mxu1 %v9875_v34  ;;  %8987 = vmatprep.subr.bf16.mxu0 %v9876_v35 }
 0x288   : > { %9011 = vmatprep.subr.bf16.mxu1 %v9877_v36 }
 0x28a   : > { %8988 = vmatpush3.bf16.msra.mxu0 %v9876_v35 }
 0x28b   : > { %9012 = vmatpush3.bf16.msra.mxu1 %v9877_v36  ;;  %8989 = vmatprep.subr.bf16.mxu0 %v9878_v37 }
 0x28c   : > { %9013 = vmatprep.subr.bf16.mxu1 %v9879_v38 }
 0x28e   : > { %8990 = vmatpush3.bf16.msra.mxu0 %v9878_v37  ;;  %v2067_v37 = vld [vmem:[#allocation4 + $0x518] sm:$0xff] }
 0x28f   : > { %9014 = vmatpush3.bf16.msra.mxu1 %v9879_v38  ;;  %8991 = vmatprep.subr.bf16.mxu0 %v9880_v39 }
 0x290   : > { %9015 = vmatprep.subr.bf16.mxu1 %v9881_v40 }
 0x292   : > { %8992 = vmatpush3.bf16.msra.mxu0 %v9880_v39 }
 0x293   : > { %9016 = vmatpush3.bf16.msra.mxu1 %v9881_v40  ;;  %8993 = vmatprep.subr.bf16.mxu0 %v9882_v41 }
 0x294   : > { %9017 = vmatprep.subr.bf16.mxu1 %v9883_v42 }
 0x296   : > { %8994 = vmatpush3.bf16.msra.mxu0 %v9882_v41 }
 0x297   : > { %9018 = vmatpush3.bf16.msra.mxu1 %v9883_v42  ;;  %9027 = vmatprep.subr.bf16.mxu0 %v11767_v43  ;;  %v2065_v42 = vld [vmem:[#allocation4 + $0x4d8] sm:$0xff] }
 0x298   : > { %9051 = vmatprep.subr.bf16.mxu1 %v11769_v44 }
 0x318   : > { %v8925_v45 = vpop.f32.mrf.mxu1  ;;  %v8901_v47 = vpop.f32.mrf.mxu0 }
 0x319   : > { %v1979_v49 = vadd.f32 %v8925_v45, %v1882_v48  ;;  %v1834_v18 = vadd.f32 %v8901_v47, %v1737_v12 }
 0x31a   : > { %v1970_v46 = vpop.f32.mrf.mxu1  ;;  %v1825_v50 = vpop.f32.mrf.mxu0 }
 0x31b   : > { %v1971_v51 = vadd.f32 %v1970_v46, %v1880_v2  ;;  %v8002_v55 = vmul.f32 -1.442695, %v1979_v49  ;;  %v1826_v22 = vadd.f32 %v1825_v50, %v1735_v14  ;;  %v2068_v2 = vld [vmem:[#allocation4 + $0x508] sm:$0xff] }
 0x31c   : > { %v8926_v4 = vpop.f32.mrf.mxu1  ;;  %v8902_v59 = vpop.f32.mrf.mxu0 }
 0x31d   : > { %v1982_v54 = vadd.f32 %v8926_v4, %v1883_v5  ;;  %v8000_v58 = vmul.f32 -1.442695, %v1971_v51  ;;  %10092 = vpow2.f32 %v8002_v55  ;;  %v1837_v24 = vadd.f32 %v8902_v59, %v1738_v15  ;;  %v2253_v15 = vld [vmem:[#allocation4 + $0x720] sm:$0xff] }
 0x31e   : > { %v1973_v6 = vpop.f32.mrf.mxu1  ;;  %v1828_v1 = vpop.f32.mrf.mxu0 }
 0x31f   : > { %v1974_v60 = vadd.f32 %v1973_v6, %v1881_v52  ;;  %v8003_v62 = vmul.f32 -1.442695, %v1982_v54  ;;  %10094 = vpow2.f32 %v8000_v58  ;;  %v1829_v26 = vadd.f32 %v1828_v1, %v1736_v19  ;;  %v2066_v52 = vld [vmem:[#allocation4 + $0x330] sm:$0xff]  ;;  %v2072_v19 = vld [vmem:[#allocation4 + $0x1c0] sm:$0xff] }
 0x320   : > { %v8929_v53 = vpop.f32.mrf.mxu1  ;;  %v8905_v11 = vpop.f32.mrf.mxu0 }
 0x321   : > { %v1995_v63 = vadd.f32 %v8929_v53, %v1886_v56  ;;  %v8001_v7 = vmul.f32 -1.442695, %v1974_v60  ;;  %10096 = vpow2.f32 %v8003_v62  ;;  %v1850_v30 = vadd.f32 %v8905_v11, %v1741_v23  ;;  %v2071_v60 = vld [vmem:[#allocation4 + $0x690] sm:$0xff] }
 0x322   : > { %v1986_v57 = vpop.f32.mrf.mxu1  ;;  %v1841_v17 = vpop.f32.mrf.mxu0 }
 0x323   : > { %v1987_v8 = vadd.f32 %v1986_v57, %v1884_v61  ;;  %v8006_v9 = vmul.f32 -1.442695, %v1995_v63  ;;  %10098 = vpow2.f32 %v8001_v7  ;;  %v1842_v32 = vadd.f32 %v1841_v17, %v1739_v25  ;;  %v2252_v57 = vld [vmem:[#allocation4 + $0x498] sm:$0xff]  ;;  %v2251_v25 = vld [vmem:[#allocation4 + $0x448] sm:$0xff] }
 0x324   : > { %v8930_v3 = vpop.f32.mrf.mxu1  ;;  %v8906_v29 = vpop.f32.mrf.mxu0 }
 0x325   : > { %v1998_v10 = vadd.f32 %v8930_v3, %v1887_v0  ;;  %v8004_v13 = vmul.f32 -1.442695, %v1987_v8  ;;  %10100 = vpow2.f32 %v8006_v9  ;;  %v1853_v34 = vadd.f32 %v8906_v29, %v1742_v28  ;;  %v2250_v3 = vld [vmem:[#allocation4 + $0x18] sm:$0xff] }
 0x326   : > { %v1989_v20 = vpop.f32.mrf.mxu1  ;;  %v11773_v36 = vpop.f32.mrf.mxu0  ;;  %v2069_v9 = vld [vmem:[#allocation4 + $0x338] sm:$0xff] }
 0x327   : > { %v8007_v16 = vmul.f32 -1.442695, %v1998_v10  ;;  %10102 = vpow2.f32 %v8004_v13  ;;  %v1990_v27 = vadd.f32 %v1989_v20, %v1885_v21  ;;  %v2070_v29 = vld [vmem:[#allocation4 + $0x5b8] sm:$0xff] }
 0x329   : > { %10104 = vpow2.f32 %v8007_v16  ;;  %v8005_v35 = vmul.f32 -1.442695, %v1990_v27 }
 0x32a   : > { %10106 = vtanh.f32 %v1834_v18  ;;  %v10093_v31 = vpop.eup %10092 }
 0x32b   : > { %10108 = vtanh.f32 %v1826_v22  ;;  %v2027_v39 = vadd.f32 1.0, %v10093_v31 }
 0x32c   : > { %v10095_v33 = vpop.eup %10094  ;;  %10110 = vtanh.f32 %v1837_v24 }
 0x32d   : > { %10112 = vtanh.f32 %v1829_v26  ;;  %v2025_v40 = vadd.f32 1.0, %v10095_v33 }
 0x32e   : > { %v10097_v38 = vpop.eup %10096  ;;  %10114 = vtanh.f32 %v1850_v30 }
 0x32f   : > { %10116 = vtanh.f32 %v1842_v32  ;;  %v2028_v47 = vadd.f32 1.0, %v10097_v38 }
 0x330   : > { %v10099_v45 = vpop.eup %10098  ;;  %10118 = vtanh.f32 %v1853_v34 }
 0x331   : > { %10120 = vpow2.f32 %v8005_v35  ;;  %v2026_v50 = vadd.f32 1.0, %v10099_v45  ;;  %v2256_v35 = vld [vmem:[#allocation4 + $0x368] sm:$0xff] }
 0x332   : > { %v10101_v49 = vpop.eup %10100  ;;  %10122 = vrcp.f32 %v2027_v39 }
 0x333   : > { %10124 = vrcp.f32 %v2025_v40  ;;  %v2031_v58 = vadd.f32 1.0, %v10101_v49 }
 0x334   : > { %v10103_v54 = vpop.eup %10102 }
 0x335   : > { %v2029_v7 = vadd.f32 1.0, %v10103_v54 }
 0x336   : > { %v10105_v62 = vpop.eup %10104 }
 0x337   : > { %v11775_v1 = vpop.eup %10106  ;;  %v2032_v17 = vadd.f32 1.0, %v10105_v62 }
 0x338   : > { %v8949_v41 = vpop.f32.mrf.mxu0  ;;  %v11777_v12 = vpop.eup %10108 }
 0x339   : > { %v2164_v46 = vadd.f32 %v8949_v41, %v2067_v37  ;;  %v8973_v4 = vpop.f32.mrf.mxu1  ;;  %v11779_v16 = vpop.eup %10110 }
 0x33a   : > { %v2155_v48 = vpop.f32.mrf.mxu0  ;;  %v2349_v10 = vadd.f32 %v8973_v4, %v2252_v57  ;;  %v11781_v22 = vpop.eup %10112 }
 0x33b   : > { %v8018_v5 = vmul.f32 -1.442695, %v2164_v46  ;;  %v2156_v6 = vadd.f32 %v2155_v48, %v2065_v42  ;;  %v2340_v53 = vpop.f32.mrf.mxu1  ;;  %v11783_v26 = vpop.eup %10114  ;;  %v2254_v46 = vld [vmem:[#allocation4 + $0x740] sm:$0xff] }
 0x33c   : > { %v8950_v51 = vpop.f32.mrf.mxu0  ;;  %v2341_v20 = vadd.f32 %v2340_v53, %v2250_v3  ;;  %v8034_v28 = vmul.f32 -1.442695, %v2349_v10  ;;  %v11785_v32 = vpop.eup %10116 }
 0x33d   : > { %10126 = vpow2.f32 %v8018_v5  ;;  %v8016_v55 = vmul.f32 -1.442695, %v2156_v6  ;;  %v2167_v56 = vadd.f32 %v8950_v51, %v2068_v2  ;;  %v8974_v61 = vpop.f32.mrf.mxu1  ;;  %v11787_v37 = vpop.eup %10118  ;;  %v2257_v6 = vld [vmem:[#allocation4 + $0x280] sm:$0xff] }
 0x33e   : > { %10128 = vrcp.f32 %v2028_v47  ;;  %v2158_v59 = vpop.f32.mrf.mxu0  ;;  %v2352_v30 = vadd.f32 %v8974_v61, %v2253_v15  ;;  %v8032_v39 = vmul.f32 -1.442695, %v2341_v20  ;;  %v10121_v41 = vpop.eup %10120 }
 0x33f   : > { %10130 = vpow2.f32 %v8016_v55  ;;  %v8019_v63 = vmul.f32 -1.442695, %v2167_v56  ;;  %v2159_v0 = vadd.f32 %v2158_v59, %v2066_v52  ;;  %v2343_v11 = vpop.f32.mrf.mxu1  ;;  %v11789_v48 = vpop.eup %10122  ;;  %v2255_v56 = vld [vmem:[#allocation4 + $0x568] sm:$0xff]  ;;  %v2030_v20 = vadd.f32 1.0, %v10121_v41 }
 0x340   : > { %10132 = vrcp.f32 %v2026_v50  ;;  %v8953_v8 = vpop.f32.mrf.mxu0  ;;  %v2344_v40 = vadd.f32 %v2343_v11, %v2251_v25  ;;  %v8035_v2 = vmul.f32 -1.442695, %v2352_v30  ;;  %v11791_v49 = vpop.eup %10124  ;;  %v1709_v30 = vld [vmem:[#allocation6 + $0x28] sm:$0xff]  ;;  %v2421_v41 = vmul.f32 %v11789_v48, %v11775_v1 }
 0x341   : > { %10134 = vpow2.f32 %v8019_v63  ;;  %v8017_v13 = vmul.f32 -1.442695, %v2159_v0  ;;  %v2180_v14 = vadd.f32 %v8953_v8, %v2071_v60  ;;  %v8977_v21 = vpop.f32.mrf.mxu1 }
 0x342   : > { %10136 = vrcp.f32 %v2031_v58  ;;  %v2171_v18 = vpop.f32.mrf.mxu0  ;;  %v2365_v4 = vadd.f32 %v8977_v21, %v2256_v35  ;;  %v8033_v51 = vmul.f32 -1.442695, %v2344_v40 }
 0x343   : > { %10138 = vpow2.f32 %v8017_v13  ;;  %v8022_v23 = vmul.f32 -1.442695, %v2180_v14  ;;  %v2172_v24 = vadd.f32 %v2171_v18, %v2069_v9  ;;  %v2356_v31 = vpop.f32.mrf.mxu1 }
 0x344   : > { %10140 = vrcp.f32 %v2029_v7  ;;  %v8954_v27 = vpop.f32.mrf.mxu0  ;;  %v2357_v52 = vadd.f32 %v2356_v31, %v2254_v46  ;;  %v8038_v58 = vmul.f32 -1.442695, %v2365_v4 }
 0x345   : > { %10142 = vpow2.f32 %v8022_v23  ;;  %v8020_v33 = vmul.f32 -1.442695, %v2172_v24  ;;  %v2183_v34 = vadd.f32 %v8954_v27, %v2072_v19  ;;  %v8978_v47 = vpop.f32.mrf.mxu1 }
 0x346   : > { %10144 = vrcp.f32 %v2032_v17  ;;  %v2174_v38 = vpop.f32.mrf.mxu0  ;;  %v2368_v59 = vadd.f32 %v8978_v47, %v2257_v6  ;;  %v8036_v63 = vmul.f32 -1.442695, %v2357_v52  ;;  %v1740_v17 = vld [vmem:[#allocation4 + $0x2e0] sm:$0xff] }
 0x347   : > { %10146 = vpow2.f32 %v8020_v33  ;;  %v8023_v42 = vmul.f32 -1.442695, %v2183_v34  ;;  %v2175_v45 = vadd.f32 %v2174_v38, %v2070_v29  ;;  %v2359_v55 = vpop.f32.mrf.mxu1  ;;  %v1845_v25 = vadd.f32 %v11773_v36, %v1740_v17  ;;  %v1707_v38 = vld [vmem:[#allocation6 + $0x18] sm:$0xff] }
 0x348   : > { %10148 = vpow2.f32 %v8034_v28  ;;  %v2360_v0 = vadd.f32 %v2359_v55, %v2255_v56  ;;  %v8039_v9 = vmul.f32 -1.442695, %v2368_v59  ;;  %v1713_v56 = vld [vmem:[#allocation6] sm:$0xff] }
 0x349   : > { %10150 = vpow2.f32 %v8023_v42  ;;  %v8021_v5 = vmul.f32 -1.442695, %v2175_v45  ;;  %v1710_v45 = vld [vmem:[#allocation6 + $0x8] sm:$0xff] }
 0x34a   : > { %v10127_v50 = vpop.eup %10126  ;;  %10152 = vpow2.f32 %v8032_v39  ;;  %v8037_v14 = vmul.f32 -1.442695, %v2360_v0 }
 0x34b   : > { %v11793_v53 = vpop.eup %10128  ;;  %v2212_v54 = vadd.f32 1.0, %v10127_v50  ;;  %10154 = vpow2.f32 %v8021_v5  ;;  %v1708_v50 = vld [vmem:[#allocation6 + $0x30] sm:$0xff] }
 0x34c   : > { %v10131_v57 = vpop.eup %10130  ;;  %10156 = vpow2.f32 %v8035_v2  ;;  %v2419_v2 = vmul.f32 %v11791_v49, %v11777_v12  ;;  %v2422_v1 = vmul.f32 %v11793_v53, %v11779_v16  ;;  %v1711_v16 = vld [vmem:[#allocation6 + $0x38] sm:$0xff] }
 0x34d   : > { %v11795_v60 = vpop.eup %10132  ;;  %10158 = vrcp.f32 %v2212_v54  ;;  %v2210_v61 = vadd.f32 1.0, %v10131_v57 }
 0x34e   : > { %v10135_v62 = vpop.eup %10134  ;;  %10160 = vpow2.f32 %v8033_v51  ;;  %v2420_v57 = vmul.f32 %v11795_v60, %v11781_v22  ;;  %v1714_v22 = vld [vmem:[#allocation6 + $0x20] sm:$0xff] }
 0x34f   : > { %v11797_v3 = vpop.eup %10136  ;;  %10162 = vrcp.f32 %v2210_v61  ;;  %v2213_v7 = vadd.f32 1.0, %v10135_v62 }
 0x350   : > { %v10139_v8 = vpop.eup %10138  ;;  %10164 = vpow2.f32 %v8038_v58 }
 0x351   : > { %v11799_v10 = vpop.eup %10140  ;;  %10166 = vrcp.f32 %v2213_v7  ;;  %v2211_v11 = vadd.f32 1.0, %v10139_v8 }
 0x352   : > { %v10143_v13 = vpop.eup %10142  ;;  %10168 = vpow2.f32 %v8036_v63  ;;  %v2425_v63 = vmul.f32 %v11797_v3, %v11783_v26  ;;  %v1712_v26 = vld [vmem:[#allocation6 + $0x10] sm:$0xff] }
 0x353   : > { %v11801_v15 = vpop.eup %10144  ;;  %10170 = vrcp.f32 %v2211_v11  ;;  %v2216_v18 = vadd.f32 1.0, %v10143_v13  ;;  %v2423_v11 = vmul.f32 %v11799_v10, %v11785_v32 }
 0x354   : > { %v10147_v19 = vpop.eup %10146  ;;  %10172 = vpow2.f32 %v8039_v9 }
 0x355   : > { %v10149_v21 = vpop.eup %10148  ;;  %10174 = vrcp.f32 %v2216_v18  ;;  %v2214_v23 = vadd.f32 1.0, %v10147_v19  ;;  %v2426_v19 = vmul.f32 %v11801_v15, %v11787_v37 }
 0x356   : > { %v10151_v24 = vpop.eup %10150  ;;  %10176 = vpow2.f32 %v8037_v14  ;;  %v2397_v33 = vadd.f32 1.0, %v10149_v21 }
 0x357   : > { %v10153_v27 = vpop.eup %10152  ;;  %10178 = vrcp.f32 %v2214_v23  ;;  %v2217_v28 = vadd.f32 1.0, %v10151_v24 }
 0x358   : > { %v10155_v29 = vpop.eup %10154  ;;  %10180 = vrcp.f32 %v2030_v20  ;;  %v2395_v39 = vadd.f32 1.0, %v10153_v27 }
 0x359   : > { %v10157_v31 = vpop.eup %10156  ;;  %10182 = vrcp.f32 %v2217_v28  ;;  %v2215_v34 = vadd.f32 1.0, %v10155_v29 }
 0x35a   : > { %v10159_v35 = vpop.eup %10158  ;;  %10184 = vtanh.f32 %v1845_v25  ;;  %v2398_v46 = vadd.f32 1.0, %v10157_v31 }
 0x35b   : > { %v10161_v40 = vpop.eup %10160  ;;  %v2429_v36 = vmul.f32 %v10159_v35, %v1709_v30  ;;  %10186 = vrcp.f32 %v2215_v34 }
 0x35c   : > { %v10163_v42 = vpop.eup %10162  ;;  %10188 = vrcp.f32 %v2397_v33  ;;  %v2396_v51 = vadd.f32 1.0, %v10161_v40 }
 0x35d   : > { %v10165_v47 = vpop.eup %10164  ;;  %v11808_v4 = vadd.f32 %v2429_v36, %v2421_v41  ;;  %v2427_v5 = vmul.f32 %v10163_v42, %v1707_v38  ;;  %10190 = vrcp.f32 %v2395_v39 }
 0x35e   : > { %v10167_v6 = vpop.eup %10166  ;;  %v2401_v12 = vadd.f32 1.0, %v10165_v47 }
 0x35f   : > { %v10169_v52 = vpop.eup %10168  ;;  %10192 = vtanh.f32 %v11808_v4  ;;  %v11813_v48 = vadd.f32 %v2427_v5, %v2419_v2  ;;  %v2430_v54 = vmul.f32 %v10167_v6, %v1710_v45  ;;  %v9886_v5 = vld [vmem:[#allocation2 + $0xc8] ss:$16 sps:$4 sm:$0xff]   ;;  %v9887_v6 = vld [vmem:[#allocation2 + $0xcc] ss:$16 sps:$4 sm:$0xff]  }
 0x360   : > { %v10171_v55 = vpop.eup %10170  ;;  %10194 = vrcp.f32 %v2398_v46  ;;  %v2399_v53 = vadd.f32 1.0, %v10169_v52 }
 0x361   : > { %v10173_v49 = vpop.eup %10172  ;;  %v11817_v58 = vadd.f32 %v2430_v54, %v2422_v1  ;;  %v2428_v59 = vmul.f32 %v10171_v55, %v1708_v50  ;;  %10196 = vtanh.f32 %v11813_v48  ;;  %v9888_v55 = vld [vmem:[#allocation2 + $0xa8] ss:$16 sps:$4 sm:$0xff]  }
 0x362   : > { %v10175_v61 = vpop.eup %10174  ;;  %10198 = vrcp.f32 %v2396_v51  ;;  %v2402_v60 = vadd.f32 1.0, %v10173_v49 }
 0x363   : > { %v10177_v62 = vpop.eup %10176  ;;  %10200 = vtanh.f32 %v11817_v58  ;;  %v11823_v0 = vadd.f32 %v2428_v59, %v2420_v57  ;;  %v2433_v7 = vmul.f32 %v10175_v61, %v1713_v56  ;;  %v9889_v56 = vld [vmem:[#allocation2 + $0xac] ss:$16 sps:$4 sm:$0xff]   ;;  %v9892_v59 = vld [vmem:[#allocation2 + $0x68] ss:$16 sps:$4 sm:$0xff]  }
 0x364   : > { %v10179_v8 = vpop.eup %10178  ;;  %10202 = vrcp.f32 %v2401_v12  ;;  %v2400_v3 = vadd.f32 1.0, %v10177_v62  ;;  %v9893_v61 = vld [vmem:[#allocation2 + $0x6c] ss:$16 sps:$4 sm:$0xff]   ;;  %v9896_v62 = vld [vmem:[#allocation2 + $0x28] ss:$16 sps:$4 sm:$0xff]  }
 0x365   : > { %v10181_v9 = vpop.eup %10180  ;;  %v11827_v13 = vadd.f32 %v2433_v7, %v2425_v63  ;;  %v2431_v14 = vmul.f32 %v10179_v8, %v1711_v16  ;;  %10204 = vtanh.f32 %v11823_v0  ;;  %v9894_v16 = vld [vmem:[#allocation2 + $0x48] ss:$16 sps:$4 sm:$0xff]   ;;  %v9897_v63 = vld [vmem:[#allocation2 + $0x2c] ss:$16 sps:$4 sm:$0xff]  }
 0x366   : > { %v10183_v17 = vpop.eup %10182  ;;  %10206 = vrcp.f32 %v2399_v53  ;;  %v9895_v53 = vld [vmem:[#allocation2 + $0x4c] ss:$16 sps:$4 sm:$0xff]   ;;  %v9898_v7 = vld [vmem:[#allocation2 + $0x8] ss:$16 sps:$4 sm:$0xff]  }
 0x367   : > { %v10185_v18 = vpop.eup %10184  ;;  %v11832_v20 = vadd.f32 %v2431_v14, %v2423_v11  ;;  %v2434_v21 = vmul.f32 %v10183_v17, %v1714_v22  ;;  %10208 = vtanh.f32 %v11827_v13  ;;  %v9899_v8 = vld [vmem:[#allocation2 + $0xc] ss:$16 sps:$4 sm:$0xff]   ;;  %v9900_v22 = vld [vmem:[#allocation2 + $0xe0] ss:$16 sps:$4 sm:$0xff]   ;;  %v9903_v11 = vld [vmem:[#allocation2 + $0xc4] ss:$16 sps:$4 sm:$0xff]  }
 0x368   : > { %v10187_v23 = vpop.eup %10186  ;;  %10210 = vrcp.f32 %v2402_v60  ;;  %v2424_v32 = vmul.f32 %v10185_v18, %v10181_v9  ;;  %v9901_v60 = vld [vmem:[#allocation2 + $0xe4] ss:$16 sps:$4 sm:$0xff]   ;;  %v9902_v9 = vld [vmem:[#allocation2 + $0xc0] ss:$16 sps:$4 sm:$0xff]  }
 0x369   : > { %v11835_v10 = vadd.f32 %v2434_v21, %v2426_v19  ;;  %v2432_v24 = vmul.f32 %v10187_v23, %v1712_v26  ;;  %10212 = vtanh.f32 %v11832_v20  ;;  %v10189_v25 = vpop.eup %10188  ;;  %v9904_v14 = vld [vmem:[#allocation2 + $0xa0] ss:$16 sps:$4 sm:$0xff]   ;;  %v9905_v17 = vld [vmem:[#allocation2 + $0xa4] ss:$16 sps:$4 sm:$0xff]  }
 0x36a   : > { %10214 = vrcp.f32 %v2400_v3  ;;  %v10191_v27 = vpop.eup %10190  ;;  %v9906_v26 = vld [vmem:[#allocation2 + $0x80] ss:$16 sps:$4 sm:$0xff]   ;;  %v9907_v3 = vld [vmem:[#allocation2 + $0x84] ss:$16 sps:$4 sm:$0xff]  }
 0x36b   : > { %v11838_v28 = vadd.f32 %v2432_v24, %v2424_v32  ;;  %10216 = vtanh.f32 %v11835_v10  ;;  %v9908_v18 = vld [vmem:[#allocation2 + $0x60] ss:$16 sps:$4 sm:$0xff]   ;;  %v9909_v19 = vld [vmem:[#allocation2 + $0x64] ss:$16 sps:$4 sm:$0xff]  }
 0x36c   : > { %v10193_v37 = vpop.eup %10192  ;;  %v9910_v21 = vld [vmem:[#allocation2 + $0x40] ss:$16 sps:$4 sm:$0xff]   ;;  %v9911_v23 = vld [vmem:[#allocation2 + $0x44] ss:$16 sps:$4 sm:$0xff]  }
 0x36d   : > { %v10195_v15 = vpop.eup %10194  ;;  %v2453_v29 = vmul.f32 %v10193_v37, %v10189_v25  ;;  %10218 = vtanh.f32 %v11838_v28  ;;  %v9912_v32 = vld [vmem:[#allocation2 + $0x20] ss:$16 sps:$4 sm:$0xff]   ;;  %v9913_v24 = vld [vmem:[#allocation2 + $0x24] ss:$16 sps:$4 sm:$0xff]   ;;  %v11858_v37 = vld [vmem:[#allocation2 + $0xe8] ss:$16 sps:$4 sm:$0xff]  }
 0x36e   : > { %v10197_v30 = vpop.eup %10196  ;;  %v9914_v25 = vld [vmem:[#allocation2] ss:$16 sps:$4 sm:$0xff]  }
 0x36f   : > { %v10199_v31 = vpop.eup %10198  ;;  %v2451_v33 = vmul.f32 %v10197_v30, %v10191_v27  ;;  %2461 = vst [vmem:[%s11390_s28 + $0x10] sm:$0xff] %v2453_v29  ;;  %v9915_v27 = vld [vmem:[#allocation2 + $0x4] ss:$16 sps:$4 sm:$0xff]  }
 0x370   : > { %v10201_v34 = vpop.eup %10200 }
 0x371   : > { %v10203_v35 = vpop.eup %10202  ;;  %2459 = vst [vmem:[%s11390_s28] sm:$0xff] %v2451_v33  ;;  %v2454_v38 = vmul.f32 %v10201_v34, %v10195_v15  ;;  %v11860_v15 = vld [vmem:[#allocation2 + $0xec] ss:$16 sps:$4 sm:$0xff]   ;;  %v2633_v34 = vld [vmem:[#allocation4 + $0x3c0] sm:$0xff] }
 0x372   : > { %v10205_v39 = vpop.eup %10204 }
 0x373   : > { %v10207_v40 = vpop.eup %10206  ;;  %v2452_v41 = vmul.f32 %v10205_v39, %v10199_v31  ;;  %2462 = vst [vmem:[%s11390_s28 + $0x18] sm:$0xff] %v2454_v38  ;;  %v11846_v2 = vpack.c.bf16 %v2454_v38, %v2453_v29  ;;  %v2636_v39 = vld [vmem:[#allocation4 + $0x5c0] sm:$0xff] }
 0x374   : > { %v10209_v36 = vpop.eup %10208 }
 0x375   : > { %v10211_v42 = vpop.eup %10210  ;;  %2460 = vst [vmem:[%s11390_s28 + $0x8] sm:$0xff] %v2452_v41  ;;  %v2467_v45 = vpack.c.bf16 %v2452_v41, %v2451_v33  ;;  %v2457_v46 = vmul.f32 %v10209_v36, %v10203_v35  ;;  %v2635_v33 = vld [vmem:[#allocation4 + $0x6a8] sm:$0xff] }
 0x376   : > { %v10213_v47 = vpop.eup %10212 }
 0x377   : > { %v10215_v50 = vpop.eup %10214  ;;  %8995 = vmatprep.mubr.bf16.mxu0 %v2467_v45  ;;  %9019 = vmatprep.mubr.bf16.mxu1 %v2467_v45  ;;  %v2455_v51 = vmul.f32 %v10213_v47, %v10207_v40  ;;  %2465 = vst [vmem:[%s11390_s28 + $0x30] sm:$0xff] %v2457_v46 }
 0x378   : > { %v10217_v52 = vpop.eup %10216  ;;  %8996 = vmatmul.mubr.bf16.vlgmr.msra.gmra.mxu0 %v11846_v2  ;;  %9020 = vmatmul.mubr.bf16.vlgmr.msra.gmra.mxu1 %v11846_v2 }
 0x379   : > { %9028 = vmatpush3.bf16.msra.mxu0 %v11767_v43  ;;  %9052 = vmatpush3.bf16.msra.mxu1 %v11769_v44  ;;  %2463 = vst [vmem:[%s11390_s28 + $0x20] sm:$0xff] %v2455_v51  ;;  %v2458_v1 = vmul.f32 %v10217_v52, %v10211_v42  ;;  %v9890_v43 = vld [vmem:[#allocation2 + $0x88] ss:$16 sps:$4 sm:$0xff]   ;;  %v9891_v44 = vld [vmem:[#allocation2 + $0x8c] ss:$16 sps:$4 sm:$0xff]   ;;  %v2634_v42 = vld [vmem:[#allocation4 + $0x4c0] sm:$0xff] }
 0x37a   : > { %v10219_v54 = vpop.eup %10218  ;;  %9029 = vmatprep.subr.bf16.mxu0 %v9886_v5  ;;  %9053 = vmatprep.subr.bf16.mxu1 %v9887_v6 }
 0x37b   : > { %v2456_v12 = vmul.f32 %v10219_v54, %v10215_v50  ;;  %2466 = vst [vmem:[%s11390_s28 + $0x38] sm:$0xff] %v2458_v1  ;;  %v2470_v57 = vpack.c.bf16 %v2458_v1, %v2457_v46  ;;  %v2639_v46 = vld [vmem:[#allocation4 + $0x3a0] sm:$0xff] }
 0x37c   : > { %v2637_v54 = vld [vmem:[#allocation4 + $0x520] sm:$0xff] }
 0x37d   : > { %9030 = vmatpush3.bf16.msra.mxu0 %v9886_v5  ;;  %9054 = vmatpush3.bf16.msra.mxu1 %v9887_v6  ;;  %2464 = vst [vmem:[%s11390_s28 + $0x28] sm:$0xff] %v2456_v12  ;;  %v2469_v49 = vpack.c.bf16 %v2456_v12, %v2455_v51  ;;  %v2640_v12 = vld [vmem:[#allocation4 + $0x440] sm:$0xff] }
 0x37e   : > { %9031 = vmatprep.subr.bf16.mxu0 %v9888_v55  ;;  %9055 = vmatprep.subr.bf16.mxu1 %v9889_v56 }
 0x37f   : > { %8999 = vmatprep.mubr.bf16.mxu0 %v2469_v49  ;;  %9023 = vmatprep.mubr.bf16.mxu1 %v2469_v49 }
 0x380   : > { %9000 = vmatmul.mubr.bf16.gmra.mxu0 %v2470_v57  ;;  %9024 = vmatmul.mubr.bf16.gmra.mxu1 %v2470_v57 }
 0x381   : > { %9032 = vmatpush3.bf16.msra.mxu0 %v9888_v55  ;;  %9056 = vmatpush3.bf16.msra.mxu1 %v9889_v56 }
 0x382   : > { %9043 = vmatprep.mubr.bf16.mxu0 %v2467_v45  ;;  %9067 = vmatprep.mubr.bf16.mxu1 %v2467_v45 }
 0x383   : > { %9033 = vmatprep.subr.bf16.mxu0 %v9890_v43  ;;  %9057 = vmatprep.subr.bf16.mxu1 %v9891_v44 }
 0x385   : > { %9034 = vmatpush3.bf16.msra.mxu0 %v9890_v43  ;;  %9058 = vmatpush3.bf16.msra.mxu1 %v9891_v44 }
 0x386   : > { %9035 = vmatprep.subr.bf16.mxu0 %v9892_v59  ;;  %9059 = vmatprep.subr.bf16.mxu1 %v9893_v61 }
 0x389   : > { %9036 = vmatpush3.bf16.msra.mxu0 %v9892_v59  ;;  %9060 = vmatpush3.bf16.msra.mxu1 %v9893_v61  ;;  %v2490_v61 = vld [vmem:[#allocation4 + $0x400] sm:$0xff] }
 0x38a   : > { %9037 = vmatprep.subr.bf16.mxu0 %v9894_v16  ;;  %9061 = vmatprep.subr.bf16.mxu1 %v9895_v53 }
 0x38d   : > { %9038 = vmatpush3.bf16.msra.mxu0 %v9894_v16  ;;  %9062 = vmatpush3.bf16.msra.mxu1 %v9895_v53  ;;  %v2488_v53 = vld [vmem:[#allocation4 + $0x100] sm:$0xff] }
 0x38e   : > { %9039 = vmatprep.subr.bf16.mxu0 %v9896_v62  ;;  %9063 = vmatprep.subr.bf16.mxu1 %v9897_v63 }
 0x391   : > { %9040 = vmatpush3.bf16.msra.mxu0 %v9896_v62  ;;  %9064 = vmatpush3.bf16.msra.mxu1 %v9897_v63  ;;  %v2491_v62 = vld [vmem:[#allocation4 + $0x6c8] sm:$0xff] }
 0x392   : > { %9041 = vmatprep.subr.bf16.mxu0 %v9898_v7  ;;  %9065 = vmatprep.subr.bf16.mxu1 %v9899_v8 }
 0x395   : > { %9042 = vmatpush3.bf16.msra.mxu0 %v9898_v7  ;;  %9066 = vmatpush3.bf16.msra.mxu1 %v9899_v8 }
 0x396   : > { %9075 = vmatprep.subr.bf16.mxu0 %v9900_v22  ;;  %9099 = vmatprep.subr.bf16.mxu1 %v9901_v60 }
 0x398   : > { %9044 = vmatmul.mubr.bf16.vlgmr.msra.gmra.mxu0 %v11846_v2  ;;  %9068 = vmatmul.mubr.bf16.vlgmr.msra.gmra.mxu1 %v11846_v2 }
 0x399   : > { %9047 = vmatprep.mubr.bf16.mxu0 %v2469_v49  ;;  %9071 = vmatprep.mubr.bf16.mxu1 %v2469_v49 }
 0x39a   : > { %9076 = vmatpush3.bf16.msra.mxu0 %v9900_v22  ;;  %9100 = vmatpush3.bf16.msra.mxu1 %v9901_v60  ;;  %v2489_v22 = vld [vmem:[#allocation4 + $0x618] sm:$0xff] }
 0x39b   : > { %9077 = vmatprep.subr.bf16.mxu0 %v9902_v9  ;;  %9101 = vmatprep.subr.bf16.mxu1 %v9903_v11 }
 0x39e   : > { %9078 = vmatpush3.bf16.msra.mxu0 %v9902_v9  ;;  %9102 = vmatpush3.bf16.msra.mxu1 %v9903_v11  ;;  %v2638_v9 = vld [vmem:[#allocation4 + $0x420] sm:$0xff] }
 0x39f   : > { %9079 = vmatprep.subr.bf16.mxu0 %v9904_v14  ;;  %9103 = vmatprep.subr.bf16.mxu1 %v9905_v17 }
 0x3a0   : > { %9048 = vmatmul.mubr.bf16.gmra.mxu0 %v2470_v57  ;;  %9072 = vmatmul.mubr.bf16.gmra.mxu1 %v2470_v57 }
 0x3a2   : > { %9080 = vmatpush3.bf16.msra.mxu0 %v9904_v14  ;;  %9104 = vmatpush3.bf16.msra.mxu1 %v9905_v17  ;;  %v2494_v14 = vld [vmem:[#allocation4 + $0x148] sm:$0xff] }
 0x3a3   : > { %9081 = vmatprep.subr.bf16.mxu0 %v9906_v26  ;;  %9105 = vmatprep.subr.bf16.mxu1 %v9907_v3 }
 0x3a6   : > { %9082 = vmatpush3.bf16.msra.mxu0 %v9906_v26  ;;  %9106 = vmatpush3.bf16.msra.mxu1 %v9907_v3  ;;  %v2492_v26 = vld [vmem:[#allocation4 + $0x770] sm:$0xff] }
 0x3a7   : > { %9083 = vmatprep.subr.bf16.mxu0 %v9908_v18  ;;  %9107 = vmatprep.subr.bf16.mxu1 %v9909_v19 }
 0x3aa   : > { %9084 = vmatpush3.bf16.msra.mxu0 %v9908_v18  ;;  %9108 = vmatpush3.bf16.msra.mxu1 %v9909_v19  ;;  %v2495_v18 = vld [vmem:[#allocation4 + $0x38] sm:$0xff] }
 0x3ab   : > { %9085 = vmatprep.subr.bf16.mxu0 %v9910_v21  ;;  %9109 = vmatprep.subr.bf16.mxu1 %v9911_v23 }
 0x3ae   : > { %9086 = vmatpush3.bf16.msra.mxu0 %v9910_v21  ;;  %9110 = vmatpush3.bf16.msra.mxu1 %v9911_v23 }
 0x3af   : > { %9087 = vmatprep.subr.bf16.mxu0 %v9912_v32  ;;  %9111 = vmatprep.subr.bf16.mxu1 %v9913_v24 }
 0x3b2   : > { %9088 = vmatpush3.bf16.msra.mxu0 %v9912_v32  ;;  %9112 = vmatpush3.bf16.msra.mxu1 %v9913_v24 }
 0x3b3   : > { %9089 = vmatprep.subr.bf16.mxu0 %v9914_v25  ;;  %9113 = vmatprep.subr.bf16.mxu1 %v9915_v27 }
 0x3b6   : > { %9090 = vmatpush3.bf16.msra.mxu0 %v9914_v25  ;;  %9114 = vmatpush3.bf16.msra.mxu1 %v9915_v27 }
 0x3b7   : > { %9123 = vmatprep.subr.bf16.mxu0 %v11858_v37  ;;  %9147 = vmatprep.subr.bf16.mxu1 %v11860_v15 }
 0x438   : > { %v9021_v29 = vpop.f32.mrf.mxu1  ;;  %v8997_v30 = vpop.f32.mrf.mxu0 }
 0x439   : > { %v2732_v40 = vadd.f32 %v9021_v29, %v2635_v33  ;;  %v2587_v8 = vadd.f32 %v8997_v30, %v2490_v61 }
 0x43a   : > { %v2723_v31 = vpop.f32.mrf.mxu1  ;;  %v2578_v38 = vpop.f32.mrf.mxu0 }
 0x43b   : > { %v2724_v36 = vadd.f32 %v2723_v31, %v2633_v34  ;;  %v8058_v5 = vmul.f32 -1.442695, %v2732_v40  ;;  %v2579_v11 = vadd.f32 %v2578_v38, %v2488_v53  ;;  %v2820_v34 = vld [vmem:[#allocation4 + $0x3f8] sm:$0xff] }
 0x43c   : > { %v9022_v35 = vpop.f32.mrf.mxu1  ;;  %v8998_v2 = vpop.f32.mrf.mxu0 }
 0x43d   : > { %v2735_v45 = vadd.f32 %v9022_v35, %v2636_v39  ;;  %v8056_v51 = vmul.f32 -1.442695, %v2724_v36  ;;  %10220 = vpow2.f32 %v8058_v5  ;;  %v2590_v17 = vadd.f32 %v8998_v2, %v2491_v62  ;;  %v2821_v5 = vld [vmem:[#allocation4 + $0x5e8] sm:$0xff] }
 0x43e   : > { %v2726_v41 = vpop.f32.mrf.mxu1  ;;  %v2581_v55 = vpop.f32.mrf.mxu0 }
 0x43f   : > { %v2727_v6 = vadd.f32 %v2726_v41, %v2634_v42  ;;  %v8059_v1 = vmul.f32 -1.442695, %v2735_v45  ;;  %10222 = vpow2.f32 %v8056_v51  ;;  %v2582_v3 = vadd.f32 %v2581_v55, %v2489_v22  ;;  %v2818_v45 = vld [vmem:[#allocation4 + $0x558] sm:$0xff]  ;;  %v2819_v55 = vld [vmem:[#allocation4 + $0x70] sm:$0xff]  ;;  %v2822_v22 = vld [vmem:[#allocation4 + $0x640] sm:$0xff] }
 0x440   : > { %v9025_v47 = vpop.f32.mrf.mxu1  ;;  %v9001_v44 = vpop.f32.mrf.mxu0 }
 0x441   : > { %v2748_v52 = vadd.f32 %v9025_v47, %v2639_v46  ;;  %v8057_v56 = vmul.f32 -1.442695, %v2727_v6  ;;  %10224 = vpow2.f32 %v8059_v1  ;;  %v2603_v23 = vadd.f32 %v9001_v44, %v2494_v14 }
 0x442   : > { %v2739_v50 = vpop.f32.mrf.mxu1  ;;  %v2594_v63 = vpop.f32.mrf.mxu0 }
 0x443   : > { %v8062_v57 = vmul.f32 -1.442695, %v2748_v52  ;;  %v2740_v43 = vadd.f32 %v2739_v50, %v2637_v54  ;;  %10226 = vpow2.f32 %v8057_v56  ;;  %v2595_v24 = vadd.f32 %v2594_v63, %v2492_v26 }
 0x444   : > { %v9026_v49 = vpop.f32.mrf.mxu1  ;;  %v9002_v19 = vpop.f32.mrf.mxu0 }
 0x445   : > { %v2751_v59 = vadd.f32 %v9026_v49, %v2640_v12  ;;  %10228 = vpow2.f32 %v8062_v57  ;;  %v8060_v16 = vmul.f32 -1.442695, %v2740_v43  ;;  %v2606_v27 = vadd.f32 %v9002_v19, %v2495_v18  ;;  %v3005_v49 = vld [vmem:[#allocation4 + $0x2e8] sm:$0xff]  ;;  %v2825_v19 = vld [vmem:[#allocation4 + $0x50] sm:$0xff] }
 0x446   : > { %v2742_v60 = vpop.f32.mrf.mxu1  ;;  %v11864_v33 = vpop.f32.mrf.mxu0 }
 0x447   : > { %v8063_v7 = vmul.f32 -1.442695, %v2751_v59  ;;  %10230 = vpow2.f32 %v8060_v16  ;;  %v2743_v21 = vadd.f32 %v2742_v60, %v2638_v9  ;;  %v2824_v59 = vld [vmem:[#allocation4 + $0x4e8] sm:$0xff] }
 0x449   : > { %10232 = vpow2.f32 %v8063_v7  ;;  %v8061_v30 = vmul.f32 -1.442695, %v2743_v21  ;;  %v3003_v7 = vld [vmem:[#allocation4 + $0x3e0] sm:$0xff] }
 0x44a   : > { %10234 = vtanh.f32 %v2587_v8  ;;  %v10221_v32 = vpop.eup %10220 }
 0x44b   : > { %10236 = vtanh.f32 %v2579_v11  ;;  %v2780_v31 = vadd.f32 1.0, %v10221_v32 }
 0x44c   : > { %v10223_v25 = vpop.eup %10222  ;;  %10238 = vtanh.f32 %v2590_v17 }
 0x44d   : > { %10240 = vtanh.f32 %v2582_v3  ;;  %v2778_v38 = vadd.f32 1.0, %v10223_v25 }
 0x44e   : > { %v10225_v29 = vpop.eup %10224  ;;  %10242 = vtanh.f32 %v2603_v23 }
 0x44f   : > { %10244 = vtanh.f32 %v2595_v24  ;;  %v2781_v40 = vadd.f32 1.0, %v10225_v29 }
 0x450   : > { %v10227_v35 = vpop.eup %10226  ;;  %10246 = vtanh.f32 %v2606_v27  ;;  %v3006_v27 = vld [vmem:[#allocation4 + $0x5f8] sm:$0xff] }
 0x451   : > { %10248 = vpow2.f32 %v8061_v30  ;;  %v2779_v46 = vadd.f32 1.0, %v10227_v35  ;;  %v2823_v30 = vld [vmem:[#allocation4 + $0xe0] sm:$0xff] }
 0x452   : > { %v10229_v39 = vpop.eup %10228  ;;  %10250 = vrcp.f32 %v2780_v31 }
 0x453   : > { %10252 = vrcp.f32 %v2778_v38  ;;  %v2784_v6 = vadd.f32 1.0, %v10229_v39 }
 0x454   : > { %v10231_v51 = vpop.eup %10230  ;;  %10254 = vrcp.f32 %v2781_v40  ;;  %v3004_v40 = vld [vmem:[#allocation4 + $0x7b8] sm:$0xff] }
 0x455   : > { %v2782_v16 = vadd.f32 1.0, %v10231_v51 }
 0x456   : > { %v10233_v12 = vpop.eup %10232 }
 0x457   : > { %v11866_v61 = vpop.eup %10234  ;;  %v2785_v9 = vadd.f32 1.0, %v10233_v12 }
 0x458   : > { %v9045_v41 = vpop.f32.mrf.mxu0  ;;  %v9069_v36 = vpop.f32.mrf.mxu1 }
 0x459   : > { %v2917_v42 = vadd.f32 %v9045_v41, %v2820_v34  ;;  %v11868_v63 = vpop.eup %10236  ;;  %v3102_v11 = vadd.f32 %v9069_v36, %v3005_v49 }
 0x45a   : > { %v2908_v47 = vpop.f32.mrf.mxu0  ;;  %v3093_v2 = vpop.f32.mrf.mxu1 }
 0x45b   : > { %v8074_v50 = vmul.f32 -1.442695, %v2917_v42  ;;  %v2909_v52 = vadd.f32 %v2908_v47, %v2818_v45  ;;  %v11870_v60 = vpop.eup %10238  ;;  %v3094_v23 = vadd.f32 %v3093_v2, %v3003_v7  ;;  %v8090_v34 = vmul.f32 -1.442695, %v3102_v11 }
 0x45c   : > { %v9046_v1 = vpop.f32.mrf.mxu0  ;;  %v9070_v54 = vpop.f32.mrf.mxu1 }
 0x45d   : > { %10256 = vpow2.f32 %v8074_v50  ;;  %v2920_v56 = vadd.f32 %v9046_v1, %v2821_v5  ;;  %v8072_v57 = vmul.f32 -1.442695, %v2909_v52  ;;  %v11872_v26 = vpop.eup %10240  ;;  %v8088_v45 = vmul.f32 -1.442695, %v3094_v23 }
 0x45e   : > { %10258 = vrcp.f32 %v2779_v46  ;;  %v2911_v43 = vpop.f32.mrf.mxu0  ;;  %v3096_v44 = vpop.f32.mrf.mxu1  ;;  %v3105_v46 = vadd.f32 %v9070_v54, %v3006_v27 }
 0x45f   : > { %10260 = vrcp.f32 %v2784_v6  ;;  %v8075_v53 = vmul.f32 -1.442695, %v2920_v56  ;;  %v2912_v62 = vadd.f32 %v2911_v43, %v2819_v55  ;;  %v11874_v21 = vpop.eup %10242  ;;  %v3009_v6 = vld [vmem:[#allocation4 + $0x310] sm:$0xff]  ;;  %v3097_v51 = vadd.f32 %v3096_v44, %v3004_v40 }
 0x460   : > { %10262 = vpow2.f32 %v8072_v57  ;;  %v9049_v8 = vpop.f32.mrf.mxu0  ;;  %v9073_v3 = vpop.f32.mrf.mxu1  ;;  %v3007_v56 = vld [vmem:[#allocation4 + $0x250] sm:$0xff]  ;;  %v8091_v54 = vmul.f32 -1.442695, %v3105_v46 }
 0x461   : > { %v8073_v14 = vmul.f32 -1.442695, %v2912_v62  ;;  %v2933_v17 = vadd.f32 %v9049_v8, %v2824_v59  ;;  %10264 = vpow2.f32 %v8075_v53  ;;  %v11876_v25 = vpop.eup %10244  ;;  %v3118_v43 = vadd.f32 %v9073_v3, %v3009_v6 }
 0x462   : > { %v2924_v18 = vpop.f32.mrf.mxu0  ;;  %10266 = vrcp.f32 %v2782_v16  ;;  %v11878_v31 = vpop.eup %10246  ;;  %v3010_v16 = vld [vmem:[#allocation4 + $0x390] sm:$0xff]  ;;  %v8089_v62 = vmul.f32 -1.442695, %v3097_v51 }
 0x463   : > { %v8078_v32 = vmul.f32 -1.442695, %v2933_v17  ;;  %v2925_v24 = vadd.f32 %v2924_v18, %v2822_v22  ;;  %10268 = vpow2.f32 %v8073_v14  ;;  %v10249_v39 = vpop.eup %10248  ;;  %v3109_v41 = vpop.f32.mrf.mxu1  ;;  %v3008_v22 = vld [vmem:[#allocation4 + $0x620] sm:$0xff]  ;;  %v8094_v11 = vmul.f32 -1.442695, %v3118_v43 }
 0x464   : > { %v9050_v29 = vpop.f32.mrf.mxu0  ;;  %10270 = vrcp.f32 %v2785_v9  ;;  %v11880_v42 = vpop.eup %10250  ;;  %v2783_v55 = vadd.f32 1.0, %v10249_v39  ;;  %v3110_v44 = vadd.f32 %v3109_v41, %v3007_v56 }
 0x465   : > { %v8076_v35 = vmul.f32 -1.442695, %v2925_v24  ;;  %v2936_v38 = vadd.f32 %v9050_v29, %v2825_v19  ;;  %10272 = vpow2.f32 %v8078_v32  ;;  %v11882_v5 = vpop.eup %10252  ;;  %v9074_v12 = vpop.f32.mrf.mxu1 }
 0x466   : > { %v2927_v36 = vpop.f32.mrf.mxu0  ;;  %v11884_v50 = vpop.eup %10254  ;;  %v3121_v14 = vadd.f32 %v9074_v12, %v3010_v16  ;;  %v8092_v19 = vmul.f32 -1.442695, %v3110_v44  ;;  %v3172_v43 = vmul.f32 %v11882_v5, %v11868_v63 }
 0x467   : > { %v8079_v47 = vmul.f32 -1.442695, %v2936_v38  ;;  %v2928_v2 = vadd.f32 %v2927_v36, %v2823_v30  ;;  %10274 = vpow2.f32 %v8076_v35  ;;  %v3112_v8 = vpop.f32.mrf.mxu1  ;;  %v2493_v30 = vld [vmem:[#allocation4 + $0x348] sm:$0xff] }
 0x468   : > { %10276 = vpow2.f32 %v8090_v34  ;;  %v3113_v23 = vadd.f32 %v3112_v8, %v3008_v22  ;;  %v8095_v29 = vmul.f32 -1.442695, %v3121_v14  ;;  %v2598_v36 = vadd.f32 %v11864_v33, %v2493_v30 }
 0x469   : > { %v8077_v52 = vmul.f32 -1.442695, %v2928_v2  ;;  %10278 = vpow2.f32 %v8079_v47 }
 0x46a   : > { %v10257_v1 = vpop.eup %10256  ;;  %10280 = vpow2.f32 %v8088_v45  ;;  %v8093_v38 = vmul.f32 -1.442695, %v3113_v23 }
 0x46b   : > { %v11886_v49 = vpop.eup %10258  ;;  %v2965_v57 = vadd.f32 1.0, %v10257_v1  ;;  %10282 = vpow2.f32 %v8077_v52  ;;  %v3174_v1 = vmul.f32 %v11880_v42, %v11866_v61 }
 0x46c   : > { %v11888_v59 = vpop.eup %10260  ;;  %v3173_v63 = vmul.f32 %v11886_v49, %v11872_v26 }
 0x46d   : > { %v10263_v53 = vpop.eup %10262  ;;  %10284 = vrcp.f32 %v2965_v57 }
 0x46e   : > { %10286 = vrcp.f32 %v2783_v55  ;;  %v2963_v7 = vadd.f32 1.0, %v10263_v53  ;;  %v10265_v9 = vpop.eup %10264 }
 0x46f   : > { %10288 = vpow2.f32 %v8091_v54  ;;  %v11890_v17 = vpop.eup %10266  ;;  %v2966_v3 = vadd.f32 1.0, %v10265_v9 }
 0x470   : > { %10290 = vrcp.f32 %v2963_v7  ;;  %v10269_v18 = vpop.eup %10268 }
 0x471   : > { %10292 = vpow2.f32 %v8089_v62  ;;  %v11892_v32 = vpop.eup %10270  ;;  %v2964_v24 = vadd.f32 1.0, %v10269_v18 }
 0x472   : > { %10294 = vrcp.f32 %v2966_v3  ;;  %v10273_v27 = vpop.eup %10272 }
 0x473   : > { %10296 = vpow2.f32 %v8094_v11  ;;  %v2969_v34 = vadd.f32 1.0, %v10273_v27 }
 0x474   : > { %10298 = vrcp.f32 %v2964_v24  ;;  %v10275_v35 = vpop.eup %10274 }
 0x475   : > { %10300 = vpow2.f32 %v8092_v19  ;;  %v10277_v39 = vpop.eup %10276  ;;  %v2967_v40 = vadd.f32 1.0, %v10275_v35 }
 0x476   : > { %10302 = vrcp.f32 %v2969_v34  ;;  %v10279_v41 = vpop.eup %10278  ;;  %v3150_v6 = vadd.f32 1.0, %v10277_v39 }
 0x477   : > { %10304 = vpow2.f32 %v8095_v29  ;;  %v10281_v45 = vpop.eup %10280  ;;  %v2970_v46 = vadd.f32 1.0, %v10279_v41 }
 0x478   : > { %10306 = vrcp.f32 %v2967_v40  ;;  %v10283_v47 = vpop.eup %10282  ;;  %v3148_v57 = vadd.f32 1.0, %v10281_v45 }
 0x479   : > { %10308 = vpow2.f32 %v8093_v38  ;;  %v2968_v51 = vadd.f32 1.0, %v10283_v47 }
 0x47a   : > { %v10285_v2 = vpop.eup %10284  ;;  %10310 = vrcp.f32 %v2970_v46 }
 0x47b   : > { %v10287_v52 = vpop.eup %10286  ;;  %10312 = vtanh.f32 %v2598_v36  ;;  %v3182_v55 = vmul.f32 %v10285_v2, %v11808_v4  ;;  %v3175_v4 = vmul.f32 %v11884_v50, %v11870_v60 }
 0x47c   : > { %v10289_v56 = vpop.eup %10288  ;;  %10314 = vrcp.f32 %v2968_v51 }
 0x47d   : > { %v10291_v33 = vpop.eup %10290  ;;  %v11898_v12 = vadd.f32 %v3182_v55, %v3174_v1  ;;  %10316 = vrcp.f32 %v3150_v6  ;;  %v3151_v61 = vadd.f32 1.0, %v10289_v56  ;;  %v9918_v56 = vld [vmem:[#allocation2 + $0xc8] ss:$16 sps:$4 sm:$0xff]  }
 0x47e   : > { %v10293_v54 = vpop.eup %10292  ;;  %v3180_v16 = vmul.f32 %v10291_v33, %v11813_v48  ;;  %v9919_v33 = vld [vmem:[#allocation2 + $0xcc] ss:$16 sps:$4 sm:$0xff]  }
 0x47f   : > { %v10295_v53 = vpop.eup %10294  ;;  %10318 = vtanh.f32 %v11898_v12  ;;  %v3149_v8 = vadd.f32 1.0, %v10293_v54 }
 0x480   : > { %v10297_v42 = vpop.eup %10296  ;;  %v11906_v62 = vadd.f32 %v3180_v16, %v3172_v43  ;;  %v3183_v44 = vmul.f32 %v10295_v53, %v11817_v58  ;;  %10320 = vrcp.f32 %v3148_v57  ;;  %v3178_v58 = vmul.f32 %v11888_v59, %v11874_v21 }
 0x481   : > { %v10299_v7 = vpop.eup %10298  ;;  %v3154_v60 = vadd.f32 1.0, %v10297_v42  ;;  %v9920_v42 = vld [vmem:[#allocation2 + $0xa8] ss:$16 sps:$4 sm:$0xff]  }
 0x482   : > { %v10301_v22 = vpop.eup %10300  ;;  %v11911_v48 = vadd.f32 %v3183_v44, %v3175_v4  ;;  %v3181_v5 = vmul.f32 %v10299_v7, %v11823_v0  ;;  %10322 = vtanh.f32 %v11906_v62  ;;  %v3176_v0 = vmul.f32 %v11890_v17, %v11876_v25  ;;  %v9921_v4 = vld [vmem:[#allocation2 + $0xac] ss:$16 sps:$4 sm:$0xff]  }
 0x483   : > { %v10303_v9 = vpop.eup %10302  ;;  %10324 = vrcp.f32 %v3151_v61  ;;  %v3152_v49 = vadd.f32 1.0, %v10301_v22  ;;  %v9924_v22 = vld [vmem:[#allocation2 + $0x68] ss:$16 sps:$4 sm:$0xff]  }
 0x484   : > { %v10305_v50 = vpop.eup %10304  ;;  %10326 = vtanh.f32 %v11911_v48  ;;  %v11918_v11 = vadd.f32 %v3181_v5, %v3173_v63  ;;  %v3186_v14 = vmul.f32 %v10303_v9, %v11827_v13  ;;  %v3179_v13 = vmul.f32 %v11892_v32, %v11878_v31  ;;  %v9925_v63 = vld [vmem:[#allocation2 + $0x6c] ss:$16 sps:$4 sm:$0xff]   ;;  %v9926_v5 = vld [vmem:[#allocation2 + $0x48] ss:$16 sps:$4 sm:$0xff]  }
 0x485   : > { %v10307_v26 = vpop.eup %10306  ;;  %10328 = vrcp.f32 %v3149_v8  ;;  %v3155_v59 = vadd.f32 1.0, %v10305_v50  ;;  %v9927_v9 = vld [vmem:[#allocation2 + $0x4c] ss:$16 sps:$4 sm:$0xff]  }
 0x486   : > { %v10309_v3 = vpop.eup %10308  ;;  %v11923_v18 = vadd.f32 %v3186_v14, %v3178_v58  ;;  %v3184_v19 = vmul.f32 %v10307_v26, %v11832_v20  ;;  %10330 = vtanh.f32 %v11918_v11  ;;  %v9929_v50 = vld [vmem:[#allocation2 + $0x2c] ss:$16 sps:$4 sm:$0xff]   ;;  %v9930_v58 = vld [vmem:[#allocation2 + $0x8] ss:$16 sps:$4 sm:$0xff]   ;;  %v9932_v26 = vld [vmem:[#allocation2 + $0xe0] ss:$16 sps:$4 sm:$0xff]  }
 0x487   : > { %v10311_v21 = vpop.eup %10310  ;;  %10332 = vrcp.f32 %v3154_v60  ;;  %v3153_v17 = vadd.f32 1.0, %v10309_v3  ;;  %v9928_v60 = vld [vmem:[#allocation2 + $0x28] ss:$16 sps:$4 sm:$0xff]   ;;  %v9931_v14 = vld [vmem:[#allocation2 + $0xc] ss:$16 sps:$4 sm:$0xff]  }
 0x488   : > { %v10313_v23 = vpop.eup %10312  ;;  %v11929_v24 = vadd.f32 %v3184_v19, %v3176_v0  ;;  %v3187_v27 = vmul.f32 %v10311_v21, %v11835_v10  ;;  %10334 = vtanh.f32 %v11923_v18  ;;  %v9934_v3 = vld [vmem:[#allocation2 + $0xc0] ss:$16 sps:$4 sm:$0xff]   ;;  %v9935_v0 = vld [vmem:[#allocation2 + $0xc4] ss:$16 sps:$4 sm:$0xff]  }
 0x489   : > { %v10315_v25 = vpop.eup %10314  ;;  %10336 = vrcp.f32 %v3152_v49  ;;  %v3177_v20 = vmul.f32 %v10313_v23, %v10287_v52  ;;  %v9933_v49 = vld [vmem:[#allocation2 + $0xe4] ss:$16 sps:$4 sm:$0xff]   ;;  %v9936_v19 = vld [vmem:[#allocation2 + $0xa0] ss:$16 sps:$4 sm:$0xff]  }
 0x48a   : > { %v11933_v29 = vadd.f32 %v3187_v27, %v3179_v13  ;;  %v3185_v30 = vmul.f32 %v10315_v25, %v11838_v28  ;;  %10338 = vtanh.f32 %v11929_v24  ;;  %v10317_v34 = vpop.eup %10316  ;;  %v9937_v21 = vld [vmem:[#allocation2 + $0xa4] ss:$16 sps:$4 sm:$0xff]   ;;  %v9940_v13 = vld [vmem:[#allocation2 + $0x60] ss:$16 sps:$4 sm:$0xff]  }
 0x48b   : > { %10340 = vrcp.f32 %v3155_v59  ;;  %v9938_v59 = vld [vmem:[#allocation2 + $0x80] ss:$16 sps:$4 sm:$0xff]   ;;  %v9939_v23 = vld [vmem:[#allocation2 + $0x84] ss:$16 sps:$4 sm:$0xff]  }
 0x48c   : > { %v10319_v31 = vpop.eup %10318  ;;  %v11937_v32 = vadd.f32 %v3185_v30, %v3177_v20  ;;  %10342 = vtanh.f32 %v11933_v29  ;;  %v9941_v27 = vld [vmem:[#allocation2 + $0x64] ss:$16 sps:$4 sm:$0xff]   ;;  %v9942_v25 = vld [vmem:[#allocation2 + $0x40] ss:$16 sps:$4 sm:$0xff]  }
 0x48d   : > { %10344 = vrcp.f32 %v3153_v17  ;;  %v3206_v10 = vmul.f32 %v10319_v31, %v10317_v34  ;;  %v10321_v35 = vpop.eup %10320  ;;  %v9943_v17 = vld [vmem:[#allocation2 + $0x44] ss:$16 sps:$4 sm:$0xff]   ;;  %v9944_v20 = vld [vmem:[#allocation2 + $0x20] ss:$16 sps:$4 sm:$0xff]  }
 0x48e   : > { %10346 = vtanh.f32 %v11937_v32  ;;  %v9945_v30 = vld [vmem:[#allocation2 + $0x24] ss:$16 sps:$4 sm:$0xff]   ;;  %v9946_v34 = vld [vmem:[#allocation2] ss:$16 sps:$4 sm:$0xff]  }
 0x48f   : > { %v10323_v38 = vpop.eup %10322  ;;  %8098 = vst [vmem:[%s11390_s28 + $0x50] sm:$0xff] %v3206_v10  ;;  %v9947_v31 = vld [vmem:[#allocation2 + $0x4] ss:$16 sps:$4 sm:$0xff]  }
 0x490   : > { %v10325_v28 = vpop.eup %10324  ;;  %v3204_v39 = vmul.f32 %v10323_v38, %v10321_v35  ;;  %v11959_v35 = vld [vmem:[#allocation2 + $0xec] ss:$16 sps:$4 sm:$0xff]  }
 0x491   : > { %v10327_v40 = vpop.eup %10326 }
 0x492   : > { %v10329_v41 = vpop.eup %10328  ;;  %8096 = vst [vmem:[%s11390_s28 + $0x40] sm:$0xff] %v3204_v39  ;;  %v3207_v36 = vmul.f32 %v10327_v40, %v10325_v28  ;;  %v3389_v40 = vld [vmem:[#allocation4 + $0x2f8] sm:$0xff] }
 0x493   : > { %v10331_v45 = vpop.eup %10330 }
 0x494   : > { %v10333_v46 = vpop.eup %10332  ;;  %v3205_v47 = vmul.f32 %v10331_v45, %v10329_v41  ;;  %8099 = vst [vmem:[%s11390_s28 + $0x58] sm:$0xff] %v3207_v36  ;;  %v11945_v55 = vpack.c.bf16 %v3207_v36, %v3206_v10  ;;  %v11957_v10 = vld [vmem:[#allocation2 + $0xe8] ss:$16 sps:$4 sm:$0xff]   ;;  %v3387_v41 = vld [vmem:[#allocation4 + $0xf0] sm:$0xff] }
 0x495   : > { %v10335_v2 = vpop.eup %10334 }
 0x496   : > { %v10337_v6 = vpop.eup %10336  ;;  %8097 = vst [vmem:[%s11390_s28 + $0x48] sm:$0xff] %v3205_v47  ;;  %v3221_v51 = vpack.c.bf16 %v3205_v47, %v3204_v39  ;;  %v3210_v52 = vmul.f32 %v10335_v2, %v10333_v46  ;;  %v3390_v46 = vld [vmem:[#allocation4 + $0x598] sm:$0xff] }
 0x497   : > { %v10339_v1 = vpop.eup %10338 }
 0x498   : > { %v10341_v57 = vpop.eup %10340  ;;  %9091 = vmatprep.mubr.bf16.mxu0 %v3221_v51  ;;  %9115 = vmatprep.mubr.bf16.mxu1 %v3221_v51  ;;  %v3208_v54 = vmul.f32 %v10339_v1, %v10337_v6  ;;  %8102 = vst [vmem:[%s11390_s28 + $0x70] sm:$0xff] %v3210_v52  ;;  %v3393_v1 = vld [vmem:[#allocation4 + $0x1f8] sm:$0xff] }
 0x499   : > { %v10343_v43 = vpop.eup %10342  ;;  %9092 = vmatmul.mubr.bf16.vlgmr.msra.gmra.mxu0 %v11945_v55  ;;  %9116 = vmatmul.mubr.bf16.vlgmr.msra.gmra.mxu1 %v11945_v55 }
 0x49a   : > { %v10345_v16 = vpop.eup %10344  ;;  %9124 = vmatpush3.bf16.msra.mxu0 %v11858_v37  ;;  %9148 = vmatpush3.bf16.msra.mxu1 %v11860_v15  ;;  %8100 = vst [vmem:[%s11390_s28 + $0x60] sm:$0xff] %v3208_v54  ;;  %v3211_v53 = vmul.f32 %v10343_v43, %v10341_v57  ;;  %v9922_v37 = vld [vmem:[#allocation2 + $0x88] ss:$16 sps:$4 sm:$0xff]   ;;  %v9923_v15 = vld [vmem:[#allocation2 + $0x8c] ss:$16 sps:$4 sm:$0xff]  }
 0x49b   : > { %v10347_v61 = vpop.eup %10346  ;;  %9125 = vmatprep.subr.bf16.mxu0 %v9918_v56  ;;  %9149 = vmatprep.subr.bf16.mxu1 %v9919_v33 }
 0x49c   : > { %v3209_v44 = vmul.f32 %v10347_v61, %v10345_v16  ;;  %8103 = vst [vmem:[%s11390_s28 + $0x78] sm:$0xff] %v3211_v53  ;;  %v3224_v8 = vpack.c.bf16 %v3211_v53, %v3210_v52  ;;  %v3391_v61 = vld [vmem:[#allocation4 + $0x1a8] sm:$0xff] }
 0x49e   : > { %9126 = vmatpush3.bf16.msra.mxu0 %v9918_v56  ;;  %9150 = vmatpush3.bf16.msra.mxu1 %v9919_v33  ;;  %8101 = vst [vmem:[%s11390_s28 + $0x68] sm:$0xff] %v3209_v44  ;;  %v3223_v7 = vpack.c.bf16 %v3209_v44, %v3208_v54  ;;  %v3394_v44 = vld [vmem:[#allocation4 + $0x2c0] sm:$0xff] }
 0x49f   : > { %9127 = vmatprep.subr.bf16.mxu0 %v9920_v42  ;;  %9151 = vmatprep.subr.bf16.mxu1 %v9921_v4 }
 0x4a0   : > { %9095 = vmatprep.mubr.bf16.mxu0 %v3223_v7  ;;  %9119 = vmatprep.mubr.bf16.mxu1 %v3223_v7 }
 0x4a1   : > { %9096 = vmatmul.mubr.bf16.gmra.mxu0 %v3224_v8  ;;  %9120 = vmatmul.mubr.bf16.gmra.mxu1 %v3224_v8 }
 0x4a2   : > { %9128 = vmatpush3.bf16.msra.mxu0 %v9920_v42  ;;  %9152 = vmatpush3.bf16.msra.mxu1 %v9921_v4 }
 0x4a3   : > { %9139 = vmatprep.mubr.bf16.mxu0 %v3221_v51  ;;  %9163 = vmatprep.mubr.bf16.mxu1 %v3221_v51  ;;  %v3388_v51 = vld [vmem:[#allocation4 + $0x120] sm:$0xff] }
 0x4a4   : > { %9129 = vmatprep.subr.bf16.mxu0 %v9922_v37  ;;  %9153 = vmatprep.subr.bf16.mxu1 %v9923_v15 }
 0x4a6   : > { %9130 = vmatpush3.bf16.msra.mxu0 %v9922_v37  ;;  %9154 = vmatpush3.bf16.msra.mxu1 %v9923_v15 }
 0x4a7   : > { %9131 = vmatprep.subr.bf16.mxu0 %v9924_v22  ;;  %9155 = vmatprep.subr.bf16.mxu1 %v9925_v63 }
 0x4aa   : > { %9132 = vmatpush3.bf16.msra.mxu0 %v9924_v22  ;;  %9156 = vmatpush3.bf16.msra.mxu1 %v9925_v63  ;;  %v3244_v63 = vld [vmem:[#allocation4 + $0x6f0] sm:$0xff] }
 0x4ab   : > { %9133 = vmatprep.subr.bf16.mxu0 %v9926_v5  ;;  %9157 = vmatprep.subr.bf16.mxu1 %v9927_v9 }
 0x4ae   : > { %9134 = vmatpush3.bf16.msra.mxu0 %v9926_v5  ;;  %9158 = vmatpush3.bf16.msra.mxu1 %v9927_v9  ;;  %v3242_v9 = vld [vmem:[#allocation4 + $0x538] sm:$0xff] }
 0x4af   : > { %9135 = vmatprep.subr.bf16.mxu0 %v9928_v60  ;;  %9159 = vmatprep.subr.bf16.mxu1 %v9929_v50 }
 0x4b2   : > { %9136 = vmatpush3.bf16.msra.mxu0 %v9928_v60  ;;  %9160 = vmatpush3.bf16.msra.mxu1 %v9929_v50  ;;  %v3245_v60 = vld [vmem:[#allocation4 + $0x738] sm:$0xff] }
 0x4b3   : > { %9137 = vmatprep.subr.bf16.mxu0 %v9930_v58  ;;  %9161 = vmatprep.subr.bf16.mxu1 %v9931_v14 }
 0x4b6   : > { %9138 = vmatpush3.bf16.msra.mxu0 %v9930_v58  ;;  %9162 = vmatpush3.bf16.msra.mxu1 %v9931_v14 }
 0x4b7   : > { %9171 = vmatprep.subr.bf16.mxu0 %v9932_v26  ;;  %9195 = vmatprep.subr.bf16.mxu1 %v9933_v49 }
 0x4b9   : > { %9140 = vmatmul.mubr.bf16.vlgmr.msra.gmra.mxu0 %v11945_v55  ;;  %9164 = vmatmul.mubr.bf16.vlgmr.msra.gmra.mxu1 %v11945_v55 }
 0x4ba   : > { %9143 = vmatprep.mubr.bf16.mxu0 %v3223_v7  ;;  %9167 = vmatprep.mubr.bf16.mxu1 %v3223_v7 }
 0x4bb   : > { %9172 = vmatpush3.bf16.msra.mxu0 %v9932_v26  ;;  %9196 = vmatpush3.bf16.msra.mxu1 %v9933_v49  ;;  %v3243_v26 = vld [vmem:[#allocation4 + $0xb8] sm:$0xff] }
 0x4bc   : > { %9173 = vmatprep.subr.bf16.mxu0 %v9934_v3  ;;  %9197 = vmatprep.subr.bf16.mxu1 %v9935_v0 }
 0x4bf   : > { %9174 = vmatpush3.bf16.msra.mxu0 %v9934_v3  ;;  %9198 = vmatpush3.bf16.msra.mxu1 %v9935_v0  ;;  %v3392_v3 = vld [vmem:[#allocation4 + $0x610] sm:$0xff] }
 0x4c0   : > { %9175 = vmatprep.subr.bf16.mxu0 %v9936_v19  ;;  %9199 = vmatprep.subr.bf16.mxu1 %v9937_v21 }
 0x4c1   : > { %9144 = vmatmul.mubr.bf16.gmra.mxu0 %v3224_v8  ;;  %9168 = vmatmul.mubr.bf16.gmra.mxu1 %v3224_v8 }
 0x4c3   : > { %9176 = vmatpush3.bf16.msra.mxu0 %v9936_v19  ;;  %9200 = vmatpush3.bf16.msra.mxu1 %v9937_v21  ;;  %v3248_v19 = vld [vmem:[#allocation4 + $0x628] sm:$0xff] }
 0x4c4   : > { %9177 = vmatprep.subr.bf16.mxu0 %v9938_v59  ;;  %9201 = vmatprep.subr.bf16.mxu1 %v9939_v23 }
 0x4c7   : > { %9178 = vmatpush3.bf16.msra.mxu0 %v9938_v59  ;;  %9202 = vmatpush3.bf16.msra.mxu1 %v9939_v23  ;;  %v3246_v59 = vld [vmem:[#allocation4 + $0x398] sm:$0xff] }
 0x4c8   : > { %9179 = vmatprep.subr.bf16.mxu0 %v9940_v13  ;;  %9203 = vmatprep.subr.bf16.mxu1 %v9941_v27 }
 0x4cb   : > { %9180 = vmatpush3.bf16.msra.mxu0 %v9940_v13  ;;  %9204 = vmatpush3.bf16.msra.mxu1 %v9941_v27  ;;  %v3249_v13 = vld [vmem:[#allocation4 + $0x478] sm:$0xff] }
 0x4cc   : > { %9181 = vmatprep.subr.bf16.mxu0 %v9942_v25  ;;  %9205 = vmatprep.subr.bf16.mxu1 %v9943_v17 }
 0x4cf   : > { %9182 = vmatpush3.bf16.msra.mxu0 %v9942_v25  ;;  %9206 = vmatpush3.bf16.msra.mxu1 %v9943_v17 }
 0x4d0   : > { %9183 = vmatprep.subr.bf16.mxu0 %v9944_v20  ;;  %9207 = vmatprep.subr.bf16.mxu1 %v9945_v30 }
 0x4d3   : > { %9184 = vmatpush3.bf16.msra.mxu0 %v9944_v20  ;;  %9208 = vmatpush3.bf16.msra.mxu1 %v9945_v30 }
 0x4d4   : > { %9185 = vmatprep.subr.bf16.mxu0 %v9946_v34  ;;  %9209 = vmatprep.subr.bf16.mxu1 %v9947_v31 }
 0x4d7   : > { %9186 = vmatpush3.bf16.msra.mxu0 %v9946_v34  ;;  %9210 = vmatpush3.bf16.msra.mxu1 %v9947_v31 }
 0x4d8   : > { %9219 = vmatprep.subr.bf16.mxu0 %v11957_v10  ;;  %9243 = vmatprep.subr.bf16.mxu1 %v11959_v35 }
 0x559   : > { %v9117_v38 = vpop.f32.mrf.mxu1  ;;  %v9093_v28 = vpop.f32.mrf.mxu0 }
 0x55a   : > { %v3486_v47 = vadd.f32 %v9117_v38, %v3389_v40  ;;  %v3341_v14 = vadd.f32 %v9093_v28, %v3244_v63 }
 0x55b   : > { %v3477_v39 = vpop.f32.mrf.mxu1  ;;  %v3332_v45 = vpop.f32.mrf.mxu0 }
 0x55c   : > { %v3478_v6 = vadd.f32 %v3477_v39, %v3387_v41  ;;  %v8122_v33 = vmul.f32 -1.442695, %v3486_v47  ;;  %v3333_v0 = vadd.f32 %v3332_v45, %v3242_v9  ;;  %v3574_v41 = vld [vmem:[#allocation4 + $0x758] sm:$0xff] }
 0x55d   : > { %v9118_v36 = vpop.f32.mrf.mxu1  ;;  %v9094_v56 = vpop.f32.mrf.mxu0 }
 0x55e   : > { %v3489_v52 = vadd.f32 %v9118_v36, %v3390_v46  ;;  %v8120_v43 = vmul.f32 -1.442695, %v3478_v6  ;;  %10348 = vpow2.f32 %v8122_v33  ;;  %v3344_v21 = vadd.f32 %v9094_v56, %v3245_v60  ;;  %v3575_v33 = vld [vmem:[#allocation4 + $0x7d8] sm:$0xff] }
 0x55f   : > { %v3480_v2 = vpop.f32.mrf.mxu1  ;;  %v3335_v42 = vpop.f32.mrf.mxu0 }
 0x560   : > { %v3481_v57 = vadd.f32 %v3480_v2, %v3388_v51  ;;  %v8123_v53 = vmul.f32 -1.442695, %v3489_v52  ;;  %10350 = vpow2.f32 %v8120_v43  ;;  %v3336_v23 = vadd.f32 %v3335_v42, %v3243_v26  ;;  %v3572_v52 = vld [vmem:[#allocation4 + $0x790] sm:$0xff]  ;;  %v3576_v26 = vld [vmem:[#allocation4 + $0x698] sm:$0xff] }
 0x561   : > { %v9121_v55 = vpop.f32.mrf.mxu1  ;;  %v9097_v15 = vpop.f32.mrf.mxu0  ;;  %v3573_v42 = vld [vmem:[#allocation4 + $0xd0] sm:$0xff] }
 0x562   : > { %v3502_v16 = vadd.f32 %v9121_v55, %v3393_v1  ;;  %v8121_v4 = vmul.f32 -1.442695, %v3481_v57  ;;  %10352 = vpow2.f32 %v8123_v53  ;;  %v3357_v17 = vadd.f32 %v9097_v15, %v3248_v19 }
 0x563   : > { %v3493_v54 = vpop.f32.mrf.mxu1  ;;  %v3348_v50 = vpop.f32.mrf.mxu0 }
 0x564   : > { %v8126_v8 = vmul.f32 -1.442695, %v3502_v16  ;;  %v3494_v37 = vadd.f32 %v3493_v54, %v3391_v61  ;;  %10354 = vpow2.f32 %v8121_v4  ;;  %v3349_v30 = vadd.f32 %v3348_v50, %v3246_v59 }
 0x565   : > { %v9122_v7 = vpop.f32.mrf.mxu1  ;;  %v9098_v27 = vpop.f32.mrf.mxu0 }
 0x566   : > { %v3505_v22 = vadd.f32 %v9122_v7, %v3394_v44  ;;  %10356 = vpow2.f32 %v8126_v8  ;;  %v8124_v5 = vmul.f32 -1.442695, %v3494_v37  ;;  %v3360_v31 = vadd.f32 %v9098_v27, %v3249_v13  ;;  %v3759_v7 = vld [vmem:[#allocation4 + $0x178] sm:$0xff]  ;;  %v3579_v27 = vld [vmem:[#allocation4 + $0x1c8] sm:$0xff] }
 0x567   : > { %v3496_v49 = vpop.f32.mrf.mxu1  ;;  %v11963_v40 = vpop.f32.mrf.mxu0 }
 0x568   : > { %v8127_v58 = vmul.f32 -1.442695, %v3505_v22  ;;  %10358 = vpow2.f32 %v8124_v5  ;;  %v3497_v25 = vadd.f32 %v3496_v49, %v3392_v3  ;;  %v3578_v22 = vld [vmem:[#allocation4 + $0x388] sm:$0xff] }
 0x56a   : > { %10360 = vpow2.f32 %v8127_v58  ;;  %v8125_v28 = vmul.f32 -1.442695, %v3497_v25  ;;  %v3757_v58 = vld [vmem:[#allocation4 + $0x680] sm:$0xff] }
 0x56b   : > { %10362 = vtanh.f32 %v3341_v14  ;;  %v10349_v20 = vpop.eup %10348 }
 0x56c   : > { %10364 = vtanh.f32 %v3333_v0  ;;  %v3534_v39 = vadd.f32 1.0, %v10349_v20 }
 0x56d   : > { %v10351_v34 = vpop.eup %10350  ;;  %10366 = vtanh.f32 %v3344_v21 }
 0x56e   : > { %10368 = vtanh.f32 %v3336_v23  ;;  %v3532_v45 = vadd.f32 1.0, %v10351_v34 }
 0x56f   : > { %v10353_v38 = vpop.eup %10352  ;;  %10370 = vtanh.f32 %v3357_v17 }
 0x570   : > { %10372 = vtanh.f32 %v3349_v30  ;;  %v3535_v47 = vadd.f32 1.0, %v10353_v38 }
 0x571   : > { %v10355_v36 = vpop.eup %10354  ;;  %10374 = vtanh.f32 %v3360_v31  ;;  %v3760_v31 = vld [vmem:[#allocation4 + $0x6d8] sm:$0xff] }
 0x572   : > { %10376 = vpow2.f32 %v8125_v28  ;;  %v3533_v1 = vadd.f32 1.0, %v10355_v36  ;;  %v3577_v28 = vld [vmem:[#allocation4 + $0x218] sm:$0xff] }
 0x573   : > { %v10357_v46 = vpop.eup %10356  ;;  %10378 = vrcp.f32 %v3534_v39 }
 0x574   : > { %10380 = vrcp.f32 %v3532_v45  ;;  %v3538_v57 = vadd.f32 1.0, %v10357_v46 }
 0x575   : > { %v10359_v43 = vpop.eup %10358  ;;  %10382 = vrcp.f32 %v3535_v47  ;;  %v3758_v47 = vld [vmem:[#allocation4 + $0x40] sm:$0xff] }
 0x576   : > { %v3536_v5 = vadd.f32 1.0, %v10359_v43 }
 0x577   : > { %v10361_v44 = vpop.eup %10360 }
 0x578   : > { %v11965_v63 = vpop.eup %10362  ;;  %v3539_v3 = vadd.f32 1.0, %v10361_v44 }
 0x579   : > { %v9141_v2 = vpop.f32.mrf.mxu0  ;;  %v9165_v6 = vpop.f32.mrf.mxu1 }
 0x57a   : > { %v3671_v51 = vadd.f32 %v9141_v2, %v3574_v41  ;;  %v11967_v50 = vpop.eup %10364  ;;  %v3856_v0 = vadd.f32 %v9165_v6, %v3759_v7 }
 0x57b   : > { %v3662_v55 = vpop.f32.mrf.mxu0  ;;  %v3847_v56 = vpop.f32.mrf.mxu1 }
 0x57c   : > { %v8138_v54 = vmul.f32 -1.442695, %v3671_v51  ;;  %v3663_v16 = vadd.f32 %v3662_v55, %v3572_v52  ;;  %v11969_v49 = vpop.eup %10366  ;;  %v3848_v17 = vadd.f32 %v3847_v56, %v3757_v58  ;;  %v8154_v41 = vmul.f32 -1.442695, %v3856_v0 }
 0x57d   : > { %v9142_v53 = vpop.f32.mrf.mxu0  ;;  %v9166_v61 = vpop.f32.mrf.mxu1 }
 0x57e   : > { %10384 = vpow2.f32 %v8138_v54  ;;  %v3674_v4 = vadd.f32 %v9142_v53, %v3575_v33  ;;  %v8136_v8 = vmul.f32 -1.442695, %v3663_v16  ;;  %v11971_v59 = vpop.eup %10368  ;;  %v8152_v52 = vmul.f32 -1.442695, %v3848_v17 }
 0x57f   : > { %10386 = vrcp.f32 %v3533_v1  ;;  %v3665_v37 = vpop.f32.mrf.mxu0  ;;  %v3850_v15 = vpop.f32.mrf.mxu1  ;;  %v3859_v1 = vadd.f32 %v9166_v61, %v3760_v31 }
 0x580   : > { %10388 = vrcp.f32 %v3538_v57  ;;  %v8139_v9 = vmul.f32 -1.442695, %v3674_v4  ;;  %v3666_v60 = vadd.f32 %v3665_v37, %v3573_v42  ;;  %v11973_v25 = vpop.eup %10370  ;;  %v3763_v57 = vld [vmem:[#allocation4 + $0x278] sm:$0xff]  ;;  %v3851_v43 = vadd.f32 %v3850_v15, %v3758_v47 }
 0x581   : > { %10390 = vpow2.f32 %v8136_v8  ;;  %v9145_v14 = vpop.f32.mrf.mxu0  ;;  %v9169_v23 = vpop.f32.mrf.mxu1  ;;  %v3761_v4 = vld [vmem:[#allocation4 + $0x3b8] sm:$0xff]  ;;  %v8155_v61 = vmul.f32 -1.442695, %v3859_v1 }
 0x582   : > { %v8137_v19 = vmul.f32 -1.442695, %v3666_v60  ;;  %v3687_v21 = vadd.f32 %v9145_v14, %v3578_v22  ;;  %10392 = vpow2.f32 %v8139_v9  ;;  %v11975_v34 = vpop.eup %10372  ;;  %v3872_v37 = vadd.f32 %v9169_v23, %v3763_v57 }
 0x583   : > { %v3678_v13 = vpop.f32.mrf.mxu0  ;;  %10394 = vrcp.f32 %v3536_v5  ;;  %v11977_v39 = vpop.eup %10374  ;;  %v3764_v5 = vld [vmem:[#allocation4 + $0x7c0] sm:$0xff]  ;;  %v8153_v60 = vmul.f32 -1.442695, %v3851_v43 }
 0x584   : > { %v8142_v20 = vmul.f32 -1.442695, %v3687_v21  ;;  %v3679_v30 = vadd.f32 %v3678_v13, %v3576_v26  ;;  %10396 = vpow2.f32 %v8137_v19  ;;  %v10377_v46 = vpop.eup %10376  ;;  %v3863_v2 = vpop.f32.mrf.mxu1  ;;  %v3762_v26 = vld [vmem:[#allocation4 + $0x1d8] sm:$0xff]  ;;  %v8158_v0 = vmul.f32 -1.442695, %v3872_v37 }
 0x585   : > { %v9146_v38 = vpop.f32.mrf.mxu0  ;;  %10398 = vrcp.f32 %v3539_v3  ;;  %v11979_v51 = vpop.eup %10378  ;;  %v3537_v42 = vadd.f32 1.0, %v10377_v46  ;;  %v3864_v15 = vadd.f32 %v3863_v2, %v3761_v4 }
 0x586   : > { %v8140_v36 = vmul.f32 -1.442695, %v3679_v30  ;;  %v3690_v45 = vadd.f32 %v9146_v38, %v3579_v27  ;;  %10400 = vpow2.f32 %v8142_v20  ;;  %v11981_v33 = vpop.eup %10380  ;;  %v9170_v44 = vpop.f32.mrf.mxu1 }
 0x587   : > { %v3681_v6 = vpop.f32.mrf.mxu0  ;;  %v11983_v54 = vpop.eup %10382  ;;  %v3875_v19 = vadd.f32 %v9170_v44, %v3764_v5  ;;  %v8156_v27 = vmul.f32 -1.442695, %v3864_v15  ;;  %v3926_v37 = vmul.f32 %v11981_v33, %v11967_v50 }
 0x588   : > { %v8143_v55 = vmul.f32 -1.442695, %v3690_v45  ;;  %v3682_v56 = vadd.f32 %v3681_v6, %v3577_v28  ;;  %10402 = vpow2.f32 %v8140_v36  ;;  %v3866_v14 = vpop.f32.mrf.mxu1  ;;  %v3247_v28 = vld [vmem:[#allocation4 + $0x5d8] sm:$0xff] }
 0x589   : > { %10404 = vpow2.f32 %v8154_v41  ;;  %v3867_v17 = vadd.f32 %v3866_v14, %v3762_v26  ;;  %v8159_v38 = vmul.f32 -1.442695, %v3875_v19  ;;  %v3352_v6 = vadd.f32 %v11963_v40, %v3247_v28 }
 0x58a   : > { %v8141_v16 = vmul.f32 -1.442695, %v3682_v56  ;;  %10406 = vpow2.f32 %v8143_v55 }
 0x58b   : > { %v10385_v53 = vpop.eup %10384  ;;  %10408 = vpow2.f32 %v8152_v52  ;;  %v8157_v45 = vmul.f32 -1.442695, %v3867_v17 }
 0x58c   : > { %v11985_v7 = vpop.eup %10386  ;;  %v3719_v8 = vadd.f32 1.0, %v10385_v53  ;;  %10410 = vpow2.f32 %v8141_v16  ;;  %v3928_v53 = vmul.f32 %v11979_v51, %v11965_v63 }
 0x58d   : > { %v11987_v22 = vpop.eup %10388  ;;  %v3927_v50 = vmul.f32 %v11985_v7, %v11971_v59 }
 0x58e   : > { %v10391_v9 = vpop.eup %10390  ;;  %10412 = vrcp.f32 %v3719_v8 }
 0x58f   : > { %10414 = vrcp.f32 %v3537_v42  ;;  %v3717_v58 = vadd.f32 1.0, %v10391_v9  ;;  %v10393_v3 = vpop.eup %10392 }
 0x590   : > { %10416 = vpow2.f32 %v8155_v61  ;;  %v11989_v21 = vpop.eup %10394  ;;  %v3720_v23 = vadd.f32 1.0, %v10393_v3 }
 0x591   : > { %10418 = vrcp.f32 %v3717_v58  ;;  %v10397_v13 = vpop.eup %10396 }
 0x592   : > { %10420 = vpow2.f32 %v8153_v60  ;;  %v11991_v20 = vpop.eup %10398  ;;  %v3718_v30 = vadd.f32 1.0, %v10397_v13 }
 0x593   : > { %10422 = vrcp.f32 %v3720_v23  ;;  %v10401_v31 = vpop.eup %10400 }
 0x594   : > { %10424 = vpow2.f32 %v8158_v0  ;;  %v3723_v41 = vadd.f32 1.0, %v10401_v31 }
 0x595   : > { %10426 = vrcp.f32 %v3718_v30  ;;  %v10403_v36 = vpop.eup %10402 }
 0x596   : > { %10428 = vpow2.f32 %v8156_v27  ;;  %v10405_v46 = vpop.eup %10404  ;;  %v3721_v47 = vadd.f32 1.0, %v10403_v36 }
 0x597   : > { %10430 = vrcp.f32 %v3723_v41  ;;  %v10407_v2 = vpop.eup %10406  ;;  %v3904_v57 = vadd.f32 1.0, %v10405_v46 }
 0x598   : > { %10432 = vpow2.f32 %v8159_v38  ;;  %v10409_v52 = vpop.eup %10408  ;;  %v3724_v1 = vadd.f32 1.0, %v10407_v2 }
 0x599   : > { %10434 = vrcp.f32 %v3721_v47  ;;  %v10411_v55 = vpop.eup %10410  ;;  %v3902_v8 = vadd.f32 1.0, %v10409_v52 }
 0x59a   : > { %10436 = vpow2.f32 %v8157_v45  ;;  %v3722_v43 = vadd.f32 1.0, %v10411_v55 }
 0x59b   : > { %v10413_v56 = vpop.eup %10412  ;;  %10438 = vrcp.f32 %v3724_v1 }
 0x59c   : > { %v10415_v16 = vpop.eup %10414  ;;  %10440 = vtanh.f32 %v3352_v6  ;;  %v3936_v42 = vmul.f32 %v10413_v56, %v11898_v12  ;;  %v3929_v12 = vmul.f32 %v11983_v54, %v11969_v49 }
 0x59d   : > { %v10417_v4 = vpop.eup %10416  ;;  %10442 = vrcp.f32 %v3722_v43 }
 0x59e   : > { %v10419_v40 = vpop.eup %10418  ;;  %v11997_v44 = vadd.f32 %v3936_v42, %v3928_v53  ;;  %10444 = vrcp.f32 %v3904_v57  ;;  %v3905_v63 = vadd.f32 1.0, %v10417_v4  ;;  %v9950_v4 = vld [vmem:[#allocation2 + $0xc8] ss:$16 sps:$4 sm:$0xff]  }
 0x59f   : > { %v10421_v61 = vpop.eup %10420  ;;  %v3934_v5 = vmul.f32 %v10419_v40, %v11906_v62  ;;  %v9951_v40 = vld [vmem:[#allocation2 + $0xcc] ss:$16 sps:$4 sm:$0xff]  }
 0x5a0   : > { %v10423_v9 = vpop.eup %10422  ;;  %10446 = vtanh.f32 %v11997_v44  ;;  %v3903_v14 = vadd.f32 1.0, %v10421_v61 }
 0x5a1   : > { %v10425_v51 = vpop.eup %10424  ;;  %v12005_v60 = vadd.f32 %v3934_v5, %v3926_v37  ;;  %v3937_v15 = vmul.f32 %v10423_v9, %v11911_v48  ;;  %10448 = vrcp.f32 %v3902_v8  ;;  %v3932_v48 = vmul.f32 %v11987_v22, %v11973_v25 }
 0x5a2   : > { %v10427_v58 = vpop.eup %10426  ;;  %v3908_v49 = vadd.f32 1.0, %v10425_v51  ;;  %v9952_v51 = vld [vmem:[#allocation2 + $0xa8] ss:$16 sps:$4 sm:$0xff]  }
 0x5a3   : > { %v10429_v26 = vpop.eup %10428  ;;  %v12010_v62 = vadd.f32 %v3937_v15, %v3929_v12  ;;  %v3935_v33 = vmul.f32 %v10427_v58, %v11918_v11  ;;  %10450 = vtanh.f32 %v12005_v60  ;;  %v3930_v11 = vmul.f32 %v11989_v21, %v11975_v34  ;;  %v9953_v12 = vld [vmem:[#allocation2 + $0xac] ss:$16 sps:$4 sm:$0xff]  }
 0x5a4   : > { %v10431_v3 = vpop.eup %10430  ;;  %10452 = vrcp.f32 %v3905_v63  ;;  %v3906_v7 = vadd.f32 1.0, %v10429_v26  ;;  %v9956_v26 = vld [vmem:[#allocation2 + $0x68] ss:$16 sps:$4 sm:$0xff]  }
 0x5a5   : > { %v10433_v54 = vpop.eup %10432  ;;  %10454 = vtanh.f32 %v12010_v62  ;;  %v12017_v0 = vadd.f32 %v3935_v33, %v3927_v50  ;;  %v3940_v19 = vmul.f32 %v10431_v3, %v11923_v18  ;;  %v3933_v18 = vmul.f32 %v11991_v20, %v11977_v39  ;;  %v9957_v50 = vld [vmem:[#allocation2 + $0x6c] ss:$16 sps:$4 sm:$0xff]   ;;  %v9958_v33 = vld [vmem:[#allocation2 + $0x48] ss:$16 sps:$4 sm:$0xff]  }
 0x5a6   : > { %v10435_v59 = vpop.eup %10434  ;;  %10456 = vrcp.f32 %v3903_v14  ;;  %v3909_v22 = vadd.f32 1.0, %v10433_v54  ;;  %v9959_v3 = vld [vmem:[#allocation2 + $0x4c] ss:$16 sps:$4 sm:$0xff]  }
 0x5a7   : > { %v10437_v23 = vpop.eup %10436  ;;  %v12022_v13 = vadd.f32 %v3940_v19, %v3932_v48  ;;  %v3938_v27 = vmul.f32 %v10435_v59, %v11929_v24  ;;  %10458 = vtanh.f32 %v12017_v0  ;;  %v9961_v54 = vld [vmem:[#allocation2 + $0x2c] ss:$16 sps:$4 sm:$0xff]   ;;  %v9962_v48 = vld [vmem:[#allocation2 + $0x8] ss:$16 sps:$4 sm:$0xff]   ;;  %v9964_v59 = vld [vmem:[#allocation2 + $0xe0] ss:$16 sps:$4 sm:$0xff]  }
 0x5a8   : > { %v10439_v25 = vpop.eup %10438  ;;  %10460 = vrcp.f32 %v3908_v49  ;;  %v3907_v21 = vadd.f32 1.0, %v10437_v23  ;;  %v9960_v49 = vld [vmem:[#allocation2 + $0x28] ss:$16 sps:$4 sm:$0xff]   ;;  %v9963_v19 = vld [vmem:[#allocation2 + $0xc] ss:$16 sps:$4 sm:$0xff]  }
 0x5a9   : > { %v10441_v17 = vpop.eup %10440  ;;  %v12028_v30 = vadd.f32 %v3938_v27, %v3930_v11  ;;  %v3941_v31 = vmul.f32 %v10439_v25, %v11933_v29  ;;  %10462 = vtanh.f32 %v12022_v13  ;;  %v9966_v23 = vld [vmem:[#allocation2 + $0xc0] ss:$16 sps:$4 sm:$0xff]   ;;  %v9967_v11 = vld [vmem:[#allocation2 + $0xc4] ss:$16 sps:$4 sm:$0xff]  }
 0x5aa   : > { %v10443_v34 = vpop.eup %10442  ;;  %10464 = vrcp.f32 %v3906_v7  ;;  %v3931_v24 = vmul.f32 %v10441_v17, %v10415_v16  ;;  %v9965_v7 = vld [vmem:[#allocation2 + $0xe4] ss:$16 sps:$4 sm:$0xff]   ;;  %v9968_v27 = vld [vmem:[#allocation2 + $0xa0] ss:$16 sps:$4 sm:$0xff]  }
 0x5ab   : > { %v12032_v38 = vadd.f32 %v3941_v31, %v3933_v18  ;;  %v3939_v28 = vmul.f32 %v10443_v34, %v11937_v32  ;;  %10466 = vtanh.f32 %v12028_v30  ;;  %v10445_v41 = vpop.eup %10444  ;;  %v9969_v25 = vld [vmem:[#allocation2 + $0xa4] ss:$16 sps:$4 sm:$0xff]   ;;  %v9972_v18 = vld [vmem:[#allocation2 + $0x60] ss:$16 sps:$4 sm:$0xff]  }
 0x5ac   : > { %10468 = vrcp.f32 %v3909_v22  ;;  %v9970_v22 = vld [vmem:[#allocation2 + $0x80] ss:$16 sps:$4 sm:$0xff]   ;;  %v9971_v17 = vld [vmem:[#allocation2 + $0x84] ss:$16 sps:$4 sm:$0xff]  }
 0x5ad   : > { %v10447_v39 = vpop.eup %10446  ;;  %v12036_v20 = vadd.f32 %v3939_v28, %v3931_v24  ;;  %10470 = vtanh.f32 %v12032_v38  ;;  %v9973_v31 = vld [vmem:[#allocation2 + $0x64] ss:$16 sps:$4 sm:$0xff]   ;;  %v9974_v34 = vld [vmem:[#allocation2 + $0x40] ss:$16 sps:$4 sm:$0xff]  }
 0x5ae   : > { %10472 = vrcp.f32 %v3907_v21  ;;  %v3960_v29 = vmul.f32 %v10447_v39, %v10445_v41  ;;  %v10449_v36 = vpop.eup %10448  ;;  %v9975_v21 = vld [vmem:[#allocation2 + $0x44] ss:$16 sps:$4 sm:$0xff]   ;;  %v9976_v24 = vld [vmem:[#allocation2 + $0x20] ss:$16 sps:$4 sm:$0xff]  }
 0x5af   : > { %10474 = vtanh.f32 %v12036_v20  ;;  %v9977_v28 = vld [vmem:[#allocation2 + $0x24] ss:$16 sps:$4 sm:$0xff]   ;;  %v9978_v41 = vld [vmem:[#allocation2] ss:$16 sps:$4 sm:$0xff]  }
 0x5b0   : > { %v10451_v45 = vpop.eup %10450  ;;  %8162 = vst [vmem:[%s11390_s28 + $0x90] sm:$0xff] %v3960_v29  ;;  %v9979_v39 = vld [vmem:[#allocation2 + $0x4] ss:$16 sps:$4 sm:$0xff]  }
 0x5b1   : > { %v10453_v32 = vpop.eup %10452  ;;  %v3958_v46 = vmul.f32 %v10451_v45, %v10449_v36  ;;  %v12058_v36 = vld [vmem:[#allocation2 + $0xec] ss:$16 sps:$4 sm:$0xff]  }
 0x5b2   : > { %v10455_v47 = vpop.eup %10454 }
 0x5b3   : > { %v10457_v2 = vpop.eup %10456  ;;  %8160 = vst [vmem:[%s11390_s28 + $0x80] sm:$0xff] %v3958_v46  ;;  %v3961_v6 = vmul.f32 %v10455_v47, %v10453_v32  ;;  %v4143_v47 = vld [vmem:[#allocation4 + $0x198] sm:$0xff] }
 0x5b4   : > { %v10459_v52 = vpop.eup %10458 }
 0x5b5   : > { %v10461_v1 = vpop.eup %10460  ;;  %v3959_v55 = vmul.f32 %v10459_v52, %v10457_v2  ;;  %8163 = vst [vmem:[%s11390_s28 + $0x98] sm:$0xff] %v3961_v6  ;;  %v12044_v42 = vpack.c.bf16 %v3961_v6, %v3960_v29  ;;  %v12056_v29 = vld [vmem:[#allocation2 + $0xe8] ss:$16 sps:$4 sm:$0xff]   ;;  %v4141_v2 = vld [vmem:[#allocation4 + $0x7f0] sm:$0xff] }
 0x5b6   : > { %v10463_v56 = vpop.eup %10462 }
 0x5b7   : > { %v10465_v57 = vpop.eup %10464  ;;  %8161 = vst [vmem:[%s11390_s28 + $0x88] sm:$0xff] %v3959_v55  ;;  %v3975_v43 = vpack.c.bf16 %v3959_v55, %v3958_v46  ;;  %v3964_v16 = vmul.f32 %v10463_v56, %v10461_v1  ;;  %v4144_v1 = vld [vmem:[#allocation4 + $0xb0] sm:$0xff] }
 0x5b8   : > { %v10467_v53 = vpop.eup %10466 }
 0x5b9   : > { %v10469_v8 = vpop.eup %10468  ;;  %9187 = vmatprep.mubr.bf16.mxu0 %v3975_v43  ;;  %9211 = vmatprep.mubr.bf16.mxu1 %v3975_v43  ;;  %v3962_v61 = vmul.f32 %v10467_v53, %v10465_v57  ;;  %8166 = vst [vmem:[%s11390_s28 + $0xb0] sm:$0xff] %v3964_v16  ;;  %v4147_v53 = vld [vmem:[#allocation4 + $0x128] sm:$0xff] }
 0x5ba   : > { %v10471_v37 = vpop.eup %10470  ;;  %9188 = vmatmul.mubr.bf16.vlgmr.msra.gmra.mxu0 %v12044_v42  ;;  %9212 = vmatmul.mubr.bf16.vlgmr.msra.gmra.mxu1 %v12044_v42 }
 0x5bb   : > { %v10473_v5 = vpop.eup %10472  ;;  %9220 = vmatpush3.bf16.msra.mxu0 %v11957_v10  ;;  %9244 = vmatpush3.bf16.msra.mxu1 %v11959_v35  ;;  %8164 = vst [vmem:[%s11390_s28 + $0xa0] sm:$0xff] %v3962_v61  ;;  %v3965_v9 = vmul.f32 %v10471_v37, %v10469_v8  ;;  %v9954_v10 = vld [vmem:[#allocation2 + $0x88] ss:$16 sps:$4 sm:$0xff]   ;;  %v9955_v35 = vld [vmem:[#allocation2 + $0x8c] ss:$16 sps:$4 sm:$0xff]  }
 0x5bc   : > { %v10475_v63 = vpop.eup %10474  ;;  %9221 = vmatprep.subr.bf16.mxu0 %v9950_v4  ;;  %9245 = vmatprep.subr.bf16.mxu1 %v9951_v40 }
 0x5bd   : > { %v3963_v15 = vmul.f32 %v10475_v63, %v10473_v5  ;;  %8167 = vst [vmem:[%s11390_s28 + $0xb8] sm:$0xff] %v3965_v9  ;;  %v3978_v14 = vpack.c.bf16 %v3965_v9, %v3964_v16  ;;  %v4145_v63 = vld [vmem:[#allocation4 + $0x1e0] sm:$0xff] }
 0x5bf   : > { %9222 = vmatpush3.bf16.msra.mxu0 %v9950_v4  ;;  %9246 = vmatpush3.bf16.msra.mxu1 %v9951_v40  ;;  %8165 = vst [vmem:[%s11390_s28 + $0xa8] sm:$0xff] %v3963_v15  ;;  %v3977_v58 = vpack.c.bf16 %v3963_v15, %v3962_v61  ;;  %v4148_v15 = vld [vmem:[#allocation4 + $0x240] sm:$0xff] }
 0x5c0   : > { %9223 = vmatprep.subr.bf16.mxu0 %v9952_v51  ;;  %9247 = vmatprep.subr.bf16.mxu1 %v9953_v12 }
 0x5c1   : > { %9191 = vmatprep.mubr.bf16.mxu0 %v3977_v58  ;;  %9215 = vmatprep.mubr.bf16.mxu1 %v3977_v58 }
 0x5c2   : > { %9192 = vmatmul.mubr.bf16.gmra.mxu0 %v3978_v14  ;;  %9216 = vmatmul.mubr.bf16.gmra.mxu1 %v3978_v14 }
 0x5c3   : > { %9224 = vmatpush3.bf16.msra.mxu0 %v9952_v51  ;;  %9248 = vmatpush3.bf16.msra.mxu1 %v9953_v12 }
 0x5c4   : > { %9235 = vmatprep.mubr.bf16.mxu0 %v3975_v43  ;;  %9259 = vmatprep.mubr.bf16.mxu1 %v3975_v43  ;;  %v4142_v43 = vld [vmem:[#allocation4 + $0x540] sm:$0xff] }
 0x5c5   : > { %9225 = vmatprep.subr.bf16.mxu0 %v9954_v10  ;;  %9249 = vmatprep.subr.bf16.mxu1 %v9955_v35 }
 0x5c7   : > { %9226 = vmatpush3.bf16.msra.mxu0 %v9954_v10  ;;  %9250 = vmatpush3.bf16.msra.mxu1 %v9955_v35 }
 0x5c8   : > { %9227 = vmatprep.subr.bf16.mxu0 %v9956_v26  ;;  %9251 = vmatprep.subr.bf16.mxu1 %v9957_v50 }
 0x5cb   : > { %9228 = vmatpush3.bf16.msra.mxu0 %v9956_v26  ;;  %9252 = vmatpush3.bf16.msra.mxu1 %v9957_v50  ;;  %v3998_v50 = vld [vmem:[#allocation4 + $0x58] sm:$0xff] }
 0x5cc   : > { %9229 = vmatprep.subr.bf16.mxu0 %v9958_v33  ;;  %9253 = vmatprep.subr.bf16.mxu1 %v9959_v3 }
 0x5cf   : > { %9230 = vmatpush3.bf16.msra.mxu0 %v9958_v33  ;;  %9254 = vmatpush3.bf16.msra.mxu1 %v9959_v3  ;;  %v3996_v3 = vld [vmem:[#allocation4 + $0x418] sm:$0xff] }
 0x5d0   : > { %9231 = vmatprep.subr.bf16.mxu0 %v9960_v49  ;;  %9255 = vmatprep.subr.bf16.mxu1 %v9961_v54 }
 0x5d3   : > { %9232 = vmatpush3.bf16.msra.mxu0 %v9960_v49  ;;  %9256 = vmatpush3.bf16.msra.mxu1 %v9961_v54  ;;  %v3999_v49 = vld [vmem:[#allocation4 + $0x3a8] sm:$0xff] }
 0x5d4   : > { %9233 = vmatprep.subr.bf16.mxu0 %v9962_v48  ;;  %9257 = vmatprep.subr.bf16.mxu1 %v9963_v19 }
 0x5d7   : > { %9234 = vmatpush3.bf16.msra.mxu0 %v9962_v48  ;;  %9258 = vmatpush3.bf16.msra.mxu1 %v9963_v19 }
 0x5d8   : > { %9267 = vmatprep.subr.bf16.mxu0 %v9964_v59  ;;  %9291 = vmatprep.subr.bf16.mxu1 %v9965_v7 }
 0x5da   : > { %9236 = vmatmul.mubr.bf16.vlgmr.msra.gmra.mxu0 %v12044_v42  ;;  %9260 = vmatmul.mubr.bf16.vlgmr.msra.gmra.mxu1 %v12044_v42 }
 0x5db   : > { %9239 = vmatprep.mubr.bf16.mxu0 %v3977_v58  ;;  %9263 = vmatprep.mubr.bf16.mxu1 %v3977_v58 }
 0x5dc   : > { %9268 = vmatpush3.bf16.msra.mxu0 %v9964_v59  ;;  %9292 = vmatpush3.bf16.msra.mxu1 %v9965_v7  ;;  %v3997_v59 = vld [vmem:[#allocation4 + $0x90] sm:$0xff] }
 0x5dd   : > { %9269 = vmatprep.subr.bf16.mxu0 %v9966_v23  ;;  %9293 = vmatprep.subr.bf16.mxu1 %v9967_v11 }
 0x5e0   : > { %9270 = vmatpush3.bf16.msra.mxu0 %v9966_v23  ;;  %9294 = vmatpush3.bf16.msra.mxu1 %v9967_v11  ;;  %v4146_v23 = vld [vmem:[#allocation4 + $0x6b8] sm:$0xff] }
 0x5e1   : > { %9271 = vmatprep.subr.bf16.mxu0 %v9968_v27  ;;  %9295 = vmatprep.subr.bf16.mxu1 %v9969_v25 }
 0x5e2   : > { %9240 = vmatmul.mubr.bf16.gmra.mxu0 %v3978_v14  ;;  %9264 = vmatmul.mubr.bf16.gmra.mxu1 %v3978_v14 }
 0x5e4   : > { %9272 = vmatpush3.bf16.msra.mxu0 %v9968_v27  ;;  %9296 = vmatpush3.bf16.msra.mxu1 %v9969_v25  ;;  %v4002_v27 = vld [vmem:[#allocation4 + $0x30] sm:$0xff] }
 0x5e5   : > { %9273 = vmatprep.subr.bf16.mxu0 %v9970_v22  ;;  %9297 = vmatprep.subr.bf16.mxu1 %v9971_v17 }
 0x5e8   : > { %9274 = vmatpush3.bf16.msra.mxu0 %v9970_v22  ;;  %9298 = vmatpush3.bf16.msra.mxu1 %v9971_v17  ;;  %v4000_v22 = vld [vmem:[#allocation4 + $0x370] sm:$0xff] }
 0x5e9   : > { %9275 = vmatprep.subr.bf16.mxu0 %v9972_v18  ;;  %9299 = vmatprep.subr.bf16.mxu1 %v9973_v31 }
 0x5ec   : > { %9276 = vmatpush3.bf16.msra.mxu0 %v9972_v18  ;;  %9300 = vmatpush3.bf16.msra.mxu1 %v9973_v31  ;;  %v4003_v18 = vld [vmem:[#allocation4 + $0x670] sm:$0xff] }
 0x5ed   : > { %9277 = vmatprep.subr.bf16.mxu0 %v9974_v34  ;;  %9301 = vmatprep.subr.bf16.mxu1 %v9975_v21 }
 0x5f0   : > { %9278 = vmatpush3.bf16.msra.mxu0 %v9974_v34  ;;  %9302 = vmatpush3.bf16.msra.mxu1 %v9975_v21 }
 0x5f1   : > { %9279 = vmatprep.subr.bf16.mxu0 %v9976_v24  ;;  %9303 = vmatprep.subr.bf16.mxu1 %v9977_v28 }
 0x5f4   : > { %9280 = vmatpush3.bf16.msra.mxu0 %v9976_v24  ;;  %9304 = vmatpush3.bf16.msra.mxu1 %v9977_v28 }
 0x5f5   : > { %9281 = vmatprep.subr.bf16.mxu0 %v9978_v41  ;;  %9305 = vmatprep.subr.bf16.mxu1 %v9979_v39 }
 0x5f8   : > { %9282 = vmatpush3.bf16.msra.mxu0 %v9978_v41  ;;  %9306 = vmatpush3.bf16.msra.mxu1 %v9979_v39 }
 0x5f9   : > { %9315 = vmatprep.subr.bf16.mxu0 %v12056_v29  ;;  %9339 = vmatprep.subr.bf16.mxu1 %v12058_v36 }
 0x67a   : > { %v9213_v45 = vpop.f32.mrf.mxu1  ;;  %v9189_v32 = vpop.f32.mrf.mxu0 }
 0x67b   : > { %v4240_v55 = vadd.f32 %v9213_v45, %v4143_v47  ;;  %v4095_v19 = vadd.f32 %v9189_v32, %v3998_v50 }
 0x67c   : > { %v4231_v46 = vpop.f32.mrf.mxu1  ;;  %v4086_v52 = vpop.f32.mrf.mxu0 }
 0x67d   : > { %v4232_v57 = vadd.f32 %v4231_v46, %v4141_v2  ;;  %v8186_v40 = vmul.f32 -1.442695, %v4240_v55  ;;  %v4087_v11 = vadd.f32 %v4086_v52, %v3996_v3  ;;  %v4328_v2 = vld [vmem:[#allocation4 + $0x68] sm:$0xff] }
 0x67e   : > { %v9214_v6 = vpop.f32.mrf.mxu1  ;;  %v9190_v4 = vpop.f32.mrf.mxu0 }
 0x67f   : > { %v4243_v16 = vadd.f32 %v9214_v6, %v4144_v1  ;;  %v8184_v37 = vmul.f32 -1.442695, %v4232_v57  ;;  %10476 = vpow2.f32 %v8186_v40  ;;  %v4098_v25 = vadd.f32 %v9190_v4, %v3999_v49  ;;  %v4329_v40 = vld [vmem:[#allocation4 + $0x630] sm:$0xff] }
 0x680   : > { %v4234_v56 = vpop.f32.mrf.mxu1  ;;  %v4089_v51 = vpop.f32.mrf.mxu0 }
 0x681   : > { %v4235_v8 = vadd.f32 %v4234_v56, %v4142_v43  ;;  %v8187_v9 = vmul.f32 -1.442695, %v4243_v16  ;;  %10478 = vpow2.f32 %v8184_v37  ;;  %v4090_v17 = vadd.f32 %v4089_v51, %v3997_v59  ;;  %v4326_v16 = vld [vmem:[#allocation4 + $0x4b0] sm:$0xff]  ;;  %v4327_v51 = vld [vmem:[#allocation4 + $0x588] sm:$0xff] }
 0x682   : > { %v9217_v42 = vpop.f32.mrf.mxu1  ;;  %v9193_v35 = vpop.f32.mrf.mxu0  ;;  %v4330_v59 = vld [vmem:[#allocation4 + $0x7b0] sm:$0xff] }
 0x683   : > { %v4256_v5 = vadd.f32 %v9217_v42, %v4147_v53  ;;  %v8185_v12 = vmul.f32 -1.442695, %v4235_v8  ;;  %10480 = vpow2.f32 %v8187_v9  ;;  %v4111_v21 = vadd.f32 %v9193_v35, %v4002_v27 }
 0x684   : > { %v4247_v61 = vpop.f32.mrf.mxu1  ;;  %v4102_v54 = vpop.f32.mrf.mxu0 }
 0x685   : > { %v8190_v14 = vmul.f32 -1.442695, %v4256_v5  ;;  %v4248_v10 = vadd.f32 %v4247_v61, %v4145_v63  ;;  %10482 = vpow2.f32 %v8185_v12  ;;  %v4103_v28 = vadd.f32 %v4102_v54, %v4000_v22 }
 0x686   : > { %v9218_v58 = vpop.f32.mrf.mxu1  ;;  %v9194_v31 = vpop.f32.mrf.mxu0 }
 0x687   : > { %v4259_v26 = vadd.f32 %v9218_v58, %v4148_v15  ;;  %10484 = vpow2.f32 %v8190_v14  ;;  %v8188_v33 = vmul.f32 -1.442695, %v4248_v10  ;;  %v4114_v39 = vadd.f32 %v9194_v31, %v4003_v18  ;;  %v4513_v58 = vld [vmem:[#allocation4 + $0x600] sm:$0xff]  ;;  %v4333_v31 = vld [vmem:[#allocation4 + $0x118] sm:$0xff] }
 0x688   : > { %v4250_v7 = vpop.f32.mrf.mxu1  ;;  %v12062_v47 = vpop.f32.mrf.mxu0 }
 0x689   : > { %v8191_v48 = vmul.f32 -1.442695, %v4259_v26  ;;  %10486 = vpow2.f32 %v8188_v33  ;;  %v4251_v34 = vadd.f32 %v4250_v7, %v4146_v23  ;;  %v4332_v26 = vld [vmem:[#allocation4 + $0x1a0] sm:$0xff] }
 0x68b   : > { %10488 = vpow2.f32 %v8191_v48  ;;  %v8189_v32 = vmul.f32 -1.442695, %v4251_v34  ;;  %v4511_v48 = vld [vmem:[#allocation4 + $0x318] sm:$0xff] }
 0x68c   : > { %10490 = vtanh.f32 %v4095_v19  ;;  %v10477_v24 = vpop.eup %10476 }
 0x68d   : > { %10492 = vtanh.f32 %v4087_v11  ;;  %v4288_v46 = vadd.f32 1.0, %v10477_v24 }
 0x68e   : > { %v10479_v41 = vpop.eup %10478  ;;  %10494 = vtanh.f32 %v4098_v25 }
 0x68f   : > { %10496 = vtanh.f32 %v4090_v17  ;;  %v4286_v52 = vadd.f32 1.0, %v10479_v41 }
 0x690   : > { %v10481_v45 = vpop.eup %10480  ;;  %10498 = vtanh.f32 %v4111_v21 }
 0x691   : > { %10500 = vtanh.f32 %v4103_v28  ;;  %v4289_v55 = vadd.f32 1.0, %v10481_v45 }
 0x692   : > { %v10483_v6 = vpop.eup %10482  ;;  %10502 = vtanh.f32 %v4114_v39  ;;  %v4514_v39 = vld [vmem:[#allocation4 + $0x158] sm:$0xff] }
 0x693   : > { %10504 = vpow2.f32 %v8189_v32  ;;  %v4287_v53 = vadd.f32 1.0, %v10483_v6  ;;  %v4331_v32 = vld [vmem:[#allocation4 + $0x140] sm:$0xff] }
 0x694   : > { %v10485_v1 = vpop.eup %10484  ;;  %10506 = vrcp.f32 %v4288_v46 }
 0x695   : > { %10508 = vrcp.f32 %v4286_v52  ;;  %v4292_v8 = vadd.f32 1.0, %v10485_v1 }
 0x696   : > { %v10487_v37 = vpop.eup %10486  ;;  %10510 = vrcp.f32 %v4289_v55  ;;  %v4512_v55 = vld [vmem:[#allocation4 + $0x648] sm:$0xff] }
 0x697   : > { %v4290_v33 = vadd.f32 1.0, %v10487_v37 }
 0x698   : > { %v10489_v15 = vpop.eup %10488 }
 0x699   : > { %v12064_v50 = vpop.eup %10490  ;;  %v4293_v23 = vadd.f32 1.0, %v10489_v15 }
 0x69a   : > { %v9237_v56 = vpop.f32.mrf.mxu0  ;;  %v9261_v57 = vpop.f32.mrf.mxu1 }
 0x69b   : > { %v4425_v43 = vadd.f32 %v9237_v56, %v4328_v2  ;;  %v12066_v54 = vpop.eup %10492  ;;  %v4610_v11 = vadd.f32 %v9261_v57, %v4513_v58 }
 0x69c   : > { %v4416_v42 = vpop.f32.mrf.mxu0  ;;  %v4601_v4 = vpop.f32.mrf.mxu1 }
 0x69d   : > { %v8202_v61 = vmul.f32 -1.442695, %v4425_v43  ;;  %v4417_v5 = vadd.f32 %v4416_v42, %v4326_v16  ;;  %v12068_v7 = vpop.eup %10494  ;;  %v4602_v21 = vadd.f32 %v4601_v4, %v4511_v48  ;;  %v8218_v2 = vmul.f32 -1.442695, %v4610_v11 }
 0x69e   : > { %v9238_v9 = vpop.f32.mrf.mxu0  ;;  %v9262_v63 = vpop.f32.mrf.mxu1 }
 0x69f   : > { %10512 = vpow2.f32 %v8202_v61  ;;  %v4428_v12 = vadd.f32 %v9238_v9, %v4329_v40  ;;  %v8200_v14 = vmul.f32 -1.442695, %v4417_v5  ;;  %v12070_v22 = vpop.eup %10496  ;;  %v8216_v16 = vmul.f32 -1.442695, %v4602_v21 }
 0x6a0   : > { %10514 = vrcp.f32 %v4287_v53  ;;  %v4419_v10 = vpop.f32.mrf.mxu0  ;;  %v4604_v35 = vpop.f32.mrf.mxu1  ;;  %v4613_v53 = vadd.f32 %v9262_v63, %v4514_v39 }
 0x6a1   : > { %10516 = vrcp.f32 %v4292_v8  ;;  %v8203_v3 = vmul.f32 -1.442695, %v4428_v12  ;;  %v4420_v49 = vadd.f32 %v4419_v10, %v4327_v51  ;;  %v12072_v34 = vpop.eup %10498  ;;  %v4517_v8 = vld [vmem:[#allocation4 + $0x5f0] sm:$0xff]  ;;  %v4605_v37 = vadd.f32 %v4604_v35, %v4512_v55  ;;  %v4515_v12 = vld [vmem:[#allocation4 + $0x6c0] sm:$0xff] }
 0x6a2   : > { %10518 = vpow2.f32 %v8200_v14  ;;  %v9241_v19 = vpop.f32.mrf.mxu0  ;;  %v9265_v17 = vpop.f32.mrf.mxu1  ;;  %v8219_v63 = vmul.f32 -1.442695, %v4613_v53 }
 0x6a3   : > { %v8201_v27 = vmul.f32 -1.442695, %v4420_v49  ;;  %v4441_v25 = vadd.f32 %v9241_v19, %v4332_v26  ;;  %10520 = vpow2.f32 %v8203_v3  ;;  %v12074_v41 = vpop.eup %10500  ;;  %v4626_v10 = vadd.f32 %v9265_v17, %v4517_v8 }
 0x6a4   : > { %v4432_v18 = vpop.f32.mrf.mxu0  ;;  %10522 = vrcp.f32 %v4290_v33  ;;  %v12076_v46 = vpop.eup %10502  ;;  %v4518_v33 = vld [vmem:[#allocation4 + $0x268] sm:$0xff]  ;;  %v8217_v49 = vmul.f32 -1.442695, %v4605_v37 }
 0x6a5   : > { %v8206_v24 = vmul.f32 -1.442695, %v4441_v25  ;;  %v4433_v28 = vadd.f32 %v4432_v18, %v4330_v59  ;;  %10524 = vpow2.f32 %v8201_v27  ;;  %v10505_v1 = vpop.eup %10504  ;;  %v4617_v56 = vpop.f32.mrf.mxu1  ;;  %v4516_v59 = vld [vmem:[#allocation4 + $0x5b0] sm:$0xff]  ;;  %v8222_v11 = vmul.f32 -1.442695, %v4626_v10 }
 0x6a6   : > { %v9242_v45 = vpop.f32.mrf.mxu0  ;;  %10526 = vrcp.f32 %v4293_v23  ;;  %v12078_v43 = vpop.eup %10506  ;;  %v4291_v51 = vadd.f32 1.0, %v10505_v1  ;;  %v4618_v35 = vadd.f32 %v4617_v56, %v4515_v12 }
 0x6a7   : > { %v8204_v6 = vmul.f32 -1.442695, %v4433_v28  ;;  %v4444_v52 = vadd.f32 %v9242_v45, %v4333_v31  ;;  %10528 = vpow2.f32 %v8206_v24  ;;  %v12080_v40 = vpop.eup %10508  ;;  %v9266_v15 = vpop.f32.mrf.mxu1 }
 0x6a8   : > { %v4435_v57 = vpop.f32.mrf.mxu0  ;;  %v12082_v61 = vpop.eup %10510  ;;  %v4629_v27 = vadd.f32 %v9266_v15, %v4518_v33  ;;  %v8220_v31 = vmul.f32 -1.442695, %v4618_v35  ;;  %v4680_v10 = vmul.f32 %v12080_v40, %v12066_v54 }
 0x6a9   : > { %v8207_v42 = vmul.f32 -1.442695, %v4444_v52  ;;  %v4436_v4 = vadd.f32 %v4435_v57, %v4331_v32  ;;  %10530 = vpow2.f32 %v8204_v6  ;;  %v4620_v19 = vpop.f32.mrf.mxu1  ;;  %v4001_v32 = vld [vmem:[#allocation4 + $0xd8] sm:$0xff] }
 0x6aa   : > { %10532 = vpow2.f32 %v8218_v2  ;;  %v4621_v21 = vadd.f32 %v4620_v19, %v4516_v59  ;;  %v8223_v45 = vmul.f32 -1.442695, %v4629_v27  ;;  %v4106_v57 = vadd.f32 %v12062_v47, %v4001_v32 }
 0x6ab   : > { %v8205_v5 = vmul.f32 -1.442695, %v4436_v4  ;;  %10534 = vpow2.f32 %v8207_v42 }
 0x6ac   : > { %v10513_v9 = vpop.eup %10512  ;;  %10536 = vpow2.f32 %v8216_v16  ;;  %v8221_v52 = vmul.f32 -1.442695, %v4621_v21 }
 0x6ad   : > { %v12084_v58 = vpop.eup %10514  ;;  %v4473_v14 = vadd.f32 1.0, %v10513_v9  ;;  %10538 = vpow2.f32 %v8205_v5  ;;  %v4682_v9 = vmul.f32 %v12078_v43, %v12064_v50 }
 0x6ae   : > { %v12086_v26 = vpop.eup %10516  ;;  %v4681_v54 = vmul.f32 %v12084_v58, %v12070_v22 }
 0x6af   : > { %v10519_v3 = vpop.eup %10518  ;;  %10540 = vrcp.f32 %v4473_v14 }
 0x6b0   : > { %10542 = vrcp.f32 %v4291_v51  ;;  %v4471_v48 = vadd.f32 1.0, %v10519_v3  ;;  %v10521_v23 = vpop.eup %10520 }
 0x6b1   : > { %10544 = vpow2.f32 %v8219_v63  ;;  %v12088_v25 = vpop.eup %10522  ;;  %v4474_v17 = vadd.f32 1.0, %v10521_v23 }
 0x6b2   : > { %10546 = vrcp.f32 %v4471_v48  ;;  %v10525_v18 = vpop.eup %10524 }
 0x6b3   : > { %10548 = vpow2.f32 %v8217_v49  ;;  %v12090_v24 = vpop.eup %10526  ;;  %v4472_v28 = vadd.f32 1.0, %v10525_v18 }
 0x6b4   : > { %10550 = vrcp.f32 %v4474_v17  ;;  %v10529_v39 = vpop.eup %10528 }
 0x6b5   : > { %10552 = vpow2.f32 %v8222_v11  ;;  %v4477_v2 = vadd.f32 1.0, %v10529_v39 }
 0x6b6   : > { %10554 = vrcp.f32 %v4472_v28  ;;  %v10531_v6 = vpop.eup %10530 }
 0x6b7   : > { %10556 = vpow2.f32 %v8220_v31  ;;  %v10533_v1 = vpop.eup %10532  ;;  %v4475_v55 = vadd.f32 1.0, %v10531_v6 }
 0x6b8   : > { %10558 = vrcp.f32 %v4477_v2  ;;  %v10535_v56 = vpop.eup %10534  ;;  %v4658_v8 = vadd.f32 1.0, %v10533_v1 }
 0x6b9   : > { %10560 = vpow2.f32 %v8223_v45  ;;  %v10537_v16 = vpop.eup %10536  ;;  %v4478_v53 = vadd.f32 1.0, %v10535_v56 }
 0x6ba   : > { %10562 = vrcp.f32 %v4475_v55  ;;  %v10539_v42 = vpop.eup %10538  ;;  %v4656_v14 = vadd.f32 1.0, %v10537_v16 }
 0x6bb   : > { %10564 = vpow2.f32 %v8221_v52  ;;  %v4476_v37 = vadd.f32 1.0, %v10539_v42 }
 0x6bc   : > { %v10541_v4 = vpop.eup %10540  ;;  %10566 = vrcp.f32 %v4478_v53 }
 0x6bd   : > { %v10543_v5 = vpop.eup %10542  ;;  %10568 = vtanh.f32 %v4106_v57  ;;  %v4690_v51 = vmul.f32 %v10541_v4, %v11997_v44  ;;  %v4683_v44 = vmul.f32 %v12082_v61, %v12068_v7 }
 0x6be   : > { %v10545_v12 = vpop.eup %10544  ;;  %10570 = vrcp.f32 %v4476_v37 }
 0x6bf   : > { %v10547_v47 = vpop.eup %10546  ;;  %v12096_v15 = vadd.f32 %v4690_v51, %v4682_v9  ;;  %10572 = vrcp.f32 %v4658_v8  ;;  %v4659_v50 = vadd.f32 1.0, %v10545_v12  ;;  %v9982_v12 = vld [vmem:[#allocation2 + $0xc8] ss:$16 sps:$4 sm:$0xff]  }
 0x6c0   : > { %v10549_v63 = vpop.eup %10548  ;;  %v4688_v33 = vmul.f32 %v10547_v47, %v12005_v60  ;;  %v9983_v47 = vld [vmem:[#allocation2 + $0xcc] ss:$16 sps:$4 sm:$0xff]  }
 0x6c1   : > { %v10551_v3 = vpop.eup %10550  ;;  %10574 = vtanh.f32 %v12096_v15  ;;  %v4657_v19 = vadd.f32 1.0, %v10549_v63 }
 0x6c2   : > { %v10553_v43 = vpop.eup %10552  ;;  %v12104_v49 = vadd.f32 %v4688_v33, %v4680_v10  ;;  %v4691_v35 = vmul.f32 %v10551_v3, %v12010_v62  ;;  %10576 = vrcp.f32 %v4656_v14  ;;  %v4686_v62 = vmul.f32 %v12086_v26, %v12072_v34 }
 0x6c3   : > { %v10555_v48 = vpop.eup %10554  ;;  %v4662_v7 = vadd.f32 1.0, %v10553_v43  ;;  %v9984_v43 = vld [vmem:[#allocation2 + $0xa8] ss:$16 sps:$4 sm:$0xff]  }
 0x6c4   : > { %v10557_v59 = vpop.eup %10556  ;;  %v12109_v60 = vadd.f32 %v4691_v35, %v4683_v44  ;;  %v4689_v40 = vmul.f32 %v10555_v48, %v12017_v0  ;;  %10578 = vtanh.f32 %v12104_v49  ;;  %v4684_v0 = vmul.f32 %v12088_v25, %v12074_v41  ;;  %v9985_v44 = vld [vmem:[#allocation2 + $0xac] ss:$16 sps:$4 sm:$0xff]  }
 0x6c5   : > { %v10559_v23 = vpop.eup %10558  ;;  %10580 = vrcp.f32 %v4659_v50  ;;  %v4660_v58 = vadd.f32 1.0, %v10557_v59  ;;  %v9988_v59 = vld [vmem:[#allocation2 + $0x68] ss:$16 sps:$4 sm:$0xff]  }
 0x6c6   : > { %v10561_v61 = vpop.eup %10560  ;;  %10582 = vtanh.f32 %v12109_v60  ;;  %v12116_v11 = vadd.f32 %v4689_v40, %v4681_v54  ;;  %v4694_v27 = vmul.f32 %v10559_v23, %v12022_v13  ;;  %v4687_v13 = vmul.f32 %v12090_v24, %v12076_v46  ;;  %v9989_v54 = vld [vmem:[#allocation2 + $0x6c] ss:$16 sps:$4 sm:$0xff]   ;;  %v9990_v40 = vld [vmem:[#allocation2 + $0x48] ss:$16 sps:$4 sm:$0xff]  }
 0x6c7   : > { %v10563_v22 = vpop.eup %10562  ;;  %10584 = vrcp.f32 %v4657_v19  ;;  %v4663_v26 = vadd.f32 1.0, %v10561_v61  ;;  %v9991_v23 = vld [vmem:[#allocation2 + $0x4c] ss:$16 sps:$4 sm:$0xff]  }
 0x6c8   : > { %v10565_v17 = vpop.eup %10564  ;;  %v12121_v18 = vadd.f32 %v4694_v27, %v4686_v62  ;;  %v4692_v31 = vmul.f32 %v10563_v22, %v12028_v30  ;;  %10586 = vtanh.f32 %v12116_v11  ;;  %v9993_v61 = vld [vmem:[#allocation2 + $0x2c] ss:$16 sps:$4 sm:$0xff]   ;;  %v9994_v62 = vld [vmem:[#allocation2 + $0x8] ss:$16 sps:$4 sm:$0xff]   ;;  %v9996_v22 = vld [vmem:[#allocation2 + $0xe0] ss:$16 sps:$4 sm:$0xff]  }
 0x6c9   : > { %v10567_v34 = vpop.eup %10566  ;;  %10588 = vrcp.f32 %v4662_v7  ;;  %v4661_v25 = vadd.f32 1.0, %v10565_v17  ;;  %v9992_v7 = vld [vmem:[#allocation2 + $0x28] ss:$16 sps:$4 sm:$0xff]   ;;  %v9995_v27 = vld [vmem:[#allocation2 + $0xc] ss:$16 sps:$4 sm:$0xff]  }
 0x6ca   : > { %v10569_v21 = vpop.eup %10568  ;;  %v12127_v28 = vadd.f32 %v4692_v31, %v4684_v0  ;;  %v4695_v39 = vmul.f32 %v10567_v34, %v12032_v38  ;;  %10590 = vtanh.f32 %v12121_v18  ;;  %v9998_v17 = vld [vmem:[#allocation2 + $0xc0] ss:$16 sps:$4 sm:$0xff]   ;;  %v9999_v0 = vld [vmem:[#allocation2 + $0xc4] ss:$16 sps:$4 sm:$0xff]  }
 0x6cb   : > { %v10571_v41 = vpop.eup %10570  ;;  %10592 = vrcp.f32 %v4660_v58  ;;  %v4685_v30 = vmul.f32 %v10569_v21, %v10543_v5  ;;  %v9997_v58 = vld [vmem:[#allocation2 + $0xe4] ss:$16 sps:$4 sm:$0xff]   ;;  %v10000_v31 = vld [vmem:[#allocation2 + $0xa0] ss:$16 sps:$4 sm:$0xff]  }
 0x6cc   : > { %v12131_v45 = vadd.f32 %v4695_v39, %v4687_v13  ;;  %v4693_v32 = vmul.f32 %v10571_v41, %v12036_v20  ;;  %10594 = vtanh.f32 %v12127_v28  ;;  %v10573_v2 = vpop.eup %10572  ;;  %v10001_v34 = vld [vmem:[#allocation2 + $0xa4] ss:$16 sps:$4 sm:$0xff]   ;;  %v10004_v13 = vld [vmem:[#allocation2 + $0x60] ss:$16 sps:$4 sm:$0xff]  }
 0x6cd   : > { %10596 = vrcp.f32 %v4663_v26  ;;  %v10002_v26 = vld [vmem:[#allocation2 + $0x80] ss:$16 sps:$4 sm:$0xff]   ;;  %v10003_v21 = vld [vmem:[#allocation2 + $0x84] ss:$16 sps:$4 sm:$0xff]  }
 0x6ce   : > { %v10575_v46 = vpop.eup %10574  ;;  %v12135_v24 = vadd.f32 %v4693_v32, %v4685_v30  ;;  %10598 = vtanh.f32 %v12131_v45  ;;  %v10005_v39 = vld [vmem:[#allocation2 + $0x64] ss:$16 sps:$4 sm:$0xff]   ;;  %v10006_v41 = vld [vmem:[#allocation2 + $0x40] ss:$16 sps:$4 sm:$0xff]  }
 0x6cf   : > { %10600 = vrcp.f32 %v4661_v25  ;;  %v4714_v38 = vmul.f32 %v10575_v46, %v10573_v2  ;;  %v10577_v6 = vpop.eup %10576  ;;  %v10007_v25 = vld [vmem:[#allocation2 + $0x44] ss:$16 sps:$4 sm:$0xff]   ;;  %v10008_v30 = vld [vmem:[#allocation2 + $0x20] ss:$16 sps:$4 sm:$0xff]  }
 0x6d0   : > { %10602 = vtanh.f32 %v12135_v24  ;;  %v10009_v32 = vld [vmem:[#allocation2 + $0x24] ss:$16 sps:$4 sm:$0xff]   ;;  %v10010_v2 = vld [vmem:[#allocation2] ss:$16 sps:$4 sm:$0xff]  }
 0x6d1   : > { %v10579_v52 = vpop.eup %10578  ;;  %8226 = vst [vmem:[%s11390_s28 + $0xd0] sm:$0xff] %v4714_v38  ;;  %v10011_v46 = vld [vmem:[#allocation2 + $0x4] ss:$16 sps:$4 sm:$0xff]  }
 0x6d2   : > { %v10581_v20 = vpop.eup %10580  ;;  %v4712_v1 = vmul.f32 %v10579_v52, %v10577_v6  ;;  %v12157_v6 = vld [vmem:[#allocation2 + $0xec] ss:$16 sps:$4 sm:$0xff]  }
 0x6d3   : > { %v10583_v55 = vpop.eup %10582 }
 0x6d4   : > { %v10585_v56 = vpop.eup %10584  ;;  %8224 = vst [vmem:[%s11390_s28 + $0xc0] sm:$0xff] %v4712_v1  ;;  %v4715_v57 = vmul.f32 %v10583_v55, %v10581_v20  ;;  %v4897_v55 = vld [vmem:[#allocation4 + $0x1e8] sm:$0xff] }
 0x6d5   : > { %v10587_v16 = vpop.eup %10586 }
 0x6d6   : > { %v10589_v53 = vpop.eup %10588  ;;  %v4713_v42 = vmul.f32 %v10587_v16, %v10585_v56  ;;  %8227 = vst [vmem:[%s11390_s28 + $0xd8] sm:$0xff] %v4715_v57  ;;  %v12143_v51 = vpack.c.bf16 %v4715_v57, %v4714_v38  ;;  %v12155_v38 = vld [vmem:[#allocation2 + $0xe8] ss:$16 sps:$4 sm:$0xff]  }
 0x6d7   : > { %v10591_v4 = vpop.eup %10590  ;;  %v4895_v56 = vld [vmem:[#allocation4 + $0x5c8] sm:$0xff] }
 0x6d8   : > { %v10593_v8 = vpop.eup %10592  ;;  %8225 = vst [vmem:[%s11390_s28 + $0xc8] sm:$0xff] %v4713_v42  ;;  %v4729_v37 = vpack.c.bf16 %v4713_v42, %v4712_v1  ;;  %v4718_v5 = vmul.f32 %v10591_v4, %v10589_v53  ;;  %v4898_v53 = vld [vmem:[#allocation4 + $0x658] sm:$0xff] }
 0x6d9   : > { %v10595_v9 = vpop.eup %10594 }
 0x6da   : > { %v10597_v14 = vpop.eup %10596  ;;  %9283 = vmatprep.mubr.bf16.mxu0 %v4729_v37  ;;  %9307 = vmatprep.mubr.bf16.mxu1 %v4729_v37  ;;  %v4716_v63 = vmul.f32 %v10595_v9, %v10593_v8  ;;  %8230 = vst [vmem:[%s11390_s28 + $0xf0] sm:$0xff] %v4718_v5  ;;  %v4901_v9 = vld [vmem:[#allocation4 + $0x778] sm:$0xff] }
 0x6db   : > { %v10599_v10 = vpop.eup %10598  ;;  %9284 = vmatmul.mubr.bf16.vlgmr.msra.gmra.mxu0 %v12143_v51  ;;  %9308 = vmatmul.mubr.bf16.vlgmr.msra.gmra.mxu1 %v12143_v51 }
 0x6dc   : > { %v10601_v33 = vpop.eup %10600  ;;  %9316 = vmatpush3.bf16.msra.mxu0 %v12056_v29  ;;  %9340 = vmatpush3.bf16.msra.mxu1 %v12058_v36  ;;  %8228 = vst [vmem:[%s11390_s28 + $0xe0] sm:$0xff] %v4716_v63  ;;  %v4719_v3 = vmul.f32 %v10599_v10, %v10597_v14  ;;  %v9986_v29 = vld [vmem:[#allocation2 + $0x88] ss:$16 sps:$4 sm:$0xff]   ;;  %v9987_v36 = vld [vmem:[#allocation2 + $0x8c] ss:$16 sps:$4 sm:$0xff]  }
 0x6dd   : > { %v10603_v50 = vpop.eup %10602  ;;  %9317 = vmatprep.subr.bf16.mxu0 %v9982_v12  ;;  %9341 = vmatprep.subr.bf16.mxu1 %v9983_v47 }
 0x6de   : > { %v4717_v35 = vmul.f32 %v10603_v50, %v10601_v33  ;;  %8231 = vst [vmem:[%s11390_s28 + $0xf8] sm:$0xff] %v4719_v3  ;;  %v4732_v19 = vpack.c.bf16 %v4719_v3, %v4718_v5  ;;  %v4899_v50 = vld [vmem:[#allocation4 + $0x4f0] sm:$0xff] }
 0x6e0   : > { %9318 = vmatpush3.bf16.msra.mxu0 %v9982_v12  ;;  %9342 = vmatpush3.bf16.msra.mxu1 %v9983_v47  ;;  %8229 = vst [vmem:[%s11390_s28 + $0xe8] sm:$0xff] %v4717_v35  ;;  %v4731_v48 = vpack.c.bf16 %v4717_v35, %v4716_v63  ;;  %v4902_v35 = vld [vmem:[#allocation4 + $0x660] sm:$0xff] }
 0x6e1   : > { %9319 = vmatprep.subr.bf16.mxu0 %v9984_v43  ;;  %9343 = vmatprep.subr.bf16.mxu1 %v9985_v44 }
 0x6e2   : > { %9287 = vmatprep.mubr.bf16.mxu0 %v4731_v48  ;;  %9311 = vmatprep.mubr.bf16.mxu1 %v4731_v48 }
 0x6e3   : > { %9288 = vmatmul.mubr.bf16.gmra.mxu0 %v4732_v19  ;;  %9312 = vmatmul.mubr.bf16.gmra.mxu1 %v4732_v19 }
 0x6e4   : > { %9320 = vmatpush3.bf16.msra.mxu0 %v9984_v43  ;;  %9344 = vmatpush3.bf16.msra.mxu1 %v9985_v44 }
 0x6e5   : > { %9331 = vmatprep.mubr.bf16.mxu0 %v4729_v37  ;;  %9355 = vmatprep.mubr.bf16.mxu1 %v4729_v37  ;;  %v4896_v37 = vld [vmem:[#allocation4 + $0xf8] sm:$0xff] }
 0x6e6   : > { %9321 = vmatprep.subr.bf16.mxu0 %v9986_v29  ;;  %9345 = vmatprep.subr.bf16.mxu1 %v9987_v36 }
 0x6e8   : > { %9322 = vmatpush3.bf16.msra.mxu0 %v9986_v29  ;;  %9346 = vmatpush3.bf16.msra.mxu1 %v9987_v36 }
 0x6e9   : > { %9323 = vmatprep.subr.bf16.mxu0 %v9988_v59  ;;  %9347 = vmatprep.subr.bf16.mxu1 %v9989_v54 }
 0x6ec   : > { %9324 = vmatpush3.bf16.msra.mxu0 %v9988_v59  ;;  %9348 = vmatpush3.bf16.msra.mxu1 %v9989_v54  ;;  %v4752_v54 = vld [vmem:[#allocation4 + $0x3c8] sm:$0xff] }
 0x6ed   : > { %9325 = vmatprep.subr.bf16.mxu0 %v9990_v40  ;;  %9349 = vmatprep.subr.bf16.mxu1 %v9991_v23 }
 0x6f0   : > { %9326 = vmatpush3.bf16.msra.mxu0 %v9990_v40  ;;  %9350 = vmatpush3.bf16.msra.mxu1 %v9991_v23  ;;  %v4750_v23 = vld [vmem:[#allocation4 + $0x4a8] sm:$0xff] }
 0x6f1   : > { %9327 = vmatprep.subr.bf16.mxu0 %v9992_v7  ;;  %9351 = vmatprep.subr.bf16.mxu1 %v9993_v61 }
 0x6f4   : > { %9328 = vmatpush3.bf16.msra.mxu0 %v9992_v7  ;;  %9352 = vmatpush3.bf16.msra.mxu1 %v9993_v61  ;;  %v4753_v7 = vld [vmem:[#allocation4 + $0x730] sm:$0xff] }
 0x6f5   : > { %9329 = vmatprep.subr.bf16.mxu0 %v9994_v62  ;;  %9353 = vmatprep.subr.bf16.mxu1 %v9995_v27 }
 0x6f8   : > { %9330 = vmatpush3.bf16.msra.mxu0 %v9994_v62  ;;  %9354 = vmatpush3.bf16.msra.mxu1 %v9995_v27 }
 0x6f9   : > { %9363 = vmatprep.subr.bf16.mxu0 %v9996_v22  ;;  %9387 = vmatprep.subr.bf16.mxu1 %v9997_v58 }
 0x6fb   : > { %9332 = vmatmul.mubr.bf16.vlgmr.msra.gmra.mxu0 %v12143_v51  ;;  %9356 = vmatmul.mubr.bf16.vlgmr.msra.gmra.mxu1 %v12143_v51 }
 0x6fc   : > { %9335 = vmatprep.mubr.bf16.mxu0 %v4731_v48  ;;  %9359 = vmatprep.mubr.bf16.mxu1 %v4731_v48 }
 0x6fd   : > { %9364 = vmatpush3.bf16.msra.mxu0 %v9996_v22  ;;  %9388 = vmatpush3.bf16.msra.mxu1 %v9997_v58  ;;  %v4751_v22 = vld [vmem:[#allocation4 + $0x2c8] sm:$0xff] }
 0x6fe   : > { %9365 = vmatprep.subr.bf16.mxu0 %v9998_v17  ;;  %9389 = vmatprep.subr.bf16.mxu1 %v9999_v0 }
 0x701   : > { %9366 = vmatpush3.bf16.msra.mxu0 %v9998_v17  ;;  %9390 = vmatpush3.bf16.msra.mxu1 %v9999_v0  ;;  %v4900_v17 = vld [vmem:[#allocation4 + $0x4f8] sm:$0xff] }
 0x702   : > { %9367 = vmatprep.subr.bf16.mxu0 %v10000_v31  ;;  %9391 = vmatprep.subr.bf16.mxu1 %v10001_v34 }
 0x703   : > { %9336 = vmatmul.mubr.bf16.gmra.mxu0 %v4732_v19  ;;  %9360 = vmatmul.mubr.bf16.gmra.mxu1 %v4732_v19 }
 0x705   : > { %9368 = vmatpush3.bf16.msra.mxu0 %v10000_v31  ;;  %9392 = vmatpush3.bf16.msra.mxu1 %v10001_v34  ;;  %v4756_v31 = vld [vmem:[#allocation4 + $0x10] sm:$0xff] }
 0x706   : > { %9369 = vmatprep.subr.bf16.mxu0 %v10002_v26  ;;  %9393 = vmatprep.subr.bf16.mxu1 %v10003_v21 }
 0x709   : > { %9370 = vmatpush3.bf16.msra.mxu0 %v10002_v26  ;;  %9394 = vmatpush3.bf16.msra.mxu1 %v10003_v21  ;;  %v4754_v26 = vld [vmem:[#allocation4 + $0x460] sm:$0xff] }
 0x70a   : > { %9371 = vmatprep.subr.bf16.mxu0 %v10004_v13  ;;  %9395 = vmatprep.subr.bf16.mxu1 %v10005_v39 }
 0x70d   : > { %9372 = vmatpush3.bf16.msra.mxu0 %v10004_v13  ;;  %9396 = vmatpush3.bf16.msra.mxu1 %v10005_v39  ;;  %v4757_v13 = vld [vmem:[#allocation4 + $0x590] sm:$0xff] }
 0x70e   : > { %9373 = vmatprep.subr.bf16.mxu0 %v10006_v41  ;;  %9397 = vmatprep.subr.bf16.mxu1 %v10007_v25 }
 0x711   : > { %9374 = vmatpush3.bf16.msra.mxu0 %v10006_v41  ;;  %9398 = vmatpush3.bf16.msra.mxu1 %v10007_v25 }
 0x712   : > { %9375 = vmatprep.subr.bf16.mxu0 %v10008_v30  ;;  %9399 = vmatprep.subr.bf16.mxu1 %v10009_v32 }
 0x715   : > { %9376 = vmatpush3.bf16.msra.mxu0 %v10008_v30  ;;  %9400 = vmatpush3.bf16.msra.mxu1 %v10009_v32 }
 0x716   : > { %9377 = vmatprep.subr.bf16.mxu0 %v10010_v2  ;;  %9401 = vmatprep.subr.bf16.mxu1 %v10011_v46 }
 0x719   : > { %9378 = vmatpush3.bf16.msra.mxu0 %v10010_v2  ;;  %9402 = vmatpush3.bf16.msra.mxu1 %v10011_v46 }
 0x71a   : > { %9411 = vmatprep.subr.bf16.mxu0 %v12155_v38  ;;  %9435 = vmatprep.subr.bf16.mxu1 %v12157_v6 }
 0x79b   : > { %v9309_v52 = vpop.f32.mrf.mxu1  ;;  %v9285_v20 = vpop.f32.mrf.mxu0 }
 0x79c   : > { %v4994_v42 = vadd.f32 %v9309_v52, %v4897_v55  ;;  %v4849_v27 = vadd.f32 %v9285_v20, %v4752_v54 }
 0x79d   : > { %v4985_v1 = vpop.f32.mrf.mxu1  ;;  %v4840_v16 = vpop.f32.mrf.mxu0 }
 0x79e   : > { %v4986_v8 = vadd.f32 %v4985_v1, %v4895_v56  ;;  %v8250_v47 = vmul.f32 -1.442695, %v4994_v42  ;;  %v4841_v0 = vadd.f32 %v4840_v16, %v4750_v23  ;;  %v5082_v56 = vld [vmem:[#allocation4 + $0x6d0] sm:$0xff] }
 0x79f   : > { %v9310_v57 = vpop.f32.mrf.mxu1  ;;  %v9286_v12 = vpop.f32.mrf.mxu0 }
 0x7a0   : > { %v4997_v5 = vadd.f32 %v9310_v57, %v4898_v53  ;;  %v8248_v10 = vmul.f32 -1.442695, %v4986_v8  ;;  %10604 = vpow2.f32 %v8250_v47  ;;  %v4852_v34 = vadd.f32 %v9286_v12, %v4753_v7  ;;  %v5083_v47 = vld [vmem:[#allocation4 + $0x458] sm:$0xff] }
 0x7a1   : > { %v4988_v4 = vpop.f32.mrf.mxu1  ;;  %v4843_v43 = vpop.f32.mrf.mxu0 }
 0x7a2   : > { %v4989_v14 = vadd.f32 %v4988_v4, %v4896_v37  ;;  %v8251_v3 = vmul.f32 -1.442695, %v4997_v5  ;;  %10606 = vpow2.f32 %v8248_v10  ;;  %v4844_v21 = vadd.f32 %v4843_v43, %v4751_v22  ;;  %v5080_v5 = vld [vmem:[#allocation4 + $0x438] sm:$0xff]  ;;  %v5081_v43 = vld [vmem:[#allocation4 + $0x488] sm:$0xff] }
 0x7a3   : > { %v9313_v51 = vpop.f32.mrf.mxu1  ;;  %v9289_v36 = vpop.f32.mrf.mxu0  ;;  %v5084_v22 = vld [vmem:[#allocation4 + $0x528] sm:$0xff] }
 0x7a4   : > { %v5010_v33 = vadd.f32 %v9313_v51, %v4901_v9  ;;  %v8249_v44 = vmul.f32 -1.442695, %v4989_v14  ;;  %10608 = vpow2.f32 %v8251_v3  ;;  %v4865_v25 = vadd.f32 %v9289_v36, %v4756_v31 }
 0x7a5   : > { %v5001_v63 = vpop.f32.mrf.mxu1  ;;  %v4856_v61 = vpop.f32.mrf.mxu0 }
 0x7a6   : > { %v8254_v19 = vmul.f32 -1.442695, %v5010_v33  ;;  %v5002_v29 = vadd.f32 %v5001_v63, %v4899_v50  ;;  %10610 = vpow2.f32 %v8249_v44  ;;  %v4857_v32 = vadd.f32 %v4856_v61, %v4754_v26 }
 0x7a7   : > { %v9314_v48 = vpop.f32.mrf.mxu1  ;;  %v9290_v39 = vpop.f32.mrf.mxu0 }
 0x7a8   : > { %v5013_v59 = vadd.f32 %v9314_v48, %v4902_v35  ;;  %10612 = vpow2.f32 %v8254_v19  ;;  %v8252_v40 = vmul.f32 -1.442695, %v5002_v29  ;;  %v4868_v46 = vadd.f32 %v9290_v39, %v4757_v13  ;;  %v5267_v48 = vld [vmem:[#allocation4 + $0x688] sm:$0xff]  ;;  %v5087_v39 = vld [vmem:[#allocation4 + $0x358] sm:$0xff] }
 0x7a9   : > { %v5004_v58 = vpop.f32.mrf.mxu1  ;;  %v12161_v55 = vpop.f32.mrf.mxu0 }
 0x7aa   : > { %v8255_v62 = vmul.f32 -1.442695, %v5013_v59  ;;  %10614 = vpow2.f32 %v8252_v40  ;;  %v5005_v41 = vadd.f32 %v5004_v58, %v4900_v17  ;;  %v5086_v59 = vld [vmem:[#allocation4 + $0x7a8] sm:$0xff] }
 0x7ac   : > { %10616 = vpow2.f32 %v8255_v62  ;;  %v8253_v20 = vmul.f32 -1.442695, %v5005_v41  ;;  %v5265_v62 = vld [vmem:[#allocation4 + $0x350] sm:$0xff] }
 0x7ad   : > { %10618 = vtanh.f32 %v4849_v27  ;;  %v10605_v30 = vpop.eup %10604 }
 0x7ae   : > { %10620 = vtanh.f32 %v4841_v0  ;;  %v5042_v1 = vadd.f32 1.0, %v10605_v30 }
 0x7af   : > { %v10607_v2 = vpop.eup %10606  ;;  %10622 = vtanh.f32 %v4852_v34 }
 0x7b0   : > { %10624 = vtanh.f32 %v4844_v21  ;;  %v5040_v16 = vadd.f32 1.0, %v10607_v2 }
 0x7b1   : > { %v10609_v52 = vpop.eup %10608  ;;  %10626 = vtanh.f32 %v4865_v25 }
 0x7b2   : > { %10628 = vtanh.f32 %v4857_v32  ;;  %v5043_v42 = vadd.f32 1.0, %v10609_v52 }
 0x7b3   : > { %v10611_v57 = vpop.eup %10610  ;;  %10630 = vtanh.f32 %v4868_v46  ;;  %v5268_v46 = vld [vmem:[#allocation4 + $0x1b8] sm:$0xff] }
 0x7b4   : > { %10632 = vpow2.f32 %v8253_v20  ;;  %v5041_v9 = vadd.f32 1.0, %v10611_v57  ;;  %v5085_v20 = vld [vmem:[#allocation4 + $0x78] sm:$0xff] }
 0x7b5   : > { %v10613_v53 = vpop.eup %10612  ;;  %10634 = vrcp.f32 %v5042_v1 }
 0x7b6   : > { %10636 = vrcp.f32 %v5040_v16  ;;  %v5046_v14 = vadd.f32 1.0, %v10613_v53 }
 0x7b7   : > { %v10615_v10 = vpop.eup %10614  ;;  %10638 = vrcp.f32 %v5043_v42  ;;  %v5266_v42 = vld [vmem:[#allocation4 + $0x6a0] sm:$0xff] }
 0x7b8   : > { %v5044_v40 = vadd.f32 1.0, %v10615_v10 }
 0x7b9   : > { %v10617_v35 = vpop.eup %10616 }
 0x7ba   : > { %v12163_v54 = vpop.eup %10618  ;;  %v5047_v17 = vadd.f32 1.0, %v10617_v35 }
 0x7bb   : > { %v9333_v4 = vpop.f32.mrf.mxu0  ;;  %v9357_v8 = vpop.f32.mrf.mxu1 }
 0x7bc   : > { %v5179_v37 = vadd.f32 %v9333_v4, %v5082_v56  ;;  %v12165_v61 = vpop.eup %10620  ;;  %v5364_v0 = vadd.f32 %v9357_v8, %v5267_v48 }
 0x7bd   : > { %v5170_v51 = vpop.f32.mrf.mxu0  ;;  %v5355_v12 = vpop.f32.mrf.mxu1 }
 0x7be   : > { %v8266_v63 = vmul.f32 -1.442695, %v5179_v37  ;;  %v5171_v33 = vadd.f32 %v5170_v51, %v5080_v5  ;;  %v12167_v58 = vpop.eup %10622  ;;  %v5356_v25 = vadd.f32 %v5355_v12, %v5265_v62  ;;  %v8282_v56 = vmul.f32 -1.442695, %v5364_v0 }
 0x7bf   : > { %v9334_v3 = vpop.f32.mrf.mxu0  ;;  %v9358_v50 = vpop.f32.mrf.mxu1 }
 0x7c0   : > { %10640 = vpow2.f32 %v8266_v63  ;;  %v5182_v44 = vadd.f32 %v9334_v3, %v5083_v47  ;;  %v8264_v19 = vmul.f32 -1.442695, %v5171_v33  ;;  %v12169_v26 = vpop.eup %10624  ;;  %v8280_v5 = vmul.f32 -1.442695, %v5356_v25 }
 0x7c1   : > { %10642 = vrcp.f32 %v5041_v9  ;;  %v5173_v29 = vpop.f32.mrf.mxu0  ;;  %v5358_v36 = vpop.f32.mrf.mxu1  ;;  %v5367_v9 = vadd.f32 %v9358_v50, %v5268_v46 }
 0x7c2   : > { %10644 = vrcp.f32 %v5046_v14  ;;  %v8267_v23 = vmul.f32 -1.442695, %v5182_v44  ;;  %v5174_v7 = vadd.f32 %v5173_v29, %v5081_v43  ;;  %v12171_v41 = vpop.eup %10626  ;;  %v5271_v14 = vld [vmem:[#allocation4 + $0x530] sm:$0xff]  ;;  %v5359_v10 = vadd.f32 %v5358_v36, %v5266_v42  ;;  %v5269_v44 = vld [vmem:[#allocation4 + $0x258] sm:$0xff] }
 0x7c3   : > { %10646 = vpow2.f32 %v8264_v19  ;;  %v9337_v27 = vpop.f32.mrf.mxu0  ;;  %v9361_v21 = vpop.f32.mrf.mxu1  ;;  %v8283_v50 = vmul.f32 -1.442695, %v5367_v9 }
 0x7c4   : > { %v8265_v31 = vmul.f32 -1.442695, %v5174_v7  ;;  %v5195_v34 = vadd.f32 %v9337_v27, %v5086_v59  ;;  %10648 = vpow2.f32 %v8267_v23  ;;  %v12173_v2 = vpop.eup %10628  ;;  %v5380_v29 = vadd.f32 %v9361_v21, %v5271_v14 }
 0x7c5   : > { %v5186_v13 = vpop.f32.mrf.mxu0  ;;  %10650 = vrcp.f32 %v5044_v40  ;;  %v12175_v1 = vpop.eup %10630  ;;  %v5272_v40 = vld [vmem:[#allocation4 + $0x700] sm:$0xff]  ;;  %v8281_v7 = vmul.f32 -1.442695, %v5359_v10 }
 0x7c6   : > { %v8270_v30 = vmul.f32 -1.442695, %v5195_v34  ;;  %v5187_v32 = vadd.f32 %v5186_v13, %v5084_v22  ;;  %10652 = vpow2.f32 %v8265_v31  ;;  %v10633_v53 = vpop.eup %10632  ;;  %v5371_v4 = vpop.f32.mrf.mxu1  ;;  %v5270_v22 = vld [vmem:[#allocation4 + $0x2a0] sm:$0xff]  ;;  %v8286_v0 = vmul.f32 -1.442695, %v5380_v29 }
 0x7c7   : > { %v9338_v52 = vpop.f32.mrf.mxu0  ;;  %10654 = vrcp.f32 %v5047_v17  ;;  %v12177_v37 = vpop.eup %10634  ;;  %v5045_v43 = vadd.f32 1.0, %v10633_v53  ;;  %v5372_v36 = vadd.f32 %v5371_v4, %v5269_v44 }
 0x7c8   : > { %v8268_v57 = vmul.f32 -1.442695, %v5187_v32  ;;  %v5198_v16 = vadd.f32 %v9338_v52, %v5087_v39  ;;  %10656 = vpow2.f32 %v8270_v30  ;;  %v12179_v47 = vpop.eup %10636  ;;  %v9362_v35 = vpop.f32.mrf.mxu1 }
 0x7c9   : > { %v5189_v8 = vpop.f32.mrf.mxu0  ;;  %v12181_v63 = vpop.eup %10638  ;;  %v5383_v31 = vadd.f32 %v9362_v35, %v5272_v40  ;;  %v8284_v39 = vmul.f32 -1.442695, %v5372_v36  ;;  %v5434_v29 = vmul.f32 %v12179_v47, %v12165_v61 }
 0x7ca   : > { %v8271_v51 = vmul.f32 -1.442695, %v5198_v16  ;;  %v5190_v12 = vadd.f32 %v5189_v8, %v5085_v20  ;;  %10658 = vpow2.f32 %v8268_v57  ;;  %v5374_v27 = vpop.f32.mrf.mxu1  ;;  %v4755_v20 = vld [vmem:[#allocation4 + $0x4d0] sm:$0xff] }
 0x7cb   : > { %10660 = vpow2.f32 %v8282_v56  ;;  %v5375_v25 = vadd.f32 %v5374_v27, %v5270_v22  ;;  %v8287_v52 = vmul.f32 -1.442695, %v5383_v31  ;;  %v4860_v8 = vadd.f32 %v12161_v55, %v4755_v20 }
 0x7cc   : > { %v8269_v33 = vmul.f32 -1.442695, %v5190_v12  ;;  %10662 = vpow2.f32 %v8271_v51 }
 0x7cd   : > { %v10641_v3 = vpop.eup %10640  ;;  %10664 = vpow2.f32 %v8280_v5  ;;  %v8285_v16 = vmul.f32 -1.442695, %v5375_v25 }
 0x7ce   : > { %v12183_v48 = vpop.eup %10642  ;;  %v5227_v19 = vadd.f32 1.0, %v10641_v3  ;;  %10666 = vpow2.f32 %v8269_v33  ;;  %v5436_v3 = vmul.f32 %v12177_v37, %v12163_v54 }
 0x7cf   : > { %v12185_v59 = vpop.eup %10644  ;;  %v5435_v61 = vmul.f32 %v12183_v48, %v12169_v26 }
 0x7d0   : > { %v10647_v23 = vpop.eup %10646  ;;  %10668 = vrcp.f32 %v5227_v19 }
 0x7d1   : > { %10670 = vrcp.f32 %v5045_v43  ;;  %v5225_v62 = vadd.f32 1.0, %v10647_v23  ;;  %v10649_v17 = vpop.eup %10648 }
 0x7d2   : > { %10672 = vpow2.f32 %v8283_v50  ;;  %v12187_v34 = vpop.eup %10650  ;;  %v5228_v21 = vadd.f32 1.0, %v10649_v17 }
 0x7d3   : > { %10674 = vrcp.f32 %v5225_v62  ;;  %v10653_v13 = vpop.eup %10652 }
 0x7d4   : > { %10676 = vpow2.f32 %v8281_v7  ;;  %v12189_v30 = vpop.eup %10654  ;;  %v5226_v32 = vadd.f32 1.0, %v10653_v13 }
 0x7d5   : > { %10678 = vrcp.f32 %v5228_v21  ;;  %v10657_v46 = vpop.eup %10656 }
 0x7d6   : > { %10680 = vpow2.f32 %v8286_v0  ;;  %v5231_v56 = vadd.f32 1.0, %v10657_v46 }
 0x7d7   : > { %10682 = vrcp.f32 %v5226_v32  ;;  %v10659_v57 = vpop.eup %10658 }
 0x7d8   : > { %10684 = vpow2.f32 %v8284_v39  ;;  %v10661_v53 = vpop.eup %10660  ;;  %v5229_v42 = vadd.f32 1.0, %v10659_v57 }
 0x7d9   : > { %10686 = vrcp.f32 %v5231_v56  ;;  %v10663_v4 = vpop.eup %10662  ;;  %v5412_v14 = vadd.f32 1.0, %v10661_v53 }
 0x7da   : > { %10688 = vpow2.f32 %v8287_v52  ;;  %v10665_v5 = vpop.eup %10664  ;;  %v5232_v9 = vadd.f32 1.0, %v10663_v4 }
 0x7db   : > { %10690 = vrcp.f32 %v5229_v42  ;;  %v10667_v51 = vpop.eup %10666  ;;  %v5410_v19 = vadd.f32 1.0, %v10665_v5 }
 0x7dc   : > { %10692 = vpow2.f32 %v8285_v16  ;;  %v5230_v10 = vadd.f32 1.0, %v10667_v51 }
 0x7dd   : > { %v10669_v12 = vpop.eup %10668  ;;  %10694 = vrcp.f32 %v5232_v9 }
 0x7de   : > { %v10671_v33 = vpop.eup %10670  ;;  %10696 = vtanh.f32 %v4860_v8  ;;  %v5444_v43 = vmul.f32 %v10669_v12, %v12096_v15  ;;  %v5437_v15 = vmul.f32 %v12181_v63, %v12167_v58 }
 0x7df   : > { %v10673_v44 = vpop.eup %10672  ;;  %10698 = vrcp.f32 %v5230_v10 }
 0x7e0   : > { %v10675_v55 = vpop.eup %10674  ;;  %v12195_v35 = vadd.f32 %v5444_v43, %v5436_v3  ;;  %10700 = vrcp.f32 %v5412_v14  ;;  %v5413_v54 = vadd.f32 1.0, %v10673_v44  ;;  %v10014_v44 = vld [vmem:[#allocation2 + $0xc8] ss:$16 sps:$4 sm:$0xff]  }
 0x7e1   : > { %v10677_v50 = vpop.eup %10676  ;;  %v5442_v40 = vmul.f32 %v10675_v55, %v12104_v49  ;;  %v10015_v55 = vld [vmem:[#allocation2 + $0xcc] ss:$16 sps:$4 sm:$0xff]  }
 0x7e2   : > { %v10679_v23 = vpop.eup %10678  ;;  %10702 = vtanh.f32 %v12195_v35  ;;  %v5411_v27 = vadd.f32 1.0, %v10677_v50 }
 0x7e3   : > { %v10681_v37 = vpop.eup %10680  ;;  %v12203_v7 = vadd.f32 %v5442_v40, %v5434_v29  ;;  %v5445_v36 = vmul.f32 %v10679_v23, %v12109_v60  ;;  %10704 = vrcp.f32 %v5410_v19  ;;  %v5440_v60 = vmul.f32 %v12185_v59, %v12171_v41 }
 0x7e4   : > { %v10683_v62 = vpop.eup %10682  ;;  %v5416_v58 = vadd.f32 1.0, %v10681_v37  ;;  %v10016_v37 = vld [vmem:[#allocation2 + $0xa8] ss:$16 sps:$4 sm:$0xff]  }
 0x7e5   : > { %v10685_v22 = vpop.eup %10684  ;;  %v12208_v49 = vadd.f32 %v5445_v36, %v5437_v15  ;;  %v5443_v47 = vmul.f32 %v10683_v62, %v12116_v11  ;;  %10706 = vtanh.f32 %v12203_v7  ;;  %v5438_v11 = vmul.f32 %v12187_v34, %v12173_v2  ;;  %v10017_v15 = vld [vmem:[#allocation2 + $0xac] ss:$16 sps:$4 sm:$0xff]  }
 0x7e6   : > { %v10687_v17 = vpop.eup %10686  ;;  %10708 = vrcp.f32 %v5413_v54  ;;  %v5414_v48 = vadd.f32 1.0, %v10685_v22  ;;  %v10020_v22 = vld [vmem:[#allocation2 + $0x68] ss:$16 sps:$4 sm:$0xff]  }
 0x7e7   : > { %v10689_v63 = vpop.eup %10688  ;;  %10710 = vtanh.f32 %v12208_v49  ;;  %v12215_v0 = vadd.f32 %v5443_v47, %v5435_v61  ;;  %v5448_v31 = vmul.f32 %v10687_v17, %v12121_v18  ;;  %v5441_v18 = vmul.f32 %v12189_v30, %v12175_v1  ;;  %v10021_v61 = vld [vmem:[#allocation2 + $0x6c] ss:$16 sps:$4 sm:$0xff]   ;;  %v10022_v47 = vld [vmem:[#allocation2 + $0x48] ss:$16 sps:$4 sm:$0xff]  }
 0x7e8   : > { %v10691_v26 = vpop.eup %10690  ;;  %10712 = vrcp.f32 %v5411_v27  ;;  %v5417_v59 = vadd.f32 1.0, %v10689_v63  ;;  %v10023_v17 = vld [vmem:[#allocation2 + $0x4c] ss:$16 sps:$4 sm:$0xff]  }
 0x7e9   : > { %v10693_v21 = vpop.eup %10692  ;;  %v12220_v13 = vadd.f32 %v5448_v31, %v5440_v60  ;;  %v5446_v39 = vmul.f32 %v10691_v26, %v12127_v28  ;;  %10714 = vtanh.f32 %v12215_v0  ;;  %v10025_v63 = vld [vmem:[#allocation2 + $0x2c] ss:$16 sps:$4 sm:$0xff]   ;;  %v10026_v60 = vld [vmem:[#allocation2 + $0x8] ss:$16 sps:$4 sm:$0xff]   ;;  %v10028_v26 = vld [vmem:[#allocation2 + $0xe0] ss:$16 sps:$4 sm:$0xff]  }
 0x7ea   : > { %v10695_v41 = vpop.eup %10694  ;;  %10716 = vrcp.f32 %v5416_v58  ;;  %v5415_v34 = vadd.f32 1.0, %v10693_v21  ;;  %v10024_v58 = vld [vmem:[#allocation2 + $0x28] ss:$16 sps:$4 sm:$0xff]   ;;  %v10027_v31 = vld [vmem:[#allocation2 + $0xc] ss:$16 sps:$4 sm:$0xff]  }
 0x7eb   : > { %v10697_v25 = vpop.eup %10696  ;;  %v12226_v32 = vadd.f32 %v5446_v39, %v5438_v11  ;;  %v5449_v46 = vmul.f32 %v10695_v41, %v12131_v45  ;;  %10718 = vtanh.f32 %v12220_v13  ;;  %v10030_v21 = vld [vmem:[#allocation2 + $0xc0] ss:$16 sps:$4 sm:$0xff]   ;;  %v10031_v11 = vld [vmem:[#allocation2 + $0xc4] ss:$16 sps:$4 sm:$0xff]  }
 0x7ec   : > { %v10699_v2 = vpop.eup %10698  ;;  %10720 = vrcp.f32 %v5414_v48  ;;  %v5439_v28 = vmul.f32 %v10697_v25, %v10671_v33  ;;  %v10029_v48 = vld [vmem:[#allocation2 + $0xe4] ss:$16 sps:$4 sm:$0xff]   ;;  %v10032_v39 = vld [vmem:[#allocation2 + $0xa0] ss:$16 sps:$4 sm:$0xff]  }
 0x7ed   : > { %v12230_v52 = vadd.f32 %v5449_v46, %v5441_v18  ;;  %v5447_v20 = vmul.f32 %v10699_v2, %v12135_v24  ;;  %10722 = vtanh.f32 %v12226_v32  ;;  %v10701_v56 = vpop.eup %10700  ;;  %v10033_v41 = vld [vmem:[#allocation2 + $0xa4] ss:$16 sps:$4 sm:$0xff]   ;;  %v10036_v18 = vld [vmem:[#allocation2 + $0x60] ss:$16 sps:$4 sm:$0xff]  }
 0x7ee   : > { %10724 = vrcp.f32 %v5417_v59  ;;  %v10034_v59 = vld [vmem:[#allocation2 + $0x80] ss:$16 sps:$4 sm:$0xff]   ;;  %v10035_v25 = vld [vmem:[#allocation2 + $0x84] ss:$16 sps:$4 sm:$0xff]  }
 0x7ef   : > { %v10703_v1 = vpop.eup %10702  ;;  %v12234_v30 = vadd.f32 %v5447_v20, %v5439_v28  ;;  %10726 = vtanh.f32 %v12230_v52  ;;  %v10037_v46 = vld [vmem:[#allocation2 + $0x64] ss:$16 sps:$4 sm:$0xff]   ;;  %v10038_v2 = vld [vmem:[#allocation2 + $0x40] ss:$16 sps:$4 sm:$0xff]  }
 0x7f0   : > { %10728 = vrcp.f32 %v5415_v34  ;;  %v5468_v45 = vmul.f32 %v10703_v1, %v10701_v56  ;;  %v10705_v57 = vpop.eup %10704  ;;  %v10039_v34 = vld [vmem:[#allocation2 + $0x44] ss:$16 sps:$4 sm:$0xff]   ;;  %v10040_v28 = vld [vmem:[#allocation2 + $0x20] ss:$16 sps:$4 sm:$0xff]  }
 0x7f1   : > { %10730 = vtanh.f32 %v12234_v30  ;;  %v10041_v20 = vld [vmem:[#allocation2 + $0x24] ss:$16 sps:$4 sm:$0xff]   ;;  %v10042_v56 = vld [vmem:[#allocation2] ss:$16 sps:$4 sm:$0xff]  }
 0x7f2   : > { %v10707_v16 = vpop.eup %10706  ;;  %8290 = vst [vmem:[%s11390_s28 + $0x110] sm:$0xff] %v5468_v45  ;;  %v10043_v1 = vld [vmem:[#allocation2 + $0x4] ss:$16 sps:$4 sm:$0xff]  }
 0x7f3   : > { %v10709_v24 = vpop.eup %10708  ;;  %v5466_v53 = vmul.f32 %v10707_v16, %v10705_v57  ;;  %v12256_v57 = vld [vmem:[#allocation2 + $0xec] ss:$16 sps:$4 sm:$0xff]  }
 0x7f4   : > { %v10711_v42 = vpop.eup %10710 }
 0x7f5   : > { %v10713_v4 = vpop.eup %10712  ;;  %8288 = vst [vmem:[%s11390_s28 + $0x100] sm:$0xff] %v5466_v53  ;;  %v5469_v8 = vmul.f32 %v10711_v42, %v10709_v24  ;;  %v5651_v42 = vld [vmem:[#allocation4 + $0x2a8] sm:$0xff] }
 0x7f6   : > { %v10715_v5 = vpop.eup %10714 }
 0x7f7   : > { %v10717_v9 = vpop.eup %10716  ;;  %v5467_v51 = vmul.f32 %v10715_v5, %v10713_v4  ;;  %8291 = vst [vmem:[%s11390_s28 + $0x118] sm:$0xff] %v5469_v8  ;;  %v12242_v43 = vpack.c.bf16 %v5469_v8, %v5468_v45  ;;  %v12254_v45 = vld [vmem:[#allocation2 + $0xe8] ss:$16 sps:$4 sm:$0xff]   ;;  %v5649_v4 = vld [vmem:[#allocation4 + $0x5a0] sm:$0xff] }
 0x7f8   : > { %v10719_v12 = vpop.eup %10718 }
 0x7f9   : > { %v10721_v14 = vpop.eup %10720  ;;  %8289 = vst [vmem:[%s11390_s28 + $0x108] sm:$0xff] %v5467_v51  ;;  %v5483_v10 = vpack.c.bf16 %v5467_v51, %v5466_v53  ;;  %v5472_v33 = vmul.f32 %v10719_v12, %v10717_v9  ;;  %v5652_v9 = vld [vmem:[#allocation4 + $0x130] sm:$0xff] }
 0x7fa   : > { %v10723_v3 = vpop.eup %10722 }
 0x7fb   : > { %v10725_v19 = vpop.eup %10724  ;;  %9379 = vmatprep.mubr.bf16.mxu0 %v5483_v10  ;;  %9403 = vmatprep.mubr.bf16.mxu1 %v5483_v10  ;;  %v5470_v50 = vmul.f32 %v10723_v3, %v10721_v14  ;;  %8294 = vst [vmem:[%s11390_s28 + $0x130] sm:$0xff] %v5472_v33  ;;  %v5655_v3 = vld [vmem:[#allocation4 + $0x378] sm:$0xff] }
 0x7fc   : > { %v10727_v29 = vpop.eup %10726  ;;  %9380 = vmatmul.mubr.bf16.vlgmr.msra.gmra.mxu0 %v12242_v43  ;;  %9404 = vmatmul.mubr.bf16.vlgmr.msra.gmra.mxu1 %v12242_v43 }
 0x7fd   : > { %v10729_v40 = vpop.eup %10728  ;;  %9412 = vmatpush3.bf16.msra.mxu0 %v12155_v38  ;;  %9436 = vmatpush3.bf16.msra.mxu1 %v12157_v6  ;;  %8292 = vst [vmem:[%s11390_s28 + $0x120] sm:$0xff] %v5470_v50  ;;  %v5473_v23 = vmul.f32 %v10727_v29, %v10725_v19  ;;  %v10018_v38 = vld [vmem:[#allocation2 + $0x88] ss:$16 sps:$4 sm:$0xff]   ;;  %v10019_v6 = vld [vmem:[#allocation2 + $0x8c] ss:$16 sps:$4 sm:$0xff]  }
 0x7fe   : > { %v10731_v54 = vpop.eup %10730  ;;  %9413 = vmatprep.subr.bf16.mxu0 %v10014_v44  ;;  %9437 = vmatprep.subr.bf16.mxu1 %v10015_v55 }
 0x7ff   : > { %v5471_v36 = vmul.f32 %v10731_v54, %v10729_v40  ;;  %8295 = vst [vmem:[%s11390_s28 + $0x138] sm:$0xff] %v5473_v23  ;;  %v5486_v27 = vpack.c.bf16 %v5473_v23, %v5472_v33  ;;  %v5653_v54 = vld [vmem:[#allocation4 + $0x228] sm:$0xff] }
 0x801   : > { %9414 = vmatpush3.bf16.msra.mxu0 %v10014_v44  ;;  %9438 = vmatpush3.bf16.msra.mxu1 %v10015_v55  ;;  %8293 = vst [vmem:[%s11390_s28 + $0x128] sm:$0xff] %v5471_v36  ;;  %v5485_v62 = vpack.c.bf16 %v5471_v36, %v5470_v50  ;;  %v5656_v36 = vld [vmem:[#allocation4 + $0x288] sm:$0xff] }
 0x802   : > { %9415 = vmatprep.subr.bf16.mxu0 %v10016_v37  ;;  %9439 = vmatprep.subr.bf16.mxu1 %v10017_v15 }
 0x803   : > { %9383 = vmatprep.mubr.bf16.mxu0 %v5485_v62  ;;  %9407 = vmatprep.mubr.bf16.mxu1 %v5485_v62 }
 0x804   : > { %9384 = vmatmul.mubr.bf16.gmra.mxu0 %v5486_v27  ;;  %9408 = vmatmul.mubr.bf16.gmra.mxu1 %v5486_v27 }
 0x805   : > { %9416 = vmatpush3.bf16.msra.mxu0 %v10016_v37  ;;  %9440 = vmatpush3.bf16.msra.mxu1 %v10017_v15 }
 0x806   : > { %9427 = vmatprep.mubr.bf16.mxu0 %v5483_v10  ;;  %9451 = vmatprep.mubr.bf16.mxu1 %v5483_v10  ;;  %v5650_v10 = vld [vmem:[#allocation4 + $0x7f8] sm:$0xff] }
 0x807   : > { %9417 = vmatprep.subr.bf16.mxu0 %v10018_v38  ;;  %9441 = vmatprep.subr.bf16.mxu1 %v10019_v6 }
 0x809   : > { %9418 = vmatpush3.bf16.msra.mxu0 %v10018_v38  ;;  %9442 = vmatpush3.bf16.msra.mxu1 %v10019_v6 }
 0x80a   : > { %9419 = vmatprep.subr.bf16.mxu0 %v10020_v22  ;;  %9443 = vmatprep.subr.bf16.mxu1 %v10021_v61 }
 0x80d   : > { %9420 = vmatpush3.bf16.msra.mxu0 %v10020_v22  ;;  %9444 = vmatpush3.bf16.msra.mxu1 %v10021_v61  ;;  %v5506_v61 = vld [vmem:[#allocation4 + $0x468] sm:$0xff] }
 0x80e   : > { %9421 = vmatprep.subr.bf16.mxu0 %v10022_v47  ;;  %9445 = vmatprep.subr.bf16.mxu1 %v10023_v17 }
 0x811   : > { %9422 = vmatpush3.bf16.msra.mxu0 %v10022_v47  ;;  %9446 = vmatpush3.bf16.msra.mxu1 %v10023_v17  ;;  %v5504_v17 = vld [vmem:[#allocation4 + $0x340] sm:$0xff] }
 0x812   : > { %9423 = vmatprep.subr.bf16.mxu0 %v10024_v58  ;;  %9447 = vmatprep.subr.bf16.mxu1 %v10025_v63 }
 0x815   : > { %9424 = vmatpush3.bf16.msra.mxu0 %v10024_v58  ;;  %9448 = vmatpush3.bf16.msra.mxu1 %v10025_v63  ;;  %v5507_v58 = vld [vmem:[#allocation4 + $0x750] sm:$0xff] }
 0x816   : > { %9425 = vmatprep.subr.bf16.mxu0 %v10026_v60  ;;  %9449 = vmatprep.subr.bf16.mxu1 %v10027_v31 }
 0x819   : > { %9426 = vmatpush3.bf16.msra.mxu0 %v10026_v60  ;;  %9450 = vmatpush3.bf16.msra.mxu1 %v10027_v31 }
 0x81a   : > { %9459 = vmatprep.subr.bf16.mxu0 %v10028_v26  ;;  %9483 = vmatprep.subr.bf16.mxu1 %v10029_v48 }
 0x81c   : > { %9428 = vmatmul.mubr.bf16.vlgmr.msra.gmra.mxu0 %v12242_v43  ;;  %9452 = vmatmul.mubr.bf16.vlgmr.msra.gmra.mxu1 %v12242_v43 }
 0x81d   : > { %9431 = vmatprep.mubr.bf16.mxu0 %v5485_v62  ;;  %9455 = vmatprep.mubr.bf16.mxu1 %v5485_v62 }
 0x81e   : > { %9460 = vmatpush3.bf16.msra.mxu0 %v10028_v26  ;;  %9484 = vmatpush3.bf16.msra.mxu1 %v10029_v48  ;;  %v5505_v26 = vld [vmem:[#allocation4 + $0x560] sm:$0xff] }
 0x81f   : > { %9461 = vmatprep.subr.bf16.mxu0 %v10030_v21  ;;  %9485 = vmatprep.subr.bf16.mxu1 %v10031_v11 }
 0x822   : > { %9462 = vmatpush3.bf16.msra.mxu0 %v10030_v21  ;;  %9486 = vmatpush3.bf16.msra.mxu1 %v10031_v11  ;;  %v5654_v21 = vld [vmem:[#allocation4 + $0x80] sm:$0xff] }
 0x823   : > { %9463 = vmatprep.subr.bf16.mxu0 %v10032_v39  ;;  %9487 = vmatprep.subr.bf16.mxu1 %v10033_v41 }
 0x824   : > { %9432 = vmatmul.mubr.bf16.gmra.mxu0 %v5486_v27  ;;  %9456 = vmatmul.mubr.bf16.gmra.mxu1 %v5486_v27 }
 0x826   : > { %9464 = vmatpush3.bf16.msra.mxu0 %v10032_v39  ;;  %9488 = vmatpush3.bf16.msra.mxu1 %v10033_v41  ;;  %v5510_v39 = vld [vmem:[#allocation4 + $0x798] sm:$0xff] }
 0x827   : > { %9465 = vmatprep.subr.bf16.mxu0 %v10034_v59  ;;  %9489 = vmatprep.subr.bf16.mxu1 %v10035_v25 }
 0x82a   : > { %9466 = vmatpush3.bf16.msra.mxu0 %v10034_v59  ;;  %9490 = vmatpush3.bf16.msra.mxu1 %v10035_v25  ;;  %v5508_v59 = vld [vmem:[#allocation4 + $0x5d0] sm:$0xff] }
 0x82b   : > { %9467 = vmatprep.subr.bf16.mxu0 %v10036_v18  ;;  %9491 = vmatprep.subr.bf16.mxu1 %v10037_v46 }
 0x82e   : > { %9468 = vmatpush3.bf16.msra.mxu0 %v10036_v18  ;;  %9492 = vmatpush3.bf16.msra.mxu1 %v10037_v46  ;;  %v5511_v18 = vld [vmem:[#allocation4 + $0x728] sm:$0xff] }
 0x82f   : > { %9469 = vmatprep.subr.bf16.mxu0 %v10038_v2  ;;  %9493 = vmatprep.subr.bf16.mxu1 %v10039_v34 }
 0x832   : > { %9470 = vmatpush3.bf16.msra.mxu0 %v10038_v2  ;;  %9494 = vmatpush3.bf16.msra.mxu1 %v10039_v34 }
 0x833   : > { %9471 = vmatprep.subr.bf16.mxu0 %v10040_v28  ;;  %9495 = vmatprep.subr.bf16.mxu1 %v10041_v20 }
 0x836   : > { %9472 = vmatpush3.bf16.msra.mxu0 %v10040_v28  ;;  %9496 = vmatpush3.bf16.msra.mxu1 %v10041_v20 }
 0x837   : > { %9473 = vmatprep.subr.bf16.mxu0 %v10042_v56  ;;  %9497 = vmatprep.subr.bf16.mxu1 %v10043_v1 }
 0x83a   : > { %9474 = vmatpush3.bf16.msra.mxu0 %v10042_v56  ;;  %9498 = vmatpush3.bf16.msra.mxu1 %v10043_v1 }
 0x83b   : > { %9507 = vmatprep.subr.bf16.mxu0 %v12254_v45  ;;  %9531 = vmatprep.subr.bf16.mxu1 %v12256_v57 }
 0x8bc   : > { %v9405_v16 = vpop.f32.mrf.mxu1  ;;  %v9381_v24 = vpop.f32.mrf.mxu0 }
 0x8bd   : > { %v5748_v51 = vadd.f32 %v9405_v16, %v5651_v42  ;;  %v5603_v31 = vadd.f32 %v9381_v24, %v5506_v61 }
 0x8be   : > { %v5739_v53 = vpop.f32.mrf.mxu1  ;;  %v5594_v5 = vpop.f32.mrf.mxu0 }
 0x8bf   : > { %v5740_v14 = vadd.f32 %v5739_v53, %v5649_v4  ;;  %v8314_v55 = vmul.f32 -1.442695, %v5748_v51  ;;  %v5595_v11 = vadd.f32 %v5594_v5, %v5504_v17  ;;  %v5836_v4 = vld [vmem:[#allocation4 + $0x1d0] sm:$0xff] }
 0x8c0   : > { %v9406_v8 = vpop.f32.mrf.mxu1  ;;  %v9382_v44 = vpop.f32.mrf.mxu0 }
 0x8c1   : > { %v5751_v33 = vadd.f32 %v9406_v8, %v5652_v9  ;;  %v8312_v29 = vmul.f32 -1.442695, %v5740_v14  ;;  %10732 = vpow2.f32 %v8314_v55  ;;  %v5606_v41 = vadd.f32 %v9382_v44, %v5507_v58  ;;  %v5837_v55 = vld [vmem:[#allocation4 + $0x28] sm:$0xff] }
 0x8c2   : > { %v5742_v12 = vpop.f32.mrf.mxu1  ;;  %v5597_v37 = vpop.f32.mrf.mxu0 }
 0x8c3   : > { %v5743_v19 = vadd.f32 %v5742_v12, %v5650_v10  ;;  %v8315_v23 = vmul.f32 -1.442695, %v5751_v33  ;;  %10734 = vpow2.f32 %v8312_v29  ;;  %v5598_v25 = vadd.f32 %v5597_v37, %v5505_v26  ;;  %v5834_v33 = vld [vmem:[#allocation4 + $0x3d0] sm:$0xff]  ;;  %v5835_v37 = vld [vmem:[#allocation4 + $0x4e0] sm:$0xff]  ;;  %v5838_v26 = vld [vmem:[#allocation4 + $0x208] sm:$0xff] }
 0x8c4   : > { %v9409_v43 = vpop.f32.mrf.mxu1  ;;  %v9385_v6 = vpop.f32.mrf.mxu0 }
 0x8c5   : > { %v5764_v40 = vadd.f32 %v9409_v43, %v5655_v3  ;;  %v8313_v15 = vmul.f32 -1.442695, %v5743_v19  ;;  %10736 = vpow2.f32 %v8315_v23  ;;  %v5619_v34 = vadd.f32 %v9385_v6, %v5510_v39 }
 0x8c6   : > { %v5755_v50 = vpop.f32.mrf.mxu1  ;;  %v5610_v63 = vpop.f32.mrf.mxu0 }
 0x8c7   : > { %v8318_v27 = vmul.f32 -1.442695, %v5764_v40  ;;  %v5756_v38 = vadd.f32 %v5755_v50, %v5653_v54  ;;  %10738 = vpow2.f32 %v8313_v15  ;;  %v5611_v20 = vadd.f32 %v5610_v63, %v5508_v59 }
 0x8c8   : > { %v9410_v62 = vpop.f32.mrf.mxu1  ;;  %v9386_v46 = vpop.f32.mrf.mxu0 }
 0x8c9   : > { %v5767_v22 = vadd.f32 %v9410_v62, %v5656_v36  ;;  %10740 = vpow2.f32 %v8318_v27  ;;  %v8316_v47 = vmul.f32 -1.442695, %v5756_v38  ;;  %v5622_v1 = vadd.f32 %v9386_v46, %v5511_v18  ;;  %v6021_v62 = vld [vmem:[#allocation4 + $0x510] sm:$0xff]  ;;  %v5841_v46 = vld [vmem:[#allocation4 + $0x188] sm:$0xff] }
 0x8ca   : > { %v5758_v48 = vpop.f32.mrf.mxu1  ;;  %v12260_v42 = vpop.f32.mrf.mxu0 }
 0x8cb   : > { %v8319_v60 = vmul.f32 -1.442695, %v5767_v22  ;;  %10742 = vpow2.f32 %v8316_v47  ;;  %v5759_v2 = vadd.f32 %v5758_v48, %v5654_v21  ;;  %v5840_v22 = vld [vmem:[#allocation4 + $0x160] sm:$0xff] }
 0x8cd   : > { %10744 = vpow2.f32 %v8319_v60  ;;  %v8317_v24 = vmul.f32 -1.442695, %v5759_v2  ;;  %v6019_v60 = vld [vmem:[#allocation4 + $0x230] sm:$0xff] }
 0x8ce   : > { %10746 = vtanh.f32 %v5603_v31  ;;  %v10733_v28 = vpop.eup %10732 }
 0x8cf   : > { %10748 = vtanh.f32 %v5595_v11  ;;  %v5796_v53 = vadd.f32 1.0, %v10733_v28 }
 0x8d0   : > { %v10735_v56 = vpop.eup %10734  ;;  %10750 = vtanh.f32 %v5606_v41 }
 0x8d1   : > { %10752 = vtanh.f32 %v5598_v25  ;;  %v5794_v5 = vadd.f32 1.0, %v10735_v56 }
 0x8d2   : > { %v10737_v16 = vpop.eup %10736  ;;  %10754 = vtanh.f32 %v5619_v34 }
 0x8d3   : > { %10756 = vtanh.f32 %v5611_v20  ;;  %v5797_v51 = vadd.f32 1.0, %v10737_v16 }
 0x8d4   : > { %v10739_v8 = vpop.eup %10738  ;;  %10758 = vtanh.f32 %v5622_v1  ;;  %v6022_v1 = vld [vmem:[#allocation4 + $0x760] sm:$0xff] }
 0x8d5   : > { %10760 = vpow2.f32 %v8317_v24  ;;  %v5795_v3 = vadd.f32 1.0, %v10739_v8  ;;  %v5839_v24 = vld [vmem:[#allocation4 + $0x4c8] sm:$0xff] }
 0x8d6   : > { %v10741_v9 = vpop.eup %10740  ;;  %10762 = vrcp.f32 %v5796_v53 }
 0x8d7   : > { %10764 = vrcp.f32 %v5794_v5  ;;  %v5800_v19 = vadd.f32 1.0, %v10741_v9 }
 0x8d8   : > { %v10743_v29 = vpop.eup %10742  ;;  %10766 = vrcp.f32 %v5797_v51  ;;  %v6020_v51 = vld [vmem:[#allocation4 + $0x200] sm:$0xff] }
 0x8d9   : > { %v5798_v47 = vadd.f32 1.0, %v10743_v29 }
 0x8da   : > { %v10745_v36 = vpop.eup %10744 }
 0x8db   : > { %v12262_v61 = vpop.eup %10746  ;;  %v5801_v21 = vadd.f32 1.0, %v10745_v36 }
 0x8dc   : > { %v9429_v12 = vpop.f32.mrf.mxu0  ;;  %v9453_v14 = vpop.f32.mrf.mxu1 }
 0x8dd   : > { %v5933_v10 = vadd.f32 %v9429_v12, %v5836_v4  ;;  %v12264_v63 = vpop.eup %10748  ;;  %v6118_v11 = vadd.f32 %v9453_v14, %v6021_v62 }
 0x8de   : > { %v5924_v43 = vpop.f32.mrf.mxu0  ;;  %v6109_v44 = vpop.f32.mrf.mxu1 }
 0x8df   : > { %v8330_v50 = vmul.f32 -1.442695, %v5933_v10  ;;  %v5925_v40 = vadd.f32 %v5924_v43, %v5834_v33  ;;  %v12266_v48 = vpop.eup %10750  ;;  %v6110_v34 = vadd.f32 %v6109_v44, %v6019_v60  ;;  %v8346_v4 = vmul.f32 -1.442695, %v6118_v11 }
 0x8e0   : > { %v9430_v23 = vpop.f32.mrf.mxu0  ;;  %v9454_v54 = vpop.f32.mrf.mxu1 }
 0x8e1   : > { %10768 = vpow2.f32 %v8330_v50  ;;  %v5936_v15 = vadd.f32 %v9430_v23, %v5837_v55  ;;  %v8328_v27 = vmul.f32 -1.442695, %v5925_v40  ;;  %v12268_v59 = vpop.eup %10752  ;;  %v8344_v33 = vmul.f32 -1.442695, %v6110_v34 }
 0x8e2   : > { %10770 = vrcp.f32 %v5795_v3  ;;  %v5927_v38 = vpop.f32.mrf.mxu0  ;;  %v6112_v6 = vpop.f32.mrf.mxu1  ;;  %v6121_v3 = vadd.f32 %v9454_v54, %v6022_v1 }
 0x8e3   : > { %10772 = vrcp.f32 %v5800_v19  ;;  %v8331_v17 = vmul.f32 -1.442695, %v5936_v15  ;;  %v5928_v58 = vadd.f32 %v5927_v38, %v5835_v37  ;;  %v12270_v2 = vpop.eup %10754  ;;  %v6025_v19 = vld [vmem:[#allocation4 + $0x260] sm:$0xff]  ;;  %v6113_v29 = vadd.f32 %v6112_v6, %v6020_v51  ;;  %v6023_v15 = vld [vmem:[#allocation4 + $0x290] sm:$0xff] }
 0x8e4   : > { %10774 = vpow2.f32 %v8328_v27  ;;  %v9433_v31 = vpop.f32.mrf.mxu0  ;;  %v9457_v25 = vpop.f32.mrf.mxu1  ;;  %v8347_v54 = vmul.f32 -1.442695, %v6121_v3 }
 0x8e5   : > { %v8329_v39 = vmul.f32 -1.442695, %v5928_v58  ;;  %v5949_v41 = vadd.f32 %v9433_v31, %v5840_v22  ;;  %10776 = vpow2.f32 %v8331_v17  ;;  %v12272_v56 = vpop.eup %10756  ;;  %v6134_v38 = vadd.f32 %v9457_v25, %v6025_v19 }
 0x8e6   : > { %v5940_v18 = vpop.f32.mrf.mxu0  ;;  %10778 = vrcp.f32 %v5798_v47  ;;  %v12274_v53 = vpop.eup %10758  ;;  %v6026_v47 = vld [vmem:[#allocation4 + $0x408] sm:$0xff]  ;;  %v8345_v58 = vmul.f32 -1.442695, %v6113_v29 }
 0x8e7   : > { %v8334_v28 = vmul.f32 -1.442695, %v5949_v41  ;;  %v5941_v20 = vadd.f32 %v5940_v18, %v5838_v26  ;;  %10780 = vpow2.f32 %v8329_v39  ;;  %v10761_v9 = vpop.eup %10760  ;;  %v6125_v12 = vpop.f32.mrf.mxu1  ;;  %v6024_v26 = vld [vmem:[#allocation4 + $0x3f0] sm:$0xff]  ;;  %v8350_v11 = vmul.f32 -1.442695, %v6134_v38 }
 0x8e8   : > { %v9434_v16 = vpop.f32.mrf.mxu0  ;;  %10782 = vrcp.f32 %v5801_v21  ;;  %v12276_v10 = vpop.eup %10762  ;;  %v5799_v37 = vadd.f32 1.0, %v10761_v9  ;;  %v6126_v6 = vadd.f32 %v6125_v12, %v6023_v15 }
 0x8e9   : > { %v8332_v8 = vmul.f32 -1.442695, %v5941_v20  ;;  %v5952_v5 = vadd.f32 %v9434_v16, %v5841_v46  ;;  %10784 = vpow2.f32 %v8334_v28  ;;  %v12278_v55 = vpop.eup %10764  ;;  %v9458_v36 = vpop.f32.mrf.mxu1 }
 0x8ea   : > { %v5943_v14 = vpop.f32.mrf.mxu0  ;;  %v12280_v50 = vpop.eup %10766  ;;  %v6137_v39 = vadd.f32 %v9458_v36, %v6026_v47  ;;  %v8348_v46 = vmul.f32 -1.442695, %v6126_v6  ;;  %v6188_v38 = vmul.f32 %v12278_v55, %v12264_v63 }
 0x8eb   : > { %v8335_v43 = vmul.f32 -1.442695, %v5952_v5  ;;  %v5944_v44 = vadd.f32 %v5943_v14, %v5839_v24  ;;  %10786 = vpow2.f32 %v8332_v8  ;;  %v6128_v31 = vpop.f32.mrf.mxu1  ;;  %v5509_v24 = vld [vmem:[#allocation4 + $0x7a0] sm:$0xff] }
 0x8ec   : > { %10788 = vpow2.f32 %v8346_v4  ;;  %v6129_v34 = vadd.f32 %v6128_v31, %v6024_v26  ;;  %v8351_v16 = vmul.f32 -1.442695, %v6137_v39  ;;  %v5614_v14 = vadd.f32 %v12260_v42, %v5509_v24 }
 0x8ed   : > { %v8333_v40 = vmul.f32 -1.442695, %v5944_v44  ;;  %10790 = vpow2.f32 %v8335_v43 }
 0x8ee   : > { %v10769_v23 = vpop.eup %10768  ;;  %10792 = vpow2.f32 %v8344_v33  ;;  %v8349_v5 = vmul.f32 -1.442695, %v6129_v34 }
 0x8ef   : > { %v12282_v62 = vpop.eup %10770  ;;  %v5981_v27 = vadd.f32 1.0, %v10769_v23  ;;  %10794 = vpow2.f32 %v8333_v40  ;;  %v6190_v23 = vmul.f32 %v12276_v10, %v12262_v61 }
 0x8f0   : > { %v12284_v22 = vpop.eup %10772  ;;  %v6189_v63 = vmul.f32 %v12282_v62, %v12268_v59 }
 0x8f1   : > { %v10775_v17 = vpop.eup %10774  ;;  %10796 = vrcp.f32 %v5981_v27 }
 0x8f2   : > { %10798 = vrcp.f32 %v5799_v37  ;;  %v5979_v60 = vadd.f32 1.0, %v10775_v17  ;;  %v10777_v21 = vpop.eup %10776 }
 0x8f3   : > { %10800 = vpow2.f32 %v8347_v54  ;;  %v12286_v41 = vpop.eup %10778  ;;  %v5982_v25 = vadd.f32 1.0, %v10777_v21 }
 0x8f4   : > { %10802 = vrcp.f32 %v5979_v60  ;;  %v10781_v18 = vpop.eup %10780 }
 0x8f5   : > { %10804 = vpow2.f32 %v8345_v58  ;;  %v12288_v28 = vpop.eup %10782  ;;  %v5980_v20 = vadd.f32 1.0, %v10781_v18 }
 0x8f6   : > { %10806 = vrcp.f32 %v5982_v25  ;;  %v10785_v1 = vpop.eup %10784 }
 0x8f7   : > { %10808 = vpow2.f32 %v8350_v11  ;;  %v5985_v4 = vadd.f32 1.0, %v10785_v1 }
 0x8f8   : > { %10810 = vrcp.f32 %v5980_v20  ;;  %v10787_v8 = vpop.eup %10786 }
 0x8f9   : > { %10812 = vpow2.f32 %v8348_v46  ;;  %v10789_v9 = vpop.eup %10788  ;;  %v5983_v51 = vadd.f32 1.0, %v10787_v8 }
 0x8fa   : > { %10814 = vrcp.f32 %v5985_v4  ;;  %v10791_v12 = vpop.eup %10790  ;;  %v6166_v19 = vadd.f32 1.0, %v10789_v9 }
 0x8fb   : > { %10816 = vpow2.f32 %v8351_v16  ;;  %v10793_v33 = vpop.eup %10792  ;;  %v5986_v3 = vadd.f32 1.0, %v10791_v12 }
 0x8fc   : > { %10818 = vrcp.f32 %v5983_v51  ;;  %v10795_v43 = vpop.eup %10794  ;;  %v6164_v27 = vadd.f32 1.0, %v10793_v33 }
 0x8fd   : > { %10820 = vpow2.f32 %v8349_v5  ;;  %v5984_v29 = vadd.f32 1.0, %v10795_v43 }
 0x8fe   : > { %v10797_v44 = vpop.eup %10796  ;;  %10822 = vrcp.f32 %v5986_v3 }
 0x8ff   : > { %v10799_v40 = vpop.eup %10798  ;;  %10824 = vtanh.f32 %v5614_v14  ;;  %v6198_v37 = vmul.f32 %v10797_v44, %v12195_v35  ;;  %v6191_v35 = vmul.f32 %v12280_v50, %v12266_v48 }
 0x900   : > { %v10801_v15 = vpop.eup %10800  ;;  %10826 = vrcp.f32 %v5984_v29 }
 0x901   : > { %v10803_v42 = vpop.eup %10802  ;;  %v12294_v36 = vadd.f32 %v6198_v37, %v6190_v23  ;;  %10828 = vrcp.f32 %v6166_v19  ;;  %v6167_v61 = vadd.f32 1.0, %v10801_v15  ;;  %v10046_v15 = vld [vmem:[#allocation2 + $0xc8] ss:$16 sps:$4 sm:$0xff]  }
 0x902   : > { %v10805_v54 = vpop.eup %10804  ;;  %v6196_v47 = vmul.f32 %v10803_v42, %v12203_v7  ;;  %v10047_v42 = vld [vmem:[#allocation2 + $0xcc] ss:$16 sps:$4 sm:$0xff]  }
 0x903   : > { %v10807_v17 = vpop.eup %10806  ;;  %10830 = vtanh.f32 %v12294_v36  ;;  %v6165_v31 = vadd.f32 1.0, %v10805_v54 }
 0x904   : > { %v10809_v10 = vpop.eup %10808  ;;  %v12302_v58 = vadd.f32 %v6196_v47, %v6188_v38  ;;  %v6199_v6 = vmul.f32 %v10807_v17, %v12208_v49  ;;  %10832 = vrcp.f32 %v6164_v27  ;;  %v6194_v49 = vmul.f32 %v12284_v22, %v12270_v2 }
 0x905   : > { %v10811_v60 = vpop.eup %10810  ;;  %v6170_v48 = vadd.f32 1.0, %v10809_v10  ;;  %v10048_v10 = vld [vmem:[#allocation2 + $0xa8] ss:$16 sps:$4 sm:$0xff]  }
 0x906   : > { %v10813_v26 = vpop.eup %10812  ;;  %v12307_v7 = vadd.f32 %v6199_v6, %v6191_v35  ;;  %v6197_v55 = vmul.f32 %v10811_v60, %v12215_v0  ;;  %10834 = vtanh.f32 %v12302_v58  ;;  %v6192_v0 = vmul.f32 %v12286_v41, %v12272_v56  ;;  %v10049_v35 = vld [vmem:[#allocation2 + $0xac] ss:$16 sps:$4 sm:$0xff]  }
 0x907   : > { %v10815_v21 = vpop.eup %10814  ;;  %10836 = vrcp.f32 %v6167_v61  ;;  %v6168_v62 = vadd.f32 1.0, %v10813_v26  ;;  %v10052_v26 = vld [vmem:[#allocation2 + $0x68] ss:$16 sps:$4 sm:$0xff]  }
 0x908   : > { %v10817_v50 = vpop.eup %10816  ;;  %10838 = vtanh.f32 %v12307_v7  ;;  %v12314_v11 = vadd.f32 %v6197_v55, %v6189_v63  ;;  %v6202_v39 = vmul.f32 %v10815_v21, %v12220_v13  ;;  %v6195_v13 = vmul.f32 %v12288_v28, %v12274_v53  ;;  %v10053_v63 = vld [vmem:[#allocation2 + $0x6c] ss:$16 sps:$4 sm:$0xff]   ;;  %v10054_v55 = vld [vmem:[#allocation2 + $0x48] ss:$16 sps:$4 sm:$0xff]  }
 0x909   : > { %v10819_v59 = vpop.eup %10818  ;;  %10840 = vrcp.f32 %v6165_v31  ;;  %v6171_v22 = vadd.f32 1.0, %v10817_v50  ;;  %v10055_v21 = vld [vmem:[#allocation2 + $0x4c] ss:$16 sps:$4 sm:$0xff]  }
 0x90a   : > { %v10821_v25 = vpop.eup %10820  ;;  %v12319_v18 = vadd.f32 %v6202_v39, %v6194_v49  ;;  %v6200_v46 = vmul.f32 %v10819_v59, %v12226_v32  ;;  %10842 = vtanh.f32 %v12314_v11  ;;  %v10057_v50 = vld [vmem:[#allocation2 + $0x2c] ss:$16 sps:$4 sm:$0xff]   ;;  %v10058_v49 = vld [vmem:[#allocation2 + $0x8] ss:$16 sps:$4 sm:$0xff]   ;;  %v10060_v59 = vld [vmem:[#allocation2 + $0xe0] ss:$16 sps:$4 sm:$0xff]  }
 0x90b   : > { %v10823_v2 = vpop.eup %10822  ;;  %10844 = vrcp.f32 %v6170_v48  ;;  %v6169_v41 = vadd.f32 1.0, %v10821_v25  ;;  %v10056_v48 = vld [vmem:[#allocation2 + $0x28] ss:$16 sps:$4 sm:$0xff]   ;;  %v10059_v39 = vld [vmem:[#allocation2 + $0xc] ss:$16 sps:$4 sm:$0xff]  }
 0x90c   : > { %v10825_v34 = vpop.eup %10824  ;;  %v12325_v20 = vadd.f32 %v6200_v46, %v6192_v0  ;;  %v6203_v1 = vmul.f32 %v10823_v2, %v12230_v52  ;;  %10846 = vtanh.f32 %v12319_v18  ;;  %v10062_v25 = vld [vmem:[#allocation2 + $0xc0] ss:$16 sps:$4 sm:$0xff]   ;;  %v10063_v0 = vld [vmem:[#allocation2 + $0xc4] ss:$16 sps:$4 sm:$0xff]  }
 0x90d   : > { %v10827_v56 = vpop.eup %10826  ;;  %10848 = vrcp.f32 %v6168_v62  ;;  %v6193_v32 = vmul.f32 %v10825_v34, %v10799_v40  ;;  %v10061_v62 = vld [vmem:[#allocation2 + $0xe4] ss:$16 sps:$4 sm:$0xff]   ;;  %v10064_v46 = vld [vmem:[#allocation2 + $0xa0] ss:$16 sps:$4 sm:$0xff]  }
 0x90e   : > { %v12329_v16 = vadd.f32 %v6203_v1, %v6195_v13  ;;  %v6201_v24 = vmul.f32 %v10827_v56, %v12234_v30  ;;  %10850 = vtanh.f32 %v12325_v20  ;;  %v10829_v4 = vpop.eup %10828  ;;  %v10065_v2 = vld [vmem:[#allocation2 + $0xa4] ss:$16 sps:$4 sm:$0xff]   ;;  %v10068_v13 = vld [vmem:[#allocation2 + $0x60] ss:$16 sps:$4 sm:$0xff]  }
 0x90f   : > { %10852 = vrcp.f32 %v6171_v22  ;;  %v10066_v22 = vld [vmem:[#allocation2 + $0x80] ss:$16 sps:$4 sm:$0xff]   ;;  %v10067_v34 = vld [vmem:[#allocation2 + $0x84] ss:$16 sps:$4 sm:$0xff]  }
 0x910   : > { %v10831_v53 = vpop.eup %10830  ;;  %v12333_v28 = vadd.f32 %v6201_v24, %v6193_v32  ;;  %10854 = vtanh.f32 %v12329_v16  ;;  %v10069_v1 = vld [vmem:[#allocation2 + $0x64] ss:$16 sps:$4 sm:$0xff]   ;;  %v10070_v56 = vld [vmem:[#allocation2 + $0x40] ss:$16 sps:$4 sm:$0xff]  }
 0x911   : > { %10856 = vrcp.f32 %v6169_v41  ;;  %v6222_v52 = vmul.f32 %v10831_v53, %v10829_v4  ;;  %v10833_v8 = vpop.eup %10832  ;;  %v10071_v41 = vld [vmem:[#allocation2 + $0x44] ss:$16 sps:$4 sm:$0xff]   ;;  %v10072_v32 = vld [vmem:[#allocation2 + $0x20] ss:$16 sps:$4 sm:$0xff]  }
 0x912   : > { %10858 = vtanh.f32 %v12333_v28  ;;  %v10073_v24 = vld [vmem:[#allocation2 + $0x24] ss:$16 sps:$4 sm:$0xff]   ;;  %v10074_v4 = vld [vmem:[#allocation2] ss:$16 sps:$4 sm:$0xff]  }
 0x913   : > { %v10835_v5 = vpop.eup %10834  ;;  %8354 = vst [vmem:[%s11390_s28 + $0x150] sm:$0xff] %v6222_v52  ;;  %v10075_v53 = vld [vmem:[#allocation2 + $0x4] ss:$16 sps:$4 sm:$0xff]  }
 0x914   : > { %v10837_v30 = vpop.eup %10836  ;;  %v6220_v9 = vmul.f32 %v10835_v5, %v10833_v8  ;;  %v12355_v8 = vld [vmem:[#allocation2 + $0xec] ss:$16 sps:$4 sm:$0xff]  }
 0x915   : > { %v10839_v51 = vpop.eup %10838 }
 0x916   : > { %v10841_v12 = vpop.eup %10840  ;;  %8352 = vst [vmem:[%s11390_s28 + $0x140] sm:$0xff] %v6220_v9  ;;  %v6223_v14 = vmul.f32 %v10839_v51, %v10837_v30  ;;  %v6405_v51 = vld [vmem:[#allocation4 + $0x8] sm:$0xff] }
 0x917   : > { %v10843_v33 = vpop.eup %10842 }
 0x918   : > { %v10845_v3 = vpop.eup %10844  ;;  %v6221_v43 = vmul.f32 %v10843_v33, %v10841_v12  ;;  %8355 = vst [vmem:[%s11390_s28 + $0x158] sm:$0xff] %v6223_v14  ;;  %v12341_v37 = vpack.c.bf16 %v6223_v14, %v6222_v52  ;;  %v12353_v52 = vld [vmem:[#allocation2 + $0xe8] ss:$16 sps:$4 sm:$0xff]  }
 0x919   : > { %v10847_v44 = vpop.eup %10846  ;;  %v6403_v12 = vld [vmem:[#allocation4 + $0x98] sm:$0xff] }
 0x91a   : > { %v10849_v19 = vpop.eup %10848  ;;  %8353 = vst [vmem:[%s11390_s28 + $0x148] sm:$0xff] %v6221_v43  ;;  %v6237_v29 = vpack.c.bf16 %v6221_v43, %v6220_v9  ;;  %v6226_v40 = vmul.f32 %v10847_v44, %v10845_v3  ;;  %v6406_v3 = vld [vmem:[#allocation4 + $0x20] sm:$0xff] }
 0x91b   : > { %v10851_v23 = vpop.eup %10850 }
 0x91c   : > { %v10853_v27 = vpop.eup %10852  ;;  %9475 = vmatprep.mubr.bf16.mxu0 %v6237_v29  ;;  %9499 = vmatprep.mubr.bf16.mxu1 %v6237_v29  ;;  %v6224_v54 = vmul.f32 %v10851_v23, %v10849_v19  ;;  %8358 = vst [vmem:[%s11390_s28 + $0x170] sm:$0xff] %v6226_v40  ;;  %v6409_v23 = vld [vmem:[#allocation4 + $0x2f0] sm:$0xff] }
 0x91d   : > { %v10855_v38 = vpop.eup %10854  ;;  %9476 = vmatmul.mubr.bf16.vlgmr.msra.gmra.mxu0 %v12341_v37  ;;  %9500 = vmatmul.mubr.bf16.vlgmr.msra.gmra.mxu1 %v12341_v37 }
 0x91e   : > { %v10857_v47 = vpop.eup %10856  ;;  %9508 = vmatpush3.bf16.msra.mxu0 %v12254_v45  ;;  %9532 = vmatpush3.bf16.msra.mxu1 %v12256_v57  ;;  %8356 = vst [vmem:[%s11390_s28 + $0x160] sm:$0xff] %v6224_v54  ;;  %v6227_v17 = vmul.f32 %v10855_v38, %v10853_v27  ;;  %v10050_v45 = vld [vmem:[#allocation2 + $0x88] ss:$16 sps:$4 sm:$0xff]   ;;  %v10051_v57 = vld [vmem:[#allocation2 + $0x8c] ss:$16 sps:$4 sm:$0xff]  }
 0x91f   : > { %v10859_v61 = vpop.eup %10858  ;;  %9509 = vmatprep.subr.bf16.mxu0 %v10046_v15  ;;  %9533 = vmatprep.subr.bf16.mxu1 %v10047_v42 }
 0x920   : > { %v6225_v6 = vmul.f32 %v10859_v61, %v10857_v47  ;;  %8359 = vst [vmem:[%s11390_s28 + $0x178] sm:$0xff] %v6227_v17  ;;  %v6240_v31 = vpack.c.bf16 %v6227_v17, %v6226_v40  ;;  %v6407_v61 = vld [vmem:[#allocation4 + $0x6b0] sm:$0xff] }
 0x922   : > { %9510 = vmatpush3.bf16.msra.mxu0 %v10046_v15  ;;  %9534 = vmatpush3.bf16.msra.mxu1 %v10047_v42  ;;  %8357 = vst [vmem:[%s11390_s28 + $0x168] sm:$0xff] %v6225_v6  ;;  %v6239_v60 = vpack.c.bf16 %v6225_v6, %v6224_v54  ;;  %v6410_v6 = vld [vmem:[#allocation4 + $0x210] sm:$0xff] }
 0x923   : > { %9511 = vmatprep.subr.bf16.mxu0 %v10048_v10  ;;  %9535 = vmatprep.subr.bf16.mxu1 %v10049_v35 }
 0x924   : > { %9479 = vmatprep.mubr.bf16.mxu0 %v6239_v60  ;;  %9503 = vmatprep.mubr.bf16.mxu1 %v6239_v60 }
 0x925   : > { %9480 = vmatmul.mubr.bf16.gmra.mxu0 %v6240_v31  ;;  %9504 = vmatmul.mubr.bf16.gmra.mxu1 %v6240_v31 }
 0x926   : > { %9512 = vmatpush3.bf16.msra.mxu0 %v10048_v10  ;;  %9536 = vmatpush3.bf16.msra.mxu1 %v10049_v35 }
 0x927   : > { %9523 = vmatprep.mubr.bf16.mxu0 %v6237_v29  ;;  %9547 = vmatprep.mubr.bf16.mxu1 %v6237_v29  ;;  %v6404_v29 = vld [vmem:[#allocation4 + $0x548] sm:$0xff] }
 0x928   : > { %9513 = vmatprep.subr.bf16.mxu0 %v10050_v45  ;;  %9537 = vmatprep.subr.bf16.mxu1 %v10051_v57 }
 0x92a   : > { %9514 = vmatpush3.bf16.msra.mxu0 %v10050_v45  ;;  %9538 = vmatpush3.bf16.msra.mxu1 %v10051_v57 }
 0x92b   : > { %9515 = vmatprep.subr.bf16.mxu0 %v10052_v26  ;;  %9539 = vmatprep.subr.bf16.mxu1 %v10053_v63 }
 0x92e   : > { %9516 = vmatpush3.bf16.msra.mxu0 %v10052_v26  ;;  %9540 = vmatpush3.bf16.msra.mxu1 %v10053_v63  ;;  %v6260_v63 = vld [vmem:[#allocation4 + $0x708] sm:$0xff] }
 0x92f   : > { %9517 = vmatprep.subr.bf16.mxu0 %v10054_v55  ;;  %9541 = vmatprep.subr.bf16.mxu1 %v10055_v21 }
 0x932   : > { %9518 = vmatpush3.bf16.msra.mxu0 %v10054_v55  ;;  %9542 = vmatpush3.bf16.msra.mxu1 %v10055_v21  ;;  %v6258_v21 = vld [vmem:[#allocation4 + $0x678] sm:$0xff] }
 0x933   : > { %9519 = vmatprep.subr.bf16.mxu0 %v10056_v48  ;;  %9543 = vmatprep.subr.bf16.mxu1 %v10057_v50 }
 0x936   : > { %9520 = vmatpush3.bf16.msra.mxu0 %v10056_v48  ;;  %9544 = vmatpush3.bf16.msra.mxu1 %v10057_v50  ;;  %v6261_v48 = vld [vmem:[#allocation4 + $0x7e0] sm:$0xff] }
 0x937   : > { %9521 = vmatprep.subr.bf16.mxu0 %v10058_v49  ;;  %9545 = vmatprep.subr.bf16.mxu1 %v10059_v39 }
 0x93a   : > { %9522 = vmatpush3.bf16.msra.mxu0 %v10058_v49  ;;  %9546 = vmatpush3.bf16.msra.mxu1 %v10059_v39 }
 0x93b   : > { %9555 = vmatprep.subr.bf16.mxu0 %v10060_v59  ;;  %9579 = vmatprep.subr.bf16.mxu1 %v10061_v62 }
 0x93d   : > { %9524 = vmatmul.mubr.bf16.vlgmr.msra.gmra.mxu0 %v12341_v37  ;;  %9548 = vmatmul.mubr.bf16.vlgmr.msra.gmra.mxu1 %v12341_v37 }
 0x93e   : > { %9527 = vmatprep.mubr.bf16.mxu0 %v6239_v60  ;;  %9551 = vmatprep.mubr.bf16.mxu1 %v6239_v60 }
 0x93f   : > { %9556 = vmatpush3.bf16.msra.mxu0 %v10060_v59  ;;  %9580 = vmatpush3.bf16.msra.mxu1 %v10061_v62  ;;  %v6259_v59 = vld [vmem:[#allocation4 + $0x248] sm:$0xff] }
 0x940   : > { %9557 = vmatprep.subr.bf16.mxu0 %v10062_v25  ;;  %9581 = vmatprep.subr.bf16.mxu1 %v10063_v0 }
 0x943   : > { %9558 = vmatpush3.bf16.msra.mxu0 %v10062_v25  ;;  %9582 = vmatpush3.bf16.msra.mxu1 %v10063_v0  ;;  %v6408_v25 = vld [vmem:[#allocation4 + $0x490] sm:$0xff] }
 0x944   : > { %9559 = vmatprep.subr.bf16.mxu0 %v10064_v46  ;;  %9583 = vmatprep.subr.bf16.mxu1 %v10065_v2 }
 0x945   : > { %9528 = vmatmul.mubr.bf16.gmra.mxu0 %v6240_v31  ;;  %9552 = vmatmul.mubr.bf16.gmra.mxu1 %v6240_v31 }
 0x947   : > { %9560 = vmatpush3.bf16.msra.mxu0 %v10064_v46  ;;  %9584 = vmatpush3.bf16.msra.mxu1 %v10065_v2  ;;  %v6264_v46 = vld [vmem:[#allocation4 + $0xe8] sm:$0xff] }
 0x948   : > { %9561 = vmatprep.subr.bf16.mxu0 %v10066_v22  ;;  %9585 = vmatprep.subr.bf16.mxu1 %v10067_v34 }
 0x94b   : > { %9562 = vmatpush3.bf16.msra.mxu0 %v10066_v22  ;;  %9586 = vmatpush3.bf16.msra.mxu1 %v10067_v34  ;;  %v6262_v22 = vld [vmem:[#allocation4 + $0x6e8] sm:$0xff] }
 0x94c   : > { %9563 = vmatprep.subr.bf16.mxu0 %v10068_v13  ;;  %9587 = vmatprep.subr.bf16.mxu1 %v10069_v1 }
 0x94f   : > { %9564 = vmatpush3.bf16.msra.mxu0 %v10068_v13  ;;  %9588 = vmatpush3.bf16.msra.mxu1 %v10069_v1  ;;  %v6265_v13 = vld [vmem:[#allocation4 + $0x60] sm:$0xff] }
 0x950   : > { %9565 = vmatprep.subr.bf16.mxu0 %v10070_v56  ;;  %9589 = vmatprep.subr.bf16.mxu1 %v10071_v41 }
 0x953   : > { %9566 = vmatpush3.bf16.msra.mxu0 %v10070_v56  ;;  %9590 = vmatpush3.bf16.msra.mxu1 %v10071_v41 }
 0x954   : > { %9567 = vmatprep.subr.bf16.mxu0 %v10072_v32  ;;  %9591 = vmatprep.subr.bf16.mxu1 %v10073_v24 }
 0x957   : > { %9568 = vmatpush3.bf16.msra.mxu0 %v10072_v32  ;;  %9592 = vmatpush3.bf16.msra.mxu1 %v10073_v24 }
 0x958   : > { %9569 = vmatprep.subr.bf16.mxu0 %v10074_v4  ;;  %9593 = vmatprep.subr.bf16.mxu1 %v10075_v53 }
 0x95b   : > { %9570 = vmatpush3.bf16.msra.mxu0 %v10074_v4  ;;  %9594 = vmatpush3.bf16.msra.mxu1 %v10075_v53 }
 0x95c   : > { %9603 = vmatprep.subr.bf16.mxu0 %v12353_v52  ;;  %9627 = vmatprep.subr.bf16.mxu1 %v12355_v8 }
 0x9dd   : > { %v9501_v5 = vpop.f32.mrf.mxu1  ;;  %v9477_v30 = vpop.f32.mrf.mxu0 }
 0x9de   : > { %v6502_v43 = vadd.f32 %v9501_v5, %v6405_v51  ;;  %v6357_v39 = vadd.f32 %v9477_v30, %v6260_v63 }
 0x9df   : > { %v6493_v9 = vpop.f32.mrf.mxu1  ;;  %v6348_v33 = vpop.f32.mrf.mxu0 }
 0x9e0   : > { %v6494_v19 = vadd.f32 %v6493_v9, %v6403_v12  ;;  %v8378_v42 = vmul.f32 -1.442695, %v6502_v43  ;;  %v6349_v0 = vadd.f32 %v6348_v33, %v6258_v21  ;;  %v6590_v12 = vld [vmem:[#allocation4 + $0x428] sm:$0xff] }
 0x9e1   : > { %v9502_v14 = vpop.f32.mrf.mxu1  ;;  %v9478_v15 = vpop.f32.mrf.mxu0 }
 0x9e2   : > { %v6505_v40 = vadd.f32 %v9502_v14, %v6406_v3  ;;  %v8376_v38 = vmul.f32 -1.442695, %v6494_v19  ;;  %10860 = vpow2.f32 %v8378_v42  ;;  %v6360_v2 = vadd.f32 %v9478_v15, %v6261_v48  ;;  %v6591_v42 = vld [vmem:[#allocation4 + $0x308] sm:$0xff] }
 0x9e3   : > { %v6496_v44 = vpop.f32.mrf.mxu1  ;;  %v6351_v10 = vpop.f32.mrf.mxu0 }
 0x9e4   : > { %v6497_v27 = vadd.f32 %v6496_v44, %v6404_v29  ;;  %v8379_v17 = vmul.f32 -1.442695, %v6505_v40  ;;  %10862 = vpow2.f32 %v8376_v38  ;;  %v6352_v34 = vadd.f32 %v6351_v10, %v6259_v59  ;;  %v6588_v40 = vld [vmem:[#allocation4 + $0x470] sm:$0xff]  ;;  %v6589_v10 = vld [vmem:[#allocation4 + $0x220] sm:$0xff] }
 0x9e5   : > { %v9505_v37 = vpop.f32.mrf.mxu1  ;;  %v9481_v57 = vpop.f32.mrf.mxu0  ;;  %v6592_v59 = vld [vmem:[#allocation4 + $0x300] sm:$0xff] }
 0x9e6   : > { %v6518_v47 = vadd.f32 %v9505_v37, %v6409_v23  ;;  %v8377_v35 = vmul.f32 -1.442695, %v6497_v27  ;;  %10864 = vpow2.f32 %v8379_v17  ;;  %v6373_v41 = vadd.f32 %v9481_v57, %v6264_v46 }
 0x9e7   : > { %v6509_v54 = vpop.f32.mrf.mxu1  ;;  %v6364_v50 = vpop.f32.mrf.mxu0 }
 0x9e8   : > { %v8382_v31 = vmul.f32 -1.442695, %v6518_v47  ;;  %v6510_v45 = vadd.f32 %v6509_v54, %v6407_v61  ;;  %10866 = vpow2.f32 %v8377_v35  ;;  %v6365_v24 = vadd.f32 %v6364_v50, %v6262_v22 }
 0x9e9   : > { %v9506_v60 = vpop.f32.mrf.mxu1  ;;  %v9482_v1 = vpop.f32.mrf.mxu0 }
 0x9ea   : > { %v6521_v26 = vadd.f32 %v9506_v60, %v6410_v6  ;;  %10868 = vpow2.f32 %v8382_v31  ;;  %v8380_v55 = vmul.f32 -1.442695, %v6510_v45  ;;  %v6376_v53 = vadd.f32 %v9482_v1, %v6265_v13  ;;  %v6775_v60 = vld [vmem:[#allocation4 + $0x170] sm:$0xff]  ;;  %v6595_v1 = vld [vmem:[#allocation4 + $0x4a0] sm:$0xff] }
 0x9eb   : > { %v6512_v62 = vpop.f32.mrf.mxu1  ;;  %v12359_v51 = vpop.f32.mrf.mxu0 }
 0x9ec   : > { %v8383_v49 = vmul.f32 -1.442695, %v6521_v26  ;;  %10870 = vpow2.f32 %v8380_v55  ;;  %v6513_v56 = vadd.f32 %v6512_v62, %v6408_v25  ;;  %v6594_v26 = vld [vmem:[#allocation4 + $0x7e8] sm:$0xff] }
 0x9ee   : > { %10872 = vpow2.f32 %v8383_v49  ;;  %v8381_v30 = vmul.f32 -1.442695, %v6513_v56  ;;  %v6773_v49 = vld [vmem:[#allocation4 + $0x410] sm:$0xff] }
 0x9ef   : > { %10874 = vtanh.f32 %v6357_v39  ;;  %v10861_v32 = vpop.eup %10860 }
 0x9f0   : > { %10876 = vtanh.f32 %v6349_v0  ;;  %v6550_v9 = vadd.f32 1.0, %v10861_v32 }
 0x9f1   : > { %v10863_v4 = vpop.eup %10862  ;;  %10878 = vtanh.f32 %v6360_v2 }
 0x9f2   : > { %10880 = vtanh.f32 %v6352_v34  ;;  %v6548_v33 = vadd.f32 1.0, %v10863_v4 }
 0x9f3   : > { %v10865_v5 = vpop.eup %10864  ;;  %10882 = vtanh.f32 %v6373_v41 }
 0x9f4   : > { %10884 = vtanh.f32 %v6365_v24  ;;  %v6551_v43 = vadd.f32 1.0, %v10865_v5 }
 0x9f5   : > { %v10867_v14 = vpop.eup %10866  ;;  %10886 = vtanh.f32 %v6376_v53  ;;  %v6776_v53 = vld [vmem:[#allocation4 + $0x88] sm:$0xff] }
 0x9f6   : > { %10888 = vpow2.f32 %v8381_v30  ;;  %v6549_v23 = vadd.f32 1.0, %v10867_v14  ;;  %v6593_v30 = vld [vmem:[#allocation4 + $0x570] sm:$0xff] }
 0x9f7   : > { %v10869_v3 = vpop.eup %10868  ;;  %10890 = vrcp.f32 %v6550_v9 }
 0x9f8   : > { %10892 = vrcp.f32 %v6548_v33  ;;  %v6554_v27 = vadd.f32 1.0, %v10869_v3 }
 0x9f9   : > { %v10871_v38 = vpop.eup %10870  ;;  %10894 = vrcp.f32 %v6551_v43  ;;  %v6774_v43 = vld [vmem:[#allocation4 + $0x780] sm:$0xff] }
 0x9fa   : > { %v6552_v55 = vadd.f32 1.0, %v10871_v38 }
 0x9fb   : > { %v10873_v6 = vpop.eup %10872 }
 0x9fc   : > { %v12361_v63 = vpop.eup %10874  ;;  %v6555_v25 = vadd.f32 1.0, %v10873_v6 }
 0x9fd   : > { %v9525_v44 = vpop.f32.mrf.mxu0  ;;  %v9549_v19 = vpop.f32.mrf.mxu1 }
 0x9fe   : > { %v6687_v29 = vadd.f32 %v9525_v44, %v6590_v12  ;;  %v12363_v50 = vpop.eup %10876  ;;  %v6872_v0 = vadd.f32 %v9549_v19, %v6775_v60 }
 0x9ff   : > { %v6678_v37 = vpop.f32.mrf.mxu0  ;;  %v6863_v15 = vpop.f32.mrf.mxu1 }
 0xa00   : > { %v8394_v54 = vmul.f32 -1.442695, %v6687_v29  ;;  %v6679_v47 = vadd.f32 %v6678_v37, %v6588_v40  ;;  %v12365_v62 = vpop.eup %10878  ;;  %v6864_v41 = vadd.f32 %v6863_v15, %v6773_v49  ;;  %v8410_v12 = vmul.f32 -1.442695, %v6872_v0 }
 0xa01   : > { %v9526_v17 = vpop.f32.mrf.mxu0  ;;  %v9550_v61 = vpop.f32.mrf.mxu1 }
 0xa02   : > { %10896 = vpow2.f32 %v8394_v54  ;;  %v6690_v35 = vadd.f32 %v9526_v17, %v6591_v42  ;;  %v8392_v31 = vmul.f32 -1.442695, %v6679_v47  ;;  %v12367_v22 = vpop.eup %10880  ;;  %v8408_v40 = vmul.f32 -1.442695, %v6864_v41 }
 0xa03   : > { %10898 = vrcp.f32 %v6549_v23  ;;  %v6681_v45 = vpop.f32.mrf.mxu0  ;;  %v6866_v57 = vpop.f32.mrf.mxu1  ;;  %v6875_v23 = vadd.f32 %v9550_v61, %v6776_v53 }
 0xa04   : > { %10900 = vrcp.f32 %v6554_v27  ;;  %v8395_v21 = vmul.f32 -1.442695, %v6690_v35  ;;  %v6682_v48 = vadd.f32 %v6681_v45, %v6589_v10  ;;  %v12369_v56 = vpop.eup %10882  ;;  %v6779_v27 = vld [vmem:[#allocation4 + $0x360] sm:$0xff]  ;;  %v6867_v38 = vadd.f32 %v6866_v57, %v6774_v43  ;;  %v6777_v35 = vld [vmem:[#allocation4 + $0x108] sm:$0xff] }
 0xa05   : > { %10902 = vpow2.f32 %v8392_v31  ;;  %v9529_v39 = vpop.f32.mrf.mxu0  ;;  %v9553_v34 = vpop.f32.mrf.mxu1  ;;  %v8411_v61 = vmul.f32 -1.442695, %v6875_v23 }
 0xa06   : > { %v8393_v46 = vmul.f32 -1.442695, %v6682_v48  ;;  %v6703_v2 = vadd.f32 %v9529_v39, %v6594_v26  ;;  %10904 = vpow2.f32 %v8395_v21  ;;  %v12371_v4 = vpop.eup %10884  ;;  %v6888_v45 = vadd.f32 %v9553_v34, %v6779_v27 }
 0xa07   : > { %v6694_v13 = vpop.f32.mrf.mxu0  ;;  %10906 = vrcp.f32 %v6552_v55  ;;  %v12373_v9 = vpop.eup %10886  ;;  %v6780_v55 = vld [vmem:[#allocation4 + $0x748] sm:$0xff]  ;;  %v8409_v48 = vmul.f32 -1.442695, %v6867_v38 }
 0xa08   : > { %v8398_v32 = vmul.f32 -1.442695, %v6703_v2  ;;  %v6695_v24 = vadd.f32 %v6694_v13, %v6592_v59  ;;  %10908 = vpow2.f32 %v8393_v46  ;;  %v10889_v3 = vpop.eup %10888  ;;  %v6879_v44 = vpop.f32.mrf.mxu1  ;;  %v6778_v59 = vld [vmem:[#allocation4 + $0x500] sm:$0xff]  ;;  %v8414_v0 = vmul.f32 -1.442695, %v6888_v45 }
 0xa09   : > { %v9530_v5 = vpop.f32.mrf.mxu0  ;;  %10910 = vrcp.f32 %v6555_v25  ;;  %v12375_v29 = vpop.eup %10890  ;;  %v6553_v10 = vadd.f32 1.0, %v10889_v3  ;;  %v6880_v57 = vadd.f32 %v6879_v44, %v6777_v35 }
 0xa0a   : > { %v8396_v14 = vmul.f32 -1.442695, %v6695_v24  ;;  %v6706_v33 = vadd.f32 %v9530_v5, %v6595_v1  ;;  %10912 = vpow2.f32 %v8398_v32  ;;  %v12377_v42 = vpop.eup %10892  ;;  %v9554_v6 = vpop.f32.mrf.mxu1 }
 0xa0b   : > { %v6697_v19 = vpop.f32.mrf.mxu0  ;;  %v12379_v54 = vpop.eup %10894  ;;  %v6891_v46 = vadd.f32 %v9554_v6, %v6780_v55  ;;  %v8412_v1 = vmul.f32 -1.442695, %v6880_v57  ;;  %v6942_v45 = vmul.f32 %v12377_v42, %v12363_v50 }
 0xa0c   : > { %v8399_v37 = vmul.f32 -1.442695, %v6706_v33  ;;  %v6698_v15 = vadd.f32 %v6697_v19, %v6593_v30  ;;  %10914 = vpow2.f32 %v8396_v14  ;;  %v6882_v39 = vpop.f32.mrf.mxu1  ;;  %v6263_v30 = vld [vmem:[#allocation4 + $0x180] sm:$0xff] }
 0xa0d   : > { %10916 = vpow2.f32 %v8410_v12  ;;  %v6883_v41 = vadd.f32 %v6882_v39, %v6778_v59  ;;  %v8415_v5 = vmul.f32 -1.442695, %v6891_v46  ;;  %v6368_v19 = vadd.f32 %v12359_v51, %v6263_v30 }
 0xa0e   : > { %v8397_v47 = vmul.f32 -1.442695, %v6698_v15  ;;  %10918 = vpow2.f32 %v8399_v37 }
 0xa0f   : > { %v10897_v17 = vpop.eup %10896  ;;  %10920 = vpow2.f32 %v8408_v40  ;;  %v8413_v33 = vmul.f32 -1.442695, %v6883_v41 }
 0xa10   : > { %v12381_v60 = vpop.eup %10898  ;;  %v6735_v31 = vadd.f32 1.0, %v10897_v17  ;;  %10922 = vpow2.f32 %v8397_v47  ;;  %v6944_v17 = vmul.f32 %v12375_v29, %v12361_v63 }
 0xa11   : > { %v12383_v26 = vpop.eup %10900  ;;  %v6943_v50 = vmul.f32 %v12381_v60, %v12367_v22 }
 0xa12   : > { %v10903_v21 = vpop.eup %10902  ;;  %10924 = vrcp.f32 %v6735_v31 }
 0xa13   : > { %10926 = vrcp.f32 %v6553_v10  ;;  %v6733_v49 = vadd.f32 1.0, %v10903_v21  ;;  %v10905_v25 = vpop.eup %10904 }
 0xa14   : > { %10928 = vpow2.f32 %v8411_v61  ;;  %v12385_v2 = vpop.eup %10906  ;;  %v6736_v34 = vadd.f32 1.0, %v10905_v25 }
 0xa15   : > { %10930 = vrcp.f32 %v6733_v49  ;;  %v10909_v13 = vpop.eup %10908 }
 0xa16   : > { %10932 = vpow2.f32 %v8409_v48  ;;  %v12387_v32 = vpop.eup %10910  ;;  %v6734_v24 = vadd.f32 1.0, %v10909_v13 }
 0xa17   : > { %10934 = vrcp.f32 %v6736_v34  ;;  %v10913_v53 = vpop.eup %10912 }
 0xa18   : > { %10936 = vpow2.f32 %v8414_v0  ;;  %v6739_v12 = vadd.f32 1.0, %v10913_v53 }
 0xa19   : > { %10938 = vrcp.f32 %v6734_v24  ;;  %v10915_v14 = vpop.eup %10914 }
 0xa1a   : > { %10940 = vpow2.f32 %v8412_v1  ;;  %v10917_v3 = vpop.eup %10916  ;;  %v6737_v43 = vadd.f32 1.0, %v10915_v14 }
 0xa1b   : > { %10942 = vrcp.f32 %v6739_v12  ;;  %v10919_v44 = vpop.eup %10918  ;;  %v6920_v27 = vadd.f32 1.0, %v10917_v3 }
 0xa1c   : > { %10944 = vpow2.f32 %v8415_v5  ;;  %v10921_v40 = vpop.eup %10920  ;;  %v6740_v23 = vadd.f32 1.0, %v10919_v44 }
 0xa1d   : > { %10946 = vrcp.f32 %v6737_v43  ;;  %v10923_v37 = vpop.eup %10922  ;;  %v6918_v31 = vadd.f32 1.0, %v10921_v40 }
 0xa1e   : > { %10948 = vpow2.f32 %v8413_v33  ;;  %v6738_v38 = vadd.f32 1.0, %v10923_v37 }
 0xa1f   : > { %v10925_v15 = vpop.eup %10924  ;;  %10950 = vrcp.f32 %v6740_v23 }
 0xa20   : > { %v10927_v47 = vpop.eup %10926  ;;  %10952 = vtanh.f32 %v6368_v19  ;;  %v6952_v10 = vmul.f32 %v10925_v15, %v12294_v36  ;;  %v6945_v36 = vmul.f32 %v12379_v54, %v12365_v62 }
 0xa21   : > { %v10929_v35 = vpop.eup %10928  ;;  %10954 = vrcp.f32 %v6738_v38 }
 0xa22   : > { %v10931_v51 = vpop.eup %10930  ;;  %v12393_v6 = vadd.f32 %v6952_v10, %v6944_v17  ;;  %10956 = vrcp.f32 %v6920_v27  ;;  %v6921_v63 = vadd.f32 1.0, %v10929_v35  ;;  %v10078_v35 = vld [vmem:[#allocation2 + $0xc8] ss:$16 sps:$4 sm:$0xff]  }
 0xa23   : > { %v10933_v61 = vpop.eup %10932  ;;  %v6950_v55 = vmul.f32 %v10931_v51, %v12302_v58  ;;  %v10079_v51 = vld [vmem:[#allocation2 + $0xcc] ss:$16 sps:$4 sm:$0xff]  }
 0xa24   : > { %v10935_v21 = vpop.eup %10934  ;;  %10958 = vtanh.f32 %v12393_v6  ;;  %v6919_v39 = vadd.f32 1.0, %v10933_v61 }
 0xa25   : > { %v10937_v29 = vpop.eup %10936  ;;  %v12401_v48 = vadd.f32 %v6950_v55, %v6942_v45  ;;  %v6953_v57 = vmul.f32 %v10935_v21, %v12307_v7  ;;  %10960 = vrcp.f32 %v6918_v31  ;;  %v6948_v7 = vmul.f32 %v12383_v26, %v12369_v56 }
 0xa26   : > { %v10939_v49 = vpop.eup %10938  ;;  %v6924_v62 = vadd.f32 1.0, %v10937_v29  ;;  %v10080_v29 = vld [vmem:[#allocation2 + $0xa8] ss:$16 sps:$4 sm:$0xff]  }
 0xa27   : > { %v10941_v59 = vpop.eup %10940  ;;  %v12406_v58 = vadd.f32 %v6953_v57, %v6945_v36  ;;  %v6951_v42 = vmul.f32 %v10939_v49, %v12314_v11  ;;  %10962 = vtanh.f32 %v12401_v48  ;;  %v6946_v11 = vmul.f32 %v12385_v2, %v12371_v4  ;;  %v10081_v36 = vld [vmem:[#allocation2 + $0xac] ss:$16 sps:$4 sm:$0xff]  }
 0xa28   : > { %v10943_v25 = vpop.eup %10942  ;;  %10964 = vrcp.f32 %v6921_v63  ;;  %v6922_v60 = vadd.f32 1.0, %v10941_v59  ;;  %v10084_v59 = vld [vmem:[#allocation2 + $0x68] ss:$16 sps:$4 sm:$0xff]  }
 0xa29   : > { %v10945_v54 = vpop.eup %10944  ;;  %10966 = vtanh.f32 %v12406_v58  ;;  %v12413_v0 = vadd.f32 %v6951_v42, %v6943_v50  ;;  %v6956_v46 = vmul.f32 %v10943_v25, %v12319_v18  ;;  %v6949_v18 = vmul.f32 %v12387_v32, %v12373_v9  ;;  %v10085_v50 = vld [vmem:[#allocation2 + $0x6c] ss:$16 sps:$4 sm:$0xff]   ;;  %v10086_v42 = vld [vmem:[#allocation2 + $0x48] ss:$16 sps:$4 sm:$0xff]  }
 0xa2a   : > { %v10947_v22 = vpop.eup %10946  ;;  %10968 = vrcp.f32 %v6919_v39  ;;  %v6925_v26 = vadd.f32 1.0, %v10945_v54  ;;  %v10087_v25 = vld [vmem:[#allocation2 + $0x4c] ss:$16 sps:$4 sm:$0xff]  }
 0xa2b   : > { %v10949_v34 = vpop.eup %10948  ;;  %v12418_v13 = vadd.f32 %v6956_v46, %v6948_v7  ;;  %v6954_v1 = vmul.f32 %v10947_v22, %v12325_v20  ;;  %10970 = vtanh.f32 %v12413_v0  ;;  %v10089_v54 = vld [vmem:[#allocation2 + $0x2c] ss:$16 sps:$4 sm:$0xff]   ;;  %v10090_v7 = vld [vmem:[#allocation2 + $0x8] ss:$16 sps:$4 sm:$0xff]  }
 0xa2c   : > { %v10951_v56 = vpop.eup %10950  ;;  %10972 = vrcp.f32 %v6924_v62  ;;  %v6923_v2 = vadd.f32 1.0, %v10949_v34  ;;  %v10088_v62 = vld [vmem:[#allocation2 + $0x28] ss:$16 sps:$4 sm:$0xff]   ;;  %v10091_v46 = vld [vmem:[#allocation2 + $0xc] ss:$16 sps:$4 sm:$0xff]  }
 0xa2d   : > { %v10953_v41 = vpop.eup %10952  ;;  %v12424_v24 = vadd.f32 %v6954_v1, %v6946_v11  ;;  %v6957_v53 = vmul.f32 %v10951_v56, %v12329_v16  ;;  %10974 = vtanh.f32 %v12418_v13  ;;  %v7159_v11 = vld [vmem:[#allocation4 + $0x430] sm:$0xff]  ;;  %v7157_v1 = vld [vmem:[#allocation4 + $0x668] sm:$0xff] }
 0xa2e   : > { %v10955_v4 = vpop.eup %10954  ;;  %10976 = vrcp.f32 %v6922_v60  ;;  %v6947_v20 = vmul.f32 %v10953_v41, %v10927_v47  ;;  %v7160_v41 = vld [vmem:[#allocation4 + $0x4b8] sm:$0xff] }
 0xa2f   : > { %v12428_v5 = vadd.f32 %v6957_v53, %v6949_v18  ;;  %v6955_v30 = vmul.f32 %v10955_v4, %v12333_v28  ;;  %10978 = vtanh.f32 %v12424_v24  ;;  %v10957_v12 = vpop.eup %10956 }
 0xa30   : > { %10980 = vrcp.f32 %v6925_v26 }
 0xa31   : > { %v10959_v9 = vpop.eup %10958  ;;  %v12432_v32 = vadd.f32 %v6955_v30, %v6947_v20  ;;  %10982 = vtanh.f32 %v12428_v5  ;;  %v7163_v30 = vld [vmem:[#allocation4 + $0xa8] sm:$0xff] }
 0xa32   : > { %10984 = vrcp.f32 %v6923_v2  ;;  %v6976_v16 = vmul.f32 %v10959_v9, %v10957_v12  ;;  %v10961_v14 = vpop.eup %10960  ;;  %v7158_v2 = vld [vmem:[#allocation4 + $0xa0] sm:$0xff] }
 0xa33   : > { %10986 = vtanh.f32 %v12432_v32 }
 0xa34   : > { %v10963_v33 = vpop.eup %10962  ;;  %8418 = vst [vmem:[%s11390_s28 + $0x190] sm:$0xff] %v6976_v16 }
 0xa35   : > { %v10965_v28 = vpop.eup %10964  ;;  %v6974_v3 = vmul.f32 %v10963_v33, %v10961_v14 }
 0xa36   : > { %v10967_v43 = vpop.eup %10966 }
 0xa37   : > { %v10969_v44 = vpop.eup %10968  ;;  %8416 = vst [vmem:[%s11390_s28 + $0x180] sm:$0xff] %v6974_v3  ;;  %v6977_v19 = vmul.f32 %v10967_v43, %v10965_v28 }
 0xa38   : > { %v10971_v40 = vpop.eup %10970 }
 0xa39   : > { %v10973_v23 = vpop.eup %10972  ;;  %v6975_v37 = vmul.f32 %v10971_v40, %v10969_v44  ;;  %8419 = vst [vmem:[%s11390_s28 + $0x198] sm:$0xff] %v6977_v19  ;;  %v12440_v10 = vpack.c.bf16 %v6977_v19, %v6976_v16  ;;  %v7161_v44 = vld [vmem:[#allocation4 + $0x2d0] sm:$0xff] }
 0xa3a   : > { %v10975_v15 = vpop.eup %10974 }
 0xa3b   : > { %v10977_v27 = vpop.eup %10976  ;;  %8417 = vst [vmem:[%s11390_s28 + $0x188] sm:$0xff] %v6975_v37  ;;  %v6991_v38 = vpack.c.bf16 %v6975_v37, %v6974_v3  ;;  %v6980_v47 = vmul.f32 %v10975_v15, %v10973_v23  ;;  %v7164_v23 = vld [vmem:[#allocation4 + $0x5e0] sm:$0xff] }
 0xa3c   : > { %v10979_v17 = vpop.eup %10978 }
 0xa3d   : > { %v10981_v31 = vpop.eup %10980  ;;  %9571 = vmatprep.mubr.bf16.mxu0 %v6991_v38  ;;  %9595 = vmatprep.mubr.bf16.mxu1 %v6991_v38  ;;  %v6978_v61 = vmul.f32 %v10979_v17, %v10977_v27  ;;  %8422 = vst [vmem:[%s11390_s28 + $0x1b0] sm:$0xff] %v6980_v47  ;;  %v7014_v17 = vld [vmem:[#allocation4 + $0x7c8] sm:$0xff] }
 0xa3e   : > { %v10983_v45 = vpop.eup %10982  ;;  %9572 = vmatmul.mubr.bf16.vlgmr.msra.gmra.mxu0 %v12440_v10  ;;  %9596 = vmatmul.mubr.bf16.vlgmr.msra.gmra.mxu1 %v12440_v10 }
 0xa3f   : > { %v10985_v55 = vpop.eup %10984  ;;  %9604 = vmatpush3.bf16.msra.mxu0 %v12353_v52  ;;  %9628 = vmatpush3.bf16.msra.mxu1 %v12355_v8  ;;  %8420 = vst [vmem:[%s11390_s28 + $0x1a0] sm:$0xff] %v6978_v61  ;;  %v6981_v21 = vmul.f32 %v10983_v45, %v10981_v31  ;;  %v10082_v52 = vld [vmem:[#allocation2 + $0x88] ss:$16 sps:$4 sm:$0xff]   ;;  %v10083_v8 = vld [vmem:[#allocation2 + $0x8c] ss:$16 sps:$4 sm:$0xff]  }
 0xa40   : > { %v10987_v63 = vpop.eup %10986  ;;  %9605 = vmatprep.subr.bf16.mxu0 %v10078_v35  ;;  %9629 = vmatprep.subr.bf16.mxu1 %v10079_v51 }
 0xa41   : > { %v6979_v57 = vmul.f32 %v10987_v63, %v10985_v55  ;;  %8423 = vst [vmem:[%s11390_s28 + $0x1b8] sm:$0xff] %v6981_v21  ;;  %v6994_v39 = vpack.c.bf16 %v6981_v21, %v6980_v47  ;;  %v7013_v55 = vld [vmem:[#allocation4 + $0xc8] sm:$0xff]  ;;  %v7162_v63 = vld [vmem:[#allocation4 + $0x718] sm:$0xff] }
 0xa43   : > { %9606 = vmatpush3.bf16.msra.mxu0 %v10078_v35  ;;  %9630 = vmatpush3.bf16.msra.mxu1 %v10079_v51  ;;  %8421 = vst [vmem:[%s11390_s28 + $0x1a8] sm:$0xff] %v6979_v57  ;;  %v6993_v49 = vpack.c.bf16 %v6979_v57, %v6978_v61  ;;  %v7012_v35 = vld [vmem:[#allocation4 + $0x168] sm:$0xff]  ;;  %v7015_v51 = vld [vmem:[#allocation4 + $0x638] sm:$0xff] }
 0xa44   : > { %9607 = vmatprep.subr.bf16.mxu0 %v10080_v29  ;;  %9631 = vmatprep.subr.bf16.mxu1 %v10081_v36 }
 0xa45   : > { %9575 = vmatprep.mubr.bf16.mxu0 %v6993_v49  ;;  %9599 = vmatprep.mubr.bf16.mxu1 %v6993_v49 }
 0xa46   : > { %9576 = vmatmul.mubr.bf16.gmra.mxu0 %v6994_v39  ;;  %9600 = vmatmul.mubr.bf16.gmra.mxu1 %v6994_v39 }
 0xa47   : > { %9608 = vmatpush3.bf16.msra.mxu0 %v10080_v29  ;;  %9632 = vmatpush3.bf16.msra.mxu1 %v10081_v36  ;;  %v7018_v36 = vld [vmem:[#allocation4 + $0x710] sm:$0xff] }
 0xa48   : > { %9619 = vmatprep.mubr.bf16.mxu0 %v6991_v38  ;;  %9643 = vmatprep.mubr.bf16.mxu1 %v6991_v38 }
 0xa49   : > { %9609 = vmatprep.subr.bf16.mxu0 %v10082_v52  ;;  %9633 = vmatprep.subr.bf16.mxu1 %v10083_v8 }
 0xa4b   : > { %9610 = vmatpush3.bf16.msra.mxu0 %v10082_v52  ;;  %9634 = vmatpush3.bf16.msra.mxu1 %v10083_v8  ;;  %v7019_v52 = vld [vmem:[#allocation4 + $0x1b0] sm:$0xff] }
 0xa4c   : > { %9611 = vmatprep.subr.bf16.mxu0 %v10084_v59  ;;  %9635 = vmatprep.subr.bf16.mxu1 %v10085_v50 }
 0xa4f   : > { %9612 = vmatpush3.bf16.msra.mxu0 %v10084_v59  ;;  %9636 = vmatpush3.bf16.msra.mxu1 %v10085_v50 }
 0xa50   : > { %9613 = vmatprep.subr.bf16.mxu0 %v10086_v42  ;;  %9637 = vmatprep.subr.bf16.mxu1 %v10087_v25 }
 0xa53   : > { %9614 = vmatpush3.bf16.msra.mxu0 %v10086_v42  ;;  %9638 = vmatpush3.bf16.msra.mxu1 %v10087_v25 }
 0xa54   : > { %9615 = vmatprep.subr.bf16.mxu0 %v10088_v62  ;;  %9639 = vmatprep.subr.bf16.mxu1 %v10089_v54 }
 0xa57   : > { %9616 = vmatpush3.bf16.msra.mxu0 %v10088_v62  ;;  %9640 = vmatpush3.bf16.msra.mxu1 %v10089_v54 }
 0xa58   : > { %9617 = vmatprep.subr.bf16.mxu0 %v10090_v7  ;;  %9641 = vmatprep.subr.bf16.mxu1 %v10091_v46 }
 0xa5b   : > { %9618 = vmatpush3.bf16.msra.mxu0 %v10090_v7  ;;  %9642 = vmatpush3.bf16.msra.mxu1 %v10091_v46 }
 0xa5e   : > { %9620 = vmatmul.mubr.bf16.vlgmr.msra.gmra.mxu0 %v12440_v10  ;;  %9644 = vmatmul.mubr.bf16.vlgmr.msra.gmra.mxu1 %v12440_v10 }
 0xa5f   : > { %9623 = vmatprep.mubr.bf16.mxu0 %v6993_v49  ;;  %9647 = vmatprep.mubr.bf16.mxu1 %v6993_v49  ;;  %v7016_v49 = vld [vmem:[#allocation4] sm:$0xff] }
 0xa66   : > { %9624 = vmatmul.mubr.bf16.gmra.mxu0 %v6994_v39  ;;  %9648 = vmatmul.mubr.bf16.gmra.mxu1 %v6994_v39 }
 0xafe   : > { %v9597_v22 = vpop.f32.mrf.mxu1  ;;  %v9573_v60 = vpop.f32.mrf.mxu0 }
 0xaff   : > { %v7256_v18 = vadd.f32 %v9597_v22, %v7159_v11  ;;  %v7111_v45 = vadd.f32 %v9573_v60, %v7014_v17 }
 0xb00   : > { %v7247_v34 = vpop.f32.mrf.mxu1  ;;  %v7102_v26 = vpop.f32.mrf.mxu0 }
 0xb01   : > { %v7248_v4 = vadd.f32 %v7247_v34, %v7157_v1  ;;  %v8442_v16 = vmul.f32 -1.442695, %v7256_v18  ;;  %v7103_v29 = vadd.f32 %v7102_v26, %v7012_v35  ;;  %v7344_v34 = vld [vmem:[#allocation4 + $0x578] sm:$0xff] }
 0xb02   : > { %v9598_v56 = vpop.f32.mrf.mxu1  ;;  %v9574_v9 = vpop.f32.mrf.mxu0 }
 0xb03   : > { %v7259_v20 = vadd.f32 %v9598_v56, %v7160_v41  ;;  %v8440_v28 = vmul.f32 -1.442695, %v7248_v4  ;;  %10988 = vpow2.f32 %v8442_v16  ;;  %v7114_v57 = vadd.f32 %v9574_v9, %v7015_v51  ;;  %v7342_v4 = vld [vmem:[#allocation4 + $0x270] sm:$0xff]  ;;  %v7527_v51 = vld [vmem:[#allocation4 + $0x2d8] sm:$0xff] }
 0xb04   : > { %v7250_v53 = vpop.f32.mrf.mxu1  ;;  %v7105_v19 = vpop.f32.mrf.mxu0 }
 0xb05   : > { %v7251_v14 = vadd.f32 %v7250_v53, %v7158_v2  ;;  %v8443_v43 = vmul.f32 -1.442695, %v7259_v20  ;;  %10990 = vpow2.f32 %v8440_v28  ;;  %v7106_v39 = vadd.f32 %v7105_v19, %v7013_v55 }
 0xb06   : > { %v9601_v12 = vpop.f32.mrf.mxu1  ;;  %v9577_v38 = vpop.f32.mrf.mxu0 }
 0xb07   : > { %v7272_v3 = vadd.f32 %v9601_v12, %v7163_v30  ;;  %v8441_v40 = vmul.f32 -1.442695, %v7251_v14  ;;  %10992 = vpow2.f32 %v8443_v43  ;;  %v7127_v50 = vadd.f32 %v9577_v38, %v7018_v36  ;;  %v7345_v12 = vld [vmem:[#allocation4 + $0x298] sm:$0xff]  ;;  %v7343_v43 = vld [vmem:[#allocation4 + $0x48] sm:$0xff] }
 0xb08   : > { %v7263_v33 = vpop.f32.mrf.mxu1  ;;  %v7118_v31 = vpop.f32.mrf.mxu0 }
 0xb09   : > { %v8446_v15 = vmul.f32 -1.442695, %v7272_v3  ;;  %v7264_v27 = vadd.f32 %v7263_v33, %v7161_v44  ;;  %10994 = vpow2.f32 %v8441_v40  ;;  %v7119_v25 = vadd.f32 %v7118_v31, %v7016_v49  ;;  %v7529_v40 = vld [vmem:[#allocation4 + $0x608] sm:$0xff] }
 0xb0a   : > { %v9602_v37 = vpop.f32.mrf.mxu1  ;;  %v9578_v8 = vpop.f32.mrf.mxu0 }
 0xb0b   : > { %v7275_v47 = vadd.f32 %v9602_v37, %v7164_v23  ;;  %10996 = vpow2.f32 %v8446_v15  ;;  %v8444_v10 = vmul.f32 -1.442695, %v7264_v27  ;;  %v7130_v54 = vadd.f32 %v9578_v8, %v7019_v52  ;;  %v7348_v27 = vld [vmem:[#allocation4 + $0x2b8] sm:$0xff] }
 0xb0c   : > { %v7266_v21 = vpop.f32.mrf.mxu1  ;;  %v12452_v60 = vpop.f32.mrf.mxu0 }
 0xb0d   : > { %v8447_v61 = vmul.f32 -1.442695, %v7275_v47  ;;  %10998 = vpow2.f32 %v8444_v10  ;;  %v7267_v59 = vadd.f32 %v7266_v21, %v7162_v63 }
 0xb0f   : > { %11000 = vpow2.f32 %v8447_v61  ;;  %v8445_v46 = vmul.f32 -1.442695, %v7267_v59  ;;  %v7346_v61 = vld [vmem:[#allocation4 + $0x650] sm:$0xff] }
 0xb10   : > { %11002 = vtanh.f32 %v7111_v45  ;;  %v10989_v42 = vpop.eup %10988 }
 0xb11   : > { %11004 = vtanh.f32 %v7103_v29  ;;  %v7304_v22 = vadd.f32 1.0, %v10989_v42 }
 0xb12   : > { %v10991_v62 = vpop.eup %10990  ;;  %11006 = vtanh.f32 %v7114_v57 }
 0xb13   : > { %11008 = vtanh.f32 %v7106_v39  ;;  %v7302_v1 = vadd.f32 1.0, %v10991_v62  ;;  %v7349_v39 = vld [vmem:[#allocation4 + $0x580] sm:$0xff] }
 0xb14   : > { %v10993_v7 = vpop.eup %10992  ;;  %11010 = vtanh.f32 %v7127_v50 }
 0xb15   : > { %11012 = vtanh.f32 %v7119_v25  ;;  %v7305_v26 = vadd.f32 1.0, %v10993_v7  ;;  %v7530_v25 = vld [vmem:[#allocation4 + $0x1f0] sm:$0xff] }
 0xb16   : > { %v10995_v11 = vpop.eup %10994  ;;  %11014 = vtanh.f32 %v7130_v54  ;;  %v7347_v54 = vld [vmem:[#allocation4 + $0x7d0] sm:$0xff] }
 0xb17   : > { %11016 = vpow2.f32 %v8445_v46  ;;  %v7303_v2 = vadd.f32 1.0, %v10995_v11 }
 0xb18   : > { %v10997_v56 = vpop.eup %10996  ;;  %11018 = vrcp.f32 %v7304_v22 }
 0xb19   : > { %11020 = vrcp.f32 %v7302_v1  ;;  %v7308_v9 = vadd.f32 1.0, %v10997_v56  ;;  %v7528_v1 = vld [vmem:[#allocation4 + $0x328] sm:$0xff] }
 0xb1a   : > { %v10999_v14 = vpop.eup %10998  ;;  %11022 = vrcp.f32 %v7305_v26 }
 0xb1b   : > { %v7306_v47 = vadd.f32 1.0, %v10999_v14 }
 0xb1c   : > { %v11001_v19 = vpop.eup %11000 }
 0xb1d   : > { %v12454_v38 = vpop.eup %11002  ;;  %v7309_v55 = vadd.f32 1.0, %v11001_v19 }
 0xb1e   : > { %v9621_v41 = vpop.f32.mrf.mxu0  ;;  %v9645_v18 = vpop.f32.mrf.mxu1 }
 0xb1f   : > { %v7441_v53 = vadd.f32 %v9621_v41, %v7344_v34  ;;  %v12456_v35 = vpop.eup %11004  ;;  %v7626_v21 = vadd.f32 %v9645_v18, %v7529_v40 }
 0xb20   : > { %v7432_v20 = vpop.f32.mrf.mxu0  ;;  %v7617_v30 = vpop.f32.mrf.mxu1 }
 0xb21   : > { %v8458_v16 = vmul.f32 -1.442695, %v7441_v53  ;;  %v7433_v33 = vadd.f32 %v7432_v20, %v7342_v4  ;;  %v12458_v45 = vpop.eup %11006  ;;  %v7618_v8 = vadd.f32 %v7617_v30, %v7527_v51  ;;  %v8474_v46 = vmul.f32 -1.442695, %v7626_v21  ;;  %v7533_v30 = vld [vmem:[#allocation4 + $0x238] sm:$0xff]  ;;  %v7532_v51 = vld [vmem:[#allocation4 + $0x190] sm:$0xff] }
 0xb22   : > { %v9622_v28 = vpop.f32.mrf.mxu0  ;;  %v9646_v3 = vpop.f32.mrf.mxu1 }
 0xb23   : > { %11024 = vpow2.f32 %v8458_v16  ;;  %v7444_v44 = vadd.f32 %v9622_v28, %v7345_v12  ;;  %v8456_v23 = vmul.f32 -1.442695, %v7433_v33  ;;  %v12460_v36 = vpop.eup %11008  ;;  %v8472_v18 = vmul.f32 -1.442695, %v7618_v8  ;;  %v7531_v28 = vld [vmem:[#allocation4 + $0x480] sm:$0xff] }
 0xb24   : > { %11026 = vrcp.f32 %v7303_v2  ;;  %v7435_v37 = vpop.f32.mrf.mxu0  ;;  %v7620_v15 = vpop.f32.mrf.mxu1  ;;  %v7629_v53 = vadd.f32 %v9646_v3, %v7530_v25  ;;  %v7017_v25 = vld [vmem:[#allocation4 + $0x3d8] sm:$0xff] }
 0xb25   : > { %11028 = vrcp.f32 %v7308_v9  ;;  %v8459_v17 = vmul.f32 -1.442695, %v7444_v44  ;;  %v7436_v10 = vadd.f32 %v7435_v37, %v7343_v43  ;;  %v12462_v52 = vpop.eup %11010  ;;  %v7621_v9 = vadd.f32 %v7620_v15, %v7528_v1  ;;  %v7534_v37 = vld [vmem:[#allocation4 + $0x150] sm:$0xff] }
 0xb26   : > { %11030 = vpow2.f32 %v8456_v23  ;;  %v9625_v31 = vpop.f32.mrf.mxu0  ;;  %v9649_v57 = vpop.f32.mrf.mxu1  ;;  %v8475_v3 = vmul.f32 -1.442695, %v7629_v53  ;;  %v7122_v1 = vadd.f32 %v12452_v60, %v7017_v25 }
 0xb27   : > { %v8457_v63 = vmul.f32 -1.442695, %v7436_v10  ;;  %v7457_v29 = vadd.f32 %v9625_v31, %v7348_v27  ;;  %11032 = vpow2.f32 %v8459_v17  ;;  %v12464_v42 = vpop.eup %11012  ;;  %v7642_v40 = vadd.f32 %v9649_v57, %v7533_v30 }
 0xb28   : > { %v7448_v49 = vpop.f32.mrf.mxu0  ;;  %11034 = vrcp.f32 %v7306_v47  ;;  %v12466_v7 = vpop.eup %11014  ;;  %v8473_v47 = vmul.f32 -1.442695, %v7621_v9 }
 0xb29   : > { %v8462_v59 = vmul.f32 -1.442695, %v7457_v29  ;;  %v7449_v50 = vadd.f32 %v7448_v49, %v7346_v61  ;;  %11036 = vpow2.f32 %v8457_v63  ;;  %v11017_v11 = vpop.eup %11016  ;;  %v7633_v56 = vpop.f32.mrf.mxu1  ;;  %v8478_v61 = vmul.f32 -1.442695, %v7642_v40 }
 0xb2a   : > { %v9626_v62 = vpop.f32.mrf.mxu0  ;;  %11038 = vrcp.f32 %v7309_v55  ;;  %v12468_v41 = vpop.eup %11018  ;;  %v7307_v33 = vadd.f32 1.0, %v11017_v11  ;;  %v7634_v15 = vadd.f32 %v7633_v56, %v7531_v28 }
 0xb2b   : > { %v8460_v22 = vmul.f32 -1.442695, %v7449_v50  ;;  %v7460_v34 = vadd.f32 %v9626_v62, %v7349_v39  ;;  %11040 = vpow2.f32 %v8462_v59  ;;  %v12470_v20 = vpop.eup %11020  ;;  %v9650_v43 = vpop.f32.mrf.mxu1  ;;  %v7698_v9 = vmul.f32 %v12468_v41, %v12454_v38 }
 0xb2c   : > { %v7451_v26 = vpop.f32.mrf.mxu0  ;;  %v12472_v12 = vpop.eup %11022  ;;  %v7645_v55 = vadd.f32 %v9650_v43, %v7534_v37  ;;  %v8476_v57 = vmul.f32 -1.442695, %v7634_v15 }
 0xb2d   : > { %v8463_v4 = vmul.f32 -1.442695, %v7460_v34  ;;  %v7452_v2 = vadd.f32 %v7451_v26, %v7347_v54  ;;  %11042 = vpow2.f32 %v8460_v22  ;;  %v7636_v10 = vpop.f32.mrf.mxu1 }
 0xb2e   : > { %11044 = vpow2.f32 %v8474_v46  ;;  %v7637_v49 = vadd.f32 %v7636_v10, %v7532_v51  ;;  %v8479_v50 = vmul.f32 -1.442695, %v7645_v55 }
 0xb2f   : > { %v8461_v16 = vmul.f32 -1.442695, %v7452_v2  ;;  %11046 = vpow2.f32 %v8463_v4 }
 0xb30   : > { %v11025_v14 = vpop.eup %11024  ;;  %11048 = vpow2.f32 %v8472_v18  ;;  %v8477_v46 = vmul.f32 -1.442695, %v7637_v49 }
 0xb31   : > { %v12474_v44 = vpop.eup %11026  ;;  %v7489_v19 = vadd.f32 1.0, %v11025_v14  ;;  %11050 = vpow2.f32 %v8461_v16 }
 0xb32   : > { %v12476_v23 = vpop.eup %11028 }
 0xb33   : > { %v11031_v27 = vpop.eup %11030  ;;  %11052 = vrcp.f32 %v7489_v19  ;;  %v7696_v19 = vmul.f32 %v12470_v20, %v12456_v35  ;;  %v7697_v35 = vmul.f32 %v12474_v44, %v12460_v36 }
 0xb34   : > { %11054 = vrcp.f32 %v7307_v33  ;;  %v7487_v17 = vadd.f32 1.0, %v11031_v27  ;;  %v11033_v31 = vpop.eup %11032 }
 0xb35   : > { %11056 = vpow2.f32 %v8475_v3  ;;  %v12478_v21 = vpop.eup %11034  ;;  %v7490_v63 = vadd.f32 1.0, %v11033_v31 }
 0xb36   : > { %11058 = vrcp.f32 %v7487_v17  ;;  %v11037_v29 = vpop.eup %11036  ;;  %v7700_v55 = vmul.f32 %v12478_v21, %v12464_v42 }
 0xb37   : > { %11060 = vpow2.f32 %v8473_v47  ;;  %v12480_v39 = vpop.eup %11038  ;;  %v7488_v8 = vadd.f32 1.0, %v11037_v29 }
 0xb38   : > { %11062 = vrcp.f32 %v7490_v63  ;;  %v11041_v59 = vpop.eup %11040 }
 0xb39   : > { %11064 = vpow2.f32 %v8478_v61  ;;  %v7493_v62 = vadd.f32 1.0, %v11041_v59 }
 0xb3a   : > { %11066 = vrcp.f32 %v7488_v8  ;;  %v11043_v54 = vpop.eup %11042 }
 0xb3b   : > { %11068 = vpow2.f32 %v8476_v57  ;;  %v11045_v22 = vpop.eup %11044  ;;  %v7491_v34 = vadd.f32 1.0, %v11043_v54  ;;  %v7703_v57 = vmul.f32 %v12480_v39, %v12466_v7 }
 0xb3c   : > { %11070 = vrcp.f32 %v7493_v62  ;;  %v11047_v11 = vpop.eup %11046  ;;  %v7674_v4 = vadd.f32 1.0, %v11045_v22 }
 0xb3d   : > { %11072 = vpow2.f32 %v8479_v50  ;;  %v11049_v56 = vpop.eup %11048  ;;  %v7494_v26 = vadd.f32 1.0, %v11047_v11 }
 0xb3e   : > { %11074 = vrcp.f32 %v7491_v34  ;;  %v11051_v18 = vpop.eup %11050  ;;  %v7672_v28 = vadd.f32 1.0, %v11049_v56 }
 0xb3f   : > { %11076 = vpow2.f32 %v8477_v46  ;;  %v7492_v2 = vadd.f32 1.0, %v11051_v18 }
 0xb40   : > { %v11053_v53 = vpop.eup %11052  ;;  %11078 = vrcp.f32 %v7494_v26 }
 0xb41   : > { %v11055_v30 = vpop.eup %11054  ;;  %11080 = vtanh.f32 %v7122_v1  ;;  %v7706_v16 = vmul.f32 %v11053_v53, %v12393_v6  ;;  %v7699_v6 = vmul.f32 %v12472_v12, %v12458_v45  ;;  %v7702_v45 = vmul.f32 %v12476_v23, %v12462_v52 }
 0xb42   : > { %v11057_v14 = vpop.eup %11056  ;;  %11082 = vrcp.f32 %v7492_v2 }
 0xb43   : > { %v11059_v60 = vpop.eup %11058  ;;  %v7714_v33 = vadd.f32 %v7706_v16, %v7698_v9  ;;  %11084 = vrcp.f32 %v7674_v4  ;;  %v7675_v37 = vadd.f32 1.0, %v11057_v14 }
 0xb44   : > { %v11061_v43 = vpop.eup %11060  ;;  %v7704_v3 = vmul.f32 %v11059_v60, %v12401_v48 }
 0xb45   : > { %v11063_v40 = vpop.eup %11062  ;;  %11086 = vtanh.f32 %v7714_v33  ;;  %7755 = vst [vmem:[#allocation6 + $0x28] sm:$0xff] %v7714_v33  ;;  %v7673_v15 = vadd.f32 1.0, %v11061_v43 }
 0xb46   : > { %v11065_v38 = vpop.eup %11064  ;;  %v7712_v41 = vadd.f32 %v7704_v3, %v7696_v19  ;;  %v7707_v27 = vmul.f32 %v11063_v40, %v12406_v58  ;;  %11088 = vrcp.f32 %v7672_v28 }
 0xb47   : > { %v11067_v47 = vpop.eup %11066  ;;  %v7678_v51 = vadd.f32 1.0, %v11065_v38 }
 0xb48   : > { %v11069_v17 = vpop.eup %11068  ;;  %11090 = vtanh.f32 %v7712_v41  ;;  %7753 = vst [vmem:[#allocation6 + $0x18] sm:$0xff] %v7712_v41  ;;  %v7715_v48 = vadd.f32 %v7707_v27, %v7699_v6  ;;  %v7705_v20 = vmul.f32 %v11067_v47, %v12413_v0 }
 0xb49   : > { %v11071_v10 = vpop.eup %11070  ;;  %11092 = vrcp.f32 %v7675_v37  ;;  %v7676_v36 = vadd.f32 1.0, %v11069_v17 }
 0xb4a   : > { %v11073_v31 = vpop.eup %11072  ;;  %11094 = vtanh.f32 %v7715_v48  ;;  %7756 = vst [vmem:[#allocation6 + $0x8] sm:$0xff] %v7715_v48  ;;  %v7713_v58 = vadd.f32 %v7705_v20, %v7697_v35  ;;  %v7710_v12 = vmul.f32 %v11071_v10, %v12418_v13 }
 0xb4b   : > { %v11075_v61 = vpop.eup %11074  ;;  %11096 = vrcp.f32 %v7673_v15  ;;  %v7679_v52 = vadd.f32 1.0, %v11073_v31 }
 0xb4c   : > { %v11077_v44 = vpop.eup %11076  ;;  %11098 = vtanh.f32 %v7713_v58  ;;  %7754 = vst [vmem:[#allocation6 + $0x30] sm:$0xff] %v7713_v58  ;;  %v7718_v0 = vadd.f32 %v7710_v12, %v7702_v45  ;;  %v7708_v63 = vmul.f32 %v11075_v61, %v12424_v24 }
 0xb4d   : > { %v11079_v29 = vpop.eup %11078  ;;  %11100 = vrcp.f32 %v7678_v51  ;;  %v7677_v42 = vadd.f32 1.0, %v11077_v44 }
 0xb4e   : > { %v11081_v23 = vpop.eup %11080  ;;  %11102 = vtanh.f32 %v7718_v0  ;;  %7759 = vst [vmem:[#allocation6] sm:$0xff] %v7718_v0  ;;  %v7716_v13 = vadd.f32 %v7708_v63, %v7700_v55  ;;  %v7711_v49 = vmul.f32 %v11079_v29, %v12428_v5 }
 0xb4f   : > { %v11083_v8 = vpop.eup %11082  ;;  %11104 = vrcp.f32 %v7676_v36  ;;  %v7701_v21 = vmul.f32 %v11081_v23, %v11055_v30 }
 0xb50   : > { %11106 = vtanh.f32 %v7716_v13  ;;  %7757 = vst [vmem:[#allocation6 + $0x38] sm:$0xff] %v7716_v13  ;;  %v7719_v24 = vadd.f32 %v7711_v49, %v7703_v57  ;;  %v7709_v59 = vmul.f32 %v11083_v8, %v12432_v32  ;;  %v11085_v50 = vpop.eup %11084 }
 0xb51   : > { %11108 = vrcp.f32 %v7679_v52 }
 0xb52   : > { %v11087_v25 = vpop.eup %11086  ;;  %11110 = vtanh.f32 %v7719_v24  ;;  %7760 = vst [vmem:[#allocation6 + $0x20] sm:$0xff] %v7719_v24  ;;  %v7717_v7 = vadd.f32 %v7709_v59, %v7701_v21 }
 0xb53   : > { %v7730_v39 = vmul.f32 %v11087_v25, %v11085_v50  ;;  %11112 = vrcp.f32 %v7677_v42  ;;  %v11089_v5 = vpop.eup %11088 }
 0xb54   : > { %11114 = vtanh.f32 %v7717_v7  ;;  %7758 = vst [vmem:[#allocation6 + $0x10] sm:$0xff] %v7717_v7 }
 0xb55   : > { %v11091_v62 = vpop.eup %11090  ;;  %8482 = vst [vmem:[%s11390_s28 + $0x1d0] sm:$0xff] %v7730_v39  ;;  %7747 = vst [vmem:[#allocation5 + $0x28] sm:$0xff] %v7730_v39 }
 0xb56   : > { %v11093_v54 = vpop.eup %11092  ;;  %v7728_v46 = vmul.f32 %v11091_v62, %v11089_v5 }
 0xb57   : > { %v11095_v32 = vpop.eup %11094 }
 0xb58   : > { %v11097_v22 = vpop.eup %11096  ;;  %8480 = vst [vmem:[%s11390_s28 + $0x1c0] sm:$0xff] %v7728_v46  ;;  %7745 = vst [vmem:[#allocation5 + $0x8] sm:$0xff] %v7728_v46  ;;  %v7731_v34 = vmul.f32 %v11095_v32, %v11093_v54 }
 0xb59   : > { %v11099_v11 = vpop.eup %11098 }
 0xb5a   : > { %v11101_v1 = vpop.eup %11100  ;;  %8483 = vst [vmem:[%s11390_s28 + $0x1d8] sm:$0xff] %v7731_v34  ;;  %7748 = vst [vmem:[#allocation5 + $0x18] sm:$0xff] %v7731_v34  ;;  %v7729_v56 = vmul.f32 %v11099_v11, %v11097_v22 }
 0xb5b   : > { %v11103_v26 = vpop.eup %11102 }
 0xb5c   : > { %v11105_v18 = vpop.eup %11104  ;;  %8481 = vst [vmem:[%s11390_s28 + $0x1c8] sm:$0xff] %v7729_v56  ;;  %7746 = vst [vmem:[#allocation5 + $0x30] sm:$0xff] %v7729_v56  ;;  %v7734_v53 = vmul.f32 %v11103_v26, %v11101_v1 }
 0xb5d   : > { %v11107_v4 = vpop.eup %11106 }
 0xb5e   : > { %v11109_v2 = vpop.eup %11108  ;;  %8486 = vst [vmem:[%s11390_s28 + $0x1f0] sm:$0xff] %v7734_v53  ;;  %7751 = vst [vmem:[#allocation5 + $0x38] sm:$0xff] %v7734_v53  ;;  %v7732_v30 = vmul.f32 %v11107_v4, %v11105_v18 }
 0xb5f   : > { %v11111_v9 = vpop.eup %11110 }
 0xb60   : > { %v11113_v16 = vpop.eup %11112  ;;  %8484 = vst [vmem:[%s11390_s28 + $0x1e0] sm:$0xff] %v7732_v30  ;;  %7749 = vst [vmem:[#allocation5 + $0x20] sm:$0xff] %v7732_v30  ;;  %v7735_v14 = vmul.f32 %v11111_v9, %v11109_v2 }
 0xb61   : > { %v11115_v60 = vpop.eup %11114 }
 0xb62   : > { %8487 = vst [vmem:[%s11390_s28 + $0x1f8] sm:$0xff] %v7735_v14  ;;  %7752 = vst [vmem:[#allocation5 + $0x10] sm:$0xff] %v7735_v14  ;;  %v7733_v33 = vmul.f32 %v11115_v60, %v11113_v16 }
 0xb64   : > { %8485 = vst [vmem:[%s11390_s28 + $0x1e8] sm:$0xff] %v7733_v33  ;;  %7750 = vst [vmem:[#allocation5] sm:$0xff] %v7733_v33 }
 0xb65   : > { %s8490_s21 = sshll.u32 %s11220_s19, 3  ;;  %s8498_s10 = sshll.u32 %s11216_s18, 7 }
 0xb66   : > { %s7775_s24 = sadd.s32 %s8498_s10, %s8490_s21  ;;  %s7788_s12 = sshll.u32 %s11390_s28, 4  ;;  %s7789_s12 = int_to_ptr.vmem [resolvable:$true] %s7788_s12 }
 0xb67   : > { %s8492_s13 = sshll.u32 %s7775_s24, 7  ;;  %s11244_s23 = smov 1024  }
 0xb68   : > { %s7777_s25 = scalar_lea.hbm %s12566_s4, %s8492_s13  ;;  %9662 = sst [smem:[#allocation21]] (%p11339_p9), %s11244_s23 }
 0xb69   : > { %s11245_s5 = smov 2048   ;;  %s11246_s6 = smov 8  }
 0xb6a   : > { %9663 = sst [smem:[#allocation21 + $0x1]] (%p11339_p9), %s11245_s5  ;;  %s11247_s19 = smov 128  }
 0xb6b   : > { %9664 = sst [smem:[#allocation21 + $0x2]] (%p11339_p9), %s11246_s6  ;;  %s11248_s18 = smov 131072  }
 0xb6c   : > { %9665 = sst [smem:[#allocation21 + $0x3]] (%p11339_p9), %s11247_s19  ;;  %s11249_s28 = smov 0  }
 0xb6d   : > { %9666 = sst [smem:[#allocation21 + $0x4]] (%p11339_p9), %s11247_s19 }
 0xb6e   : > { %9667 = sst [smem:[#allocation21 + $0x5]] (%p11339_p9), %s11246_s6 }
 0xb6f   : > { %9668 = dma.general (%p11339_p9), %s7789_s12, 8192, %s7777_s25, %s7762_s11, %s11248_s18, [#allocation21], %s11249_s28, 0  }
 0xb70 PF: > { %p9675_p3 = scmp.ge.s32.totalorder %s11232_s22, 2  ;;  %s7816_s26 = sand.u32 1, %s11204_s15  }
 0xb71   : > { %s7817_s27 = scalar_lea.sflag [#allocation10], %s7816_s26 }
 0xb72   : > { %p9671_p4 = pnand %p9675_p3, %p11346_p12 }
 0xb74   : > { %p9672_p5 = pneg %p9671_p4 }
 0xb76   : > { %11199 = dma.done.wait (%p9672_p5), %s7817_s27, 8192  }
 0xb77   : > { %11201 = vsyncadd (%p9672_p5), %s7817_s27, 4294959104  ;;  %s20_s22 = sadd.s32 1, %s11232_s22   ;;  %s12577_s19 = sld [smem:[#allocation27_spill]] }
 0xb78   : > { %p17_p6 = scmp.ge.s32.totalorder %s20_s22, 6   ;;  %s12578_s30 = sld [smem:[#allocation28_spill]] }
 0xb79   : > { %s12579_s21 = sld [smem:[#allocation29_spill]]  ;;  %s12580_s15 = smov %s11208_s16 }
 0xb7a   : > { %s12581_s16 = smov %s11212_s17  ;;  %s12582_s17 = smov %s11351_s9 }
 0xb7b   : > { %s12583_s18 = smov %s11224_s20  ;;  %19 = sbr.rel (!%p17_p6) target bundleno = 7 (0x7), region = 115 }
 0xb7e   : > { %s12584_s20 = smov %s12578_s30 }
 0xb80   :  { %7822 = vsyncpa [#allocation9], 1 }
 0xb81   :  { %7824 = vsyncpa [#allocation9 + $0x1], 1 }
 0xb82   :  { %7825 = vsyncpa [#allocation10], 1 }
 0xb83   :  { %7827 = vsyncpa [#allocation10 + $0x1], 1 }
 0xb84   :  { %7828 = vsyncmov [#allocation7] }
 0xb87   :  { %s7829_s8 = vpop.sfrf %7828 }
 0xb88   :  { %p8495_p9 = scmp.ne.s32.totalorder %s7829_s8, 0 }
 0xb8a   :  { %7833 = shalt.err (%p8495_p9)  }
 0xb8b   :  { %7835 = vsyncmov [#allocation7 + $0x1] }
 0xb8e   :  { %s7836_s9 = vpop.sfrf %7835 }
 0xb8f   :  { %p8496_p12 = scmp.ne.s32.totalorder %s7836_s9, 0 }
 0xb91   :  { %7840 = shalt.err (%p8496_p12)  }

</bundles_post_ra>
